<compile_context>
chip_gen: v7x
topology: tpu7x:2x2x1
jax: 0.10.0
libtpu: 0.0.40
codegen_flags: <defaults>
</compile_context>

<pallas_src>
import functools

import jax
import jax.numpy as jnp
from jax.experimental import pallas as pl
from jax.experimental.pallas import tpu as pltpu


def _out_dim(n):
    return (n - 3) // 2 + 1


# ----------------------------------------------------------------------------
# Host-side prep: stride-4 space-to-depth (16 phases) of the raw input.
#   phases[b, 4a+c, u, v] = x[b, 4u+a, 4v+c]   (zero-padded past the edges)
# conv1's phase-(p,q) output at (u, v) only needs x[4u+(2p+kh), 4v+(2q+kw)],
# i.e. phase ((2p+kh)%4, (2q+kw)%4) at row u+(2p+kh)//4, col v+(2q+kw)//4 —
# purely unit-stride slices inside the kernel.  Same total data as the input.
# ----------------------------------------------------------------------------
def _stride4_phases(x, t2, d2):
    u_sz, v_sz = t2 + 2, d2 + 2
    planes = []
    for a in range(4):
        for c in range(4):
            v = x[:, a::4, c::4][:, :u_sz, :v_sz]
            pad_u = u_sz - v.shape[1]
            pad_v = v_sz - v.shape[2]
            if pad_u or pad_v:
                v = jnp.pad(v, ((0, 0), (0, pad_u), (0, pad_v)))
            planes.append(v)
    return jnp.stack(planes, axis=1)                      # (B, 16, t2+2, d2+2)


# ----------------------------------------------------------------------------
# Fused kernel: conv1 + ReLU + conv2 + ReLU + channel/width flatten.
# ----------------------------------------------------------------------------
def _fused_kernel(xp4_ref, w1_ref, b1_ref, w2lane_ref, b2lane_ref, o_ref, *,
                  c_mid, c_out, t2, d2):
    # xp4_ref:    (1, 16, t2+2, d2+2)  VMEM  stride-4 phases of one utterance
    # w1_ref:     (c_mid, 9)           SMEM  conv1 weights (scalar broadcasts)
    # b1_ref:     (c_mid,)             SMEM
    # w2lane_ref: (c_mid*9, c_out*d2)  VMEM  per-lane conv2 weight rows
    # b2lane_ref: (1, c_out*d2)        VMEM  per-lane conv2 bias row
    # o_ref:      (1, t2, c_out*d2)    VMEM  final flattened layout
    tp1, dp1 = t2 + 1, d2 + 1

    def xslice(p, q, kh, kw):
        r, s = 2 * p + kh, 2 * q + kw
        return xp4_ref[0, 4 * (r % 4) + (s % 4),
                       r // 4:r // 4 + tp1, s // 4:s // 4 + dp1]

    # ---- conv1 + ReLU, produced directly in stride-2 phase form; stays in
    #      registers/VMEM (never written to HBM).  Two partial accumulators
    #      break the vmul+vadd dependency chain (no f32 FMA on v5e/v6e).
    y1ph = [[[None] * c_mid for _ in range(2)] for _ in range(2)]
    for p in range(2):
        for q in range(2):
            for c in range(c_mid):
                acc0 = xslice(p, q, 0, 0) * w1_ref[c, 0]
                acc1 = xslice(p, q, 0, 1) * w1_ref[c, 1]
                for k in range(2, 9):
                    term = xslice(p, q, k // 3, k % 3) * w1_ref[c, k]
                    if k % 2 == 0:
                        acc0 = acc0 + term
                    else:
                        acc1 = acc1 + term
                y1ph[p][q][c] = jnp.maximum(acc0 + acc1 + b1_ref[c], 0.0)

    # ---- conv2 + ReLU + permute/flatten, lane-dense: each tap is tiled once
    #      across the c_out lane groups and accumulates against its per-lane
    #      weight row; finish with a single dense store in the final layout
    #      out[t, co*d2 + d] (the torch permute(0,2,1,3).view fusion).
    acc_a = jnp.zeros((t2, c_out * d2), jnp.float32)
    acc_b = jnp.zeros((t2, c_out * d2), jnp.float32)
    for c in range(c_mid):
        for kh in range(3):
            for kw in range(3):
                tap = y1ph[kh % 2][kw % 2][c][kh // 2:kh // 2 + t2,
                                              kw // 2:kw // 2 + d2]
                dense = jnp.concatenate([tap] * c_out, axis=-1)
                contrib = dense * w2lane_ref[c * 9 + kh * 3 + kw, :]
                if (kh * 3 + kw) % 2 == 0:
                    acc_a = acc_a + contrib
                else:
                    acc_b = acc_b + contrib
    o_ref[0, :, :] = jnp.maximum(acc_a + acc_b + b2lane_ref[0, :], 0.0)


def _fused_pallas(xp4, w1_flat, b1, w2lane, b2lane, *, c_mid, c_out, t2, d2):
    bsz = xp4.shape[0]
    u_sz, v_sz = t2 + 2, d2 + 2
    kern = functools.partial(_fused_kernel, c_mid=c_mid, c_out=c_out, t2=t2, d2=d2)
    return pl.pallas_call(
        kern,
        out_shape=jax.ShapeDtypeStruct((bsz, t2, c_out * d2), jnp.float32),
        grid=(bsz,),
        in_specs=[
            pl.BlockSpec((1, 16, u_sz, v_sz), lambda b: (b, 0, 0, 0)),
            pl.BlockSpec(memory_space=pltpu.MemorySpace.SMEM),   # w1 (scalars)
            pl.BlockSpec(memory_space=pltpu.MemorySpace.SMEM),   # b1 (scalars)
            pl.BlockSpec((c_mid * 9, c_out * d2), lambda b: (0, 0)),  # resident
            pl.BlockSpec((1, c_out * d2), lambda b: (0, 0)),          # resident
        ],
        out_specs=pl.BlockSpec((1, t2, c_out * d2), lambda b: (b, 0, 0)),
        compiler_params=pltpu.CompilerParams(
            dimension_semantics=("parallel",),
            vmem_limit_bytes=32 * 1024 * 1024),
    )(xp4, w1_flat, b1, w2lane, b2lane)


# ----------------------------------------------------------------------------
# Forward pass (mirrors the PyTorch module semantics).
# ----------------------------------------------------------------------------
def conv2d_subsampling_forward(params, inputs, input_lengths):
    """inputs: (B, T, D) float32 ; input_lengths: (B,) int."""
    w1, b1, w2, b2 = params
    bsz, t, d = inputs.shape
    c_out = w2.shape[0]
    c_mid = w2.shape[1]

    t1, d1 = _out_dim(t), _out_dim(d)
    t2, d2 = _out_dim(t1), _out_dim(d1)

    xp4 = _stride4_phases(inputs, t2, d2)                 # (B, 16, t2+2, d2+2)

    # conv1 weights as scalar table (in_channels == 1: the torch unsqueeze(1)).
    w1_flat = w1.reshape(c_mid, 9)
    # conv2 weights as per-lane rows: w2lane[c*9+kh*3+kw, o*d2+n] = w2[o,c,kh,kw]
    w2lane = jnp.repeat(
        jnp.transpose(w2, (1, 2, 3, 0)).reshape(c_mid * 9, c_out), d2, axis=1)
    b2lane = jnp.repeat(b2, d2)[None, :]

    outputs = _fused_pallas(xp4, w1_flat, b1, w2lane, b2lane,
                            c_mid=c_mid, c_out=c_out, t2=t2, d2=d2)

    # torch: int_tensor / 4 is true division (-> float), then -= 1.
    output_lengths = input_lengths.astype(jnp.float32) / 4.0 - 1.0
    return outputs, output_lengths


# ----------------------------------------------------------------------------
# Pure-JAX reference (lax conv) for a runtime sanity check.
# ----------------------------------------------------------------------------
def _ref_forward(params, inputs, input_lengths):
    w1, b1, w2, b2 = params
    x = inputs[:, None, :, :]                              # NCHW
    dn = ("NCHW", "OIHW", "NCHW")
    c1 = jax.lax.conv_general_dilated(x, w1, (2, 2), "VALID", dimension_numbers=dn)
    c1 = jnp.maximum(c1 + b1[None, :, None, None], 0.0)
    c2 = jax.lax.conv_general_dilated(c1, w2, (2, 2), "VALID", dimension_numbers=dn)
    c2 = jnp.maximum(c2 + b2[None, :, None, None], 0.0)
    bsz, ch, t2, d2 = c2.shape
    out = jnp.transpose(c2, (0, 2, 1, 3)).reshape(bsz, t2, ch * d2)
    return out, input_lengths.astype(jnp.float32) / 4.0 - 1.0


if __name__ == "__main__":
    in_channels = 1            # forward() unsqueezes a singleton channel dim
    out_channels = 8
    B, T, D = 2, 16, 16

    key = jax.random.PRNGKey(0)
    k_in, k_w1, k_b1, k_w2, k_b2 = jax.random.split(key, 5)

    inputs = jax.random.normal(k_in, (B, T, D), dtype=jnp.float32)
    input_lengths = jnp.array([16, 12], dtype=jnp.int32)

    # deterministic synthetic parameters (torch Conv2d shapes)
    w1 = 0.1 * jax.random.normal(k_w1, (out_channels, in_channels, 3, 3), jnp.float32)
    b1 = 0.1 * jax.random.normal(k_b1, (out_channels,), jnp.float32)
    w2 = 0.1 * jax.random.normal(k_w2, (out_channels, out_channels, 3, 3), jnp.float32)
    b2 = 0.1 * jax.random.normal(k_b2, (out_channels,), jnp.float32)
    params = (w1, b1, w2, b2)

    fwd = jax.jit(conv2d_subsampling_forward)
    out, out_len = fwd(params, inputs, input_lengths)
    out = jax.block_until_ready(out)
    out_len = jax.block_until_ready(out_len)

    ref_out, ref_len = _ref_forward(params, inputs, input_lengths)
    assert out.shape == ref_out.shape, (out.shape, ref_out.shape)
    assert jnp.allclose(out, ref_out, rtol=1e-3, atol=1e-3), "conv output mismatch"
    assert jnp.allclose(out_len, ref_len), "length mismatch"

    print("KERNEL_OK")
</pallas_src>

<mosaic_0001>
module attributes {stable_mosaic.version = 11 : i64} {
  func.func @_fused_kernel(%arg0: i32, %arg1: memref<1x16x5x5xf32, #tpu.memory_space<vmem>>, %arg2: memref<8x9xf32, #tpu.memory_space<smem>>, %arg3: memref<8xf32, #tpu.memory_space<smem>>, %arg4: memref<72x24xf32, #tpu.memory_space<vmem>>, %arg5: memref<1x24xf32, #tpu.memory_space<vmem>>, %arg6: memref<1x3x24xf32, #tpu.memory_space<vmem>>) attributes {dimension_semantics = [#tpu.dimension_semantics<parallel>], iteration_bounds = array<i64: 2>, scalar_prefetch = 0 : i64, scratch_operands = 0 : i64, tpu.core_type = #tpu.core_type<tc>, window_params = [{transform_indices = @transform_0, window_bounds = array<i64: 1, 16, 5, 5>}, {transform_indices = @transform_1, window_bounds = array<i64: 8, 9>}, {transform_indices = @transform_2, window_bounds = array<i64: 8>}, {pipeline_mode = #tpu.pipeline_mode<synchronous>, transform_indices = @transform_3, window_bounds = array<i64: 72, 24>}, {pipeline_mode = #tpu.pipeline_mode<synchronous>, transform_indices = @transform_4, window_bounds = array<i64: 1, 24>}, {transform_indices = @transform_5, window_bounds = array<i64: 1, 3, 24>}]} {
    %c0 = arith.constant 0 : index
    %c0_0 = arith.constant 0 : index
    %c0_1 = arith.constant 0 : index
    %c0_2 = arith.constant 0 : index
    %0 = vector.load %arg1[%c0, %c0_0, %c0_1, %c0_2] : memref<1x16x5x5xf32, #tpu.memory_space<vmem>>, vector<1x1x4x4xf32>
    %1 = vector.shape_cast %0 : vector<1x1x4x4xf32> to vector<4x4xf32>
    %c0_3 = arith.constant 0 : index
    %c0_4 = arith.constant 0 : index
    %2 = memref.load %arg2[%c0_3, %c0_4] : memref<8x9xf32, #tpu.memory_space<smem>>
    %3 = vector.broadcast %2 : f32 to vector<4x4xf32>
    %4 = arith.mulf %1, %3 : vector<4x4xf32>
    %c0_5 = arith.constant 0 : index
    %c1 = arith.constant 1 : index
    %c0_6 = arith.constant 0 : index
    %c0_7 = arith.constant 0 : index
    %5 = vector.load %arg1[%c0_5, %c1, %c0_6, %c0_7] : memref<1x16x5x5xf32, #tpu.memory_space<vmem>>, vector<1x1x4x4xf32>
    %6 = vector.shape_cast %5 : vector<1x1x4x4xf32> to vector<4x4xf32>
    %c0_8 = arith.constant 0 : index
    %c1_9 = arith.constant 1 : index
    %7 = memref.load %arg2[%c0_8, %c1_9] : memref<8x9xf32, #tpu.memory_space<smem>>
    %8 = vector.broadcast %7 : f32 to vector<4x4xf32>
    %9 = arith.mulf %6, %8 : vector<4x4xf32>
    %c0_10 = arith.constant 0 : index
    %c2 = arith.constant 2 : index
    %c0_11 = arith.constant 0 : index
    %c0_12 = arith.constant 0 : index
    %10 = vector.load %arg1[%c0_10, %c2, %c0_11, %c0_12] : memref<1x16x5x5xf32, #tpu.memory_space<vmem>>, vector<1x1x4x4xf32>
    %11 = vector.shape_cast %10 : vector<1x1x4x4xf32> to vector<4x4xf32>
    %c0_13 = arith.constant 0 : index
    %c2_14 = arith.constant 2 : index
    %12 = memref.load %arg2[%c0_13, %c2_14] : memref<8x9xf32, #tpu.memory_space<smem>>
    %13 = vector.broadcast %12 : f32 to vector<4x4xf32>
    %14 = arith.mulf %11, %13 : vector<4x4xf32>
    %15 = arith.addf %4, %14 : vector<4x4xf32>
    %c0_15 = arith.constant 0 : index
    %c4 = arith.constant 4 : index
    %c0_16 = arith.constant 0 : index
    %c0_17 = arith.constant 0 : index
    %16 = vector.load %arg1[%c0_15, %c4, %c0_16, %c0_17] : memref<1x16x5x5xf32, #tpu.memory_space<vmem>>, vector<1x1x4x4xf32>
    %17 = vector.shape_cast %16 : vector<1x1x4x4xf32> to vector<4x4xf32>
    %c0_18 = arith.constant 0 : index
    %c3 = arith.constant 3 : index
    %18 = memref.load %arg2[%c0_18, %c3] : memref<8x9xf32, #tpu.memory_space<smem>>
    %19 = vector.broadcast %18 : f32 to vector<4x4xf32>
    %20 = arith.mulf %17, %19 : vector<4x4xf32>
    %21 = arith.addf %9, %20 : vector<4x4xf32>
    %c0_19 = arith.constant 0 : index
    %c5 = arith.constant 5 : index
    %c0_20 = arith.constant 0 : index
    %c0_21 = arith.constant 0 : index
    %22 = vector.load %arg1[%c0_19, %c5, %c0_20, %c0_21] : memref<1x16x5x5xf32, #tpu.memory_space<vmem>>, vector<1x1x4x4xf32>
    %23 = vector.shape_cast %22 : vector<1x1x4x4xf32> to vector<4x4xf32>
    %c0_22 = arith.constant 0 : index
    %c4_23 = arith.constant 4 : index
    %24 = memref.load %arg2[%c0_22, %c4_23] : memref<8x9xf32, #tpu.memory_space<smem>>
    %25 = vector.broadcast %24 : f32 to vector<4x4xf32>
    %26 = arith.mulf %23, %25 : vector<4x4xf32>
    %27 = arith.addf %15, %26 : vector<4x4xf32>
    %c0_24 = arith.constant 0 : index
    %c6 = arith.constant 6 : index
    %c0_25 = arith.constant 0 : index
    %c0_26 = arith.constant 0 : index
    %28 = vector.load %arg1[%c0_24, %c6, %c0_25, %c0_26] : memref<1x16x5x5xf32, #tpu.memory_space<vmem>>, vector<1x1x4x4xf32>
    %29 = vector.shape_cast %28 : vector<1x1x4x4xf32> to vector<4x4xf32>
    %c0_27 = arith.constant 0 : index
    %c5_28 = arith.constant 5 : index
    %30 = memref.load %arg2[%c0_27, %c5_28] : memref<8x9xf32, #tpu.memory_space<smem>>
    %31 = vector.broadcast %30 : f32 to vector<4x4xf32>
    %32 = arith.mulf %29, %31 : vector<4x4xf32>
    %33 = arith.addf %21, %32 : vector<4x4xf32>
    %c0_29 = arith.constant 0 : index
    %c8 = arith.constant 8 : index
    %c0_30 = arith.constant 0 : index
    %c0_31 = arith.constant 0 : index
    %34 = vector.load %arg1[%c0_29, %c8, %c0_30, %c0_31] : memref<1x16x5x5xf32, #tpu.memory_space<vmem>>, vector<1x1x4x4xf32>
    %35 = vector.shape_cast %34 : vector<1x1x4x4xf32> to vector<4x4xf32>
    %c0_32 = arith.constant 0 : index
    %c6_33 = arith.constant 6 : index
    %36 = memref.load %arg2[%c0_32, %c6_33] : memref<8x9xf32, #tpu.memory_space<smem>>
    %37 = vector.broadcast %36 : f32 to vector<4x4xf32>
    %38 = arith.mulf %35, %37 : vector<4x4xf32>
    %39 = arith.addf %27, %38 : vector<4x4xf32>
    %c0_34 = arith.constant 0 : index
    %c9 = arith.constant 9 : index
    %c0_35 = arith.constant 0 : index
    %c0_36 = arith.constant 0 : index
    %40 = vector.load %arg1[%c0_34, %c9, %c0_35, %c0_36] : memref<1x16x5x5xf32, #tpu.memory_space<vmem>>, vector<1x1x4x4xf32>
    %41 = vector.shape_cast %40 : vector<1x1x4x4xf32> to vector<4x4xf32>
    %c0_37 = arith.constant 0 : index
    %c7 = arith.constant 7 : index
    %42 = memref.load %arg2[%c0_37, %c7] : memref<8x9xf32, #tpu.memory_space<smem>>
    %43 = vector.broadcast %42 : f32 to vector<4x4xf32>
    %44 = arith.mulf %41, %43 : vector<4x4xf32>
    %45 = arith.addf %33, %44 : vector<4x4xf32>
    %c0_38 = arith.constant 0 : index
    %c10 = arith.constant 10 : index
    %c0_39 = arith.constant 0 : index
    %c0_40 = arith.constant 0 : index
    %46 = vector.load %arg1[%c0_38, %c10, %c0_39, %c0_40] : memref<1x16x5x5xf32, #tpu.memory_space<vmem>>, vector<1x1x4x4xf32>
    %47 = vector.shape_cast %46 : vector<1x1x4x4xf32> to vector<4x4xf32>
    %c0_41 = arith.constant 0 : index
    %c8_42 = arith.constant 8 : index
    %48 = memref.load %arg2[%c0_41, %c8_42] : memref<8x9xf32, #tpu.memory_space<smem>>
    %49 = vector.broadcast %48 : f32 to vector<4x4xf32>
    %50 = arith.mulf %47, %49 : vector<4x4xf32>
    %51 = arith.addf %39, %50 : vector<4x4xf32>
    %52 = arith.addf %51, %45 : vector<4x4xf32>
    %c0_43 = arith.constant 0 : index
    %53 = memref.load %arg3[%c0_43] : memref<8xf32, #tpu.memory_space<smem>>
    %54 = vector.broadcast %53 : f32 to vector<4x4xf32>
    %55 = arith.addf %52, %54 : vector<4x4xf32>
    %cst = arith.constant 0.000000e+00 : f32
    %56 = vector.broadcast %cst : f32 to vector<4x4xf32>
    %57 = arith.maximumf %55, %56 : vector<4x4xf32>
    %c0_44 = arith.constant 0 : index
    %c0_45 = arith.constant 0 : index
    %c0_46 = arith.constant 0 : index
    %c0_47 = arith.constant 0 : index
    %58 = vector.load %arg1[%c0_44, %c0_45, %c0_46, %c0_47] : memref<1x16x5x5xf32, #tpu.memory_space<vmem>>, vector<1x1x4x4xf32>
    %59 = vector.shape_cast %58 : vector<1x1x4x4xf32> to vector<4x4xf32>
    %c1_48 = arith.constant 1 : index
    %c0_49 = arith.constant 0 : index
    %60 = memref.load %arg2[%c1_48, %c0_49] : memref<8x9xf32, #tpu.memory_space<smem>>
    %61 = vector.broadcast %60 : f32 to vector<4x4xf32>
    %62 = arith.mulf %59, %61 : vector<4x4xf32>
    %c0_50 = arith.constant 0 : index
    %c1_51 = arith.constant 1 : index
    %c0_52 = arith.constant 0 : index
    %c0_53 = arith.constant 0 : index
    %63 = vector.load %arg1[%c0_50, %c1_51, %c0_52, %c0_53] : memref<1x16x5x5xf32, #tpu.memory_space<vmem>>, vector<1x1x4x4xf32>
    %64 = vector.shape_cast %63 : vector<1x1x4x4xf32> to vector<4x4xf32>
    %c1_54 = arith.constant 1 : index
    %c1_55 = arith.constant 1 : index
    %65 = memref.load %arg2[%c1_54, %c1_55] : memref<8x9xf32, #tpu.memory_space<smem>>
    %66 = vector.broadcast %65 : f32 to vector<4x4xf32>
    %67 = arith.mulf %64, %66 : vector<4x4xf32>
    %c0_56 = arith.constant 0 : index
    %c2_57 = arith.constant 2 : index
    %c0_58 = arith.constant 0 : index
    %c0_59 = arith.constant 0 : index
    %68 = vector.load %arg1[%c0_56, %c2_57, %c0_58, %c0_59] : memref<1x16x5x5xf32, #tpu.memory_space<vmem>>, vector<1x1x4x4xf32>
    %69 = vector.shape_cast %68 : vector<1x1x4x4xf32> to vector<4x4xf32>
    %c1_60 = arith.constant 1 : index
    %c2_61 = arith.constant 2 : index
    %70 = memref.load %arg2[%c1_60, %c2_61] : memref<8x9xf32, #tpu.memory_space<smem>>
    %71 = vector.broadcast %70 : f32 to vector<4x4xf32>
    %72 = arith.mulf %69, %71 : vector<4x4xf32>
    %73 = arith.addf %62, %72 : vector<4x4xf32>
    %c0_62 = arith.constant 0 : index
    %c4_63 = arith.constant 4 : index
    %c0_64 = arith.constant 0 : index
    %c0_65 = arith.constant 0 : index
    %74 = vector.load %arg1[%c0_62, %c4_63, %c0_64, %c0_65] : memref<1x16x5x5xf32, #tpu.memory_space<vmem>>, vector<1x1x4x4xf32>
    %75 = vector.shape_cast %74 : vector<1x1x4x4xf32> to vector<4x4xf32>
    %c1_66 = arith.constant 1 : index
    %c3_67 = arith.constant 3 : index
    %76 = memref.load %arg2[%c1_66, %c3_67] : memref<8x9xf32, #tpu.memory_space<smem>>
    %77 = vector.broadcast %76 : f32 to vector<4x4xf32>
    %78 = arith.mulf %75, %77 : vector<4x4xf32>
    %79 = arith.addf %67, %78 : vector<4x4xf32>
    %c0_68 = arith.constant 0 : index
    %c5_69 = arith.constant 5 : index
    %c0_70 = arith.constant 0 : index
    %c0_71 = arith.constant 0 : index
    %80 = vector.load %arg1[%c0_68, %c5_69, %c0_70, %c0_71] : memref<1x16x5x5xf32, #tpu.memory_space<vmem>>, vector<1x1x4x4xf32>
    %81 = vector.shape_cast %80 : vector<1x1x4x4xf32> to vector<4x4xf32>
    %c1_72 = arith.constant 1 : index
    %c4_73 = arith.constant 4 : index
    %82 = memref.load %arg2[%c1_72, %c4_73] : memref<8x9xf32, #tpu.memory_space<smem>>
    %83 = vector.broadcast %82 : f32 to vector<4x4xf32>
    %84 = arith.mulf %81, %83 : vector<4x4xf32>
    %85 = arith.addf %73, %84 : vector<4x4xf32>
    %c0_74 = arith.constant 0 : index
    %c6_75 = arith.constant 6 : index
    %c0_76 = arith.constant 0 : index
    %c0_77 = arith.constant 0 : index
    %86 = vector.load %arg1[%c0_74, %c6_75, %c0_76, %c0_77] : memref<1x16x5x5xf32, #tpu.memory_space<vmem>>, vector<1x1x4x4xf32>
    %87 = vector.shape_cast %86 : vector<1x1x4x4xf32> to vector<4x4xf32>
    %c1_78 = arith.constant 1 : index
    %c5_79 = arith.constant 5 : index
    %88 = memref.load %arg2[%c1_78, %c5_79] : memref<8x9xf32, #tpu.memory_space<smem>>
    %89 = vector.broadcast %88 : f32 to vector<4x4xf32>
    %90 = arith.mulf %87, %89 : vector<4x4xf32>
    %91 = arith.addf %79, %90 : vector<4x4xf32>
    %c0_80 = arith.constant 0 : index
    %c8_81 = arith.constant 8 : index
    %c0_82 = arith.constant 0 : index
    %c0_83 = arith.constant 0 : index
    %92 = vector.load %arg1[%c0_80, %c8_81, %c0_82, %c0_83] : memref<1x16x5x5xf32, #tpu.memory_space<vmem>>, vector<1x1x4x4xf32>
    %93 = vector.shape_cast %92 : vector<1x1x4x4xf32> to vector<4x4xf32>
    %c1_84 = arith.constant 1 : index
    %c6_85 = arith.constant 6 : index
    %94 = memref.load %arg2[%c1_84, %c6_85] : memref<8x9xf32, #tpu.memory_space<smem>>
    %95 = vector.broadcast %94 : f32 to vector<4x4xf32>
    %96 = arith.mulf %93, %95 : vector<4x4xf32>
    %97 = arith.addf %85, %96 : vector<4x4xf32>
    %c0_86 = arith.constant 0 : index
    %c9_87 = arith.constant 9 : index
    %c0_88 = arith.constant 0 : index
    %c0_89 = arith.constant 0 : index
    %98 = vector.load %arg1[%c0_86, %c9_87, %c0_88, %c0_89] : memref<1x16x5x5xf32, #tpu.memory_space<vmem>>, vector<1x1x4x4xf32>
    %99 = vector.shape_cast %98 : vector<1x1x4x4xf32> to vector<4x4xf32>
    %c1_90 = arith.constant 1 : index
    %c7_91 = arith.constant 7 : index
    %100 = memref.load %arg2[%c1_90, %c7_91] : memref<8x9xf32, #tpu.memory_space<smem>>
    %101 = vector.broadcast %100 : f32 to vector<4x4xf32>
    %102 = arith.mulf %99, %101 : vector<4x4xf32>
    %103 = arith.addf %91, %102 : vector<4x4xf32>
    %c0_92 = arith.constant 0 : index
    %c10_93 = arith.constant 10 : index
    %c0_94 = arith.constant 0 : index
    %c0_95 = arith.constant 0 : index
    %104 = vector.load %arg1[%c0_92, %c10_93, %c0_94, %c0_95] : memref<1x16x5x5xf32, #tpu.memory_space<vmem>>, vector<1x1x4x4xf32>
    %105 = vector.shape_cast %104 : vector<1x1x4x4xf32> to vector<4x4xf32>
    %c1_96 = arith.constant 1 : index
    %c8_97 = arith.constant 8 : index
    %106 = memref.load %arg2[%c1_96, %c8_97] : memref<8x9xf32, #tpu.memory_space<smem>>
    %107 = vector.broadcast %106 : f32 to vector<4x4xf32>
    %108 = arith.mulf %105, %107 : vector<4x4xf32>
    %109 = arith.addf %97, %108 : vector<4x4xf32>
    %110 = arith.addf %109, %103 : vector<4x4xf32>
    %c1_98 = arith.constant 1 : index
    %111 = memref.load %arg3[%c1_98] : memref<8xf32, #tpu.memory_space<smem>>
    %112 = vector.broadcast %111 : f32 to vector<4x4xf32>
    %113 = arith.addf %110, %112 : vector<4x4xf32>
    %cst_99 = arith.constant 0.000000e+00 : f32
    %114 = vector.broadcast %cst_99 : f32 to vector<4x4xf32>
    %115 = arith.maximumf %113, %114 : vector<4x4xf32>
    %c0_100 = arith.constant 0 : index
    %c0_101 = arith.constant 0 : index
    %c0_102 = arith.constant 0 : index
    %c0_103 = arith.constant 0 : index
    %116 = vector.load %arg1[%c0_100, %c0_101, %c0_102, %c0_103] : memref<1x16x5x5xf32, #tpu.memory_space<vmem>>, vector<1x1x4x4xf32>
    %117 = vector.shape_cast %116 : vector<1x1x4x4xf32> to vector<4x4xf32>
    %c2_104 = arith.constant 2 : index
    %c0_105 = arith.constant 0 : index
    %118 = memref.load %arg2[%c2_104, %c0_105] : memref<8x9xf32, #tpu.memory_space<smem>>
    %119 = vector.broadcast %118 : f32 to vector<4x4xf32>
    %120 = arith.mulf %117, %119 : vector<4x4xf32>
    %c0_106 = arith.constant 0 : index
    %c1_107 = arith.constant 1 : index
    %c0_108 = arith.constant 0 : index
    %c0_109 = arith.constant 0 : index
    %121 = vector.load %arg1[%c0_106, %c1_107, %c0_108, %c0_109] : memref<1x16x5x5xf32, #tpu.memory_space<vmem>>, vector<1x1x4x4xf32>
    %122 = vector.shape_cast %121 : vector<1x1x4x4xf32> to vector<4x4xf32>
    %c2_110 = arith.constant 2 : index
    %c1_111 = arith.constant 1 : index
    %123 = memref.load %arg2[%c2_110, %c1_111] : memref<8x9xf32, #tpu.memory_space<smem>>
    %124 = vector.broadcast %123 : f32 to vector<4x4xf32>
    %125 = arith.mulf %122, %124 : vector<4x4xf32>
    %c0_112 = arith.constant 0 : index
    %c2_113 = arith.constant 2 : index
    %c0_114 = arith.constant 0 : index
    %c0_115 = arith.constant 0 : index
    %126 = vector.load %arg1[%c0_112, %c2_113, %c0_114, %c0_115] : memref<1x16x5x5xf32, #tpu.memory_space<vmem>>, vector<1x1x4x4xf32>
    %127 = vector.shape_cast %126 : vector<1x1x4x4xf32> to vector<4x4xf32>
    %c2_116 = arith.constant 2 : index
    %c2_117 = arith.constant 2 : index
    %128 = memref.load %arg2[%c2_116, %c2_117] : memref<8x9xf32, #tpu.memory_space<smem>>
    %129 = vector.broadcast %128 : f32 to vector<4x4xf32>
    %130 = arith.mulf %127, %129 : vector<4x4xf32>
    %131 = arith.addf %120, %130 : vector<4x4xf32>
    %c0_118 = arith.constant 0 : index
    %c4_119 = arith.constant 4 : index
    %c0_120 = arith.constant 0 : index
    %c0_121 = arith.constant 0 : index
    %132 = vector.load %arg1[%c0_118, %c4_119, %c0_120, %c0_121] : memref<1x16x5x5xf32, #tpu.memory_space<vmem>>, vector<1x1x4x4xf32>
    %133 = vector.shape_cast %132 : vector<1x1x4x4xf32> to vector<4x4xf32>
    %c2_122 = arith.constant 2 : index
    %c3_123 = arith.constant 3 : index
    %134 = memref.load %arg2[%c2_122, %c3_123] : memref<8x9xf32, #tpu.memory_space<smem>>
    %135 = vector.broadcast %134 : f32 to vector<4x4xf32>
    %136 = arith.mulf %133, %135 : vector<4x4xf32>
    %137 = arith.addf %125, %136 : vector<4x4xf32>
    %c0_124 = arith.constant 0 : index
    %c5_125 = arith.constant 5 : index
    %c0_126 = arith.constant 0 : index
    %c0_127 = arith.constant 0 : index
    %138 = vector.load %arg1[%c0_124, %c5_125, %c0_126, %c0_127] : memref<1x16x5x5xf32, #tpu.memory_space<vmem>>, vector<1x1x4x4xf32>
    %139 = vector.shape_cast %138 : vector<1x1x4x4xf32> to vector<4x4xf32>
    %c2_128 = arith.constant 2 : index
    %c4_129 = arith.constant 4 : index
    %140 = memref.load %arg2[%c2_128, %c4_129] : memref<8x9xf32, #tpu.memory_space<smem>>
    %141 = vector.broadcast %140 : f32 to vector<4x4xf32>
    %142 = arith.mulf %139, %141 : vector<4x4xf32>
    %143 = arith.addf %131, %142 : vector<4x4xf32>
    %c0_130 = arith.constant 0 : index
    %c6_131 = arith.constant 6 : index
    %c0_132 = arith.constant 0 : index
    %c0_133 = arith.constant 0 : index
    %144 = vector.load %arg1[%c0_130, %c6_131, %c0_132, %c0_133] : memref<1x16x5x5xf32, #tpu.memory_space<vmem>>, vector<1x1x4x4xf32>
    %145 = vector.shape_cast %144 : vector<1x1x4x4xf32> to vector<4x4xf32>
    %c2_134 = arith.constant 2 : index
    %c5_135 = arith.constant 5 : index
    %146 = memref.load %arg2[%c2_134, %c5_135] : memref<8x9xf32, #tpu.memory_space<smem>>
    %147 = vector.broadcast %146 : f32 to vector<4x4xf32>
    %148 = arith.mulf %145, %147 : vector<4x4xf32>
    %149 = arith.addf %137, %148 : vector<4x4xf32>
    %c0_136 = arith.constant 0 : index
    %c8_137 = arith.constant 8 : index
    %c0_138 = arith.constant 0 : index
    %c0_139 = arith.constant 0 : index
    %150 = vector.load %arg1[%c0_136, %c8_137, %c0_138, %c0_139] : memref<1x16x5x5xf32, #tpu.memory_space<vmem>>, vector<1x1x4x4xf32>
    %151 = vector.shape_cast %150 : vector<1x1x4x4xf32> to vector<4x4xf32>
    %c2_140 = arith.constant 2 : index
    %c6_141 = arith.constant 6 : index
    %152 = memref.load %arg2[%c2_140, %c6_141] : memref<8x9xf32, #tpu.memory_space<smem>>
    %153 = vector.broadcast %152 : f32 to vector<4x4xf32>
    %154 = arith.mulf %151, %153 : vector<4x4xf32>
    %155 = arith.addf %143, %154 : vector<4x4xf32>
    %c0_142 = arith.constant 0 : index
    %c9_143 = arith.constant 9 : index
    %c0_144 = arith.constant 0 : index
    %c0_145 = arith.constant 0 : index
    %156 = vector.load %arg1[%c0_142, %c9_143, %c0_144, %c0_145] : memref<1x16x5x5xf32, #tpu.memory_space<vmem>>, vector<1x1x4x4xf32>
    %157 = vector.shape_cast %156 : vector<1x1x4x4xf32> to vector<4x4xf32>
    %c2_146 = arith.constant 2 : index
    %c7_147 = arith.constant 7 : index
    %158 = memref.load %arg2[%c2_146, %c7_147] : memref<8x9xf32, #tpu.memory_space<smem>>
    %159 = vector.broadcast %158 : f32 to vector<4x4xf32>
    %160 = arith.mulf %157, %159 : vector<4x4xf32>
    %161 = arith.addf %149, %160 : vector<4x4xf32>
    %c0_148 = arith.constant 0 : index
    %c10_149 = arith.constant 10 : index
    %c0_150 = arith.constant 0 : index
    %c0_151 = arith.constant 0 : index
    %162 = vector.load %arg1[%c0_148, %c10_149, %c0_150, %c0_151] : memref<1x16x5x5xf32, #tpu.memory_space<vmem>>, vector<1x1x4x4xf32>
    %163 = vector.shape_cast %162 : vector<1x1x4x4xf32> to vector<4x4xf32>
    %c2_152 = arith.constant 2 : index
    %c8_153 = arith.constant 8 : index
    %164 = memref.load %arg2[%c2_152, %c8_153] : memref<8x9xf32, #tpu.memory_space<smem>>
    %165 = vector.broadcast %164 : f32 to vector<4x4xf32>
    %166 = arith.mulf %163, %165 : vector<4x4xf32>
    %167 = arith.addf %155, %166 : vector<4x4xf32>
    %168 = arith.addf %167, %161 : vector<4x4xf32>
    %c2_154 = arith.constant 2 : index
    %169 = memref.load %arg3[%c2_154] : memref<8xf32, #tpu.memory_space<smem>>
    %170 = vector.broadcast %169 : f32 to vector<4x4xf32>
    %171 = arith.addf %168, %170 : vector<4x4xf32>
    %cst_155 = arith.constant 0.000000e+00 : f32
    %172 = vector.broadcast %cst_155 : f32 to vector<4x4xf32>
    %173 = arith.maximumf %171, %172 : vector<4x4xf32>
    %c0_156 = arith.constant 0 : index
    %c0_157 = arith.constant 0 : index
    %c0_158 = arith.constant 0 : index
    %c0_159 = arith.constant 0 : index
    %174 = vector.load %arg1[%c0_156, %c0_157, %c0_158, %c0_159] : memref<1x16x5x5xf32, #tpu.memory_space<vmem>>, vector<1x1x4x4xf32>
    %175 = vector.shape_cast %174 : vector<1x1x4x4xf32> to vector<4x4xf32>
    %c3_160 = arith.constant 3 : index
    %c0_161 = arith.constant 0 : index
    %176 = memref.load %arg2[%c3_160, %c0_161] : memref<8x9xf32, #tpu.memory_space<smem>>
    %177 = vector.broadcast %176 : f32 to vector<4x4xf32>
    %178 = arith.mulf %175, %177 : vector<4x4xf32>
    %c0_162 = arith.constant 0 : index
    %c1_163 = arith.constant 1 : index
    %c0_164 = arith.constant 0 : index
    %c0_165 = arith.constant 0 : index
    %179 = vector.load %arg1[%c0_162, %c1_163, %c0_164, %c0_165] : memref<1x16x5x5xf32, #tpu.memory_space<vmem>>, vector<1x1x4x4xf32>
    %180 = vector.shape_cast %179 : vector<1x1x4x4xf32> to vector<4x4xf32>
    %c3_166 = arith.constant 3 : index
    %c1_167 = arith.constant 1 : index
    %181 = memref.load %arg2[%c3_166, %c1_167] : memref<8x9xf32, #tpu.memory_space<smem>>
    %182 = vector.broadcast %181 : f32 to vector<4x4xf32>
    %183 = arith.mulf %180, %182 : vector<4x4xf32>
    %c0_168 = arith.constant 0 : index
    %c2_169 = arith.constant 2 : index
    %c0_170 = arith.constant 0 : index
    %c0_171 = arith.constant 0 : index
    %184 = vector.load %arg1[%c0_168, %c2_169, %c0_170, %c0_171] : memref<1x16x5x5xf32, #tpu.memory_space<vmem>>, vector<1x1x4x4xf32>
    %185 = vector.shape_cast %184 : vector<1x1x4x4xf32> to vector<4x4xf32>
    %c3_172 = arith.constant 3 : index
    %c2_173 = arith.constant 2 : index
    %186 = memref.load %arg2[%c3_172, %c2_173] : memref<8x9xf32, #tpu.memory_space<smem>>
    %187 = vector.broadcast %186 : f32 to vector<4x4xf32>
    %188 = arith.mulf %185, %187 : vector<4x4xf32>
    %189 = arith.addf %178, %188 : vector<4x4xf32>
    %c0_174 = arith.constant 0 : index
    %c4_175 = arith.constant 4 : index
    %c0_176 = arith.constant 0 : index
    %c0_177 = arith.constant 0 : index
    %190 = vector.load %arg1[%c0_174, %c4_175, %c0_176, %c0_177] : memref<1x16x5x5xf32, #tpu.memory_space<vmem>>, vector<1x1x4x4xf32>
    %191 = vector.shape_cast %190 : vector<1x1x4x4xf32> to vector<4x4xf32>
    %c3_178 = arith.constant 3 : index
    %c3_179 = arith.constant 3 : index
    %192 = memref.load %arg2[%c3_178, %c3_179] : memref<8x9xf32, #tpu.memory_space<smem>>
    %193 = vector.broadcast %192 : f32 to vector<4x4xf32>
    %194 = arith.mulf %191, %193 : vector<4x4xf32>
    %195 = arith.addf %183, %194 : vector<4x4xf32>
    %c0_180 = arith.constant 0 : index
    %c5_181 = arith.constant 5 : index
    %c0_182 = arith.constant 0 : index
    %c0_183 = arith.constant 0 : index
    %196 = vector.load %arg1[%c0_180, %c5_181, %c0_182, %c0_183] : memref<1x16x5x5xf32, #tpu.memory_space<vmem>>, vector<1x1x4x4xf32>
    %197 = vector.shape_cast %196 : vector<1x1x4x4xf32> to vector<4x4xf32>
    %c3_184 = arith.constant 3 : index
    %c4_185 = arith.constant 4 : index
    %198 = memref.load %arg2[%c3_184, %c4_185] : memref<8x9xf32, #tpu.memory_space<smem>>
    %199 = vector.broadcast %198 : f32 to vector<4x4xf32>
    %200 = arith.mulf %197, %199 : vector<4x4xf32>
    %201 = arith.addf %189, %200 : vector<4x4xf32>
    %c0_186 = arith.constant 0 : index
    %c6_187 = arith.constant 6 : index
    %c0_188 = arith.constant 0 : index
    %c0_189 = arith.constant 0 : index
    %202 = vector.load %arg1[%c0_186, %c6_187, %c0_188, %c0_189] : memref<1x16x5x5xf32, #tpu.memory_space<vmem>>, vector<1x1x4x4xf32>
    %203 = vector.shape_cast %202 : vector<1x1x4x4xf32> to vector<4x4xf32>
    %c3_190 = arith.constant 3 : index
    %c5_191 = arith.constant 5 : index
    %204 = memref.load %arg2[%c3_190, %c5_191] : memref<8x9xf32, #tpu.memory_space<smem>>
    %205 = vector.broadcast %204 : f32 to vector<4x4xf32>
    %206 = arith.mulf %203, %205 : vector<4x4xf32>
    %207 = arith.addf %195, %206 : vector<4x4xf32>
    %c0_192 = arith.constant 0 : index
    %c8_193 = arith.constant 8 : index
    %c0_194 = arith.constant 0 : index
    %c0_195 = arith.constant 0 : index
    %208 = vector.load %arg1[%c0_192, %c8_193, %c0_194, %c0_195] : memref<1x16x5x5xf32, #tpu.memory_space<vmem>>, vector<1x1x4x4xf32>
    %209 = vector.shape_cast %208 : vector<1x1x4x4xf32> to vector<4x4xf32>
    %c3_196 = arith.constant 3 : index
    %c6_197 = arith.constant 6 : index
    %210 = memref.load %arg2[%c3_196, %c6_197] : memref<8x9xf32, #tpu.memory_space<smem>>
    %211 = vector.broadcast %210 : f32 to vector<4x4xf32>
    %212 = arith.mulf %209, %211 : vector<4x4xf32>
    %213 = arith.addf %201, %212 : vector<4x4xf32>
    %c0_198 = arith.constant 0 : index
    %c9_199 = arith.constant 9 : index
    %c0_200 = arith.constant 0 : index
    %c0_201 = arith.constant 0 : index
    %214 = vector.load %arg1[%c0_198, %c9_199, %c0_200, %c0_201] : memref<1x16x5x5xf32, #tpu.memory_space<vmem>>, vector<1x1x4x4xf32>
    %215 = vector.shape_cast %214 : vector<1x1x4x4xf32> to vector<4x4xf32>
    %c3_202 = arith.constant 3 : index
    %c7_203 = arith.constant 7 : index
    %216 = memref.load %arg2[%c3_202, %c7_203] : memref<8x9xf32, #tpu.memory_space<smem>>
    %217 = vector.broadcast %216 : f32 to vector<4x4xf32>
    %218 = arith.mulf %215, %217 : vector<4x4xf32>
    %219 = arith.addf %207, %218 : vector<4x4xf32>
    %c0_204 = arith.constant 0 : index
    %c10_205 = arith.constant 10 : index
    %c0_206 = arith.constant 0 : index
    %c0_207 = arith.constant 0 : index
    %220 = vector.load %arg1[%c0_204, %c10_205, %c0_206, %c0_207] : memref<1x16x5x5xf32, #tpu.memory_space<vmem>>, vector<1x1x4x4xf32>
    %221 = vector.shape_cast %220 : vector<1x1x4x4xf32> to vector<4x4xf32>
    %c3_208 = arith.constant 3 : index
    %c8_209 = arith.constant 8 : index
    %222 = memref.load %arg2[%c3_208, %c8_209] : memref<8x9xf32, #tpu.memory_space<smem>>
    %223 = vector.broadcast %222 : f32 to vector<4x4xf32>
    %224 = arith.mulf %221, %223 : vector<4x4xf32>
    %225 = arith.addf %213, %224 : vector<4x4xf32>
    %226 = arith.addf %225, %219 : vector<4x4xf32>
    %c3_210 = arith.constant 3 : index
    %227 = memref.load %arg3[%c3_210] : memref<8xf32, #tpu.memory_space<smem>>
    %228 = vector.broadcast %227 : f32 to vector<4x4xf32>
    %229 = arith.addf %226, %228 : vector<4x4xf32>
    %cst_211 = arith.constant 0.000000e+00 : f32
    %230 = vector.broadcast %cst_211 : f32 to vector<4x4xf32>
    %231 = arith.maximumf %229, %230 : vector<4x4xf32>
    %c0_212 = arith.constant 0 : index
    %c0_213 = arith.constant 0 : index
    %c0_214 = arith.constant 0 : index
    %c0_215 = arith.constant 0 : index
    %232 = vector.load %arg1[%c0_212, %c0_213, %c0_214, %c0_215] : memref<1x16x5x5xf32, #tpu.memory_space<vmem>>, vector<1x1x4x4xf32>
    %233 = vector.shape_cast %232 : vector<1x1x4x4xf32> to vector<4x4xf32>
    %c4_216 = arith.constant 4 : index
    %c0_217 = arith.constant 0 : index
    %234 = memref.load %arg2[%c4_216, %c0_217] : memref<8x9xf32, #tpu.memory_space<smem>>
    %235 = vector.broadcast %234 : f32 to vector<4x4xf32>
    %236 = arith.mulf %233, %235 : vector<4x4xf32>
    %c0_218 = arith.constant 0 : index
    %c1_219 = arith.constant 1 : index
    %c0_220 = arith.constant 0 : index
    %c0_221 = arith.constant 0 : index
    %237 = vector.load %arg1[%c0_218, %c1_219, %c0_220, %c0_221] : memref<1x16x5x5xf32, #tpu.memory_space<vmem>>, vector<1x1x4x4xf32>
    %238 = vector.shape_cast %237 : vector<1x1x4x4xf32> to vector<4x4xf32>
    %c4_222 = arith.constant 4 : index
    %c1_223 = arith.constant 1 : index
    %239 = memref.load %arg2[%c4_222, %c1_223] : memref<8x9xf32, #tpu.memory_space<smem>>
    %240 = vector.broadcast %239 : f32 to vector<4x4xf32>
    %241 = arith.mulf %238, %240 : vector<4x4xf32>
    %c0_224 = arith.constant 0 : index
    %c2_225 = arith.constant 2 : index
    %c0_226 = arith.constant 0 : index
    %c0_227 = arith.constant 0 : index
    %242 = vector.load %arg1[%c0_224, %c2_225, %c0_226, %c0_227] : memref<1x16x5x5xf32, #tpu.memory_space<vmem>>, vector<1x1x4x4xf32>
    %243 = vector.shape_cast %242 : vector<1x1x4x4xf32> to vector<4x4xf32>
    %c4_228 = arith.constant 4 : index
    %c2_229 = arith.constant 2 : index
    %244 = memref.load %arg2[%c4_228, %c2_229] : memref<8x9xf32, #tpu.memory_space<smem>>
    %245 = vector.broadcast %244 : f32 to vector<4x4xf32>
    %246 = arith.mulf %243, %245 : vector<4x4xf32>
    %247 = arith.addf %236, %246 : vector<4x4xf32>
    %c0_230 = arith.constant 0 : index
    %c4_231 = arith.constant 4 : index
    %c0_232 = arith.constant 0 : index
    %c0_233 = arith.constant 0 : index
    %248 = vector.load %arg1[%c0_230, %c4_231, %c0_232, %c0_233] : memref<1x16x5x5xf32, #tpu.memory_space<vmem>>, vector<1x1x4x4xf32>
    %249 = vector.shape_cast %248 : vector<1x1x4x4xf32> to vector<4x4xf32>
    %c4_234 = arith.constant 4 : index
    %c3_235 = arith.constant 3 : index
    %250 = memref.load %arg2[%c4_234, %c3_235] : memref<8x9xf32, #tpu.memory_space<smem>>
    %251 = vector.broadcast %250 : f32 to vector<4x4xf32>
    %252 = arith.mulf %249, %251 : vector<4x4xf32>
    %253 = arith.addf %241, %252 : vector<4x4xf32>
    %c0_236 = arith.constant 0 : index
    %c5_237 = arith.constant 5 : index
    %c0_238 = arith.constant 0 : index
    %c0_239 = arith.constant 0 : index
    %254 = vector.load %arg1[%c0_236, %c5_237, %c0_238, %c0_239] : memref<1x16x5x5xf32, #tpu.memory_space<vmem>>, vector<1x1x4x4xf32>
    %255 = vector.shape_cast %254 : vector<1x1x4x4xf32> to vector<4x4xf32>
    %c4_240 = arith.constant 4 : index
    %c4_241 = arith.constant 4 : index
    %256 = memref.load %arg2[%c4_240, %c4_241] : memref<8x9xf32, #tpu.memory_space<smem>>
    %257 = vector.broadcast %256 : f32 to vector<4x4xf32>
    %258 = arith.mulf %255, %257 : vector<4x4xf32>
    %259 = arith.addf %247, %258 : vector<4x4xf32>
    %c0_242 = arith.constant 0 : index
    %c6_243 = arith.constant 6 : index
    %c0_244 = arith.constant 0 : index
    %c0_245 = arith.constant 0 : index
    %260 = vector.load %arg1[%c0_242, %c6_243, %c0_244, %c0_245] : memref<1x16x5x5xf32, #tpu.memory_space<vmem>>, vector<1x1x4x4xf32>
    %261 = vector.shape_cast %260 : vector<1x1x4x4xf32> to vector<4x4xf32>
    %c4_246 = arith.constant 4 : index
    %c5_247 = arith.constant 5 : index
    %262 = memref.load %arg2[%c4_246, %c5_247] : memref<8x9xf32, #tpu.memory_space<smem>>
    %263 = vector.broadcast %262 : f32 to vector<4x4xf32>
    %264 = arith.mulf %261, %263 : vector<4x4xf32>
    %265 = arith.addf %253, %264 : vector<4x4xf32>
    %c0_248 = arith.constant 0 : index
    %c8_249 = arith.constant 8 : index
    %c0_250 = arith.constant 0 : index
    %c0_251 = arith.constant 0 : index
    %266 = vector.load %arg1[%c0_248, %c8_249, %c0_250, %c0_251] : memref<1x16x5x5xf32, #tpu.memory_space<vmem>>, vector<1x1x4x4xf32>
    %267 = vector.shape_cast %266 : vector<1x1x4x4xf32> to vector<4x4xf32>
    %c4_252 = arith.constant 4 : index
    %c6_253 = arith.constant 6 : index
    %268 = memref.load %arg2[%c4_252, %c6_253] : memref<8x9xf32, #tpu.memory_space<smem>>
    %269 = vector.broadcast %268 : f32 to vector<4x4xf32>
    %270 = arith.mulf %267, %269 : vector<4x4xf32>
    %271 = arith.addf %259, %270 : vector<4x4xf32>
    %c0_254 = arith.constant 0 : index
    %c9_255 = arith.constant 9 : index
    %c0_256 = arith.constant 0 : index
    %c0_257 = arith.constant 0 : index
    %272 = vector.load %arg1[%c0_254, %c9_255, %c0_256, %c0_257] : memref<1x16x5x5xf32, #tpu.memory_space<vmem>>, vector<1x1x4x4xf32>
    %273 = vector.shape_cast %272 : vector<1x1x4x4xf32> to vector<4x4xf32>
    %c4_258 = arith.constant 4 : index
    %c7_259 = arith.constant 7 : index
    %274 = memref.load %arg2[%c4_258, %c7_259] : memref<8x9xf32, #tpu.memory_space<smem>>
    %275 = vector.broadcast %274 : f32 to vector<4x4xf32>
    %276 = arith.mulf %273, %275 : vector<4x4xf32>
    %277 = arith.addf %265, %276 : vector<4x4xf32>
    %c0_260 = arith.constant 0 : index
    %c10_261 = arith.constant 10 : index
    %c0_262 = arith.constant 0 : index
    %c0_263 = arith.constant 0 : index
    %278 = vector.load %arg1[%c0_260, %c10_261, %c0_262, %c0_263] : memref<1x16x5x5xf32, #tpu.memory_space<vmem>>, vector<1x1x4x4xf32>
    %279 = vector.shape_cast %278 : vector<1x1x4x4xf32> to vector<4x4xf32>
    %c4_264 = arith.constant 4 : index
    %c8_265 = arith.constant 8 : index
    %280 = memref.load %arg2[%c4_264, %c8_265] : memref<8x9xf32, #tpu.memory_space<smem>>
    %281 = vector.broadcast %280 : f32 to vector<4x4xf32>
    %282 = arith.mulf %279, %281 : vector<4x4xf32>
    %283 = arith.addf %271, %282 : vector<4x4xf32>
    %284 = arith.addf %283, %277 : vector<4x4xf32>
    %c4_266 = arith.constant 4 : index
    %285 = memref.load %arg3[%c4_266] : memref<8xf32, #tpu.memory_space<smem>>
    %286 = vector.broadcast %285 : f32 to vector<4x4xf32>
    %287 = arith.addf %284, %286 : vector<4x4xf32>
    %cst_267 = arith.constant 0.000000e+00 : f32
    %288 = vector.broadcast %cst_267 : f32 to vector<4x4xf32>
    %289 = arith.maximumf %287, %288 : vector<4x4xf32>
    %c0_268 = arith.constant 0 : index
    %c0_269 = arith.constant 0 : index
    %c0_270 = arith.constant 0 : index
    %c0_271 = arith.constant 0 : index
    %290 = vector.load %arg1[%c0_268, %c0_269, %c0_270, %c0_271] : memref<1x16x5x5xf32, #tpu.memory_space<vmem>>, vector<1x1x4x4xf32>
    %291 = vector.shape_cast %290 : vector<1x1x4x4xf32> to vector<4x4xf32>
    %c5_272 = arith.constant 5 : index
    %c0_273 = arith.constant 0 : index
    %292 = memref.load %arg2[%c5_272, %c0_273] : memref<8x9xf32, #tpu.memory_space<smem>>
    %293 = vector.broadcast %292 : f32 to vector<4x4xf32>
    %294 = arith.mulf %291, %293 : vector<4x4xf32>
    %c0_274 = arith.constant 0 : index
    %c1_275 = arith.constant 1 : index
    %c0_276 = arith.constant 0 : index
    %c0_277 = arith.constant 0 : index
    %295 = vector.load %arg1[%c0_274, %c1_275, %c0_276, %c0_277] : memref<1x16x5x5xf32, #tpu.memory_space<vmem>>, vector<1x1x4x4xf32>
    %296 = vector.shape_cast %295 : vector<1x1x4x4xf32> to vector<4x4xf32>
    %c5_278 = arith.constant 5 : index
    %c1_279 = arith.constant 1 : index
    %297 = memref.load %arg2[%c5_278, %c1_279] : memref<8x9xf32, #tpu.memory_space<smem>>
    %298 = vector.broadcast %297 : f32 to vector<4x4xf32>
    %299 = arith.mulf %296, %298 : vector<4x4xf32>
    %c0_280 = arith.constant 0 : index
    %c2_281 = arith.constant 2 : index
    %c0_282 = arith.constant 0 : index
    %c0_283 = arith.constant 0 : index
    %300 = vector.load %arg1[%c0_280, %c2_281, %c0_282, %c0_283] : memref<1x16x5x5xf32, #tpu.memory_space<vmem>>, vector<1x1x4x4xf32>
    %301 = vector.shape_cast %300 : vector<1x1x4x4xf32> to vector<4x4xf32>
    %c5_284 = arith.constant 5 : index
    %c2_285 = arith.constant 2 : index
    %302 = memref.load %arg2[%c5_284, %c2_285] : memref<8x9xf32, #tpu.memory_space<smem>>
    %303 = vector.broadcast %302 : f32 to vector<4x4xf32>
    %304 = arith.mulf %301, %303 : vector<4x4xf32>
    %305 = arith.addf %294, %304 : vector<4x4xf32>
    %c0_286 = arith.constant 0 : index
    %c4_287 = arith.constant 4 : index
    %c0_288 = arith.constant 0 : index
    %c0_289 = arith.constant 0 : index
    %306 = vector.load %arg1[%c0_286, %c4_287, %c0_288, %c0_289] : memref<1x16x5x5xf32, #tpu.memory_space<vmem>>, vector<1x1x4x4xf32>
    %307 = vector.shape_cast %306 : vector<1x1x4x4xf32> to vector<4x4xf32>
    %c5_290 = arith.constant 5 : index
    %c3_291 = arith.constant 3 : index
    %308 = memref.load %arg2[%c5_290, %c3_291] : memref<8x9xf32, #tpu.memory_space<smem>>
    %309 = vector.broadcast %308 : f32 to vector<4x4xf32>
    %310 = arith.mulf %307, %309 : vector<4x4xf32>
    %311 = arith.addf %299, %310 : vector<4x4xf32>
    %c0_292 = arith.constant 0 : index
    %c5_293 = arith.constant 5 : index
    %c0_294 = arith.constant 0 : index
    %c0_295 = arith.constant 0 : index
    %312 = vector.load %arg1[%c0_292, %c5_293, %c0_294, %c0_295] : memref<1x16x5x5xf32, #tpu.memory_space<vmem>>, vector<1x1x4x4xf32>
    %313 = vector.shape_cast %312 : vector<1x1x4x4xf32> to vector<4x4xf32>
    %c5_296 = arith.constant 5 : index
    %c4_297 = arith.constant 4 : index
    %314 = memref.load %arg2[%c5_296, %c4_297] : memref<8x9xf32, #tpu.memory_space<smem>>
    %315 = vector.broadcast %314 : f32 to vector<4x4xf32>
    %316 = arith.mulf %313, %315 : vector<4x4xf32>
    %317 = arith.addf %305, %316 : vector<4x4xf32>
    %c0_298 = arith.constant 0 : index
    %c6_299 = arith.constant 6 : index
    %c0_300 = arith.constant 0 : index
    %c0_301 = arith.constant 0 : index
    %318 = vector.load %arg1[%c0_298, %c6_299, %c0_300, %c0_301] : memref<1x16x5x5xf32, #tpu.memory_space<vmem>>, vector<1x1x4x4xf32>
    %319 = vector.shape_cast %318 : vector<1x1x4x4xf32> to vector<4x4xf32>
    %c5_302 = arith.constant 5 : index
    %c5_303 = arith.constant 5 : index
    %320 = memref.load %arg2[%c5_302, %c5_303] : memref<8x9xf32, #tpu.memory_space<smem>>
    %321 = vector.broadcast %320 : f32 to vector<4x4xf32>
    %322 = arith.mulf %319, %321 : vector<4x4xf32>
    %323 = arith.addf %311, %322 : vector<4x4xf32>
    %c0_304 = arith.constant 0 : index
    %c8_305 = arith.constant 8 : index
    %c0_306 = arith.constant 0 : index
    %c0_307 = arith.constant 0 : index
    %324 = vector.load %arg1[%c0_304, %c8_305, %c0_306, %c0_307] : memref<1x16x5x5xf32, #tpu.memory_space<vmem>>, vector<1x1x4x4xf32>
    %325 = vector.shape_cast %324 : vector<1x1x4x4xf32> to vector<4x4xf32>
    %c5_308 = arith.constant 5 : index
    %c6_309 = arith.constant 6 : index
    %326 = memref.load %arg2[%c5_308, %c6_309] : memref<8x9xf32, #tpu.memory_space<smem>>
    %327 = vector.broadcast %326 : f32 to vector<4x4xf32>
    %328 = arith.mulf %325, %327 : vector<4x4xf32>
    %329 = arith.addf %317, %328 : vector<4x4xf32>
    %c0_310 = arith.constant 0 : index
    %c9_311 = arith.constant 9 : index
    %c0_312 = arith.constant 0 : index
    %c0_313 = arith.constant 0 : index
    %330 = vector.load %arg1[%c0_310, %c9_311, %c0_312, %c0_313] : memref<1x16x5x5xf32, #tpu.memory_space<vmem>>, vector<1x1x4x4xf32>
    %331 = vector.shape_cast %330 : vector<1x1x4x4xf32> to vector<4x4xf32>
    %c5_314 = arith.constant 5 : index
    %c7_315 = arith.constant 7 : index
    %332 = memref.load %arg2[%c5_314, %c7_315] : memref<8x9xf32, #tpu.memory_space<smem>>
    %333 = vector.broadcast %332 : f32 to vector<4x4xf32>
    %334 = arith.mulf %331, %333 : vector<4x4xf32>
    %335 = arith.addf %323, %334 : vector<4x4xf32>
    %c0_316 = arith.constant 0 : index
    %c10_317 = arith.constant 10 : index
    %c0_318 = arith.constant 0 : index
    %c0_319 = arith.constant 0 : index
    %336 = vector.load %arg1[%c0_316, %c10_317, %c0_318, %c0_319] : memref<1x16x5x5xf32, #tpu.memory_space<vmem>>, vector<1x1x4x4xf32>
    %337 = vector.shape_cast %336 : vector<1x1x4x4xf32> to vector<4x4xf32>
    %c5_320 = arith.constant 5 : index
    %c8_321 = arith.constant 8 : index
    %338 = memref.load %arg2[%c5_320, %c8_321] : memref<8x9xf32, #tpu.memory_space<smem>>
    %339 = vector.broadcast %338 : f32 to vector<4x4xf32>
    %340 = arith.mulf %337, %339 : vector<4x4xf32>
    %341 = arith.addf %329, %340 : vector<4x4xf32>
    %342 = arith.addf %341, %335 : vector<4x4xf32>
    %c5_322 = arith.constant 5 : index
    %343 = memref.load %arg3[%c5_322] : memref<8xf32, #tpu.memory_space<smem>>
    %344 = vector.broadcast %343 : f32 to vector<4x4xf32>
    %345 = arith.addf %342, %344 : vector<4x4xf32>
    %cst_323 = arith.constant 0.000000e+00 : f32
    %346 = vector.broadcast %cst_323 : f32 to vector<4x4xf32>
    %347 = arith.maximumf %345, %346 : vector<4x4xf32>
    %c0_324 = arith.constant 0 : index
    %c0_325 = arith.constant 0 : index
    %c0_326 = arith.constant 0 : index
    %c0_327 = arith.constant 0 : index
    %348 = vector.load %arg1[%c0_324, %c0_325, %c0_326, %c0_327] : memref<1x16x5x5xf32, #tpu.memory_space<vmem>>, vector<1x1x4x4xf32>
    %349 = vector.shape_cast %348 : vector<1x1x4x4xf32> to vector<4x4xf32>
    %c6_328 = arith.constant 6 : index
    %c0_329 = arith.constant 0 : index
    %350 = memref.load %arg2[%c6_328, %c0_329] : memref<8x9xf32, #tpu.memory_space<smem>>
    %351 = vector.broadcast %350 : f32 to vector<4x4xf32>
    %352 = arith.mulf %349, %351 : vector<4x4xf32>
    %c0_330 = arith.constant 0 : index
    %c1_331 = arith.constant 1 : index
    %c0_332 = arith.constant 0 : index
    %c0_333 = arith.constant 0 : index
    %353 = vector.load %arg1[%c0_330, %c1_331, %c0_332, %c0_333] : memref<1x16x5x5xf32, #tpu.memory_space<vmem>>, vector<1x1x4x4xf32>
    %354 = vector.shape_cast %353 : vector<1x1x4x4xf32> to vector<4x4xf32>
    %c6_334 = arith.constant 6 : index
    %c1_335 = arith.constant 1 : index
    %355 = memref.load %arg2[%c6_334, %c1_335] : memref<8x9xf32, #tpu.memory_space<smem>>
    %356 = vector.broadcast %355 : f32 to vector<4x4xf32>
    %357 = arith.mulf %354, %356 : vector<4x4xf32>
    %c0_336 = arith.constant 0 : index
    %c2_337 = arith.constant 2 : index
    %c0_338 = arith.constant 0 : index
    %c0_339 = arith.constant 0 : index
    %358 = vector.load %arg1[%c0_336, %c2_337, %c0_338, %c0_339] : memref<1x16x5x5xf32, #tpu.memory_space<vmem>>, vector<1x1x4x4xf32>
    %359 = vector.shape_cast %358 : vector<1x1x4x4xf32> to vector<4x4xf32>
    %c6_340 = arith.constant 6 : index
    %c2_341 = arith.constant 2 : index
    %360 = memref.load %arg2[%c6_340, %c2_341] : memref<8x9xf32, #tpu.memory_space<smem>>
    %361 = vector.broadcast %360 : f32 to vector<4x4xf32>
    %362 = arith.mulf %359, %361 : vector<4x4xf32>
    %363 = arith.addf %352, %362 : vector<4x4xf32>
    %c0_342 = arith.constant 0 : index
    %c4_343 = arith.constant 4 : index
    %c0_344 = arith.constant 0 : index
    %c0_345 = arith.constant 0 : index
    %364 = vector.load %arg1[%c0_342, %c4_343, %c0_344, %c0_345] : memref<1x16x5x5xf32, #tpu.memory_space<vmem>>, vector<1x1x4x4xf32>
    %365 = vector.shape_cast %364 : vector<1x1x4x4xf32> to vector<4x4xf32>
    %c6_346 = arith.constant 6 : index
    %c3_347 = arith.constant 3 : index
    %366 = memref.load %arg2[%c6_346, %c3_347] : memref<8x9xf32, #tpu.memory_space<smem>>
    %367 = vector.broadcast %366 : f32 to vector<4x4xf32>
    %368 = arith.mulf %365, %367 : vector<4x4xf32>
    %369 = arith.addf %357, %368 : vector<4x4xf32>
    %c0_348 = arith.constant 0 : index
    %c5_349 = arith.constant 5 : index
    %c0_350 = arith.constant 0 : index
    %c0_351 = arith.constant 0 : index
    %370 = vector.load %arg1[%c0_348, %c5_349, %c0_350, %c0_351] : memref<1x16x5x5xf32, #tpu.memory_space<vmem>>, vector<1x1x4x4xf32>
    %371 = vector.shape_cast %370 : vector<1x1x4x4xf32> to vector<4x4xf32>
    %c6_352 = arith.constant 6 : index
    %c4_353 = arith.constant 4 : index
    %372 = memref.load %arg2[%c6_352, %c4_353] : memref<8x9xf32, #tpu.memory_space<smem>>
    %373 = vector.broadcast %372 : f32 to vector<4x4xf32>
    %374 = arith.mulf %371, %373 : vector<4x4xf32>
    %375 = arith.addf %363, %374 : vector<4x4xf32>
    %c0_354 = arith.constant 0 : index
    %c6_355 = arith.constant 6 : index
    %c0_356 = arith.constant 0 : index
    %c0_357 = arith.constant 0 : index
    %376 = vector.load %arg1[%c0_354, %c6_355, %c0_356, %c0_357] : memref<1x16x5x5xf32, #tpu.memory_space<vmem>>, vector<1x1x4x4xf32>
    %377 = vector.shape_cast %376 : vector<1x1x4x4xf32> to vector<4x4xf32>
    %c6_358 = arith.constant 6 : index
    %c5_359 = arith.constant 5 : index
    %378 = memref.load %arg2[%c6_358, %c5_359] : memref<8x9xf32, #tpu.memory_space<smem>>
    %379 = vector.broadcast %378 : f32 to vector<4x4xf32>
    %380 = arith.mulf %377, %379 : vector<4x4xf32>
    %381 = arith.addf %369, %380 : vector<4x4xf32>
    %c0_360 = arith.constant 0 : index
    %c8_361 = arith.constant 8 : index
    %c0_362 = arith.constant 0 : index
    %c0_363 = arith.constant 0 : index
    %382 = vector.load %arg1[%c0_360, %c8_361, %c0_362, %c0_363] : memref<1x16x5x5xf32, #tpu.memory_space<vmem>>, vector<1x1x4x4xf32>
    %383 = vector.shape_cast %382 : vector<1x1x4x4xf32> to vector<4x4xf32>
    %c6_364 = arith.constant 6 : index
    %c6_365 = arith.constant 6 : index
    %384 = memref.load %arg2[%c6_364, %c6_365] : memref<8x9xf32, #tpu.memory_space<smem>>
    %385 = vector.broadcast %384 : f32 to vector<4x4xf32>
    %386 = arith.mulf %383, %385 : vector<4x4xf32>
    %387 = arith.addf %375, %386 : vector<4x4xf32>
    %c0_366 = arith.constant 0 : index
    %c9_367 = arith.constant 9 : index
    %c0_368 = arith.constant 0 : index
    %c0_369 = arith.constant 0 : index
    %388 = vector.load %arg1[%c0_366, %c9_367, %c0_368, %c0_369] : memref<1x16x5x5xf32, #tpu.memory_space<vmem>>, vector<1x1x4x4xf32>
    %389 = vector.shape_cast %388 : vector<1x1x4x4xf32> to vector<4x4xf32>
    %c6_370 = arith.constant 6 : index
    %c7_371 = arith.constant 7 : index
    %390 = memref.load %arg2[%c6_370, %c7_371] : memref<8x9xf32, #tpu.memory_space<smem>>
    %391 = vector.broadcast %390 : f32 to vector<4x4xf32>
    %392 = arith.mulf %389, %391 : vector<4x4xf32>
    %393 = arith.addf %381, %392 : vector<4x4xf32>
    %c0_372 = arith.constant 0 : index
    %c10_373 = arith.constant 10 : index
    %c0_374 = arith.constant 0 : index
    %c0_375 = arith.constant 0 : index
    %394 = vector.load %arg1[%c0_372, %c10_373, %c0_374, %c0_375] : memref<1x16x5x5xf32, #tpu.memory_space<vmem>>, vector<1x1x4x4xf32>
    %395 = vector.shape_cast %394 : vector<1x1x4x4xf32> to vector<4x4xf32>
    %c6_376 = arith.constant 6 : index
    %c8_377 = arith.constant 8 : index
    %396 = memref.load %arg2[%c6_376, %c8_377] : memref<8x9xf32, #tpu.memory_space<smem>>
    %397 = vector.broadcast %396 : f32 to vector<4x4xf32>
    %398 = arith.mulf %395, %397 : vector<4x4xf32>
    %399 = arith.addf %387, %398 : vector<4x4xf32>
    %400 = arith.addf %399, %393 : vector<4x4xf32>
    %c6_378 = arith.constant 6 : index
    %401 = memref.load %arg3[%c6_378] : memref<8xf32, #tpu.memory_space<smem>>
    %402 = vector.broadcast %401 : f32 to vector<4x4xf32>
    %403 = arith.addf %400, %402 : vector<4x4xf32>
    %cst_379 = arith.constant 0.000000e+00 : f32
    %404 = vector.broadcast %cst_379 : f32 to vector<4x4xf32>
    %405 = arith.maximumf %403, %404 : vector<4x4xf32>
    %c0_380 = arith.constant 0 : index
    %c0_381 = arith.constant 0 : index
    %c0_382 = arith.constant 0 : index
    %c0_383 = arith.constant 0 : index
    %406 = vector.load %arg1[%c0_380, %c0_381, %c0_382, %c0_383] : memref<1x16x5x5xf32, #tpu.memory_space<vmem>>, vector<1x1x4x4xf32>
    %407 = vector.shape_cast %406 : vector<1x1x4x4xf32> to vector<4x4xf32>
    %c7_384 = arith.constant 7 : index
    %c0_385 = arith.constant 0 : index
    %408 = memref.load %arg2[%c7_384, %c0_385] : memref<8x9xf32, #tpu.memory_space<smem>>
    %409 = vector.broadcast %408 : f32 to vector<4x4xf32>
    %410 = arith.mulf %407, %409 : vector<4x4xf32>
    %c0_386 = arith.constant 0 : index
    %c1_387 = arith.constant 1 : index
    %c0_388 = arith.constant 0 : index
    %c0_389 = arith.constant 0 : index
    %411 = vector.load %arg1[%c0_386, %c1_387, %c0_388, %c0_389] : memref<1x16x5x5xf32, #tpu.memory_space<vmem>>, vector<1x1x4x4xf32>
    %412 = vector.shape_cast %411 : vector<1x1x4x4xf32> to vector<4x4xf32>
    %c7_390 = arith.constant 7 : index
    %c1_391 = arith.constant 1 : index
    %413 = memref.load %arg2[%c7_390, %c1_391] : memref<8x9xf32, #tpu.memory_space<smem>>
    %414 = vector.broadcast %413 : f32 to vector<4x4xf32>
    %415 = arith.mulf %412, %414 : vector<4x4xf32>
    %c0_392 = arith.constant 0 : index
    %c2_393 = arith.constant 2 : index
    %c0_394 = arith.constant 0 : index
    %c0_395 = arith.constant 0 : index
    %416 = vector.load %arg1[%c0_392, %c2_393, %c0_394, %c0_395] : memref<1x16x5x5xf32, #tpu.memory_space<vmem>>, vector<1x1x4x4xf32>
    %417 = vector.shape_cast %416 : vector<1x1x4x4xf32> to vector<4x4xf32>
    %c7_396 = arith.constant 7 : index
    %c2_397 = arith.constant 2 : index
    %418 = memref.load %arg2[%c7_396, %c2_397] : memref<8x9xf32, #tpu.memory_space<smem>>
    %419 = vector.broadcast %418 : f32 to vector<4x4xf32>
    %420 = arith.mulf %417, %419 : vector<4x4xf32>
    %421 = arith.addf %410, %420 : vector<4x4xf32>
    %c0_398 = arith.constant 0 : index
    %c4_399 = arith.constant 4 : index
    %c0_400 = arith.constant 0 : index
    %c0_401 = arith.constant 0 : index
    %422 = vector.load %arg1[%c0_398, %c4_399, %c0_400, %c0_401] : memref<1x16x5x5xf32, #tpu.memory_space<vmem>>, vector<1x1x4x4xf32>
    %423 = vector.shape_cast %422 : vector<1x1x4x4xf32> to vector<4x4xf32>
    %c7_402 = arith.constant 7 : index
    %c3_403 = arith.constant 3 : index
    %424 = memref.load %arg2[%c7_402, %c3_403] : memref<8x9xf32, #tpu.memory_space<smem>>
    %425 = vector.broadcast %424 : f32 to vector<4x4xf32>
    %426 = arith.mulf %423, %425 : vector<4x4xf32>
    %427 = arith.addf %415, %426 : vector<4x4xf32>
    %c0_404 = arith.constant 0 : index
    %c5_405 = arith.constant 5 : index
    %c0_406 = arith.constant 0 : index
    %c0_407 = arith.constant 0 : index
    %428 = vector.load %arg1[%c0_404, %c5_405, %c0_406, %c0_407] : memref<1x16x5x5xf32, #tpu.memory_space<vmem>>, vector<1x1x4x4xf32>
    %429 = vector.shape_cast %428 : vector<1x1x4x4xf32> to vector<4x4xf32>
    %c7_408 = arith.constant 7 : index
    %c4_409 = arith.constant 4 : index
    %430 = memref.load %arg2[%c7_408, %c4_409] : memref<8x9xf32, #tpu.memory_space<smem>>
    %431 = vector.broadcast %430 : f32 to vector<4x4xf32>
    %432 = arith.mulf %429, %431 : vector<4x4xf32>
    %433 = arith.addf %421, %432 : vector<4x4xf32>
    %c0_410 = arith.constant 0 : index
    %c6_411 = arith.constant 6 : index
    %c0_412 = arith.constant 0 : index
    %c0_413 = arith.constant 0 : index
    %434 = vector.load %arg1[%c0_410, %c6_411, %c0_412, %c0_413] : memref<1x16x5x5xf32, #tpu.memory_space<vmem>>, vector<1x1x4x4xf32>
    %435 = vector.shape_cast %434 : vector<1x1x4x4xf32> to vector<4x4xf32>
    %c7_414 = arith.constant 7 : index
    %c5_415 = arith.constant 5 : index
    %436 = memref.load %arg2[%c7_414, %c5_415] : memref<8x9xf32, #tpu.memory_space<smem>>
    %437 = vector.broadcast %436 : f32 to vector<4x4xf32>
    %438 = arith.mulf %435, %437 : vector<4x4xf32>
    %439 = arith.addf %427, %438 : vector<4x4xf32>
    %c0_416 = arith.constant 0 : index
    %c8_417 = arith.constant 8 : index
    %c0_418 = arith.constant 0 : index
    %c0_419 = arith.constant 0 : index
    %440 = vector.load %arg1[%c0_416, %c8_417, %c0_418, %c0_419] : memref<1x16x5x5xf32, #tpu.memory_space<vmem>>, vector<1x1x4x4xf32>
    %441 = vector.shape_cast %440 : vector<1x1x4x4xf32> to vector<4x4xf32>
    %c7_420 = arith.constant 7 : index
    %c6_421 = arith.constant 6 : index
    %442 = memref.load %arg2[%c7_420, %c6_421] : memref<8x9xf32, #tpu.memory_space<smem>>
    %443 = vector.broadcast %442 : f32 to vector<4x4xf32>
    %444 = arith.mulf %441, %443 : vector<4x4xf32>
    %445 = arith.addf %433, %444 : vector<4x4xf32>
    %c0_422 = arith.constant 0 : index
    %c9_423 = arith.constant 9 : index
    %c0_424 = arith.constant 0 : index
    %c0_425 = arith.constant 0 : index
    %446 = vector.load %arg1[%c0_422, %c9_423, %c0_424, %c0_425] : memref<1x16x5x5xf32, #tpu.memory_space<vmem>>, vector<1x1x4x4xf32>
    %447 = vector.shape_cast %446 : vector<1x1x4x4xf32> to vector<4x4xf32>
    %c7_426 = arith.constant 7 : index
    %c7_427 = arith.constant 7 : index
    %448 = memref.load %arg2[%c7_426, %c7_427] : memref<8x9xf32, #tpu.memory_space<smem>>
    %449 = vector.broadcast %448 : f32 to vector<4x4xf32>
    %450 = arith.mulf %447, %449 : vector<4x4xf32>
    %451 = arith.addf %439, %450 : vector<4x4xf32>
    %c0_428 = arith.constant 0 : index
    %c10_429 = arith.constant 10 : index
    %c0_430 = arith.constant 0 : index
    %c0_431 = arith.constant 0 : index
    %452 = vector.load %arg1[%c0_428, %c10_429, %c0_430, %c0_431] : memref<1x16x5x5xf32, #tpu.memory_space<vmem>>, vector<1x1x4x4xf32>
    %453 = vector.shape_cast %452 : vector<1x1x4x4xf32> to vector<4x4xf32>
    %c7_432 = arith.constant 7 : index
    %c8_433 = arith.constant 8 : index
    %454 = memref.load %arg2[%c7_432, %c8_433] : memref<8x9xf32, #tpu.memory_space<smem>>
    %455 = vector.broadcast %454 : f32 to vector<4x4xf32>
    %456 = arith.mulf %453, %455 : vector<4x4xf32>
    %457 = arith.addf %445, %456 : vector<4x4xf32>
    %458 = arith.addf %457, %451 : vector<4x4xf32>
    %c7_434 = arith.constant 7 : index
    %459 = memref.load %arg3[%c7_434] : memref<8xf32, #tpu.memory_space<smem>>
    %460 = vector.broadcast %459 : f32 to vector<4x4xf32>
    %461 = arith.addf %458, %460 : vector<4x4xf32>
    %cst_435 = arith.constant 0.000000e+00 : f32
    %462 = vector.broadcast %cst_435 : f32 to vector<4x4xf32>
    %463 = arith.maximumf %461, %462 : vector<4x4xf32>
    %c0_436 = arith.constant 0 : index
    %c2_437 = arith.constant 2 : index
    %c0_438 = arith.constant 0 : index
    %c0_439 = arith.constant 0 : index
    %464 = vector.load %arg1[%c0_436, %c2_437, %c0_438, %c0_439] : memref<1x16x5x5xf32, #tpu.memory_space<vmem>>, vector<1x1x4x4xf32>
    %465 = vector.shape_cast %464 : vector<1x1x4x4xf32> to vector<4x4xf32>
    %c0_440 = arith.constant 0 : index
    %c0_441 = arith.constant 0 : index
    %466 = memref.load %arg2[%c0_440, %c0_441] : memref<8x9xf32, #tpu.memory_space<smem>>
    %467 = vector.broadcast %466 : f32 to vector<4x4xf32>
    %468 = arith.mulf %465, %467 : vector<4x4xf32>
    %c0_442 = arith.constant 0 : index
    %c3_443 = arith.constant 3 : index
    %c0_444 = arith.constant 0 : index
    %c0_445 = arith.constant 0 : index
    %469 = vector.load %arg1[%c0_442, %c3_443, %c0_444, %c0_445] : memref<1x16x5x5xf32, #tpu.memory_space<vmem>>, vector<1x1x4x4xf32>
    %470 = vector.shape_cast %469 : vector<1x1x4x4xf32> to vector<4x4xf32>
    %c0_446 = arith.constant 0 : index
    %c1_447 = arith.constant 1 : index
    %471 = memref.load %arg2[%c0_446, %c1_447] : memref<8x9xf32, #tpu.memory_space<smem>>
    %472 = vector.broadcast %471 : f32 to vector<4x4xf32>
    %473 = arith.mulf %470, %472 : vector<4x4xf32>
    %c0_448 = arith.constant 0 : index
    %c0_449 = arith.constant 0 : index
    %c0_450 = arith.constant 0 : index
    %c1_451 = arith.constant 1 : index
    %474 = vector.load %arg1[%c0_448, %c0_449, %c0_450, %c1_451] : memref<1x16x5x5xf32, #tpu.memory_space<vmem>>, vector<1x1x4x4xf32>
    %475 = vector.shape_cast %474 : vector<1x1x4x4xf32> to vector<4x4xf32>
    %c0_452 = arith.constant 0 : index
    %c2_453 = arith.constant 2 : index
    %476 = memref.load %arg2[%c0_452, %c2_453] : memref<8x9xf32, #tpu.memory_space<smem>>
    %477 = vector.broadcast %476 : f32 to vector<4x4xf32>
    %478 = arith.mulf %475, %477 : vector<4x4xf32>
    %479 = arith.addf %468, %478 : vector<4x4xf32>
    %c0_454 = arith.constant 0 : index
    %c6_455 = arith.constant 6 : index
    %c0_456 = arith.constant 0 : index
    %c0_457 = arith.constant 0 : index
    %480 = vector.load %arg1[%c0_454, %c6_455, %c0_456, %c0_457] : memref<1x16x5x5xf32, #tpu.memory_space<vmem>>, vector<1x1x4x4xf32>
    %481 = vector.shape_cast %480 : vector<1x1x4x4xf32> to vector<4x4xf32>
    %c0_458 = arith.constant 0 : index
    %c3_459 = arith.constant 3 : index
    %482 = memref.load %arg2[%c0_458, %c3_459] : memref<8x9xf32, #tpu.memory_space<smem>>
    %483 = vector.broadcast %482 : f32 to vector<4x4xf32>
    %484 = arith.mulf %481, %483 : vector<4x4xf32>
    %485 = arith.addf %473, %484 : vector<4x4xf32>
    %c0_460 = arith.constant 0 : index
    %c7_461 = arith.constant 7 : index
    %c0_462 = arith.constant 0 : index
    %c0_463 = arith.constant 0 : index
    %486 = vector.load %arg1[%c0_460, %c7_461, %c0_462, %c0_463] : memref<1x16x5x5xf32, #tpu.memory_space<vmem>>, vector<1x1x4x4xf32>
    %487 = vector.shape_cast %486 : vector<1x1x4x4xf32> to vector<4x4xf32>
    %c0_464 = arith.constant 0 : index
    %c4_465 = arith.constant 4 : index
    %488 = memref.load %arg2[%c0_464, %c4_465] : memref<8x9xf32, #tpu.memory_space<smem>>
    %489 = vector.broadcast %488 : f32 to vector<4x4xf32>
    %490 = arith.mulf %487, %489 : vector<4x4xf32>
    %491 = arith.addf %479, %490 : vector<4x4xf32>
    %c0_466 = arith.constant 0 : index
    %c4_467 = arith.constant 4 : index
    %c0_468 = arith.constant 0 : index
    %c1_469 = arith.constant 1 : index
    %492 = vector.load %arg1[%c0_466, %c4_467, %c0_468, %c1_469] : memref<1x16x5x5xf32, #tpu.memory_space<vmem>>, vector<1x1x4x4xf32>
    %493 = vector.shape_cast %492 : vector<1x1x4x4xf32> to vector<4x4xf32>
    %c0_470 = arith.constant 0 : index
    %c5_471 = arith.constant 5 : index
    %494 = memref.load %arg2[%c0_470, %c5_471] : memref<8x9xf32, #tpu.memory_space<smem>>
    %495 = vector.broadcast %494 : f32 to vector<4x4xf32>
    %496 = arith.mulf %493, %495 : vector<4x4xf32>
    %497 = arith.addf %485, %496 : vector<4x4xf32>
    %c0_472 = arith.constant 0 : index
    %c10_473 = arith.constant 10 : index
    %c0_474 = arith.constant 0 : index
    %c0_475 = arith.constant 0 : index
    %498 = vector.load %arg1[%c0_472, %c10_473, %c0_474, %c0_475] : memref<1x16x5x5xf32, #tpu.memory_space<vmem>>, vector<1x1x4x4xf32>
    %499 = vector.shape_cast %498 : vector<1x1x4x4xf32> to vector<4x4xf32>
    %c0_476 = arith.constant 0 : index
    %c6_477 = arith.constant 6 : index
    %500 = memref.load %arg2[%c0_476, %c6_477] : memref<8x9xf32, #tpu.memory_space<smem>>
    %501 = vector.broadcast %500 : f32 to vector<4x4xf32>
    %502 = arith.mulf %499, %501 : vector<4x4xf32>
    %503 = arith.addf %491, %502 : vector<4x4xf32>
    %c0_478 = arith.constant 0 : index
    %c11 = arith.constant 11 : index
    %c0_479 = arith.constant 0 : index
    %c0_480 = arith.constant 0 : index
    %504 = vector.load %arg1[%c0_478, %c11, %c0_479, %c0_480] : memref<1x16x5x5xf32, #tpu.memory_space<vmem>>, vector<1x1x4x4xf32>
    %505 = vector.shape_cast %504 : vector<1x1x4x4xf32> to vector<4x4xf32>
    %c0_481 = arith.constant 0 : index
    %c7_482 = arith.constant 7 : index
    %506 = memref.load %arg2[%c0_481, %c7_482] : memref<8x9xf32, #tpu.memory_space<smem>>
    %507 = vector.broadcast %506 : f32 to vector<4x4xf32>
    %508 = arith.mulf %505, %507 : vector<4x4xf32>
    %509 = arith.addf %497, %508 : vector<4x4xf32>
    %c0_483 = arith.constant 0 : index
    %c8_484 = arith.constant 8 : index
    %c0_485 = arith.constant 0 : index
    %c1_486 = arith.constant 1 : index
    %510 = vector.load %arg1[%c0_483, %c8_484, %c0_485, %c1_486] : memref<1x16x5x5xf32, #tpu.memory_space<vmem>>, vector<1x1x4x4xf32>
    %511 = vector.shape_cast %510 : vector<1x1x4x4xf32> to vector<4x4xf32>
    %c0_487 = arith.constant 0 : index
    %c8_488 = arith.constant 8 : index
    %512 = memref.load %arg2[%c0_487, %c8_488] : memref<8x9xf32, #tpu.memory_space<smem>>
    %513 = vector.broadcast %512 : f32 to vector<4x4xf32>
    %514 = arith.mulf %511, %513 : vector<4x4xf32>
    %515 = arith.addf %503, %514 : vector<4x4xf32>
    %516 = arith.addf %515, %509 : vector<4x4xf32>
    %c0_489 = arith.constant 0 : index
    %517 = memref.load %arg3[%c0_489] : memref<8xf32, #tpu.memory_space<smem>>
    %518 = vector.broadcast %517 : f32 to vector<4x4xf32>
    %519 = arith.addf %516, %518 : vector<4x4xf32>
    %cst_490 = arith.constant 0.000000e+00 : f32
    %520 = vector.broadcast %cst_490 : f32 to vector<4x4xf32>
    %521 = arith.maximumf %519, %520 : vector<4x4xf32>
    %c0_491 = arith.constant 0 : index
    %c2_492 = arith.constant 2 : index
    %c0_493 = arith.constant 0 : index
    %c0_494 = arith.constant 0 : index
    %522 = vector.load %arg1[%c0_491, %c2_492, %c0_493, %c0_494] : memref<1x16x5x5xf32, #tpu.memory_space<vmem>>, vector<1x1x4x4xf32>
    %523 = vector.shape_cast %522 : vector<1x1x4x4xf32> to vector<4x4xf32>
    %c1_495 = arith.constant 1 : index
    %c0_496 = arith.constant 0 : index
    %524 = memref.load %arg2[%c1_495, %c0_496] : memref<8x9xf32, #tpu.memory_space<smem>>
    %525 = vector.broadcast %524 : f32 to vector<4x4xf32>
    %526 = arith.mulf %523, %525 : vector<4x4xf32>
    %c0_497 = arith.constant 0 : index
    %c3_498 = arith.constant 3 : index
    %c0_499 = arith.constant 0 : index
    %c0_500 = arith.constant 0 : index
    %527 = vector.load %arg1[%c0_497, %c3_498, %c0_499, %c0_500] : memref<1x16x5x5xf32, #tpu.memory_space<vmem>>, vector<1x1x4x4xf32>
    %528 = vector.shape_cast %527 : vector<1x1x4x4xf32> to vector<4x4xf32>
    %c1_501 = arith.constant 1 : index
    %c1_502 = arith.constant 1 : index
    %529 = memref.load %arg2[%c1_501, %c1_502] : memref<8x9xf32, #tpu.memory_space<smem>>
    %530 = vector.broadcast %529 : f32 to vector<4x4xf32>
    %531 = arith.mulf %528, %530 : vector<4x4xf32>
    %c0_503 = arith.constant 0 : index
    %c0_504 = arith.constant 0 : index
    %c0_505 = arith.constant 0 : index
    %c1_506 = arith.constant 1 : index
    %532 = vector.load %arg1[%c0_503, %c0_504, %c0_505, %c1_506] : memref<1x16x5x5xf32, #tpu.memory_space<vmem>>, vector<1x1x4x4xf32>
    %533 = vector.shape_cast %532 : vector<1x1x4x4xf32> to vector<4x4xf32>
    %c1_507 = arith.constant 1 : index
    %c2_508 = arith.constant 2 : index
    %534 = memref.load %arg2[%c1_507, %c2_508] : memref<8x9xf32, #tpu.memory_space<smem>>
    %535 = vector.broadcast %534 : f32 to vector<4x4xf32>
    %536 = arith.mulf %533, %535 : vector<4x4xf32>
    %537 = arith.addf %526, %536 : vector<4x4xf32>
    %c0_509 = arith.constant 0 : index
    %c6_510 = arith.constant 6 : index
    %c0_511 = arith.constant 0 : index
    %c0_512 = arith.constant 0 : index
    %538 = vector.load %arg1[%c0_509, %c6_510, %c0_511, %c0_512] : memref<1x16x5x5xf32, #tpu.memory_space<vmem>>, vector<1x1x4x4xf32>
    %539 = vector.shape_cast %538 : vector<1x1x4x4xf32> to vector<4x4xf32>
    %c1_513 = arith.constant 1 : index
    %c3_514 = arith.constant 3 : index
    %540 = memref.load %arg2[%c1_513, %c3_514] : memref<8x9xf32, #tpu.memory_space<smem>>
    %541 = vector.broadcast %540 : f32 to vector<4x4xf32>
    %542 = arith.mulf %539, %541 : vector<4x4xf32>
    %543 = arith.addf %531, %542 : vector<4x4xf32>
    %c0_515 = arith.constant 0 : index
    %c7_516 = arith.constant 7 : index
    %c0_517 = arith.constant 0 : index
    %c0_518 = arith.constant 0 : index
    %544 = vector.load %arg1[%c0_515, %c7_516, %c0_517, %c0_518] : memref<1x16x5x5xf32, #tpu.memory_space<vmem>>, vector<1x1x4x4xf32>
    %545 = vector.shape_cast %544 : vector<1x1x4x4xf32> to vector<4x4xf32>
    %c1_519 = arith.constant 1 : index
    %c4_520 = arith.constant 4 : index
    %546 = memref.load %arg2[%c1_519, %c4_520] : memref<8x9xf32, #tpu.memory_space<smem>>
    %547 = vector.broadcast %546 : f32 to vector<4x4xf32>
    %548 = arith.mulf %545, %547 : vector<4x4xf32>
    %549 = arith.addf %537, %548 : vector<4x4xf32>
    %c0_521 = arith.constant 0 : index
    %c4_522 = arith.constant 4 : index
    %c0_523 = arith.constant 0 : index
    %c1_524 = arith.constant 1 : index
    %550 = vector.load %arg1[%c0_521, %c4_522, %c0_523, %c1_524] : memref<1x16x5x5xf32, #tpu.memory_space<vmem>>, vector<1x1x4x4xf32>
    %551 = vector.shape_cast %550 : vector<1x1x4x4xf32> to vector<4x4xf32>
    %c1_525 = arith.constant 1 : index
    %c5_526 = arith.constant 5 : index
    %552 = memref.load %arg2[%c1_525, %c5_526] : memref<8x9xf32, #tpu.memory_space<smem>>
    %553 = vector.broadcast %552 : f32 to vector<4x4xf32>
    %554 = arith.mulf %551, %553 : vector<4x4xf32>
    %555 = arith.addf %543, %554 : vector<4x4xf32>
    %c0_527 = arith.constant 0 : index
    %c10_528 = arith.constant 10 : index
    %c0_529 = arith.constant 0 : index
    %c0_530 = arith.constant 0 : index
    %556 = vector.load %arg1[%c0_527, %c10_528, %c0_529, %c0_530] : memref<1x16x5x5xf32, #tpu.memory_space<vmem>>, vector<1x1x4x4xf32>
    %557 = vector.shape_cast %556 : vector<1x1x4x4xf32> to vector<4x4xf32>
    %c1_531 = arith.constant 1 : index
    %c6_532 = arith.constant 6 : index
    %558 = memref.load %arg2[%c1_531, %c6_532] : memref<8x9xf32, #tpu.memory_space<smem>>
    %559 = vector.broadcast %558 : f32 to vector<4x4xf32>
    %560 = arith.mulf %557, %559 : vector<4x4xf32>
    %561 = arith.addf %549, %560 : vector<4x4xf32>
    %c0_533 = arith.constant 0 : index
    %c11_534 = arith.constant 11 : index
    %c0_535 = arith.constant 0 : index
    %c0_536 = arith.constant 0 : index
    %562 = vector.load %arg1[%c0_533, %c11_534, %c0_535, %c0_536] : memref<1x16x5x5xf32, #tpu.memory_space<vmem>>, vector<1x1x4x4xf32>
    %563 = vector.shape_cast %562 : vector<1x1x4x4xf32> to vector<4x4xf32>
    %c1_537 = arith.constant 1 : index
    %c7_538 = arith.constant 7 : index
    %564 = memref.load %arg2[%c1_537, %c7_538] : memref<8x9xf32, #tpu.memory_space<smem>>
    %565 = vector.broadcast %564 : f32 to vector<4x4xf32>
    %566 = arith.mulf %563, %565 : vector<4x4xf32>
    %567 = arith.addf %555, %566 : vector<4x4xf32>
    %c0_539 = arith.constant 0 : index
    %c8_540 = arith.constant 8 : index
    %c0_541 = arith.constant 0 : index
    %c1_542 = arith.constant 1 : index
    %568 = vector.load %arg1[%c0_539, %c8_540, %c0_541, %c1_542] : memref<1x16x5x5xf32, #tpu.memory_space<vmem>>, vector<1x1x4x4xf32>
    %569 = vector.shape_cast %568 : vector<1x1x4x4xf32> to vector<4x4xf32>
    %c1_543 = arith.constant 1 : index
    %c8_544 = arith.constant 8 : index
    %570 = memref.load %arg2[%c1_543, %c8_544] : memref<8x9xf32, #tpu.memory_space<smem>>
    %571 = vector.broadcast %570 : f32 to vector<4x4xf32>
    %572 = arith.mulf %569, %571 : vector<4x4xf32>
    %573 = arith.addf %561, %572 : vector<4x4xf32>
    %574 = arith.addf %573, %567 : vector<4x4xf32>
    %c1_545 = arith.constant 1 : index
    %575 = memref.load %arg3[%c1_545] : memref<8xf32, #tpu.memory_space<smem>>
    %576 = vector.broadcast %575 : f32 to vector<4x4xf32>
    %577 = arith.addf %574, %576 : vector<4x4xf32>
    %cst_546 = arith.constant 0.000000e+00 : f32
    %578 = vector.broadcast %cst_546 : f32 to vector<4x4xf32>
    %579 = arith.maximumf %577, %578 : vector<4x4xf32>
    %c0_547 = arith.constant 0 : index
    %c2_548 = arith.constant 2 : index
    %c0_549 = arith.constant 0 : index
    %c0_550 = arith.constant 0 : index
    %580 = vector.load %arg1[%c0_547, %c2_548, %c0_549, %c0_550] : memref<1x16x5x5xf32, #tpu.memory_space<vmem>>, vector<1x1x4x4xf32>
    %581 = vector.shape_cast %580 : vector<1x1x4x4xf32> to vector<4x4xf32>
    %c2_551 = arith.constant 2 : index
    %c0_552 = arith.constant 0 : index
    %582 = memref.load %arg2[%c2_551, %c0_552] : memref<8x9xf32, #tpu.memory_space<smem>>
    %583 = vector.broadcast %582 : f32 to vector<4x4xf32>
    %584 = arith.mulf %581, %583 : vector<4x4xf32>
    %c0_553 = arith.constant 0 : index
    %c3_554 = arith.constant 3 : index
    %c0_555 = arith.constant 0 : index
    %c0_556 = arith.constant 0 : index
    %585 = vector.load %arg1[%c0_553, %c3_554, %c0_555, %c0_556] : memref<1x16x5x5xf32, #tpu.memory_space<vmem>>, vector<1x1x4x4xf32>
    %586 = vector.shape_cast %585 : vector<1x1x4x4xf32> to vector<4x4xf32>
    %c2_557 = arith.constant 2 : index
    %c1_558 = arith.constant 1 : index
    %587 = memref.load %arg2[%c2_557, %c1_558] : memref<8x9xf32, #tpu.memory_space<smem>>
    %588 = vector.broadcast %587 : f32 to vector<4x4xf32>
    %589 = arith.mulf %586, %588 : vector<4x4xf32>
    %c0_559 = arith.constant 0 : index
    %c0_560 = arith.constant 0 : index
    %c0_561 = arith.constant 0 : index
    %c1_562 = arith.constant 1 : index
    %590 = vector.load %arg1[%c0_559, %c0_560, %c0_561, %c1_562] : memref<1x16x5x5xf32, #tpu.memory_space<vmem>>, vector<1x1x4x4xf32>
    %591 = vector.shape_cast %590 : vector<1x1x4x4xf32> to vector<4x4xf32>
    %c2_563 = arith.constant 2 : index
    %c2_564 = arith.constant 2 : index
    %592 = memref.load %arg2[%c2_563, %c2_564] : memref<8x9xf32, #tpu.memory_space<smem>>
    %593 = vector.broadcast %592 : f32 to vector<4x4xf32>
    %594 = arith.mulf %591, %593 : vector<4x4xf32>
    %595 = arith.addf %584, %594 : vector<4x4xf32>
    %c0_565 = arith.constant 0 : index
    %c6_566 = arith.constant 6 : index
    %c0_567 = arith.constant 0 : index
    %c0_568 = arith.constant 0 : index
    %596 = vector.load %arg1[%c0_565, %c6_566, %c0_567, %c0_568] : memref<1x16x5x5xf32, #tpu.memory_space<vmem>>, vector<1x1x4x4xf32>
    %597 = vector.shape_cast %596 : vector<1x1x4x4xf32> to vector<4x4xf32>
    %c2_569 = arith.constant 2 : index
    %c3_570 = arith.constant 3 : index
    %598 = memref.load %arg2[%c2_569, %c3_570] : memref<8x9xf32, #tpu.memory_space<smem>>
    %599 = vector.broadcast %598 : f32 to vector<4x4xf32>
    %600 = arith.mulf %597, %599 : vector<4x4xf32>
    %601 = arith.addf %589, %600 : vector<4x4xf32>
    %c0_571 = arith.constant 0 : index
    %c7_572 = arith.constant 7 : index
    %c0_573 = arith.constant 0 : index
    %c0_574 = arith.constant 0 : index
    %602 = vector.load %arg1[%c0_571, %c7_572, %c0_573, %c0_574] : memref<1x16x5x5xf32, #tpu.memory_space<vmem>>, vector<1x1x4x4xf32>
    %603 = vector.shape_cast %602 : vector<1x1x4x4xf32> to vector<4x4xf32>
    %c2_575 = arith.constant 2 : index
    %c4_576 = arith.constant 4 : index
    %604 = memref.load %arg2[%c2_575, %c4_576] : memref<8x9xf32, #tpu.memory_space<smem>>
    %605 = vector.broadcast %604 : f32 to vector<4x4xf32>
    %606 = arith.mulf %603, %605 : vector<4x4xf32>
    %607 = arith.addf %595, %606 : vector<4x4xf32>
    %c0_577 = arith.constant 0 : index
    %c4_578 = arith.constant 4 : index
    %c0_579 = arith.constant 0 : index
    %c1_580 = arith.constant 1 : index
    %608 = vector.load %arg1[%c0_577, %c4_578, %c0_579, %c1_580] : memref<1x16x5x5xf32, #tpu.memory_space<vmem>>, vector<1x1x4x4xf32>
    %609 = vector.shape_cast %608 : vector<1x1x4x4xf32> to vector<4x4xf32>
    %c2_581 = arith.constant 2 : index
    %c5_582 = arith.constant 5 : index
    %610 = memref.load %arg2[%c2_581, %c5_582] : memref<8x9xf32, #tpu.memory_space<smem>>
    %611 = vector.broadcast %610 : f32 to vector<4x4xf32>
    %612 = arith.mulf %609, %611 : vector<4x4xf32>
    %613 = arith.addf %601, %612 : vector<4x4xf32>
    %c0_583 = arith.constant 0 : index
    %c10_584 = arith.constant 10 : index
    %c0_585 = arith.constant 0 : index
    %c0_586 = arith.constant 0 : index
    %614 = vector.load %arg1[%c0_583, %c10_584, %c0_585, %c0_586] : memref<1x16x5x5xf32, #tpu.memory_space<vmem>>, vector<1x1x4x4xf32>
    %615 = vector.shape_cast %614 : vector<1x1x4x4xf32> to vector<4x4xf32>
    %c2_587 = arith.constant 2 : index
    %c6_588 = arith.constant 6 : index
    %616 = memref.load %arg2[%c2_587, %c6_588] : memref<8x9xf32, #tpu.memory_space<smem>>
    %617 = vector.broadcast %616 : f32 to vector<4x4xf32>
    %618 = arith.mulf %615, %617 : vector<4x4xf32>
    %619 = arith.addf %607, %618 : vector<4x4xf32>
    %c0_589 = arith.constant 0 : index
    %c11_590 = arith.constant 11 : index
    %c0_591 = arith.constant 0 : index
    %c0_592 = arith.constant 0 : index
    %620 = vector.load %arg1[%c0_589, %c11_590, %c0_591, %c0_592] : memref<1x16x5x5xf32, #tpu.memory_space<vmem>>, vector<1x1x4x4xf32>
    %621 = vector.shape_cast %620 : vector<1x1x4x4xf32> to vector<4x4xf32>
    %c2_593 = arith.constant 2 : index
    %c7_594 = arith.constant 7 : index
    %622 = memref.load %arg2[%c2_593, %c7_594] : memref<8x9xf32, #tpu.memory_space<smem>>
    %623 = vector.broadcast %622 : f32 to vector<4x4xf32>
    %624 = arith.mulf %621, %623 : vector<4x4xf32>
    %625 = arith.addf %613, %624 : vector<4x4xf32>
    %c0_595 = arith.constant 0 : index
    %c8_596 = arith.constant 8 : index
    %c0_597 = arith.constant 0 : index
    %c1_598 = arith.constant 1 : index
    %626 = vector.load %arg1[%c0_595, %c8_596, %c0_597, %c1_598] : memref<1x16x5x5xf32, #tpu.memory_space<vmem>>, vector<1x1x4x4xf32>
    %627 = vector.shape_cast %626 : vector<1x1x4x4xf32> to vector<4x4xf32>
    %c2_599 = arith.constant 2 : index
    %c8_600 = arith.constant 8 : index
    %628 = memref.load %arg2[%c2_599, %c8_600] : memref<8x9xf32, #tpu.memory_space<smem>>
    %629 = vector.broadcast %628 : f32 to vector<4x4xf32>
    %630 = arith.mulf %627, %629 : vector<4x4xf32>
    %631 = arith.addf %619, %630 : vector<4x4xf32>
    %632 = arith.addf %631, %625 : vector<4x4xf32>
    %c2_601 = arith.constant 2 : index
    %633 = memref.load %arg3[%c2_601] : memref<8xf32, #tpu.memory_space<smem>>
    %634 = vector.broadcast %633 : f32 to vector<4x4xf32>
    %635 = arith.addf %632, %634 : vector<4x4xf32>
    %cst_602 = arith.constant 0.000000e+00 : f32
    %636 = vector.broadcast %cst_602 : f32 to vector<4x4xf32>
    %637 = arith.maximumf %635, %636 : vector<4x4xf32>
    %c0_603 = arith.constant 0 : index
    %c2_604 = arith.constant 2 : index
    %c0_605 = arith.constant 0 : index
    %c0_606 = arith.constant 0 : index
    %638 = vector.load %arg1[%c0_603, %c2_604, %c0_605, %c0_606] : memref<1x16x5x5xf32, #tpu.memory_space<vmem>>, vector<1x1x4x4xf32>
    %639 = vector.shape_cast %638 : vector<1x1x4x4xf32> to vector<4x4xf32>
    %c3_607 = arith.constant 3 : index
    %c0_608 = arith.constant 0 : index
    %640 = memref.load %arg2[%c3_607, %c0_608] : memref<8x9xf32, #tpu.memory_space<smem>>
    %641 = vector.broadcast %640 : f32 to vector<4x4xf32>
    %642 = arith.mulf %639, %641 : vector<4x4xf32>
    %c0_609 = arith.constant 0 : index
    %c3_610 = arith.constant 3 : index
    %c0_611 = arith.constant 0 : index
    %c0_612 = arith.constant 0 : index
    %643 = vector.load %arg1[%c0_609, %c3_610, %c0_611, %c0_612] : memref<1x16x5x5xf32, #tpu.memory_space<vmem>>, vector<1x1x4x4xf32>
    %644 = vector.shape_cast %643 : vector<1x1x4x4xf32> to vector<4x4xf32>
    %c3_613 = arith.constant 3 : index
    %c1_614 = arith.constant 1 : index
    %645 = memref.load %arg2[%c3_613, %c1_614] : memref<8x9xf32, #tpu.memory_space<smem>>
    %646 = vector.broadcast %645 : f32 to vector<4x4xf32>
    %647 = arith.mulf %644, %646 : vector<4x4xf32>
    %c0_615 = arith.constant 0 : index
    %c0_616 = arith.constant 0 : index
    %c0_617 = arith.constant 0 : index
    %c1_618 = arith.constant 1 : index
    %648 = vector.load %arg1[%c0_615, %c0_616, %c0_617, %c1_618] : memref<1x16x5x5xf32, #tpu.memory_space<vmem>>, vector<1x1x4x4xf32>
    %649 = vector.shape_cast %648 : vector<1x1x4x4xf32> to vector<4x4xf32>
    %c3_619 = arith.constant 3 : index
    %c2_620 = arith.constant 2 : index
    %650 = memref.load %arg2[%c3_619, %c2_620] : memref<8x9xf32, #tpu.memory_space<smem>>
    %651 = vector.broadcast %650 : f32 to vector<4x4xf32>
    %652 = arith.mulf %649, %651 : vector<4x4xf32>
    %653 = arith.addf %642, %652 : vector<4x4xf32>
    %c0_621 = arith.constant 0 : index
    %c6_622 = arith.constant 6 : index
    %c0_623 = arith.constant 0 : index
    %c0_624 = arith.constant 0 : index
    %654 = vector.load %arg1[%c0_621, %c6_622, %c0_623, %c0_624] : memref<1x16x5x5xf32, #tpu.memory_space<vmem>>, vector<1x1x4x4xf32>
    %655 = vector.shape_cast %654 : vector<1x1x4x4xf32> to vector<4x4xf32>
    %c3_625 = arith.constant 3 : index
    %c3_626 = arith.constant 3 : index
    %656 = memref.load %arg2[%c3_625, %c3_626] : memref<8x9xf32, #tpu.memory_space<smem>>
    %657 = vector.broadcast %656 : f32 to vector<4x4xf32>
    %658 = arith.mulf %655, %657 : vector<4x4xf32>
    %659 = arith.addf %647, %658 : vector<4x4xf32>
    %c0_627 = arith.constant 0 : index
    %c7_628 = arith.constant 7 : index
    %c0_629 = arith.constant 0 : index
    %c0_630 = arith.constant 0 : index
    %660 = vector.load %arg1[%c0_627, %c7_628, %c0_629, %c0_630] : memref<1x16x5x5xf32, #tpu.memory_space<vmem>>, vector<1x1x4x4xf32>
    %661 = vector.shape_cast %660 : vector<1x1x4x4xf32> to vector<4x4xf32>
    %c3_631 = arith.constant 3 : index
    %c4_632 = arith.constant 4 : index
    %662 = memref.load %arg2[%c3_631, %c4_632] : memref<8x9xf32, #tpu.memory_space<smem>>
    %663 = vector.broadcast %662 : f32 to vector<4x4xf32>
    %664 = arith.mulf %661, %663 : vector<4x4xf32>
    %665 = arith.addf %653, %664 : vector<4x4xf32>
    %c0_633 = arith.constant 0 : index
    %c4_634 = arith.constant 4 : index
    %c0_635 = arith.constant 0 : index
    %c1_636 = arith.constant 1 : index
    %666 = vector.load %arg1[%c0_633, %c4_634, %c0_635, %c1_636] : memref<1x16x5x5xf32, #tpu.memory_space<vmem>>, vector<1x1x4x4xf32>
    %667 = vector.shape_cast %666 : vector<1x1x4x4xf32> to vector<4x4xf32>
    %c3_637 = arith.constant 3 : index
    %c5_638 = arith.constant 5 : index
    %668 = memref.load %arg2[%c3_637, %c5_638] : memref<8x9xf32, #tpu.memory_space<smem>>
    %669 = vector.broadcast %668 : f32 to vector<4x4xf32>
    %670 = arith.mulf %667, %669 : vector<4x4xf32>
    %671 = arith.addf %659, %670 : vector<4x4xf32>
    %c0_639 = arith.constant 0 : index
    %c10_640 = arith.constant 10 : index
    %c0_641 = arith.constant 0 : index
    %c0_642 = arith.constant 0 : index
    %672 = vector.load %arg1[%c0_639, %c10_640, %c0_641, %c0_642] : memref<1x16x5x5xf32, #tpu.memory_space<vmem>>, vector<1x1x4x4xf32>
    %673 = vector.shape_cast %672 : vector<1x1x4x4xf32> to vector<4x4xf32>
    %c3_643 = arith.constant 3 : index
    %c6_644 = arith.constant 6 : index
    %674 = memref.load %arg2[%c3_643, %c6_644] : memref<8x9xf32, #tpu.memory_space<smem>>
    %675 = vector.broadcast %674 : f32 to vector<4x4xf32>
    %676 = arith.mulf %673, %675 : vector<4x4xf32>
    %677 = arith.addf %665, %676 : vector<4x4xf32>
    %c0_645 = arith.constant 0 : index
    %c11_646 = arith.constant 11 : index
    %c0_647 = arith.constant 0 : index
    %c0_648 = arith.constant 0 : index
    %678 = vector.load %arg1[%c0_645, %c11_646, %c0_647, %c0_648] : memref<1x16x5x5xf32, #tpu.memory_space<vmem>>, vector<1x1x4x4xf32>
    %679 = vector.shape_cast %678 : vector<1x1x4x4xf32> to vector<4x4xf32>
    %c3_649 = arith.constant 3 : index
    %c7_650 = arith.constant 7 : index
    %680 = memref.load %arg2[%c3_649, %c7_650] : memref<8x9xf32, #tpu.memory_space<smem>>
    %681 = vector.broadcast %680 : f32 to vector<4x4xf32>
    %682 = arith.mulf %679, %681 : vector<4x4xf32>
    %683 = arith.addf %671, %682 : vector<4x4xf32>
    %c0_651 = arith.constant 0 : index
    %c8_652 = arith.constant 8 : index
    %c0_653 = arith.constant 0 : index
    %c1_654 = arith.constant 1 : index
    %684 = vector.load %arg1[%c0_651, %c8_652, %c0_653, %c1_654] : memref<1x16x5x5xf32, #tpu.memory_space<vmem>>, vector<1x1x4x4xf32>
    %685 = vector.shape_cast %684 : vector<1x1x4x4xf32> to vector<4x4xf32>
    %c3_655 = arith.constant 3 : index
    %c8_656 = arith.constant 8 : index
    %686 = memref.load %arg2[%c3_655, %c8_656] : memref<8x9xf32, #tpu.memory_space<smem>>
    %687 = vector.broadcast %686 : f32 to vector<4x4xf32>
    %688 = arith.mulf %685, %687 : vector<4x4xf32>
    %689 = arith.addf %677, %688 : vector<4x4xf32>
    %690 = arith.addf %689, %683 : vector<4x4xf32>
    %c3_657 = arith.constant 3 : index
    %691 = memref.load %arg3[%c3_657] : memref<8xf32, #tpu.memory_space<smem>>
    %692 = vector.broadcast %691 : f32 to vector<4x4xf32>
    %693 = arith.addf %690, %692 : vector<4x4xf32>
    %cst_658 = arith.constant 0.000000e+00 : f32
    %694 = vector.broadcast %cst_658 : f32 to vector<4x4xf32>
    %695 = arith.maximumf %693, %694 : vector<4x4xf32>
    %c0_659 = arith.constant 0 : index
    %c2_660 = arith.constant 2 : index
    %c0_661 = arith.constant 0 : index
    %c0_662 = arith.constant 0 : index
    %696 = vector.load %arg1[%c0_659, %c2_660, %c0_661, %c0_662] : memref<1x16x5x5xf32, #tpu.memory_space<vmem>>, vector<1x1x4x4xf32>
    %697 = vector.shape_cast %696 : vector<1x1x4x4xf32> to vector<4x4xf32>
    %c4_663 = arith.constant 4 : index
    %c0_664 = arith.constant 0 : index
    %698 = memref.load %arg2[%c4_663, %c0_664] : memref<8x9xf32, #tpu.memory_space<smem>>
    %699 = vector.broadcast %698 : f32 to vector<4x4xf32>
    %700 = arith.mulf %697, %699 : vector<4x4xf32>
    %c0_665 = arith.constant 0 : index
    %c3_666 = arith.constant 3 : index
    %c0_667 = arith.constant 0 : index
    %c0_668 = arith.constant 0 : index
    %701 = vector.load %arg1[%c0_665, %c3_666, %c0_667, %c0_668] : memref<1x16x5x5xf32, #tpu.memory_space<vmem>>, vector<1x1x4x4xf32>
    %702 = vector.shape_cast %701 : vector<1x1x4x4xf32> to vector<4x4xf32>
    %c4_669 = arith.constant 4 : index
    %c1_670 = arith.constant 1 : index
    %703 = memref.load %arg2[%c4_669, %c1_670] : memref<8x9xf32, #tpu.memory_space<smem>>
    %704 = vector.broadcast %703 : f32 to vector<4x4xf32>
    %705 = arith.mulf %702, %704 : vector<4x4xf32>
    %c0_671 = arith.constant 0 : index
    %c0_672 = arith.constant 0 : index
    %c0_673 = arith.constant 0 : index
    %c1_674 = arith.constant 1 : index
    %706 = vector.load %arg1[%c0_671, %c0_672, %c0_673, %c1_674] : memref<1x16x5x5xf32, #tpu.memory_space<vmem>>, vector<1x1x4x4xf32>
    %707 = vector.shape_cast %706 : vector<1x1x4x4xf32> to vector<4x4xf32>
    %c4_675 = arith.constant 4 : index
    %c2_676 = arith.constant 2 : index
    %708 = memref.load %arg2[%c4_675, %c2_676] : memref<8x9xf32, #tpu.memory_space<smem>>
    %709 = vector.broadcast %708 : f32 to vector<4x4xf32>
    %710 = arith.mulf %707, %709 : vector<4x4xf32>
    %711 = arith.addf %700, %710 : vector<4x4xf32>
    %c0_677 = arith.constant 0 : index
    %c6_678 = arith.constant 6 : index
    %c0_679 = arith.constant 0 : index
    %c0_680 = arith.constant 0 : index
    %712 = vector.load %arg1[%c0_677, %c6_678, %c0_679, %c0_680] : memref<1x16x5x5xf32, #tpu.memory_space<vmem>>, vector<1x1x4x4xf32>
    %713 = vector.shape_cast %712 : vector<1x1x4x4xf32> to vector<4x4xf32>
    %c4_681 = arith.constant 4 : index
    %c3_682 = arith.constant 3 : index
    %714 = memref.load %arg2[%c4_681, %c3_682] : memref<8x9xf32, #tpu.memory_space<smem>>
    %715 = vector.broadcast %714 : f32 to vector<4x4xf32>
    %716 = arith.mulf %713, %715 : vector<4x4xf32>
    %717 = arith.addf %705, %716 : vector<4x4xf32>
    %c0_683 = arith.constant 0 : index
    %c7_684 = arith.constant 7 : index
    %c0_685 = arith.constant 0 : index
    %c0_686 = arith.constant 0 : index
    %718 = vector.load %arg1[%c0_683, %c7_684, %c0_685, %c0_686] : memref<1x16x5x5xf32, #tpu.memory_space<vmem>>, vector<1x1x4x4xf32>
    %719 = vector.shape_cast %718 : vector<1x1x4x4xf32> to vector<4x4xf32>
    %c4_687 = arith.constant 4 : index
    %c4_688 = arith.constant 4 : index
    %720 = memref.load %arg2[%c4_687, %c4_688] : memref<8x9xf32, #tpu.memory_space<smem>>
    %721 = vector.broadcast %720 : f32 to vector<4x4xf32>
    %722 = arith.mulf %719, %721 : vector<4x4xf32>
    %723 = arith.addf %711, %722 : vector<4x4xf32>
    %c0_689 = arith.constant 0 : index
    %c4_690 = arith.constant 4 : index
    %c0_691 = arith.constant 0 : index
    %c1_692 = arith.constant 1 : index
    %724 = vector.load %arg1[%c0_689, %c4_690, %c0_691, %c1_692] : memref<1x16x5x5xf32, #tpu.memory_space<vmem>>, vector<1x1x4x4xf32>
    %725 = vector.shape_cast %724 : vector<1x1x4x4xf32> to vector<4x4xf32>
    %c4_693 = arith.constant 4 : index
    %c5_694 = arith.constant 5 : index
    %726 = memref.load %arg2[%c4_693, %c5_694] : memref<8x9xf32, #tpu.memory_space<smem>>
    %727 = vector.broadcast %726 : f32 to vector<4x4xf32>
    %728 = arith.mulf %725, %727 : vector<4x4xf32>
    %729 = arith.addf %717, %728 : vector<4x4xf32>
    %c0_695 = arith.constant 0 : index
    %c10_696 = arith.constant 10 : index
    %c0_697 = arith.constant 0 : index
    %c0_698 = arith.constant 0 : index
    %730 = vector.load %arg1[%c0_695, %c10_696, %c0_697, %c0_698] : memref<1x16x5x5xf32, #tpu.memory_space<vmem>>, vector<1x1x4x4xf32>
    %731 = vector.shape_cast %730 : vector<1x1x4x4xf32> to vector<4x4xf32>
    %c4_699 = arith.constant 4 : index
    %c6_700 = arith.constant 6 : index
    %732 = memref.load %arg2[%c4_699, %c6_700] : memref<8x9xf32, #tpu.memory_space<smem>>
    %733 = vector.broadcast %732 : f32 to vector<4x4xf32>
    %734 = arith.mulf %731, %733 : vector<4x4xf32>
    %735 = arith.addf %723, %734 : vector<4x4xf32>
    %c0_701 = arith.constant 0 : index
    %c11_702 = arith.constant 11 : index
    %c0_703 = arith.constant 0 : index
    %c0_704 = arith.constant 0 : index
    %736 = vector.load %arg1[%c0_701, %c11_702, %c0_703, %c0_704] : memref<1x16x5x5xf32, #tpu.memory_space<vmem>>, vector<1x1x4x4xf32>
    %737 = vector.shape_cast %736 : vector<1x1x4x4xf32> to vector<4x4xf32>
    %c4_705 = arith.constant 4 : index
    %c7_706 = arith.constant 7 : index
    %738 = memref.load %arg2[%c4_705, %c7_706] : memref<8x9xf32, #tpu.memory_space<smem>>
    %739 = vector.broadcast %738 : f32 to vector<4x4xf32>
    %740 = arith.mulf %737, %739 : vector<4x4xf32>
    %741 = arith.addf %729, %740 : vector<4x4xf32>
    %c0_707 = arith.constant 0 : index
    %c8_708 = arith.constant 8 : index
    %c0_709 = arith.constant 0 : index
    %c1_710 = arith.constant 1 : index
    %742 = vector.load %arg1[%c0_707, %c8_708, %c0_709, %c1_710] : memref<1x16x5x5xf32, #tpu.memory_space<vmem>>, vector<1x1x4x4xf32>
    %743 = vector.shape_cast %742 : vector<1x1x4x4xf32> to vector<4x4xf32>
    %c4_711 = arith.constant 4 : index
    %c8_712 = arith.constant 8 : index
    %744 = memref.load %arg2[%c4_711, %c8_712] : memref<8x9xf32, #tpu.memory_space<smem>>
    %745 = vector.broadcast %744 : f32 to vector<4x4xf32>
    %746 = arith.mulf %743, %745 : vector<4x4xf32>
    %747 = arith.addf %735, %746 : vector<4x4xf32>
    %748 = arith.addf %747, %741 : vector<4x4xf32>
    %c4_713 = arith.constant 4 : index
    %749 = memref.load %arg3[%c4_713] : memref<8xf32, #tpu.memory_space<smem>>
    %750 = vector.broadcast %749 : f32 to vector<4x4xf32>
    %751 = arith.addf %748, %750 : vector<4x4xf32>
    %cst_714 = arith.constant 0.000000e+00 : f32
    %752 = vector.broadcast %cst_714 : f32 to vector<4x4xf32>
    %753 = arith.maximumf %751, %752 : vector<4x4xf32>
    %c0_715 = arith.constant 0 : index
    %c2_716 = arith.constant 2 : index
    %c0_717 = arith.constant 0 : index
    %c0_718 = arith.constant 0 : index
    %754 = vector.load %arg1[%c0_715, %c2_716, %c0_717, %c0_718] : memref<1x16x5x5xf32, #tpu.memory_space<vmem>>, vector<1x1x4x4xf32>
    %755 = vector.shape_cast %754 : vector<1x1x4x4xf32> to vector<4x4xf32>
    %c5_719 = arith.constant 5 : index
    %c0_720 = arith.constant 0 : index
    %756 = memref.load %arg2[%c5_719, %c0_720] : memref<8x9xf32, #tpu.memory_space<smem>>
    %757 = vector.broadcast %756 : f32 to vector<4x4xf32>
    %758 = arith.mulf %755, %757 : vector<4x4xf32>
    %c0_721 = arith.constant 0 : index
    %c3_722 = arith.constant 3 : index
    %c0_723 = arith.constant 0 : index
    %c0_724 = arith.constant 0 : index
    %759 = vector.load %arg1[%c0_721, %c3_722, %c0_723, %c0_724] : memref<1x16x5x5xf32, #tpu.memory_space<vmem>>, vector<1x1x4x4xf32>
    %760 = vector.shape_cast %759 : vector<1x1x4x4xf32> to vector<4x4xf32>
    %c5_725 = arith.constant 5 : index
    %c1_726 = arith.constant 1 : index
    %761 = memref.load %arg2[%c5_725, %c1_726] : memref<8x9xf32, #tpu.memory_space<smem>>
    %762 = vector.broadcast %761 : f32 to vector<4x4xf32>
    %763 = arith.mulf %760, %762 : vector<4x4xf32>
    %c0_727 = arith.constant 0 : index
    %c0_728 = arith.constant 0 : index
    %c0_729 = arith.constant 0 : index
    %c1_730 = arith.constant 1 : index
    %764 = vector.load %arg1[%c0_727, %c0_728, %c0_729, %c1_730] : memref<1x16x5x5xf32, #tpu.memory_space<vmem>>, vector<1x1x4x4xf32>
    %765 = vector.shape_cast %764 : vector<1x1x4x4xf32> to vector<4x4xf32>
    %c5_731 = arith.constant 5 : index
    %c2_732 = arith.constant 2 : index
    %766 = memref.load %arg2[%c5_731, %c2_732] : memref<8x9xf32, #tpu.memory_space<smem>>
    %767 = vector.broadcast %766 : f32 to vector<4x4xf32>
    %768 = arith.mulf %765, %767 : vector<4x4xf32>
    %769 = arith.addf %758, %768 : vector<4x4xf32>
    %c0_733 = arith.constant 0 : index
    %c6_734 = arith.constant 6 : index
    %c0_735 = arith.constant 0 : index
    %c0_736 = arith.constant 0 : index
    %770 = vector.load %arg1[%c0_733, %c6_734, %c0_735, %c0_736] : memref<1x16x5x5xf32, #tpu.memory_space<vmem>>, vector<1x1x4x4xf32>
    %771 = vector.shape_cast %770 : vector<1x1x4x4xf32> to vector<4x4xf32>
    %c5_737 = arith.constant 5 : index
    %c3_738 = arith.constant 3 : index
    %772 = memref.load %arg2[%c5_737, %c3_738] : memref<8x9xf32, #tpu.memory_space<smem>>
    %773 = vector.broadcast %772 : f32 to vector<4x4xf32>
    %774 = arith.mulf %771, %773 : vector<4x4xf32>
    %775 = arith.addf %763, %774 : vector<4x4xf32>
    %c0_739 = arith.constant 0 : index
    %c7_740 = arith.constant 7 : index
    %c0_741 = arith.constant 0 : index
    %c0_742 = arith.constant 0 : index
    %776 = vector.load %arg1[%c0_739, %c7_740, %c0_741, %c0_742] : memref<1x16x5x5xf32, #tpu.memory_space<vmem>>, vector<1x1x4x4xf32>
    %777 = vector.shape_cast %776 : vector<1x1x4x4xf32> to vector<4x4xf32>
    %c5_743 = arith.constant 5 : index
    %c4_744 = arith.constant 4 : index
    %778 = memref.load %arg2[%c5_743, %c4_744] : memref<8x9xf32, #tpu.memory_space<smem>>
    %779 = vector.broadcast %778 : f32 to vector<4x4xf32>
    %780 = arith.mulf %777, %779 : vector<4x4xf32>
    %781 = arith.addf %769, %780 : vector<4x4xf32>
    %c0_745 = arith.constant 0 : index
    %c4_746 = arith.constant 4 : index
    %c0_747 = arith.constant 0 : index
    %c1_748 = arith.constant 1 : index
    %782 = vector.load %arg1[%c0_745, %c4_746, %c0_747, %c1_748] : memref<1x16x5x5xf32, #tpu.memory_space<vmem>>, vector<1x1x4x4xf32>
    %783 = vector.shape_cast %782 : vector<1x1x4x4xf32> to vector<4x4xf32>
    %c5_749 = arith.constant 5 : index
    %c5_750 = arith.constant 5 : index
    %784 = memref.load %arg2[%c5_749, %c5_750] : memref<8x9xf32, #tpu.memory_space<smem>>
    %785 = vector.broadcast %784 : f32 to vector<4x4xf32>
    %786 = arith.mulf %783, %785 : vector<4x4xf32>
    %787 = arith.addf %775, %786 : vector<4x4xf32>
    %c0_751 = arith.constant 0 : index
    %c10_752 = arith.constant 10 : index
    %c0_753 = arith.constant 0 : index
    %c0_754 = arith.constant 0 : index
    %788 = vector.load %arg1[%c0_751, %c10_752, %c0_753, %c0_754] : memref<1x16x5x5xf32, #tpu.memory_space<vmem>>, vector<1x1x4x4xf32>
    %789 = vector.shape_cast %788 : vector<1x1x4x4xf32> to vector<4x4xf32>
    %c5_755 = arith.constant 5 : index
    %c6_756 = arith.constant 6 : index
    %790 = memref.load %arg2[%c5_755, %c6_756] : memref<8x9xf32, #tpu.memory_space<smem>>
    %791 = vector.broadcast %790 : f32 to vector<4x4xf32>
    %792 = arith.mulf %789, %791 : vector<4x4xf32>
    %793 = arith.addf %781, %792 : vector<4x4xf32>
    %c0_757 = arith.constant 0 : index
    %c11_758 = arith.constant 11 : index
    %c0_759 = arith.constant 0 : index
    %c0_760 = arith.constant 0 : index
    %794 = vector.load %arg1[%c0_757, %c11_758, %c0_759, %c0_760] : memref<1x16x5x5xf32, #tpu.memory_space<vmem>>, vector<1x1x4x4xf32>
    %795 = vector.shape_cast %794 : vector<1x1x4x4xf32> to vector<4x4xf32>
    %c5_761 = arith.constant 5 : index
    %c7_762 = arith.constant 7 : index
    %796 = memref.load %arg2[%c5_761, %c7_762] : memref<8x9xf32, #tpu.memory_space<smem>>
    %797 = vector.broadcast %796 : f32 to vector<4x4xf32>
    %798 = arith.mulf %795, %797 : vector<4x4xf32>
    %799 = arith.addf %787, %798 : vector<4x4xf32>
    %c0_763 = arith.constant 0 : index
    %c8_764 = arith.constant 8 : index
    %c0_765 = arith.constant 0 : index
    %c1_766 = arith.constant 1 : index
    %800 = vector.load %arg1[%c0_763, %c8_764, %c0_765, %c1_766] : memref<1x16x5x5xf32, #tpu.memory_space<vmem>>, vector<1x1x4x4xf32>
    %801 = vector.shape_cast %800 : vector<1x1x4x4xf32> to vector<4x4xf32>
    %c5_767 = arith.constant 5 : index
    %c8_768 = arith.constant 8 : index
    %802 = memref.load %arg2[%c5_767, %c8_768] : memref<8x9xf32, #tpu.memory_space<smem>>
    %803 = vector.broadcast %802 : f32 to vector<4x4xf32>
    %804 = arith.mulf %801, %803 : vector<4x4xf32>
    %805 = arith.addf %793, %804 : vector<4x4xf32>
    %806 = arith.addf %805, %799 : vector<4x4xf32>
    %c5_769 = arith.constant 5 : index
    %807 = memref.load %arg3[%c5_769] : memref<8xf32, #tpu.memory_space<smem>>
    %808 = vector.broadcast %807 : f32 to vector<4x4xf32>
    %809 = arith.addf %806, %808 : vector<4x4xf32>
    %cst_770 = arith.constant 0.000000e+00 : f32
    %810 = vector.broadcast %cst_770 : f32 to vector<4x4xf32>
    %811 = arith.maximumf %809, %810 : vector<4x4xf32>
    %c0_771 = arith.constant 0 : index
    %c2_772 = arith.constant 2 : index
    %c0_773 = arith.constant 0 : index
    %c0_774 = arith.constant 0 : index
    %812 = vector.load %arg1[%c0_771, %c2_772, %c0_773, %c0_774] : memref<1x16x5x5xf32, #tpu.memory_space<vmem>>, vector<1x1x4x4xf32>
    %813 = vector.shape_cast %812 : vector<1x1x4x4xf32> to vector<4x4xf32>
    %c6_775 = arith.constant 6 : index
    %c0_776 = arith.constant 0 : index
    %814 = memref.load %arg2[%c6_775, %c0_776] : memref<8x9xf32, #tpu.memory_space<smem>>
    %815 = vector.broadcast %814 : f32 to vector<4x4xf32>
    %816 = arith.mulf %813, %815 : vector<4x4xf32>
    %c0_777 = arith.constant 0 : index
    %c3_778 = arith.constant 3 : index
    %c0_779 = arith.constant 0 : index
    %c0_780 = arith.constant 0 : index
    %817 = vector.load %arg1[%c0_777, %c3_778, %c0_779, %c0_780] : memref<1x16x5x5xf32, #tpu.memory_space<vmem>>, vector<1x1x4x4xf32>
    %818 = vector.shape_cast %817 : vector<1x1x4x4xf32> to vector<4x4xf32>
    %c6_781 = arith.constant 6 : index
    %c1_782 = arith.constant 1 : index
    %819 = memref.load %arg2[%c6_781, %c1_782] : memref<8x9xf32, #tpu.memory_space<smem>>
    %820 = vector.broadcast %819 : f32 to vector<4x4xf32>
    %821 = arith.mulf %818, %820 : vector<4x4xf32>
    %c0_783 = arith.constant 0 : index
    %c0_784 = arith.constant 0 : index
    %c0_785 = arith.constant 0 : index
    %c1_786 = arith.constant 1 : index
    %822 = vector.load %arg1[%c0_783, %c0_784, %c0_785, %c1_786] : memref<1x16x5x5xf32, #tpu.memory_space<vmem>>, vector<1x1x4x4xf32>
    %823 = vector.shape_cast %822 : vector<1x1x4x4xf32> to vector<4x4xf32>
    %c6_787 = arith.constant 6 : index
    %c2_788 = arith.constant 2 : index
    %824 = memref.load %arg2[%c6_787, %c2_788] : memref<8x9xf32, #tpu.memory_space<smem>>
    %825 = vector.broadcast %824 : f32 to vector<4x4xf32>
    %826 = arith.mulf %823, %825 : vector<4x4xf32>
    %827 = arith.addf %816, %826 : vector<4x4xf32>
    %c0_789 = arith.constant 0 : index
    %c6_790 = arith.constant 6 : index
    %c0_791 = arith.constant 0 : index
    %c0_792 = arith.constant 0 : index
    %828 = vector.load %arg1[%c0_789, %c6_790, %c0_791, %c0_792] : memref<1x16x5x5xf32, #tpu.memory_space<vmem>>, vector<1x1x4x4xf32>
    %829 = vector.shape_cast %828 : vector<1x1x4x4xf32> to vector<4x4xf32>
    %c6_793 = arith.constant 6 : index
    %c3_794 = arith.constant 3 : index
    %830 = memref.load %arg2[%c6_793, %c3_794] : memref<8x9xf32, #tpu.memory_space<smem>>
    %831 = vector.broadcast %830 : f32 to vector<4x4xf32>
    %832 = arith.mulf %829, %831 : vector<4x4xf32>
    %833 = arith.addf %821, %832 : vector<4x4xf32>
    %c0_795 = arith.constant 0 : index
    %c7_796 = arith.constant 7 : index
    %c0_797 = arith.constant 0 : index
    %c0_798 = arith.constant 0 : index
    %834 = vector.load %arg1[%c0_795, %c7_796, %c0_797, %c0_798] : memref<1x16x5x5xf32, #tpu.memory_space<vmem>>, vector<1x1x4x4xf32>
    %835 = vector.shape_cast %834 : vector<1x1x4x4xf32> to vector<4x4xf32>
    %c6_799 = arith.constant 6 : index
    %c4_800 = arith.constant 4 : index
    %836 = memref.load %arg2[%c6_799, %c4_800] : memref<8x9xf32, #tpu.memory_space<smem>>
    %837 = vector.broadcast %836 : f32 to vector<4x4xf32>
    %838 = arith.mulf %835, %837 : vector<4x4xf32>
    %839 = arith.addf %827, %838 : vector<4x4xf32>
    %c0_801 = arith.constant 0 : index
    %c4_802 = arith.constant 4 : index
    %c0_803 = arith.constant 0 : index
    %c1_804 = arith.constant 1 : index
    %840 = vector.load %arg1[%c0_801, %c4_802, %c0_803, %c1_804] : memref<1x16x5x5xf32, #tpu.memory_space<vmem>>, vector<1x1x4x4xf32>
    %841 = vector.shape_cast %840 : vector<1x1x4x4xf32> to vector<4x4xf32>
    %c6_805 = arith.constant 6 : index
    %c5_806 = arith.constant 5 : index
    %842 = memref.load %arg2[%c6_805, %c5_806] : memref<8x9xf32, #tpu.memory_space<smem>>
    %843 = vector.broadcast %842 : f32 to vector<4x4xf32>
    %844 = arith.mulf %841, %843 : vector<4x4xf32>
    %845 = arith.addf %833, %844 : vector<4x4xf32>
    %c0_807 = arith.constant 0 : index
    %c10_808 = arith.constant 10 : index
    %c0_809 = arith.constant 0 : index
    %c0_810 = arith.constant 0 : index
    %846 = vector.load %arg1[%c0_807, %c10_808, %c0_809, %c0_810] : memref<1x16x5x5xf32, #tpu.memory_space<vmem>>, vector<1x1x4x4xf32>
    %847 = vector.shape_cast %846 : vector<1x1x4x4xf32> to vector<4x4xf32>
    %c6_811 = arith.constant 6 : index
    %c6_812 = arith.constant 6 : index
    %848 = memref.load %arg2[%c6_811, %c6_812] : memref<8x9xf32, #tpu.memory_space<smem>>
    %849 = vector.broadcast %848 : f32 to vector<4x4xf32>
    %850 = arith.mulf %847, %849 : vector<4x4xf32>
    %851 = arith.addf %839, %850 : vector<4x4xf32>
    %c0_813 = arith.constant 0 : index
    %c11_814 = arith.constant 11 : index
    %c0_815 = arith.constant 0 : index
    %c0_816 = arith.constant 0 : index
    %852 = vector.load %arg1[%c0_813, %c11_814, %c0_815, %c0_816] : memref<1x16x5x5xf32, #tpu.memory_space<vmem>>, vector<1x1x4x4xf32>
    %853 = vector.shape_cast %852 : vector<1x1x4x4xf32> to vector<4x4xf32>
    %c6_817 = arith.constant 6 : index
    %c7_818 = arith.constant 7 : index
    %854 = memref.load %arg2[%c6_817, %c7_818] : memref<8x9xf32, #tpu.memory_space<smem>>
    %855 = vector.broadcast %854 : f32 to vector<4x4xf32>
    %856 = arith.mulf %853, %855 : vector<4x4xf32>
    %857 = arith.addf %845, %856 : vector<4x4xf32>
    %c0_819 = arith.constant 0 : index
    %c8_820 = arith.constant 8 : index
    %c0_821 = arith.constant 0 : index
    %c1_822 = arith.constant 1 : index
    %858 = vector.load %arg1[%c0_819, %c8_820, %c0_821, %c1_822] : memref<1x16x5x5xf32, #tpu.memory_space<vmem>>, vector<1x1x4x4xf32>
    %859 = vector.shape_cast %858 : vector<1x1x4x4xf32> to vector<4x4xf32>
    %c6_823 = arith.constant 6 : index
    %c8_824 = arith.constant 8 : index
    %860 = memref.load %arg2[%c6_823, %c8_824] : memref<8x9xf32, #tpu.memory_space<smem>>
    %861 = vector.broadcast %860 : f32 to vector<4x4xf32>
    %862 = arith.mulf %859, %861 : vector<4x4xf32>
    %863 = arith.addf %851, %862 : vector<4x4xf32>
    %864 = arith.addf %863, %857 : vector<4x4xf32>
    %c6_825 = arith.constant 6 : index
    %865 = memref.load %arg3[%c6_825] : memref<8xf32, #tpu.memory_space<smem>>
    %866 = vector.broadcast %865 : f32 to vector<4x4xf32>
    %867 = arith.addf %864, %866 : vector<4x4xf32>
    %cst_826 = arith.constant 0.000000e+00 : f32
    %868 = vector.broadcast %cst_826 : f32 to vector<4x4xf32>
    %869 = arith.maximumf %867, %868 : vector<4x4xf32>
    %c0_827 = arith.constant 0 : index
    %c2_828 = arith.constant 2 : index
    %c0_829 = arith.constant 0 : index
    %c0_830 = arith.constant 0 : index
    %870 = vector.load %arg1[%c0_827, %c2_828, %c0_829, %c0_830] : memref<1x16x5x5xf32, #tpu.memory_space<vmem>>, vector<1x1x4x4xf32>
    %871 = vector.shape_cast %870 : vector<1x1x4x4xf32> to vector<4x4xf32>
    %c7_831 = arith.constant 7 : index
    %c0_832 = arith.constant 0 : index
    %872 = memref.load %arg2[%c7_831, %c0_832] : memref<8x9xf32, #tpu.memory_space<smem>>
    %873 = vector.broadcast %872 : f32 to vector<4x4xf32>
    %874 = arith.mulf %871, %873 : vector<4x4xf32>
    %c0_833 = arith.constant 0 : index
    %c3_834 = arith.constant 3 : index
    %c0_835 = arith.constant 0 : index
    %c0_836 = arith.constant 0 : index
    %875 = vector.load %arg1[%c0_833, %c3_834, %c0_835, %c0_836] : memref<1x16x5x5xf32, #tpu.memory_space<vmem>>, vector<1x1x4x4xf32>
    %876 = vector.shape_cast %875 : vector<1x1x4x4xf32> to vector<4x4xf32>
    %c7_837 = arith.constant 7 : index
    %c1_838 = arith.constant 1 : index
    %877 = memref.load %arg2[%c7_837, %c1_838] : memref<8x9xf32, #tpu.memory_space<smem>>
    %878 = vector.broadcast %877 : f32 to vector<4x4xf32>
    %879 = arith.mulf %876, %878 : vector<4x4xf32>
    %c0_839 = arith.constant 0 : index
    %c0_840 = arith.constant 0 : index
    %c0_841 = arith.constant 0 : index
    %c1_842 = arith.constant 1 : index
    %880 = vector.load %arg1[%c0_839, %c0_840, %c0_841, %c1_842] : memref<1x16x5x5xf32, #tpu.memory_space<vmem>>, vector<1x1x4x4xf32>
    %881 = vector.shape_cast %880 : vector<1x1x4x4xf32> to vector<4x4xf32>
    %c7_843 = arith.constant 7 : index
    %c2_844 = arith.constant 2 : index
    %882 = memref.load %arg2[%c7_843, %c2_844] : memref<8x9xf32, #tpu.memory_space<smem>>
    %883 = vector.broadcast %882 : f32 to vector<4x4xf32>
    %884 = arith.mulf %881, %883 : vector<4x4xf32>
    %885 = arith.addf %874, %884 : vector<4x4xf32>
    %c0_845 = arith.constant 0 : index
    %c6_846 = arith.constant 6 : index
    %c0_847 = arith.constant 0 : index
    %c0_848 = arith.constant 0 : index
    %886 = vector.load %arg1[%c0_845, %c6_846, %c0_847, %c0_848] : memref<1x16x5x5xf32, #tpu.memory_space<vmem>>, vector<1x1x4x4xf32>
    %887 = vector.shape_cast %886 : vector<1x1x4x4xf32> to vector<4x4xf32>
    %c7_849 = arith.constant 7 : index
    %c3_850 = arith.constant 3 : index
    %888 = memref.load %arg2[%c7_849, %c3_850] : memref<8x9xf32, #tpu.memory_space<smem>>
    %889 = vector.broadcast %888 : f32 to vector<4x4xf32>
    %890 = arith.mulf %887, %889 : vector<4x4xf32>
    %891 = arith.addf %879, %890 : vector<4x4xf32>
    %c0_851 = arith.constant 0 : index
    %c7_852 = arith.constant 7 : index
    %c0_853 = arith.constant 0 : index
    %c0_854 = arith.constant 0 : index
    %892 = vector.load %arg1[%c0_851, %c7_852, %c0_853, %c0_854] : memref<1x16x5x5xf32, #tpu.memory_space<vmem>>, vector<1x1x4x4xf32>
    %893 = vector.shape_cast %892 : vector<1x1x4x4xf32> to vector<4x4xf32>
    %c7_855 = arith.constant 7 : index
    %c4_856 = arith.constant 4 : index
    %894 = memref.load %arg2[%c7_855, %c4_856] : memref<8x9xf32, #tpu.memory_space<smem>>
    %895 = vector.broadcast %894 : f32 to vector<4x4xf32>
    %896 = arith.mulf %893, %895 : vector<4x4xf32>
    %897 = arith.addf %885, %896 : vector<4x4xf32>
    %c0_857 = arith.constant 0 : index
    %c4_858 = arith.constant 4 : index
    %c0_859 = arith.constant 0 : index
    %c1_860 = arith.constant 1 : index
    %898 = vector.load %arg1[%c0_857, %c4_858, %c0_859, %c1_860] : memref<1x16x5x5xf32, #tpu.memory_space<vmem>>, vector<1x1x4x4xf32>
    %899 = vector.shape_cast %898 : vector<1x1x4x4xf32> to vector<4x4xf32>
    %c7_861 = arith.constant 7 : index
    %c5_862 = arith.constant 5 : index
    %900 = memref.load %arg2[%c7_861, %c5_862] : memref<8x9xf32, #tpu.memory_space<smem>>
    %901 = vector.broadcast %900 : f32 to vector<4x4xf32>
    %902 = arith.mulf %899, %901 : vector<4x4xf32>
    %903 = arith.addf %891, %902 : vector<4x4xf32>
    %c0_863 = arith.constant 0 : index
    %c10_864 = arith.constant 10 : index
    %c0_865 = arith.constant 0 : index
    %c0_866 = arith.constant 0 : index
    %904 = vector.load %arg1[%c0_863, %c10_864, %c0_865, %c0_866] : memref<1x16x5x5xf32, #tpu.memory_space<vmem>>, vector<1x1x4x4xf32>
    %905 = vector.shape_cast %904 : vector<1x1x4x4xf32> to vector<4x4xf32>
    %c7_867 = arith.constant 7 : index
    %c6_868 = arith.constant 6 : index
    %906 = memref.load %arg2[%c7_867, %c6_868] : memref<8x9xf32, #tpu.memory_space<smem>>
    %907 = vector.broadcast %906 : f32 to vector<4x4xf32>
    %908 = arith.mulf %905, %907 : vector<4x4xf32>
    %909 = arith.addf %897, %908 : vector<4x4xf32>
    %c0_869 = arith.constant 0 : index
    %c11_870 = arith.constant 11 : index
    %c0_871 = arith.constant 0 : index
    %c0_872 = arith.constant 0 : index
    %910 = vector.load %arg1[%c0_869, %c11_870, %c0_871, %c0_872] : memref<1x16x5x5xf32, #tpu.memory_space<vmem>>, vector<1x1x4x4xf32>
    %911 = vector.shape_cast %910 : vector<1x1x4x4xf32> to vector<4x4xf32>
    %c7_873 = arith.constant 7 : index
    %c7_874 = arith.constant 7 : index
    %912 = memref.load %arg2[%c7_873, %c7_874] : memref<8x9xf32, #tpu.memory_space<smem>>
    %913 = vector.broadcast %912 : f32 to vector<4x4xf32>
    %914 = arith.mulf %911, %913 : vector<4x4xf32>
    %915 = arith.addf %903, %914 : vector<4x4xf32>
    %c0_875 = arith.constant 0 : index
    %c8_876 = arith.constant 8 : index
    %c0_877 = arith.constant 0 : index
    %c1_878 = arith.constant 1 : index
    %916 = vector.load %arg1[%c0_875, %c8_876, %c0_877, %c1_878] : memref<1x16x5x5xf32, #tpu.memory_space<vmem>>, vector<1x1x4x4xf32>
    %917 = vector.shape_cast %916 : vector<1x1x4x4xf32> to vector<4x4xf32>
    %c7_879 = arith.constant 7 : index
    %c8_880 = arith.constant 8 : index
    %918 = memref.load %arg2[%c7_879, %c8_880] : memref<8x9xf32, #tpu.memory_space<smem>>
    %919 = vector.broadcast %918 : f32 to vector<4x4xf32>
    %920 = arith.mulf %917, %919 : vector<4x4xf32>
    %921 = arith.addf %909, %920 : vector<4x4xf32>
    %922 = arith.addf %921, %915 : vector<4x4xf32>
    %c7_881 = arith.constant 7 : index
    %923 = memref.load %arg3[%c7_881] : memref<8xf32, #tpu.memory_space<smem>>
    %924 = vector.broadcast %923 : f32 to vector<4x4xf32>
    %925 = arith.addf %922, %924 : vector<4x4xf32>
    %cst_882 = arith.constant 0.000000e+00 : f32
    %926 = vector.broadcast %cst_882 : f32 to vector<4x4xf32>
    %927 = arith.maximumf %925, %926 : vector<4x4xf32>
    %c0_883 = arith.constant 0 : index
    %c8_884 = arith.constant 8 : index
    %c0_885 = arith.constant 0 : index
    %c0_886 = arith.constant 0 : index
    %928 = vector.load %arg1[%c0_883, %c8_884, %c0_885, %c0_886] : memref<1x16x5x5xf32, #tpu.memory_space<vmem>>, vector<1x1x4x4xf32>
    %929 = vector.shape_cast %928 : vector<1x1x4x4xf32> to vector<4x4xf32>
    %c0_887 = arith.constant 0 : index
    %c0_888 = arith.constant 0 : index
    %930 = memref.load %arg2[%c0_887, %c0_888] : memref<8x9xf32, #tpu.memory_space<smem>>
    %931 = vector.broadcast %930 : f32 to vector<4x4xf32>
    %932 = arith.mulf %929, %931 : vector<4x4xf32>
    %c0_889 = arith.constant 0 : index
    %c9_890 = arith.constant 9 : index
    %c0_891 = arith.constant 0 : index
    %c0_892 = arith.constant 0 : index
    %933 = vector.load %arg1[%c0_889, %c9_890, %c0_891, %c0_892] : memref<1x16x5x5xf32, #tpu.memory_space<vmem>>, vector<1x1x4x4xf32>
    %934 = vector.shape_cast %933 : vector<1x1x4x4xf32> to vector<4x4xf32>
    %c0_893 = arith.constant 0 : index
    %c1_894 = arith.constant 1 : index
    %935 = memref.load %arg2[%c0_893, %c1_894] : memref<8x9xf32, #tpu.memory_space<smem>>
    %936 = vector.broadcast %935 : f32 to vector<4x4xf32>
    %937 = arith.mulf %934, %936 : vector<4x4xf32>
    %c0_895 = arith.constant 0 : index
    %c10_896 = arith.constant 10 : index
    %c0_897 = arith.constant 0 : index
    %c0_898 = arith.constant 0 : index
    %938 = vector.load %arg1[%c0_895, %c10_896, %c0_897, %c0_898] : memref<1x16x5x5xf32, #tpu.memory_space<vmem>>, vector<1x1x4x4xf32>
    %939 = vector.shape_cast %938 : vector<1x1x4x4xf32> to vector<4x4xf32>
    %c0_899 = arith.constant 0 : index
    %c2_900 = arith.constant 2 : index
    %940 = memref.load %arg2[%c0_899, %c2_900] : memref<8x9xf32, #tpu.memory_space<smem>>
    %941 = vector.broadcast %940 : f32 to vector<4x4xf32>
    %942 = arith.mulf %939, %941 : vector<4x4xf32>
    %943 = arith.addf %932, %942 : vector<4x4xf32>
    %c0_901 = arith.constant 0 : index
    %c12 = arith.constant 12 : index
    %c0_902 = arith.constant 0 : index
    %c0_903 = arith.constant 0 : index
    %944 = vector.load %arg1[%c0_901, %c12, %c0_902, %c0_903] : memref<1x16x5x5xf32, #tpu.memory_space<vmem>>, vector<1x1x4x4xf32>
    %945 = vector.shape_cast %944 : vector<1x1x4x4xf32> to vector<4x4xf32>
    %c0_904 = arith.constant 0 : index
    %c3_905 = arith.constant 3 : index
    %946 = memref.load %arg2[%c0_904, %c3_905] : memref<8x9xf32, #tpu.memory_space<smem>>
    %947 = vector.broadcast %946 : f32 to vector<4x4xf32>
    %948 = arith.mulf %945, %947 : vector<4x4xf32>
    %949 = arith.addf %937, %948 : vector<4x4xf32>
    %c0_906 = arith.constant 0 : index
    %c13 = arith.constant 13 : index
    %c0_907 = arith.constant 0 : index
    %c0_908 = arith.constant 0 : index
    %950 = vector.load %arg1[%c0_906, %c13, %c0_907, %c0_908] : memref<1x16x5x5xf32, #tpu.memory_space<vmem>>, vector<1x1x4x4xf32>
    %951 = vector.shape_cast %950 : vector<1x1x4x4xf32> to vector<4x4xf32>
    %c0_909 = arith.constant 0 : index
    %c4_910 = arith.constant 4 : index
    %952 = memref.load %arg2[%c0_909, %c4_910] : memref<8x9xf32, #tpu.memory_space<smem>>
    %953 = vector.broadcast %952 : f32 to vector<4x4xf32>
    %954 = arith.mulf %951, %953 : vector<4x4xf32>
    %955 = arith.addf %943, %954 : vector<4x4xf32>
    %c0_911 = arith.constant 0 : index
    %c14 = arith.constant 14 : index
    %c0_912 = arith.constant 0 : index
    %c0_913 = arith.constant 0 : index
    %956 = vector.load %arg1[%c0_911, %c14, %c0_912, %c0_913] : memref<1x16x5x5xf32, #tpu.memory_space<vmem>>, vector<1x1x4x4xf32>
    %957 = vector.shape_cast %956 : vector<1x1x4x4xf32> to vector<4x4xf32>
    %c0_914 = arith.constant 0 : index
    %c5_915 = arith.constant 5 : index
    %958 = memref.load %arg2[%c0_914, %c5_915] : memref<8x9xf32, #tpu.memory_space<smem>>
    %959 = vector.broadcast %958 : f32 to vector<4x4xf32>
    %960 = arith.mulf %957, %959 : vector<4x4xf32>
    %961 = arith.addf %949, %960 : vector<4x4xf32>
    %c0_916 = arith.constant 0 : index
    %c0_917 = arith.constant 0 : index
    %c1_918 = arith.constant 1 : index
    %c0_919 = arith.constant 0 : index
    %962 = vector.load %arg1[%c0_916, %c0_917, %c1_918, %c0_919] : memref<1x16x5x5xf32, #tpu.memory_space<vmem>>, vector<1x1x4x4xf32>
    %963 = vector.shape_cast %962 : vector<1x1x4x4xf32> to vector<4x4xf32>
    %c0_920 = arith.constant 0 : index
    %c6_921 = arith.constant 6 : index
    %964 = memref.load %arg2[%c0_920, %c6_921] : memref<8x9xf32, #tpu.memory_space<smem>>
    %965 = vector.broadcast %964 : f32 to vector<4x4xf32>
    %966 = arith.mulf %963, %965 : vector<4x4xf32>
    %967 = arith.addf %955, %966 : vector<4x4xf32>
    %c0_922 = arith.constant 0 : index
    %c1_923 = arith.constant 1 : index
    %c1_924 = arith.constant 1 : index
    %c0_925 = arith.constant 0 : index
    %968 = vector.load %arg1[%c0_922, %c1_923, %c1_924, %c0_925] : memref<1x16x5x5xf32, #tpu.memory_space<vmem>>, vector<1x1x4x4xf32>
    %969 = vector.shape_cast %968 : vector<1x1x4x4xf32> to vector<4x4xf32>
    %c0_926 = arith.constant 0 : index
    %c7_927 = arith.constant 7 : index
    %970 = memref.load %arg2[%c0_926, %c7_927] : memref<8x9xf32, #tpu.memory_space<smem>>
    %971 = vector.broadcast %970 : f32 to vector<4x4xf32>
    %972 = arith.mulf %969, %971 : vector<4x4xf32>
    %973 = arith.addf %961, %972 : vector<4x4xf32>
    %c0_928 = arith.constant 0 : index
    %c2_929 = arith.constant 2 : index
    %c1_930 = arith.constant 1 : index
    %c0_931 = arith.constant 0 : index
    %974 = vector.load %arg1[%c0_928, %c2_929, %c1_930, %c0_931] : memref<1x16x5x5xf32, #tpu.memory_space<vmem>>, vector<1x1x4x4xf32>
    %975 = vector.shape_cast %974 : vector<1x1x4x4xf32> to vector<4x4xf32>
    %c0_932 = arith.constant 0 : index
    %c8_933 = arith.constant 8 : index
    %976 = memref.load %arg2[%c0_932, %c8_933] : memref<8x9xf32, #tpu.memory_space<smem>>
    %977 = vector.broadcast %976 : f32 to vector<4x4xf32>
    %978 = arith.mulf %975, %977 : vector<4x4xf32>
    %979 = arith.addf %967, %978 : vector<4x4xf32>
    %980 = arith.addf %979, %973 : vector<4x4xf32>
    %c0_934 = arith.constant 0 : index
    %981 = memref.load %arg3[%c0_934] : memref<8xf32, #tpu.memory_space<smem>>
    %982 = vector.broadcast %981 : f32 to vector<4x4xf32>
    %983 = arith.addf %980, %982 : vector<4x4xf32>
    %cst_935 = arith.constant 0.000000e+00 : f32
    %984 = vector.broadcast %cst_935 : f32 to vector<4x4xf32>
    %985 = arith.maximumf %983, %984 : vector<4x4xf32>
    %c0_936 = arith.constant 0 : index
    %c8_937 = arith.constant 8 : index
    %c0_938 = arith.constant 0 : index
    %c0_939 = arith.constant 0 : index
    %986 = vector.load %arg1[%c0_936, %c8_937, %c0_938, %c0_939] : memref<1x16x5x5xf32, #tpu.memory_space<vmem>>, vector<1x1x4x4xf32>
    %987 = vector.shape_cast %986 : vector<1x1x4x4xf32> to vector<4x4xf32>
    %c1_940 = arith.constant 1 : index
    %c0_941 = arith.constant 0 : index
    %988 = memref.load %arg2[%c1_940, %c0_941] : memref<8x9xf32, #tpu.memory_space<smem>>
    %989 = vector.broadcast %988 : f32 to vector<4x4xf32>
    %990 = arith.mulf %987, %989 : vector<4x4xf32>
    %c0_942 = arith.constant 0 : index
    %c9_943 = arith.constant 9 : index
    %c0_944 = arith.constant 0 : index
    %c0_945 = arith.constant 0 : index
    %991 = vector.load %arg1[%c0_942, %c9_943, %c0_944, %c0_945] : memref<1x16x5x5xf32, #tpu.memory_space<vmem>>, vector<1x1x4x4xf32>
    %992 = vector.shape_cast %991 : vector<1x1x4x4xf32> to vector<4x4xf32>
    %c1_946 = arith.constant 1 : index
    %c1_947 = arith.constant 1 : index
    %993 = memref.load %arg2[%c1_946, %c1_947] : memref<8x9xf32, #tpu.memory_space<smem>>
    %994 = vector.broadcast %993 : f32 to vector<4x4xf32>
    %995 = arith.mulf %992, %994 : vector<4x4xf32>
    %c0_948 = arith.constant 0 : index
    %c10_949 = arith.constant 10 : index
    %c0_950 = arith.constant 0 : index
    %c0_951 = arith.constant 0 : index
    %996 = vector.load %arg1[%c0_948, %c10_949, %c0_950, %c0_951] : memref<1x16x5x5xf32, #tpu.memory_space<vmem>>, vector<1x1x4x4xf32>
    %997 = vector.shape_cast %996 : vector<1x1x4x4xf32> to vector<4x4xf32>
    %c1_952 = arith.constant 1 : index
    %c2_953 = arith.constant 2 : index
    %998 = memref.load %arg2[%c1_952, %c2_953] : memref<8x9xf32, #tpu.memory_space<smem>>
    %999 = vector.broadcast %998 : f32 to vector<4x4xf32>
    %1000 = arith.mulf %997, %999 : vector<4x4xf32>
    %1001 = arith.addf %990, %1000 : vector<4x4xf32>
    %c0_954 = arith.constant 0 : index
    %c12_955 = arith.constant 12 : index
    %c0_956 = arith.constant 0 : index
    %c0_957 = arith.constant 0 : index
    %1002 = vector.load %arg1[%c0_954, %c12_955, %c0_956, %c0_957] : memref<1x16x5x5xf32, #tpu.memory_space<vmem>>, vector<1x1x4x4xf32>
    %1003 = vector.shape_cast %1002 : vector<1x1x4x4xf32> to vector<4x4xf32>
    %c1_958 = arith.constant 1 : index
    %c3_959 = arith.constant 3 : index
    %1004 = memref.load %arg2[%c1_958, %c3_959] : memref<8x9xf32, #tpu.memory_space<smem>>
    %1005 = vector.broadcast %1004 : f32 to vector<4x4xf32>
    %1006 = arith.mulf %1003, %1005 : vector<4x4xf32>
    %1007 = arith.addf %995, %1006 : vector<4x4xf32>
    %c0_960 = arith.constant 0 : index
    %c13_961 = arith.constant 13 : index
    %c0_962 = arith.constant 0 : index
    %c0_963 = arith.constant 0 : index
    %1008 = vector.load %arg1[%c0_960, %c13_961, %c0_962, %c0_963] : memref<1x16x5x5xf32, #tpu.memory_space<vmem>>, vector<1x1x4x4xf32>
    %1009 = vector.shape_cast %1008 : vector<1x1x4x4xf32> to vector<4x4xf32>
    %c1_964 = arith.constant 1 : index
    %c4_965 = arith.constant 4 : index
    %1010 = memref.load %arg2[%c1_964, %c4_965] : memref<8x9xf32, #tpu.memory_space<smem>>
    %1011 = vector.broadcast %1010 : f32 to vector<4x4xf32>
    %1012 = arith.mulf %1009, %1011 : vector<4x4xf32>
    %1013 = arith.addf %1001, %1012 : vector<4x4xf32>
    %c0_966 = arith.constant 0 : index
    %c14_967 = arith.constant 14 : index
    %c0_968 = arith.constant 0 : index
    %c0_969 = arith.constant 0 : index
    %1014 = vector.load %arg1[%c0_966, %c14_967, %c0_968, %c0_969] : memref<1x16x5x5xf32, #tpu.memory_space<vmem>>, vector<1x1x4x4xf32>
    %1015 = vector.shape_cast %1014 : vector<1x1x4x4xf32> to vector<4x4xf32>
    %c1_970 = arith.constant 1 : index
    %c5_971 = arith.constant 5 : index
    %1016 = memref.load %arg2[%c1_970, %c5_971] : memref<8x9xf32, #tpu.memory_space<smem>>
    %1017 = vector.broadcast %1016 : f32 to vector<4x4xf32>
    %1018 = arith.mulf %1015, %1017 : vector<4x4xf32>
    %1019 = arith.addf %1007, %1018 : vector<4x4xf32>
    %c0_972 = arith.constant 0 : index
    %c0_973 = arith.constant 0 : index
    %c1_974 = arith.constant 1 : index
    %c0_975 = arith.constant 0 : index
    %1020 = vector.load %arg1[%c0_972, %c0_973, %c1_974, %c0_975] : memref<1x16x5x5xf32, #tpu.memory_space<vmem>>, vector<1x1x4x4xf32>
    %1021 = vector.shape_cast %1020 : vector<1x1x4x4xf32> to vector<4x4xf32>
    %c1_976 = arith.constant 1 : index
    %c6_977 = arith.constant 6 : index
    %1022 = memref.load %arg2[%c1_976, %c6_977] : memref<8x9xf32, #tpu.memory_space<smem>>
    %1023 = vector.broadcast %1022 : f32 to vector<4x4xf32>
    %1024 = arith.mulf %1021, %1023 : vector<4x4xf32>
    %1025 = arith.addf %1013, %1024 : vector<4x4xf32>
    %c0_978 = arith.constant 0 : index
    %c1_979 = arith.constant 1 : index
    %c1_980 = arith.constant 1 : index
    %c0_981 = arith.constant 0 : index
    %1026 = vector.load %arg1[%c0_978, %c1_979, %c1_980, %c0_981] : memref<1x16x5x5xf32, #tpu.memory_space<vmem>>, vector<1x1x4x4xf32>
    %1027 = vector.shape_cast %1026 : vector<1x1x4x4xf32> to vector<4x4xf32>
    %c1_982 = arith.constant 1 : index
    %c7_983 = arith.constant 7 : index
    %1028 = memref.load %arg2[%c1_982, %c7_983] : memref<8x9xf32, #tpu.memory_space<smem>>
    %1029 = vector.broadcast %1028 : f32 to vector<4x4xf32>
    %1030 = arith.mulf %1027, %1029 : vector<4x4xf32>
    %1031 = arith.addf %1019, %1030 : vector<4x4xf32>
    %c0_984 = arith.constant 0 : index
    %c2_985 = arith.constant 2 : index
    %c1_986 = arith.constant 1 : index
    %c0_987 = arith.constant 0 : index
    %1032 = vector.load %arg1[%c0_984, %c2_985, %c1_986, %c0_987] : memref<1x16x5x5xf32, #tpu.memory_space<vmem>>, vector<1x1x4x4xf32>
    %1033 = vector.shape_cast %1032 : vector<1x1x4x4xf32> to vector<4x4xf32>
    %c1_988 = arith.constant 1 : index
    %c8_989 = arith.constant 8 : index
    %1034 = memref.load %arg2[%c1_988, %c8_989] : memref<8x9xf32, #tpu.memory_space<smem>>
    %1035 = vector.broadcast %1034 : f32 to vector<4x4xf32>
    %1036 = arith.mulf %1033, %1035 : vector<4x4xf32>
    %1037 = arith.addf %1025, %1036 : vector<4x4xf32>
    %1038 = arith.addf %1037, %1031 : vector<4x4xf32>
    %c1_990 = arith.constant 1 : index
    %1039 = memref.load %arg3[%c1_990] : memref<8xf32, #tpu.memory_space<smem>>
    %1040 = vector.broadcast %1039 : f32 to vector<4x4xf32>
    %1041 = arith.addf %1038, %1040 : vector<4x4xf32>
    %cst_991 = arith.constant 0.000000e+00 : f32
    %1042 = vector.broadcast %cst_991 : f32 to vector<4x4xf32>
    %1043 = arith.maximumf %1041, %1042 : vector<4x4xf32>
    %c0_992 = arith.constant 0 : index
    %c8_993 = arith.constant 8 : index
    %c0_994 = arith.constant 0 : index
    %c0_995 = arith.constant 0 : index
    %1044 = vector.load %arg1[%c0_992, %c8_993, %c0_994, %c0_995] : memref<1x16x5x5xf32, #tpu.memory_space<vmem>>, vector<1x1x4x4xf32>
    %1045 = vector.shape_cast %1044 : vector<1x1x4x4xf32> to vector<4x4xf32>
    %c2_996 = arith.constant 2 : index
    %c0_997 = arith.constant 0 : index
    %1046 = memref.load %arg2[%c2_996, %c0_997] : memref<8x9xf32, #tpu.memory_space<smem>>
    %1047 = vector.broadcast %1046 : f32 to vector<4x4xf32>
    %1048 = arith.mulf %1045, %1047 : vector<4x4xf32>
    %c0_998 = arith.constant 0 : index
    %c9_999 = arith.constant 9 : index
    %c0_1000 = arith.constant 0 : index
    %c0_1001 = arith.constant 0 : index
    %1049 = vector.load %arg1[%c0_998, %c9_999, %c0_1000, %c0_1001] : memref<1x16x5x5xf32, #tpu.memory_space<vmem>>, vector<1x1x4x4xf32>
    %1050 = vector.shape_cast %1049 : vector<1x1x4x4xf32> to vector<4x4xf32>
    %c2_1002 = arith.constant 2 : index
    %c1_1003 = arith.constant 1 : index
    %1051 = memref.load %arg2[%c2_1002, %c1_1003] : memref<8x9xf32, #tpu.memory_space<smem>>
    %1052 = vector.broadcast %1051 : f32 to vector<4x4xf32>
    %1053 = arith.mulf %1050, %1052 : vector<4x4xf32>
    %c0_1004 = arith.constant 0 : index
    %c10_1005 = arith.constant 10 : index
    %c0_1006 = arith.constant 0 : index
    %c0_1007 = arith.constant 0 : index
    %1054 = vector.load %arg1[%c0_1004, %c10_1005, %c0_1006, %c0_1007] : memref<1x16x5x5xf32, #tpu.memory_space<vmem>>, vector<1x1x4x4xf32>
    %1055 = vector.shape_cast %1054 : vector<1x1x4x4xf32> to vector<4x4xf32>
    %c2_1008 = arith.constant 2 : index
    %c2_1009 = arith.constant 2 : index
    %1056 = memref.load %arg2[%c2_1008, %c2_1009] : memref<8x9xf32, #tpu.memory_space<smem>>
    %1057 = vector.broadcast %1056 : f32 to vector<4x4xf32>
    %1058 = arith.mulf %1055, %1057 : vector<4x4xf32>
    %1059 = arith.addf %1048, %1058 : vector<4x4xf32>
    %c0_1010 = arith.constant 0 : index
    %c12_1011 = arith.constant 12 : index
    %c0_1012 = arith.constant 0 : index
    %c0_1013 = arith.constant 0 : index
    %1060 = vector.load %arg1[%c0_1010, %c12_1011, %c0_1012, %c0_1013] : memref<1x16x5x5xf32, #tpu.memory_space<vmem>>, vector<1x1x4x4xf32>
    %1061 = vector.shape_cast %1060 : vector<1x1x4x4xf32> to vector<4x4xf32>
    %c2_1014 = arith.constant 2 : index
    %c3_1015 = arith.constant 3 : index
    %1062 = memref.load %arg2[%c2_1014, %c3_1015] : memref<8x9xf32, #tpu.memory_space<smem>>
    %1063 = vector.broadcast %1062 : f32 to vector<4x4xf32>
    %1064 = arith.mulf %1061, %1063 : vector<4x4xf32>
    %1065 = arith.addf %1053, %1064 : vector<4x4xf32>
    %c0_1016 = arith.constant 0 : index
    %c13_1017 = arith.constant 13 : index
    %c0_1018 = arith.constant 0 : index
    %c0_1019 = arith.constant 0 : index
    %1066 = vector.load %arg1[%c0_1016, %c13_1017, %c0_1018, %c0_1019] : memref<1x16x5x5xf32, #tpu.memory_space<vmem>>, vector<1x1x4x4xf32>
    %1067 = vector.shape_cast %1066 : vector<1x1x4x4xf32> to vector<4x4xf32>
    %c2_1020 = arith.constant 2 : index
    %c4_1021 = arith.constant 4 : index
    %1068 = memref.load %arg2[%c2_1020, %c4_1021] : memref<8x9xf32, #tpu.memory_space<smem>>
    %1069 = vector.broadcast %1068 : f32 to vector<4x4xf32>
    %1070 = arith.mulf %1067, %1069 : vector<4x4xf32>
    %1071 = arith.addf %1059, %1070 : vector<4x4xf32>
    %c0_1022 = arith.constant 0 : index
    %c14_1023 = arith.constant 14 : index
    %c0_1024 = arith.constant 0 : index
    %c0_1025 = arith.constant 0 : index
    %1072 = vector.load %arg1[%c0_1022, %c14_1023, %c0_1024, %c0_1025] : memref<1x16x5x5xf32, #tpu.memory_space<vmem>>, vector<1x1x4x4xf32>
    %1073 = vector.shape_cast %1072 : vector<1x1x4x4xf32> to vector<4x4xf32>
    %c2_1026 = arith.constant 2 : index
    %c5_1027 = arith.constant 5 : index
    %1074 = memref.load %arg2[%c2_1026, %c5_1027] : memref<8x9xf32, #tpu.memory_space<smem>>
    %1075 = vector.broadcast %1074 : f32 to vector<4x4xf32>
    %1076 = arith.mulf %1073, %1075 : vector<4x4xf32>
    %1077 = arith.addf %1065, %1076 : vector<4x4xf32>
    %c0_1028 = arith.constant 0 : index
    %c0_1029 = arith.constant 0 : index
    %c1_1030 = arith.constant 1 : index
    %c0_1031 = arith.constant 0 : index
    %1078 = vector.load %arg1[%c0_1028, %c0_1029, %c1_1030, %c0_1031] : memref<1x16x5x5xf32, #tpu.memory_space<vmem>>, vector<1x1x4x4xf32>
    %1079 = vector.shape_cast %1078 : vector<1x1x4x4xf32> to vector<4x4xf32>
    %c2_1032 = arith.constant 2 : index
    %c6_1033 = arith.constant 6 : index
    %1080 = memref.load %arg2[%c2_1032, %c6_1033] : memref<8x9xf32, #tpu.memory_space<smem>>
    %1081 = vector.broadcast %1080 : f32 to vector<4x4xf32>
    %1082 = arith.mulf %1079, %1081 : vector<4x4xf32>
    %1083 = arith.addf %1071, %1082 : vector<4x4xf32>
    %c0_1034 = arith.constant 0 : index
    %c1_1035 = arith.constant 1 : index
    %c1_1036 = arith.constant 1 : index
    %c0_1037 = arith.constant 0 : index
    %1084 = vector.load %arg1[%c0_1034, %c1_1035, %c1_1036, %c0_1037] : memref<1x16x5x5xf32, #tpu.memory_space<vmem>>, vector<1x1x4x4xf32>
    %1085 = vector.shape_cast %1084 : vector<1x1x4x4xf32> to vector<4x4xf32>
    %c2_1038 = arith.constant 2 : index
    %c7_1039 = arith.constant 7 : index
    %1086 = memref.load %arg2[%c2_1038, %c7_1039] : memref<8x9xf32, #tpu.memory_space<smem>>
    %1087 = vector.broadcast %1086 : f32 to vector<4x4xf32>
    %1088 = arith.mulf %1085, %1087 : vector<4x4xf32>
    %1089 = arith.addf %1077, %1088 : vector<4x4xf32>
    %c0_1040 = arith.constant 0 : index
    %c2_1041 = arith.constant 2 : index
    %c1_1042 = arith.constant 1 : index
    %c0_1043 = arith.constant 0 : index
    %1090 = vector.load %arg1[%c0_1040, %c2_1041, %c1_1042, %c0_1043] : memref<1x16x5x5xf32, #tpu.memory_space<vmem>>, vector<1x1x4x4xf32>
    %1091 = vector.shape_cast %1090 : vector<1x1x4x4xf32> to vector<4x4xf32>
    %c2_1044 = arith.constant 2 : index
    %c8_1045 = arith.constant 8 : index
    %1092 = memref.load %arg2[%c2_1044, %c8_1045] : memref<8x9xf32, #tpu.memory_space<smem>>
    %1093 = vector.broadcast %1092 : f32 to vector<4x4xf32>
    %1094 = arith.mulf %1091, %1093 : vector<4x4xf32>
    %1095 = arith.addf %1083, %1094 : vector<4x4xf32>
    %1096 = arith.addf %1095, %1089 : vector<4x4xf32>
    %c2_1046 = arith.constant 2 : index
    %1097 = memref.load %arg3[%c2_1046] : memref<8xf32, #tpu.memory_space<smem>>
    %1098 = vector.broadcast %1097 : f32 to vector<4x4xf32>
    %1099 = arith.addf %1096, %1098 : vector<4x4xf32>
    %cst_1047 = arith.constant 0.000000e+00 : f32
    %1100 = vector.broadcast %cst_1047 : f32 to vector<4x4xf32>
    %1101 = arith.maximumf %1099, %1100 : vector<4x4xf32>
    %c0_1048 = arith.constant 0 : index
    %c8_1049 = arith.constant 8 : index
    %c0_1050 = arith.constant 0 : index
    %c0_1051 = arith.constant 0 : index
    %1102 = vector.load %arg1[%c0_1048, %c8_1049, %c0_1050, %c0_1051] : memref<1x16x5x5xf32, #tpu.memory_space<vmem>>, vector<1x1x4x4xf32>
    %1103 = vector.shape_cast %1102 : vector<1x1x4x4xf32> to vector<4x4xf32>
    %c3_1052 = arith.constant 3 : index
    %c0_1053 = arith.constant 0 : index
    %1104 = memref.load %arg2[%c3_1052, %c0_1053] : memref<8x9xf32, #tpu.memory_space<smem>>
    %1105 = vector.broadcast %1104 : f32 to vector<4x4xf32>
    %1106 = arith.mulf %1103, %1105 : vector<4x4xf32>
    %c0_1054 = arith.constant 0 : index
    %c9_1055 = arith.constant 9 : index
    %c0_1056 = arith.constant 0 : index
    %c0_1057 = arith.constant 0 : index
    %1107 = vector.load %arg1[%c0_1054, %c9_1055, %c0_1056, %c0_1057] : memref<1x16x5x5xf32, #tpu.memory_space<vmem>>, vector<1x1x4x4xf32>
    %1108 = vector.shape_cast %1107 : vector<1x1x4x4xf32> to vector<4x4xf32>
    %c3_1058 = arith.constant 3 : index
    %c1_1059 = arith.constant 1 : index
    %1109 = memref.load %arg2[%c3_1058, %c1_1059] : memref<8x9xf32, #tpu.memory_space<smem>>
    %1110 = vector.broadcast %1109 : f32 to vector<4x4xf32>
    %1111 = arith.mulf %1108, %1110 : vector<4x4xf32>
    %c0_1060 = arith.constant 0 : index
    %c10_1061 = arith.constant 10 : index
    %c0_1062 = arith.constant 0 : index
    %c0_1063 = arith.constant 0 : index
    %1112 = vector.load %arg1[%c0_1060, %c10_1061, %c0_1062, %c0_1063] : memref<1x16x5x5xf32, #tpu.memory_space<vmem>>, vector<1x1x4x4xf32>
    %1113 = vector.shape_cast %1112 : vector<1x1x4x4xf32> to vector<4x4xf32>
    %c3_1064 = arith.constant 3 : index
    %c2_1065 = arith.constant 2 : index
    %1114 = memref.load %arg2[%c3_1064, %c2_1065] : memref<8x9xf32, #tpu.memory_space<smem>>
    %1115 = vector.broadcast %1114 : f32 to vector<4x4xf32>
    %1116 = arith.mulf %1113, %1115 : vector<4x4xf32>
    %1117 = arith.addf %1106, %1116 : vector<4x4xf32>
    %c0_1066 = arith.constant 0 : index
    %c12_1067 = arith.constant 12 : index
    %c0_1068 = arith.constant 0 : index
    %c0_1069 = arith.constant 0 : index
    %1118 = vector.load %arg1[%c0_1066, %c12_1067, %c0_1068, %c0_1069] : memref<1x16x5x5xf32, #tpu.memory_space<vmem>>, vector<1x1x4x4xf32>
    %1119 = vector.shape_cast %1118 : vector<1x1x4x4xf32> to vector<4x4xf32>
    %c3_1070 = arith.constant 3 : index
    %c3_1071 = arith.constant 3 : index
    %1120 = memref.load %arg2[%c3_1070, %c3_1071] : memref<8x9xf32, #tpu.memory_space<smem>>
    %1121 = vector.broadcast %1120 : f32 to vector<4x4xf32>
    %1122 = arith.mulf %1119, %1121 : vector<4x4xf32>
    %1123 = arith.addf %1111, %1122 : vector<4x4xf32>
    %c0_1072 = arith.constant 0 : index
    %c13_1073 = arith.constant 13 : index
    %c0_1074 = arith.constant 0 : index
    %c0_1075 = arith.constant 0 : index
    %1124 = vector.load %arg1[%c0_1072, %c13_1073, %c0_1074, %c0_1075] : memref<1x16x5x5xf32, #tpu.memory_space<vmem>>, vector<1x1x4x4xf32>
    %1125 = vector.shape_cast %1124 : vector<1x1x4x4xf32> to vector<4x4xf32>
    %c3_1076 = arith.constant 3 : index
    %c4_1077 = arith.constant 4 : index
    %1126 = memref.load %arg2[%c3_1076, %c4_1077] : memref<8x9xf32, #tpu.memory_space<smem>>
    %1127 = vector.broadcast %1126 : f32 to vector<4x4xf32>
    %1128 = arith.mulf %1125, %1127 : vector<4x4xf32>
    %1129 = arith.addf %1117, %1128 : vector<4x4xf32>
    %c0_1078 = arith.constant 0 : index
    %c14_1079 = arith.constant 14 : index
    %c0_1080 = arith.constant 0 : index
    %c0_1081 = arith.constant 0 : index
    %1130 = vector.load %arg1[%c0_1078, %c14_1079, %c0_1080, %c0_1081] : memref<1x16x5x5xf32, #tpu.memory_space<vmem>>, vector<1x1x4x4xf32>
    %1131 = vector.shape_cast %1130 : vector<1x1x4x4xf32> to vector<4x4xf32>
    %c3_1082 = arith.constant 3 : index
    %c5_1083 = arith.constant 5 : index
    %1132 = memref.load %arg2[%c3_1082, %c5_1083] : memref<8x9xf32, #tpu.memory_space<smem>>
    %1133 = vector.broadcast %1132 : f32 to vector<4x4xf32>
    %1134 = arith.mulf %1131, %1133 : vector<4x4xf32>
    %1135 = arith.addf %1123, %1134 : vector<4x4xf32>
    %c0_1084 = arith.constant 0 : index
    %c0_1085 = arith.constant 0 : index
    %c1_1086 = arith.constant 1 : index
    %c0_1087 = arith.constant 0 : index
    %1136 = vector.load %arg1[%c0_1084, %c0_1085, %c1_1086, %c0_1087] : memref<1x16x5x5xf32, #tpu.memory_space<vmem>>, vector<1x1x4x4xf32>
    %1137 = vector.shape_cast %1136 : vector<1x1x4x4xf32> to vector<4x4xf32>
    %c3_1088 = arith.constant 3 : index
    %c6_1089 = arith.constant 6 : index
    %1138 = memref.load %arg2[%c3_1088, %c6_1089] : memref<8x9xf32, #tpu.memory_space<smem>>
    %1139 = vector.broadcast %1138 : f32 to vector<4x4xf32>
    %1140 = arith.mulf %1137, %1139 : vector<4x4xf32>
    %1141 = arith.addf %1129, %1140 : vector<4x4xf32>
    %c0_1090 = arith.constant 0 : index
    %c1_1091 = arith.constant 1 : index
    %c1_1092 = arith.constant 1 : index
    %c0_1093 = arith.constant 0 : index
    %1142 = vector.load %arg1[%c0_1090, %c1_1091, %c1_1092, %c0_1093] : memref<1x16x5x5xf32, #tpu.memory_space<vmem>>, vector<1x1x4x4xf32>
    %1143 = vector.shape_cast %1142 : vector<1x1x4x4xf32> to vector<4x4xf32>
    %c3_1094 = arith.constant 3 : index
    %c7_1095 = arith.constant 7 : index
    %1144 = memref.load %arg2[%c3_1094, %c7_1095] : memref<8x9xf32, #tpu.memory_space<smem>>
    %1145 = vector.broadcast %1144 : f32 to vector<4x4xf32>
    %1146 = arith.mulf %1143, %1145 : vector<4x4xf32>
    %1147 = arith.addf %1135, %1146 : vector<4x4xf32>
    %c0_1096 = arith.constant 0 : index
    %c2_1097 = arith.constant 2 : index
    %c1_1098 = arith.constant 1 : index
    %c0_1099 = arith.constant 0 : index
    %1148 = vector.load %arg1[%c0_1096, %c2_1097, %c1_1098, %c0_1099] : memref<1x16x5x5xf32, #tpu.memory_space<vmem>>, vector<1x1x4x4xf32>
    %1149 = vector.shape_cast %1148 : vector<1x1x4x4xf32> to vector<4x4xf32>
    %c3_1100 = arith.constant 3 : index
    %c8_1101 = arith.constant 8 : index
    %1150 = memref.load %arg2[%c3_1100, %c8_1101] : memref<8x9xf32, #tpu.memory_space<smem>>
    %1151 = vector.broadcast %1150 : f32 to vector<4x4xf32>
    %1152 = arith.mulf %1149, %1151 : vector<4x4xf32>
    %1153 = arith.addf %1141, %1152 : vector<4x4xf32>
    %1154 = arith.addf %1153, %1147 : vector<4x4xf32>
    %c3_1102 = arith.constant 3 : index
    %1155 = memref.load %arg3[%c3_1102] : memref<8xf32, #tpu.memory_space<smem>>
    %1156 = vector.broadcast %1155 : f32 to vector<4x4xf32>
    %1157 = arith.addf %1154, %1156 : vector<4x4xf32>
    %cst_1103 = arith.constant 0.000000e+00 : f32
    %1158 = vector.broadcast %cst_1103 : f32 to vector<4x4xf32>
    %1159 = arith.maximumf %1157, %1158 : vector<4x4xf32>
    %c0_1104 = arith.constant 0 : index
    %c8_1105 = arith.constant 8 : index
    %c0_1106 = arith.constant 0 : index
    %c0_1107 = arith.constant 0 : index
    %1160 = vector.load %arg1[%c0_1104, %c8_1105, %c0_1106, %c0_1107] : memref<1x16x5x5xf32, #tpu.memory_space<vmem>>, vector<1x1x4x4xf32>
    %1161 = vector.shape_cast %1160 : vector<1x1x4x4xf32> to vector<4x4xf32>
    %c4_1108 = arith.constant 4 : index
    %c0_1109 = arith.constant 0 : index
    %1162 = memref.load %arg2[%c4_1108, %c0_1109] : memref<8x9xf32, #tpu.memory_space<smem>>
    %1163 = vector.broadcast %1162 : f32 to vector<4x4xf32>
    %1164 = arith.mulf %1161, %1163 : vector<4x4xf32>
    %c0_1110 = arith.constant 0 : index
    %c9_1111 = arith.constant 9 : index
    %c0_1112 = arith.constant 0 : index
    %c0_1113 = arith.constant 0 : index
    %1165 = vector.load %arg1[%c0_1110, %c9_1111, %c0_1112, %c0_1113] : memref<1x16x5x5xf32, #tpu.memory_space<vmem>>, vector<1x1x4x4xf32>
    %1166 = vector.shape_cast %1165 : vector<1x1x4x4xf32> to vector<4x4xf32>
    %c4_1114 = arith.constant 4 : index
    %c1_1115 = arith.constant 1 : index
    %1167 = memref.load %arg2[%c4_1114, %c1_1115] : memref<8x9xf32, #tpu.memory_space<smem>>
    %1168 = vector.broadcast %1167 : f32 to vector<4x4xf32>
    %1169 = arith.mulf %1166, %1168 : vector<4x4xf32>
    %c0_1116 = arith.constant 0 : index
    %c10_1117 = arith.constant 10 : index
    %c0_1118 = arith.constant 0 : index
    %c0_1119 = arith.constant 0 : index
    %1170 = vector.load %arg1[%c0_1116, %c10_1117, %c0_1118, %c0_1119] : memref<1x16x5x5xf32, #tpu.memory_space<vmem>>, vector<1x1x4x4xf32>
    %1171 = vector.shape_cast %1170 : vector<1x1x4x4xf32> to vector<4x4xf32>
    %c4_1120 = arith.constant 4 : index
    %c2_1121 = arith.constant 2 : index
    %1172 = memref.load %arg2[%c4_1120, %c2_1121] : memref<8x9xf32, #tpu.memory_space<smem>>
    %1173 = vector.broadcast %1172 : f32 to vector<4x4xf32>
    %1174 = arith.mulf %1171, %1173 : vector<4x4xf32>
    %1175 = arith.addf %1164, %1174 : vector<4x4xf32>
    %c0_1122 = arith.constant 0 : index
    %c12_1123 = arith.constant 12 : index
    %c0_1124 = arith.constant 0 : index
    %c0_1125 = arith.constant 0 : index
    %1176 = vector.load %arg1[%c0_1122, %c12_1123, %c0_1124, %c0_1125] : memref<1x16x5x5xf32, #tpu.memory_space<vmem>>, vector<1x1x4x4xf32>
    %1177 = vector.shape_cast %1176 : vector<1x1x4x4xf32> to vector<4x4xf32>
    %c4_1126 = arith.constant 4 : index
    %c3_1127 = arith.constant 3 : index
    %1178 = memref.load %arg2[%c4_1126, %c3_1127] : memref<8x9xf32, #tpu.memory_space<smem>>
    %1179 = vector.broadcast %1178 : f32 to vector<4x4xf32>
    %1180 = arith.mulf %1177, %1179 : vector<4x4xf32>
    %1181 = arith.addf %1169, %1180 : vector<4x4xf32>
    %c0_1128 = arith.constant 0 : index
    %c13_1129 = arith.constant 13 : index
    %c0_1130 = arith.constant 0 : index
    %c0_1131 = arith.constant 0 : index
    %1182 = vector.load %arg1[%c0_1128, %c13_1129, %c0_1130, %c0_1131] : memref<1x16x5x5xf32, #tpu.memory_space<vmem>>, vector<1x1x4x4xf32>
    %1183 = vector.shape_cast %1182 : vector<1x1x4x4xf32> to vector<4x4xf32>
    %c4_1132 = arith.constant 4 : index
    %c4_1133 = arith.constant 4 : index
    %1184 = memref.load %arg2[%c4_1132, %c4_1133] : memref<8x9xf32, #tpu.memory_space<smem>>
    %1185 = vector.broadcast %1184 : f32 to vector<4x4xf32>
    %1186 = arith.mulf %1183, %1185 : vector<4x4xf32>
    %1187 = arith.addf %1175, %1186 : vector<4x4xf32>
    %c0_1134 = arith.constant 0 : index
    %c14_1135 = arith.constant 14 : index
    %c0_1136 = arith.constant 0 : index
    %c0_1137 = arith.constant 0 : index
    %1188 = vector.load %arg1[%c0_1134, %c14_1135, %c0_1136, %c0_1137] : memref<1x16x5x5xf32, #tpu.memory_space<vmem>>, vector<1x1x4x4xf32>
    %1189 = vector.shape_cast %1188 : vector<1x1x4x4xf32> to vector<4x4xf32>
    %c4_1138 = arith.constant 4 : index
    %c5_1139 = arith.constant 5 : index
    %1190 = memref.load %arg2[%c4_1138, %c5_1139] : memref<8x9xf32, #tpu.memory_space<smem>>
    %1191 = vector.broadcast %1190 : f32 to vector<4x4xf32>
    %1192 = arith.mulf %1189, %1191 : vector<4x4xf32>
    %1193 = arith.addf %1181, %1192 : vector<4x4xf32>
    %c0_1140 = arith.constant 0 : index
    %c0_1141 = arith.constant 0 : index
    %c1_1142 = arith.constant 1 : index
    %c0_1143 = arith.constant 0 : index
    %1194 = vector.load %arg1[%c0_1140, %c0_1141, %c1_1142, %c0_1143] : memref<1x16x5x5xf32, #tpu.memory_space<vmem>>, vector<1x1x4x4xf32>
    %1195 = vector.shape_cast %1194 : vector<1x1x4x4xf32> to vector<4x4xf32>
    %c4_1144 = arith.constant 4 : index
    %c6_1145 = arith.constant 6 : index
    %1196 = memref.load %arg2[%c4_1144, %c6_1145] : memref<8x9xf32, #tpu.memory_space<smem>>
    %1197 = vector.broadcast %1196 : f32 to vector<4x4xf32>
    %1198 = arith.mulf %1195, %1197 : vector<4x4xf32>
    %1199 = arith.addf %1187, %1198 : vector<4x4xf32>
    %c0_1146 = arith.constant 0 : index
    %c1_1147 = arith.constant 1 : index
    %c1_1148 = arith.constant 1 : index
    %c0_1149 = arith.constant 0 : index
    %1200 = vector.load %arg1[%c0_1146, %c1_1147, %c1_1148, %c0_1149] : memref<1x16x5x5xf32, #tpu.memory_space<vmem>>, vector<1x1x4x4xf32>
    %1201 = vector.shape_cast %1200 : vector<1x1x4x4xf32> to vector<4x4xf32>
    %c4_1150 = arith.constant 4 : index
    %c7_1151 = arith.constant 7 : index
    %1202 = memref.load %arg2[%c4_1150, %c7_1151] : memref<8x9xf32, #tpu.memory_space<smem>>
    %1203 = vector.broadcast %1202 : f32 to vector<4x4xf32>
    %1204 = arith.mulf %1201, %1203 : vector<4x4xf32>
    %1205 = arith.addf %1193, %1204 : vector<4x4xf32>
    %c0_1152 = arith.constant 0 : index
    %c2_1153 = arith.constant 2 : index
    %c1_1154 = arith.constant 1 : index
    %c0_1155 = arith.constant 0 : index
    %1206 = vector.load %arg1[%c0_1152, %c2_1153, %c1_1154, %c0_1155] : memref<1x16x5x5xf32, #tpu.memory_space<vmem>>, vector<1x1x4x4xf32>
    %1207 = vector.shape_cast %1206 : vector<1x1x4x4xf32> to vector<4x4xf32>
    %c4_1156 = arith.constant 4 : index
    %c8_1157 = arith.constant 8 : index
    %1208 = memref.load %arg2[%c4_1156, %c8_1157] : memref<8x9xf32, #tpu.memory_space<smem>>
    %1209 = vector.broadcast %1208 : f32 to vector<4x4xf32>
    %1210 = arith.mulf %1207, %1209 : vector<4x4xf32>
    %1211 = arith.addf %1199, %1210 : vector<4x4xf32>
    %1212 = arith.addf %1211, %1205 : vector<4x4xf32>
    %c4_1158 = arith.constant 4 : index
    %1213 = memref.load %arg3[%c4_1158] : memref<8xf32, #tpu.memory_space<smem>>
    %1214 = vector.broadcast %1213 : f32 to vector<4x4xf32>
    %1215 = arith.addf %1212, %1214 : vector<4x4xf32>
    %cst_1159 = arith.constant 0.000000e+00 : f32
    %1216 = vector.broadcast %cst_1159 : f32 to vector<4x4xf32>
    %1217 = arith.maximumf %1215, %1216 : vector<4x4xf32>
    %c0_1160 = arith.constant 0 : index
    %c8_1161 = arith.constant 8 : index
    %c0_1162 = arith.constant 0 : index
    %c0_1163 = arith.constant 0 : index
    %1218 = vector.load %arg1[%c0_1160, %c8_1161, %c0_1162, %c0_1163] : memref<1x16x5x5xf32, #tpu.memory_space<vmem>>, vector<1x1x4x4xf32>
    %1219 = vector.shape_cast %1218 : vector<1x1x4x4xf32> to vector<4x4xf32>
    %c5_1164 = arith.constant 5 : index
    %c0_1165 = arith.constant 0 : index
    %1220 = memref.load %arg2[%c5_1164, %c0_1165] : memref<8x9xf32, #tpu.memory_space<smem>>
    %1221 = vector.broadcast %1220 : f32 to vector<4x4xf32>
    %1222 = arith.mulf %1219, %1221 : vector<4x4xf32>
    %c0_1166 = arith.constant 0 : index
    %c9_1167 = arith.constant 9 : index
    %c0_1168 = arith.constant 0 : index
    %c0_1169 = arith.constant 0 : index
    %1223 = vector.load %arg1[%c0_1166, %c9_1167, %c0_1168, %c0_1169] : memref<1x16x5x5xf32, #tpu.memory_space<vmem>>, vector<1x1x4x4xf32>
    %1224 = vector.shape_cast %1223 : vector<1x1x4x4xf32> to vector<4x4xf32>
    %c5_1170 = arith.constant 5 : index
    %c1_1171 = arith.constant 1 : index
    %1225 = memref.load %arg2[%c5_1170, %c1_1171] : memref<8x9xf32, #tpu.memory_space<smem>>
    %1226 = vector.broadcast %1225 : f32 to vector<4x4xf32>
    %1227 = arith.mulf %1224, %1226 : vector<4x4xf32>
    %c0_1172 = arith.constant 0 : index
    %c10_1173 = arith.constant 10 : index
    %c0_1174 = arith.constant 0 : index
    %c0_1175 = arith.constant 0 : index
    %1228 = vector.load %arg1[%c0_1172, %c10_1173, %c0_1174, %c0_1175] : memref<1x16x5x5xf32, #tpu.memory_space<vmem>>, vector<1x1x4x4xf32>
    %1229 = vector.shape_cast %1228 : vector<1x1x4x4xf32> to vector<4x4xf32>
    %c5_1176 = arith.constant 5 : index
    %c2_1177 = arith.constant 2 : index
    %1230 = memref.load %arg2[%c5_1176, %c2_1177] : memref<8x9xf32, #tpu.memory_space<smem>>
    %1231 = vector.broadcast %1230 : f32 to vector<4x4xf32>
    %1232 = arith.mulf %1229, %1231 : vector<4x4xf32>
    %1233 = arith.addf %1222, %1232 : vector<4x4xf32>
    %c0_1178 = arith.constant 0 : index
    %c12_1179 = arith.constant 12 : index
    %c0_1180 = arith.constant 0 : index
    %c0_1181 = arith.constant 0 : index
    %1234 = vector.load %arg1[%c0_1178, %c12_1179, %c0_1180, %c0_1181] : memref<1x16x5x5xf32, #tpu.memory_space<vmem>>, vector<1x1x4x4xf32>
    %1235 = vector.shape_cast %1234 : vector<1x1x4x4xf32> to vector<4x4xf32>
    %c5_1182 = arith.constant 5 : index
    %c3_1183 = arith.constant 3 : index
    %1236 = memref.load %arg2[%c5_1182, %c3_1183] : memref<8x9xf32, #tpu.memory_space<smem>>
    %1237 = vector.broadcast %1236 : f32 to vector<4x4xf32>
    %1238 = arith.mulf %1235, %1237 : vector<4x4xf32>
    %1239 = arith.addf %1227, %1238 : vector<4x4xf32>
    %c0_1184 = arith.constant 0 : index
    %c13_1185 = arith.constant 13 : index
    %c0_1186 = arith.constant 0 : index
    %c0_1187 = arith.constant 0 : index
    %1240 = vector.load %arg1[%c0_1184, %c13_1185, %c0_1186, %c0_1187] : memref<1x16x5x5xf32, #tpu.memory_space<vmem>>, vector<1x1x4x4xf32>
    %1241 = vector.shape_cast %1240 : vector<1x1x4x4xf32> to vector<4x4xf32>
    %c5_1188 = arith.constant 5 : index
    %c4_1189 = arith.constant 4 : index
    %1242 = memref.load %arg2[%c5_1188, %c4_1189] : memref<8x9xf32, #tpu.memory_space<smem>>
    %1243 = vector.broadcast %1242 : f32 to vector<4x4xf32>
    %1244 = arith.mulf %1241, %1243 : vector<4x4xf32>
    %1245 = arith.addf %1233, %1244 : vector<4x4xf32>
    %c0_1190 = arith.constant 0 : index
    %c14_1191 = arith.constant 14 : index
    %c0_1192 = arith.constant 0 : index
    %c0_1193 = arith.constant 0 : index
    %1246 = vector.load %arg1[%c0_1190, %c14_1191, %c0_1192, %c0_1193] : memref<1x16x5x5xf32, #tpu.memory_space<vmem>>, vector<1x1x4x4xf32>
    %1247 = vector.shape_cast %1246 : vector<1x1x4x4xf32> to vector<4x4xf32>
    %c5_1194 = arith.constant 5 : index
    %c5_1195 = arith.constant 5 : index
    %1248 = memref.load %arg2[%c5_1194, %c5_1195] : memref<8x9xf32, #tpu.memory_space<smem>>
    %1249 = vector.broadcast %1248 : f32 to vector<4x4xf32>
    %1250 = arith.mulf %1247, %1249 : vector<4x4xf32>
    %1251 = arith.addf %1239, %1250 : vector<4x4xf32>
    %c0_1196 = arith.constant 0 : index
    %c0_1197 = arith.constant 0 : index
    %c1_1198 = arith.constant 1 : index
    %c0_1199 = arith.constant 0 : index
    %1252 = vector.load %arg1[%c0_1196, %c0_1197, %c1_1198, %c0_1199] : memref<1x16x5x5xf32, #tpu.memory_space<vmem>>, vector<1x1x4x4xf32>
    %1253 = vector.shape_cast %1252 : vector<1x1x4x4xf32> to vector<4x4xf32>
    %c5_1200 = arith.constant 5 : index
    %c6_1201 = arith.constant 6 : index
    %1254 = memref.load %arg2[%c5_1200, %c6_1201] : memref<8x9xf32, #tpu.memory_space<smem>>
    %1255 = vector.broadcast %1254 : f32 to vector<4x4xf32>
    %1256 = arith.mulf %1253, %1255 : vector<4x4xf32>
    %1257 = arith.addf %1245, %1256 : vector<4x4xf32>
    %c0_1202 = arith.constant 0 : index
    %c1_1203 = arith.constant 1 : index
    %c1_1204 = arith.constant 1 : index
    %c0_1205 = arith.constant 0 : index
    %1258 = vector.load %arg1[%c0_1202, %c1_1203, %c1_1204, %c0_1205] : memref<1x16x5x5xf32, #tpu.memory_space<vmem>>, vector<1x1x4x4xf32>
    %1259 = vector.shape_cast %1258 : vector<1x1x4x4xf32> to vector<4x4xf32>
    %c5_1206 = arith.constant 5 : index
    %c7_1207 = arith.constant 7 : index
    %1260 = memref.load %arg2[%c5_1206, %c7_1207] : memref<8x9xf32, #tpu.memory_space<smem>>
    %1261 = vector.broadcast %1260 : f32 to vector<4x4xf32>
    %1262 = arith.mulf %1259, %1261 : vector<4x4xf32>
    %1263 = arith.addf %1251, %1262 : vector<4x4xf32>
    %c0_1208 = arith.constant 0 : index
    %c2_1209 = arith.constant 2 : index
    %c1_1210 = arith.constant 1 : index
    %c0_1211 = arith.constant 0 : index
    %1264 = vector.load %arg1[%c0_1208, %c2_1209, %c1_1210, %c0_1211] : memref<1x16x5x5xf32, #tpu.memory_space<vmem>>, vector<1x1x4x4xf32>
    %1265 = vector.shape_cast %1264 : vector<1x1x4x4xf32> to vector<4x4xf32>
    %c5_1212 = arith.constant 5 : index
    %c8_1213 = arith.constant 8 : index
    %1266 = memref.load %arg2[%c5_1212, %c8_1213] : memref<8x9xf32, #tpu.memory_space<smem>>
    %1267 = vector.broadcast %1266 : f32 to vector<4x4xf32>
    %1268 = arith.mulf %1265, %1267 : vector<4x4xf32>
    %1269 = arith.addf %1257, %1268 : vector<4x4xf32>
    %1270 = arith.addf %1269, %1263 : vector<4x4xf32>
    %c5_1214 = arith.constant 5 : index
    %1271 = memref.load %arg3[%c5_1214] : memref<8xf32, #tpu.memory_space<smem>>
    %1272 = vector.broadcast %1271 : f32 to vector<4x4xf32>
    %1273 = arith.addf %1270, %1272 : vector<4x4xf32>
    %cst_1215 = arith.constant 0.000000e+00 : f32
    %1274 = vector.broadcast %cst_1215 : f32 to vector<4x4xf32>
    %1275 = arith.maximumf %1273, %1274 : vector<4x4xf32>
    %c0_1216 = arith.constant 0 : index
    %c8_1217 = arith.constant 8 : index
    %c0_1218 = arith.constant 0 : index
    %c0_1219 = arith.constant 0 : index
    %1276 = vector.load %arg1[%c0_1216, %c8_1217, %c0_1218, %c0_1219] : memref<1x16x5x5xf32, #tpu.memory_space<vmem>>, vector<1x1x4x4xf32>
    %1277 = vector.shape_cast %1276 : vector<1x1x4x4xf32> to vector<4x4xf32>
    %c6_1220 = arith.constant 6 : index
    %c0_1221 = arith.constant 0 : index
    %1278 = memref.load %arg2[%c6_1220, %c0_1221] : memref<8x9xf32, #tpu.memory_space<smem>>
    %1279 = vector.broadcast %1278 : f32 to vector<4x4xf32>
    %1280 = arith.mulf %1277, %1279 : vector<4x4xf32>
    %c0_1222 = arith.constant 0 : index
    %c9_1223 = arith.constant 9 : index
    %c0_1224 = arith.constant 0 : index
    %c0_1225 = arith.constant 0 : index
    %1281 = vector.load %arg1[%c0_1222, %c9_1223, %c0_1224, %c0_1225] : memref<1x16x5x5xf32, #tpu.memory_space<vmem>>, vector<1x1x4x4xf32>
    %1282 = vector.shape_cast %1281 : vector<1x1x4x4xf32> to vector<4x4xf32>
    %c6_1226 = arith.constant 6 : index
    %c1_1227 = arith.constant 1 : index
    %1283 = memref.load %arg2[%c6_1226, %c1_1227] : memref<8x9xf32, #tpu.memory_space<smem>>
    %1284 = vector.broadcast %1283 : f32 to vector<4x4xf32>
    %1285 = arith.mulf %1282, %1284 : vector<4x4xf32>
    %c0_1228 = arith.constant 0 : index
    %c10_1229 = arith.constant 10 : index
    %c0_1230 = arith.constant 0 : index
    %c0_1231 = arith.constant 0 : index
    %1286 = vector.load %arg1[%c0_1228, %c10_1229, %c0_1230, %c0_1231] : memref<1x16x5x5xf32, #tpu.memory_space<vmem>>, vector<1x1x4x4xf32>
    %1287 = vector.shape_cast %1286 : vector<1x1x4x4xf32> to vector<4x4xf32>
    %c6_1232 = arith.constant 6 : index
    %c2_1233 = arith.constant 2 : index
    %1288 = memref.load %arg2[%c6_1232, %c2_1233] : memref<8x9xf32, #tpu.memory_space<smem>>
    %1289 = vector.broadcast %1288 : f32 to vector<4x4xf32>
    %1290 = arith.mulf %1287, %1289 : vector<4x4xf32>
    %1291 = arith.addf %1280, %1290 : vector<4x4xf32>
    %c0_1234 = arith.constant 0 : index
    %c12_1235 = arith.constant 12 : index
    %c0_1236 = arith.constant 0 : index
    %c0_1237 = arith.constant 0 : index
    %1292 = vector.load %arg1[%c0_1234, %c12_1235, %c0_1236, %c0_1237] : memref<1x16x5x5xf32, #tpu.memory_space<vmem>>, vector<1x1x4x4xf32>
    %1293 = vector.shape_cast %1292 : vector<1x1x4x4xf32> to vector<4x4xf32>
    %c6_1238 = arith.constant 6 : index
    %c3_1239 = arith.constant 3 : index
    %1294 = memref.load %arg2[%c6_1238, %c3_1239] : memref<8x9xf32, #tpu.memory_space<smem>>
    %1295 = vector.broadcast %1294 : f32 to vector<4x4xf32>
    %1296 = arith.mulf %1293, %1295 : vector<4x4xf32>
    %1297 = arith.addf %1285, %1296 : vector<4x4xf32>
    %c0_1240 = arith.constant 0 : index
    %c13_1241 = arith.constant 13 : index
    %c0_1242 = arith.constant 0 : index
    %c0_1243 = arith.constant 0 : index
    %1298 = vector.load %arg1[%c0_1240, %c13_1241, %c0_1242, %c0_1243] : memref<1x16x5x5xf32, #tpu.memory_space<vmem>>, vector<1x1x4x4xf32>
    %1299 = vector.shape_cast %1298 : vector<1x1x4x4xf32> to vector<4x4xf32>
    %c6_1244 = arith.constant 6 : index
    %c4_1245 = arith.constant 4 : index
    %1300 = memref.load %arg2[%c6_1244, %c4_1245] : memref<8x9xf32, #tpu.memory_space<smem>>
    %1301 = vector.broadcast %1300 : f32 to vector<4x4xf32>
    %1302 = arith.mulf %1299, %1301 : vector<4x4xf32>
    %1303 = arith.addf %1291, %1302 : vector<4x4xf32>
    %c0_1246 = arith.constant 0 : index
    %c14_1247 = arith.constant 14 : index
    %c0_1248 = arith.constant 0 : index
    %c0_1249 = arith.constant 0 : index
    %1304 = vector.load %arg1[%c0_1246, %c14_1247, %c0_1248, %c0_1249] : memref<1x16x5x5xf32, #tpu.memory_space<vmem>>, vector<1x1x4x4xf32>
    %1305 = vector.shape_cast %1304 : vector<1x1x4x4xf32> to vector<4x4xf32>
    %c6_1250 = arith.constant 6 : index
    %c5_1251 = arith.constant 5 : index
    %1306 = memref.load %arg2[%c6_1250, %c5_1251] : memref<8x9xf32, #tpu.memory_space<smem>>
    %1307 = vector.broadcast %1306 : f32 to vector<4x4xf32>
    %1308 = arith.mulf %1305, %1307 : vector<4x4xf32>
    %1309 = arith.addf %1297, %1308 : vector<4x4xf32>
    %c0_1252 = arith.constant 0 : index
    %c0_1253 = arith.constant 0 : index
    %c1_1254 = arith.constant 1 : index
    %c0_1255 = arith.constant 0 : index
    %1310 = vector.load %arg1[%c0_1252, %c0_1253, %c1_1254, %c0_1255] : memref<1x16x5x5xf32, #tpu.memory_space<vmem>>, vector<1x1x4x4xf32>
    %1311 = vector.shape_cast %1310 : vector<1x1x4x4xf32> to vector<4x4xf32>
    %c6_1256 = arith.constant 6 : index
    %c6_1257 = arith.constant 6 : index
    %1312 = memref.load %arg2[%c6_1256, %c6_1257] : memref<8x9xf32, #tpu.memory_space<smem>>
    %1313 = vector.broadcast %1312 : f32 to vector<4x4xf32>
    %1314 = arith.mulf %1311, %1313 : vector<4x4xf32>
    %1315 = arith.addf %1303, %1314 : vector<4x4xf32>
    %c0_1258 = arith.constant 0 : index
    %c1_1259 = arith.constant 1 : index
    %c1_1260 = arith.constant 1 : index
    %c0_1261 = arith.constant 0 : index
    %1316 = vector.load %arg1[%c0_1258, %c1_1259, %c1_1260, %c0_1261] : memref<1x16x5x5xf32, #tpu.memory_space<vmem>>, vector<1x1x4x4xf32>
    %1317 = vector.shape_cast %1316 : vector<1x1x4x4xf32> to vector<4x4xf32>
    %c6_1262 = arith.constant 6 : index
    %c7_1263 = arith.constant 7 : index
    %1318 = memref.load %arg2[%c6_1262, %c7_1263] : memref<8x9xf32, #tpu.memory_space<smem>>
    %1319 = vector.broadcast %1318 : f32 to vector<4x4xf32>
    %1320 = arith.mulf %1317, %1319 : vector<4x4xf32>
    %1321 = arith.addf %1309, %1320 : vector<4x4xf32>
    %c0_1264 = arith.constant 0 : index
    %c2_1265 = arith.constant 2 : index
    %c1_1266 = arith.constant 1 : index
    %c0_1267 = arith.constant 0 : index
    %1322 = vector.load %arg1[%c0_1264, %c2_1265, %c1_1266, %c0_1267] : memref<1x16x5x5xf32, #tpu.memory_space<vmem>>, vector<1x1x4x4xf32>
    %1323 = vector.shape_cast %1322 : vector<1x1x4x4xf32> to vector<4x4xf32>
    %c6_1268 = arith.constant 6 : index
    %c8_1269 = arith.constant 8 : index
    %1324 = memref.load %arg2[%c6_1268, %c8_1269] : memref<8x9xf32, #tpu.memory_space<smem>>
    %1325 = vector.broadcast %1324 : f32 to vector<4x4xf32>
    %1326 = arith.mulf %1323, %1325 : vector<4x4xf32>
    %1327 = arith.addf %1315, %1326 : vector<4x4xf32>
    %1328 = arith.addf %1327, %1321 : vector<4x4xf32>
    %c6_1270 = arith.constant 6 : index
    %1329 = memref.load %arg3[%c6_1270] : memref<8xf32, #tpu.memory_space<smem>>
    %1330 = vector.broadcast %1329 : f32 to vector<4x4xf32>
    %1331 = arith.addf %1328, %1330 : vector<4x4xf32>
    %cst_1271 = arith.constant 0.000000e+00 : f32
    %1332 = vector.broadcast %cst_1271 : f32 to vector<4x4xf32>
    %1333 = arith.maximumf %1331, %1332 : vector<4x4xf32>
    %c0_1272 = arith.constant 0 : index
    %c8_1273 = arith.constant 8 : index
    %c0_1274 = arith.constant 0 : index
    %c0_1275 = arith.constant 0 : index
    %1334 = vector.load %arg1[%c0_1272, %c8_1273, %c0_1274, %c0_1275] : memref<1x16x5x5xf32, #tpu.memory_space<vmem>>, vector<1x1x4x4xf32>
    %1335 = vector.shape_cast %1334 : vector<1x1x4x4xf32> to vector<4x4xf32>
    %c7_1276 = arith.constant 7 : index
    %c0_1277 = arith.constant 0 : index
    %1336 = memref.load %arg2[%c7_1276, %c0_1277] : memref<8x9xf32, #tpu.memory_space<smem>>
    %1337 = vector.broadcast %1336 : f32 to vector<4x4xf32>
    %1338 = arith.mulf %1335, %1337 : vector<4x4xf32>
    %c0_1278 = arith.constant 0 : index
    %c9_1279 = arith.constant 9 : index
    %c0_1280 = arith.constant 0 : index
    %c0_1281 = arith.constant 0 : index
    %1339 = vector.load %arg1[%c0_1278, %c9_1279, %c0_1280, %c0_1281] : memref<1x16x5x5xf32, #tpu.memory_space<vmem>>, vector<1x1x4x4xf32>
    %1340 = vector.shape_cast %1339 : vector<1x1x4x4xf32> to vector<4x4xf32>
    %c7_1282 = arith.constant 7 : index
    %c1_1283 = arith.constant 1 : index
    %1341 = memref.load %arg2[%c7_1282, %c1_1283] : memref<8x9xf32, #tpu.memory_space<smem>>
    %1342 = vector.broadcast %1341 : f32 to vector<4x4xf32>
    %1343 = arith.mulf %1340, %1342 : vector<4x4xf32>
    %c0_1284 = arith.constant 0 : index
    %c10_1285 = arith.constant 10 : index
    %c0_1286 = arith.constant 0 : index
    %c0_1287 = arith.constant 0 : index
    %1344 = vector.load %arg1[%c0_1284, %c10_1285, %c0_1286, %c0_1287] : memref<1x16x5x5xf32, #tpu.memory_space<vmem>>, vector<1x1x4x4xf32>
    %1345 = vector.shape_cast %1344 : vector<1x1x4x4xf32> to vector<4x4xf32>
    %c7_1288 = arith.constant 7 : index
    %c2_1289 = arith.constant 2 : index
    %1346 = memref.load %arg2[%c7_1288, %c2_1289] : memref<8x9xf32, #tpu.memory_space<smem>>
    %1347 = vector.broadcast %1346 : f32 to vector<4x4xf32>
    %1348 = arith.mulf %1345, %1347 : vector<4x4xf32>
    %1349 = arith.addf %1338, %1348 : vector<4x4xf32>
    %c0_1290 = arith.constant 0 : index
    %c12_1291 = arith.constant 12 : index
    %c0_1292 = arith.constant 0 : index
    %c0_1293 = arith.constant 0 : index
    %1350 = vector.load %arg1[%c0_1290, %c12_1291, %c0_1292, %c0_1293] : memref<1x16x5x5xf32, #tpu.memory_space<vmem>>, vector<1x1x4x4xf32>
    %1351 = vector.shape_cast %1350 : vector<1x1x4x4xf32> to vector<4x4xf32>
    %c7_1294 = arith.constant 7 : index
    %c3_1295 = arith.constant 3 : index
    %1352 = memref.load %arg2[%c7_1294, %c3_1295] : memref<8x9xf32, #tpu.memory_space<smem>>
    %1353 = vector.broadcast %1352 : f32 to vector<4x4xf32>
    %1354 = arith.mulf %1351, %1353 : vector<4x4xf32>
    %1355 = arith.addf %1343, %1354 : vector<4x4xf32>
    %c0_1296 = arith.constant 0 : index
    %c13_1297 = arith.constant 13 : index
    %c0_1298 = arith.constant 0 : index
    %c0_1299 = arith.constant 0 : index
    %1356 = vector.load %arg1[%c0_1296, %c13_1297, %c0_1298, %c0_1299] : memref<1x16x5x5xf32, #tpu.memory_space<vmem>>, vector<1x1x4x4xf32>
    %1357 = vector.shape_cast %1356 : vector<1x1x4x4xf32> to vector<4x4xf32>
    %c7_1300 = arith.constant 7 : index
    %c4_1301 = arith.constant 4 : index
    %1358 = memref.load %arg2[%c7_1300, %c4_1301] : memref<8x9xf32, #tpu.memory_space<smem>>
    %1359 = vector.broadcast %1358 : f32 to vector<4x4xf32>
    %1360 = arith.mulf %1357, %1359 : vector<4x4xf32>
    %1361 = arith.addf %1349, %1360 : vector<4x4xf32>
    %c0_1302 = arith.constant 0 : index
    %c14_1303 = arith.constant 14 : index
    %c0_1304 = arith.constant 0 : index
    %c0_1305 = arith.constant 0 : index
    %1362 = vector.load %arg1[%c0_1302, %c14_1303, %c0_1304, %c0_1305] : memref<1x16x5x5xf32, #tpu.memory_space<vmem>>, vector<1x1x4x4xf32>
    %1363 = vector.shape_cast %1362 : vector<1x1x4x4xf32> to vector<4x4xf32>
    %c7_1306 = arith.constant 7 : index
    %c5_1307 = arith.constant 5 : index
    %1364 = memref.load %arg2[%c7_1306, %c5_1307] : memref<8x9xf32, #tpu.memory_space<smem>>
    %1365 = vector.broadcast %1364 : f32 to vector<4x4xf32>
    %1366 = arith.mulf %1363, %1365 : vector<4x4xf32>
    %1367 = arith.addf %1355, %1366 : vector<4x4xf32>
    %c0_1308 = arith.constant 0 : index
    %c0_1309 = arith.constant 0 : index
    %c1_1310 = arith.constant 1 : index
    %c0_1311 = arith.constant 0 : index
    %1368 = vector.load %arg1[%c0_1308, %c0_1309, %c1_1310, %c0_1311] : memref<1x16x5x5xf32, #tpu.memory_space<vmem>>, vector<1x1x4x4xf32>
    %1369 = vector.shape_cast %1368 : vector<1x1x4x4xf32> to vector<4x4xf32>
    %c7_1312 = arith.constant 7 : index
    %c6_1313 = arith.constant 6 : index
    %1370 = memref.load %arg2[%c7_1312, %c6_1313] : memref<8x9xf32, #tpu.memory_space<smem>>
    %1371 = vector.broadcast %1370 : f32 to vector<4x4xf32>
    %1372 = arith.mulf %1369, %1371 : vector<4x4xf32>
    %1373 = arith.addf %1361, %1372 : vector<4x4xf32>
    %c0_1314 = arith.constant 0 : index
    %c1_1315 = arith.constant 1 : index
    %c1_1316 = arith.constant 1 : index
    %c0_1317 = arith.constant 0 : index
    %1374 = vector.load %arg1[%c0_1314, %c1_1315, %c1_1316, %c0_1317] : memref<1x16x5x5xf32, #tpu.memory_space<vmem>>, vector<1x1x4x4xf32>
    %1375 = vector.shape_cast %1374 : vector<1x1x4x4xf32> to vector<4x4xf32>
    %c7_1318 = arith.constant 7 : index
    %c7_1319 = arith.constant 7 : index
    %1376 = memref.load %arg2[%c7_1318, %c7_1319] : memref<8x9xf32, #tpu.memory_space<smem>>
    %1377 = vector.broadcast %1376 : f32 to vector<4x4xf32>
    %1378 = arith.mulf %1375, %1377 : vector<4x4xf32>
    %1379 = arith.addf %1367, %1378 : vector<4x4xf32>
    %c0_1320 = arith.constant 0 : index
    %c2_1321 = arith.constant 2 : index
    %c1_1322 = arith.constant 1 : index
    %c0_1323 = arith.constant 0 : index
    %1380 = vector.load %arg1[%c0_1320, %c2_1321, %c1_1322, %c0_1323] : memref<1x16x5x5xf32, #tpu.memory_space<vmem>>, vector<1x1x4x4xf32>
    %1381 = vector.shape_cast %1380 : vector<1x1x4x4xf32> to vector<4x4xf32>
    %c7_1324 = arith.constant 7 : index
    %c8_1325 = arith.constant 8 : index
    %1382 = memref.load %arg2[%c7_1324, %c8_1325] : memref<8x9xf32, #tpu.memory_space<smem>>
    %1383 = vector.broadcast %1382 : f32 to vector<4x4xf32>
    %1384 = arith.mulf %1381, %1383 : vector<4x4xf32>
    %1385 = arith.addf %1373, %1384 : vector<4x4xf32>
    %1386 = arith.addf %1385, %1379 : vector<4x4xf32>
    %c7_1326 = arith.constant 7 : index
    %1387 = memref.load %arg3[%c7_1326] : memref<8xf32, #tpu.memory_space<smem>>
    %1388 = vector.broadcast %1387 : f32 to vector<4x4xf32>
    %1389 = arith.addf %1386, %1388 : vector<4x4xf32>
    %cst_1327 = arith.constant 0.000000e+00 : f32
    %1390 = vector.broadcast %cst_1327 : f32 to vector<4x4xf32>
    %1391 = arith.maximumf %1389, %1390 : vector<4x4xf32>
    %c0_1328 = arith.constant 0 : index
    %c10_1329 = arith.constant 10 : index
    %c0_1330 = arith.constant 0 : index
    %c0_1331 = arith.constant 0 : index
    %1392 = vector.load %arg1[%c0_1328, %c10_1329, %c0_1330, %c0_1331] : memref<1x16x5x5xf32, #tpu.memory_space<vmem>>, vector<1x1x4x4xf32>
    %1393 = vector.shape_cast %1392 : vector<1x1x4x4xf32> to vector<4x4xf32>
    %c0_1332 = arith.constant 0 : index
    %c0_1333 = arith.constant 0 : index
    %1394 = memref.load %arg2[%c0_1332, %c0_1333] : memref<8x9xf32, #tpu.memory_space<smem>>
    %1395 = vector.broadcast %1394 : f32 to vector<4x4xf32>
    %1396 = arith.mulf %1393, %1395 : vector<4x4xf32>
    %c0_1334 = arith.constant 0 : index
    %c11_1335 = arith.constant 11 : index
    %c0_1336 = arith.constant 0 : index
    %c0_1337 = arith.constant 0 : index
    %1397 = vector.load %arg1[%c0_1334, %c11_1335, %c0_1336, %c0_1337] : memref<1x16x5x5xf32, #tpu.memory_space<vmem>>, vector<1x1x4x4xf32>
    %1398 = vector.shape_cast %1397 : vector<1x1x4x4xf32> to vector<4x4xf32>
    %c0_1338 = arith.constant 0 : index
    %c1_1339 = arith.constant 1 : index
    %1399 = memref.load %arg2[%c0_1338, %c1_1339] : memref<8x9xf32, #tpu.memory_space<smem>>
    %1400 = vector.broadcast %1399 : f32 to vector<4x4xf32>
    %1401 = arith.mulf %1398, %1400 : vector<4x4xf32>
    %c0_1340 = arith.constant 0 : index
    %c8_1341 = arith.constant 8 : index
    %c0_1342 = arith.constant 0 : index
    %c1_1343 = arith.constant 1 : index
    %1402 = vector.load %arg1[%c0_1340, %c8_1341, %c0_1342, %c1_1343] : memref<1x16x5x5xf32, #tpu.memory_space<vmem>>, vector<1x1x4x4xf32>
    %1403 = vector.shape_cast %1402 : vector<1x1x4x4xf32> to vector<4x4xf32>
    %c0_1344 = arith.constant 0 : index
    %c2_1345 = arith.constant 2 : index
    %1404 = memref.load %arg2[%c0_1344, %c2_1345] : memref<8x9xf32, #tpu.memory_space<smem>>
    %1405 = vector.broadcast %1404 : f32 to vector<4x4xf32>
    %1406 = arith.mulf %1403, %1405 : vector<4x4xf32>
    %1407 = arith.addf %1396, %1406 : vector<4x4xf32>
    %c0_1346 = arith.constant 0 : index
    %c14_1347 = arith.constant 14 : index
    %c0_1348 = arith.constant 0 : index
    %c0_1349 = arith.constant 0 : index
    %1408 = vector.load %arg1[%c0_1346, %c14_1347, %c0_1348, %c0_1349] : memref<1x16x5x5xf32, #tpu.memory_space<vmem>>, vector<1x1x4x4xf32>
    %1409 = vector.shape_cast %1408 : vector<1x1x4x4xf32> to vector<4x4xf32>
    %c0_1350 = arith.constant 0 : index
    %c3_1351 = arith.constant 3 : index
    %1410 = memref.load %arg2[%c0_1350, %c3_1351] : memref<8x9xf32, #tpu.memory_space<smem>>
    %1411 = vector.broadcast %1410 : f32 to vector<4x4xf32>
    %1412 = arith.mulf %1409, %1411 : vector<4x4xf32>
    %1413 = arith.addf %1401, %1412 : vector<4x4xf32>
    %c0_1352 = arith.constant 0 : index
    %c15 = arith.constant 15 : index
    %c0_1353 = arith.constant 0 : index
    %c0_1354 = arith.constant 0 : index
    %1414 = vector.load %arg1[%c0_1352, %c15, %c0_1353, %c0_1354] : memref<1x16x5x5xf32, #tpu.memory_space<vmem>>, vector<1x1x4x4xf32>
    %1415 = vector.shape_cast %1414 : vector<1x1x4x4xf32> to vector<4x4xf32>
    %c0_1355 = arith.constant 0 : index
    %c4_1356 = arith.constant 4 : index
    %1416 = memref.load %arg2[%c0_1355, %c4_1356] : memref<8x9xf32, #tpu.memory_space<smem>>
    %1417 = vector.broadcast %1416 : f32 to vector<4x4xf32>
    %1418 = arith.mulf %1415, %1417 : vector<4x4xf32>
    %1419 = arith.addf %1407, %1418 : vector<4x4xf32>
    %c0_1357 = arith.constant 0 : index
    %c12_1358 = arith.constant 12 : index
    %c0_1359 = arith.constant 0 : index
    %c1_1360 = arith.constant 1 : index
    %1420 = vector.load %arg1[%c0_1357, %c12_1358, %c0_1359, %c1_1360] : memref<1x16x5x5xf32, #tpu.memory_space<vmem>>, vector<1x1x4x4xf32>
    %1421 = vector.shape_cast %1420 : vector<1x1x4x4xf32> to vector<4x4xf32>
    %c0_1361 = arith.constant 0 : index
    %c5_1362 = arith.constant 5 : index
    %1422 = memref.load %arg2[%c0_1361, %c5_1362] : memref<8x9xf32, #tpu.memory_space<smem>>
    %1423 = vector.broadcast %1422 : f32 to vector<4x4xf32>
    %1424 = arith.mulf %1421, %1423 : vector<4x4xf32>
    %1425 = arith.addf %1413, %1424 : vector<4x4xf32>
    %c0_1363 = arith.constant 0 : index
    %c2_1364 = arith.constant 2 : index
    %c1_1365 = arith.constant 1 : index
    %c0_1366 = arith.constant 0 : index
    %1426 = vector.load %arg1[%c0_1363, %c2_1364, %c1_1365, %c0_1366] : memref<1x16x5x5xf32, #tpu.memory_space<vmem>>, vector<1x1x4x4xf32>
    %1427 = vector.shape_cast %1426 : vector<1x1x4x4xf32> to vector<4x4xf32>
    %c0_1367 = arith.constant 0 : index
    %c6_1368 = arith.constant 6 : index
    %1428 = memref.load %arg2[%c0_1367, %c6_1368] : memref<8x9xf32, #tpu.memory_space<smem>>
    %1429 = vector.broadcast %1428 : f32 to vector<4x4xf32>
    %1430 = arith.mulf %1427, %1429 : vector<4x4xf32>
    %1431 = arith.addf %1419, %1430 : vector<4x4xf32>
    %c0_1369 = arith.constant 0 : index
    %c3_1370 = arith.constant 3 : index
    %c1_1371 = arith.constant 1 : index
    %c0_1372 = arith.constant 0 : index
    %1432 = vector.load %arg1[%c0_1369, %c3_1370, %c1_1371, %c0_1372] : memref<1x16x5x5xf32, #tpu.memory_space<vmem>>, vector<1x1x4x4xf32>
    %1433 = vector.shape_cast %1432 : vector<1x1x4x4xf32> to vector<4x4xf32>
    %c0_1373 = arith.constant 0 : index
    %c7_1374 = arith.constant 7 : index
    %1434 = memref.load %arg2[%c0_1373, %c7_1374] : memref<8x9xf32, #tpu.memory_space<smem>>
    %1435 = vector.broadcast %1434 : f32 to vector<4x4xf32>
    %1436 = arith.mulf %1433, %1435 : vector<4x4xf32>
    %1437 = arith.addf %1425, %1436 : vector<4x4xf32>
    %c0_1375 = arith.constant 0 : index
    %c0_1376 = arith.constant 0 : index
    %c1_1377 = arith.constant 1 : index
    %c1_1378 = arith.constant 1 : index
    %1438 = vector.load %arg1[%c0_1375, %c0_1376, %c1_1377, %c1_1378] : memref<1x16x5x5xf32, #tpu.memory_space<vmem>>, vector<1x1x4x4xf32>
    %1439 = vector.shape_cast %1438 : vector<1x1x4x4xf32> to vector<4x4xf32>
    %c0_1379 = arith.constant 0 : index
    %c8_1380 = arith.constant 8 : index
    %1440 = memref.load %arg2[%c0_1379, %c8_1380] : memref<8x9xf32, #tpu.memory_space<smem>>
    %1441 = vector.broadcast %1440 : f32 to vector<4x4xf32>
    %1442 = arith.mulf %1439, %1441 : vector<4x4xf32>
    %1443 = arith.addf %1431, %1442 : vector<4x4xf32>
    %1444 = arith.addf %1443, %1437 : vector<4x4xf32>
    %c0_1381 = arith.constant 0 : index
    %1445 = memref.load %arg3[%c0_1381] : memref<8xf32, #tpu.memory_space<smem>>
    %1446 = vector.broadcast %1445 : f32 to vector<4x4xf32>
    %1447 = arith.addf %1444, %1446 : vector<4x4xf32>
    %cst_1382 = arith.constant 0.000000e+00 : f32
    %1448 = vector.broadcast %cst_1382 : f32 to vector<4x4xf32>
    %1449 = arith.maximumf %1447, %1448 : vector<4x4xf32>
    %c0_1383 = arith.constant 0 : index
    %c10_1384 = arith.constant 10 : index
    %c0_1385 = arith.constant 0 : index
    %c0_1386 = arith.constant 0 : index
    %1450 = vector.load %arg1[%c0_1383, %c10_1384, %c0_1385, %c0_1386] : memref<1x16x5x5xf32, #tpu.memory_space<vmem>>, vector<1x1x4x4xf32>
    %1451 = vector.shape_cast %1450 : vector<1x1x4x4xf32> to vector<4x4xf32>
    %c1_1387 = arith.constant 1 : index
    %c0_1388 = arith.constant 0 : index
    %1452 = memref.load %arg2[%c1_1387, %c0_1388] : memref<8x9xf32, #tpu.memory_space<smem>>
    %1453 = vector.broadcast %1452 : f32 to vector<4x4xf32>
    %1454 = arith.mulf %1451, %1453 : vector<4x4xf32>
    %c0_1389 = arith.constant 0 : index
    %c11_1390 = arith.constant 11 : index
    %c0_1391 = arith.constant 0 : index
    %c0_1392 = arith.constant 0 : index
    %1455 = vector.load %arg1[%c0_1389, %c11_1390, %c0_1391, %c0_1392] : memref<1x16x5x5xf32, #tpu.memory_space<vmem>>, vector<1x1x4x4xf32>
    %1456 = vector.shape_cast %1455 : vector<1x1x4x4xf32> to vector<4x4xf32>
    %c1_1393 = arith.constant 1 : index
    %c1_1394 = arith.constant 1 : index
    %1457 = memref.load %arg2[%c1_1393, %c1_1394] : memref<8x9xf32, #tpu.memory_space<smem>>
    %1458 = vector.broadcast %1457 : f32 to vector<4x4xf32>
    %1459 = arith.mulf %1456, %1458 : vector<4x4xf32>
    %c0_1395 = arith.constant 0 : index
    %c8_1396 = arith.constant 8 : index
    %c0_1397 = arith.constant 0 : index
    %c1_1398 = arith.constant 1 : index
    %1460 = vector.load %arg1[%c0_1395, %c8_1396, %c0_1397, %c1_1398] : memref<1x16x5x5xf32, #tpu.memory_space<vmem>>, vector<1x1x4x4xf32>
    %1461 = vector.shape_cast %1460 : vector<1x1x4x4xf32> to vector<4x4xf32>
    %c1_1399 = arith.constant 1 : index
    %c2_1400 = arith.constant 2 : index
    %1462 = memref.load %arg2[%c1_1399, %c2_1400] : memref<8x9xf32, #tpu.memory_space<smem>>
    %1463 = vector.broadcast %1462 : f32 to vector<4x4xf32>
    %1464 = arith.mulf %1461, %1463 : vector<4x4xf32>
    %1465 = arith.addf %1454, %1464 : vector<4x4xf32>
    %c0_1401 = arith.constant 0 : index
    %c14_1402 = arith.constant 14 : index
    %c0_1403 = arith.constant 0 : index
    %c0_1404 = arith.constant 0 : index
    %1466 = vector.load %arg1[%c0_1401, %c14_1402, %c0_1403, %c0_1404] : memref<1x16x5x5xf32, #tpu.memory_space<vmem>>, vector<1x1x4x4xf32>
    %1467 = vector.shape_cast %1466 : vector<1x1x4x4xf32> to vector<4x4xf32>
    %c1_1405 = arith.constant 1 : index
    %c3_1406 = arith.constant 3 : index
    %1468 = memref.load %arg2[%c1_1405, %c3_1406] : memref<8x9xf32, #tpu.memory_space<smem>>
    %1469 = vector.broadcast %1468 : f32 to vector<4x4xf32>
    %1470 = arith.mulf %1467, %1469 : vector<4x4xf32>
    %1471 = arith.addf %1459, %1470 : vector<4x4xf32>
    %c0_1407 = arith.constant 0 : index
    %c15_1408 = arith.constant 15 : index
    %c0_1409 = arith.constant 0 : index
    %c0_1410 = arith.constant 0 : index
    %1472 = vector.load %arg1[%c0_1407, %c15_1408, %c0_1409, %c0_1410] : memref<1x16x5x5xf32, #tpu.memory_space<vmem>>, vector<1x1x4x4xf32>
    %1473 = vector.shape_cast %1472 : vector<1x1x4x4xf32> to vector<4x4xf32>
    %c1_1411 = arith.constant 1 : index
    %c4_1412 = arith.constant 4 : index
    %1474 = memref.load %arg2[%c1_1411, %c4_1412] : memref<8x9xf32, #tpu.memory_space<smem>>
    %1475 = vector.broadcast %1474 : f32 to vector<4x4xf32>
    %1476 = arith.mulf %1473, %1475 : vector<4x4xf32>
    %1477 = arith.addf %1465, %1476 : vector<4x4xf32>
    %c0_1413 = arith.constant 0 : index
    %c12_1414 = arith.constant 12 : index
    %c0_1415 = arith.constant 0 : index
    %c1_1416 = arith.constant 1 : index
    %1478 = vector.load %arg1[%c0_1413, %c12_1414, %c0_1415, %c1_1416] : memref<1x16x5x5xf32, #tpu.memory_space<vmem>>, vector<1x1x4x4xf32>
    %1479 = vector.shape_cast %1478 : vector<1x1x4x4xf32> to vector<4x4xf32>
    %c1_1417 = arith.constant 1 : index
    %c5_1418 = arith.constant 5 : index
    %1480 = memref.load %arg2[%c1_1417, %c5_1418] : memref<8x9xf32, #tpu.memory_space<smem>>
    %1481 = vector.broadcast %1480 : f32 to vector<4x4xf32>
    %1482 = arith.mulf %1479, %1481 : vector<4x4xf32>
    %1483 = arith.addf %1471, %1482 : vector<4x4xf32>
    %c0_1419 = arith.constant 0 : index
    %c2_1420 = arith.constant 2 : index
    %c1_1421 = arith.constant 1 : index
    %c0_1422 = arith.constant 0 : index
    %1484 = vector.load %arg1[%c0_1419, %c2_1420, %c1_1421, %c0_1422] : memref<1x16x5x5xf32, #tpu.memory_space<vmem>>, vector<1x1x4x4xf32>
    %1485 = vector.shape_cast %1484 : vector<1x1x4x4xf32> to vector<4x4xf32>
    %c1_1423 = arith.constant 1 : index
    %c6_1424 = arith.constant 6 : index
    %1486 = memref.load %arg2[%c1_1423, %c6_1424] : memref<8x9xf32, #tpu.memory_space<smem>>
    %1487 = vector.broadcast %1486 : f32 to vector<4x4xf32>
    %1488 = arith.mulf %1485, %1487 : vector<4x4xf32>
    %1489 = arith.addf %1477, %1488 : vector<4x4xf32>
    %c0_1425 = arith.constant 0 : index
    %c3_1426 = arith.constant 3 : index
    %c1_1427 = arith.constant 1 : index
    %c0_1428 = arith.constant 0 : index
    %1490 = vector.load %arg1[%c0_1425, %c3_1426, %c1_1427, %c0_1428] : memref<1x16x5x5xf32, #tpu.memory_space<vmem>>, vector<1x1x4x4xf32>
    %1491 = vector.shape_cast %1490 : vector<1x1x4x4xf32> to vector<4x4xf32>
    %c1_1429 = arith.constant 1 : index
    %c7_1430 = arith.constant 7 : index
    %1492 = memref.load %arg2[%c1_1429, %c7_1430] : memref<8x9xf32, #tpu.memory_space<smem>>
    %1493 = vector.broadcast %1492 : f32 to vector<4x4xf32>
    %1494 = arith.mulf %1491, %1493 : vector<4x4xf32>
    %1495 = arith.addf %1483, %1494 : vector<4x4xf32>
    %c0_1431 = arith.constant 0 : index
    %c0_1432 = arith.constant 0 : index
    %c1_1433 = arith.constant 1 : index
    %c1_1434 = arith.constant 1 : index
    %1496 = vector.load %arg1[%c0_1431, %c0_1432, %c1_1433, %c1_1434] : memref<1x16x5x5xf32, #tpu.memory_space<vmem>>, vector<1x1x4x4xf32>
    %1497 = vector.shape_cast %1496 : vector<1x1x4x4xf32> to vector<4x4xf32>
    %c1_1435 = arith.constant 1 : index
    %c8_1436 = arith.constant 8 : index
    %1498 = memref.load %arg2[%c1_1435, %c8_1436] : memref<8x9xf32, #tpu.memory_space<smem>>
    %1499 = vector.broadcast %1498 : f32 to vector<4x4xf32>
    %1500 = arith.mulf %1497, %1499 : vector<4x4xf32>
    %1501 = arith.addf %1489, %1500 : vector<4x4xf32>
    %1502 = arith.addf %1501, %1495 : vector<4x4xf32>
    %c1_1437 = arith.constant 1 : index
    %1503 = memref.load %arg3[%c1_1437] : memref<8xf32, #tpu.memory_space<smem>>
    %1504 = vector.broadcast %1503 : f32 to vector<4x4xf32>
    %1505 = arith.addf %1502, %1504 : vector<4x4xf32>
    %cst_1438 = arith.constant 0.000000e+00 : f32
    %1506 = vector.broadcast %cst_1438 : f32 to vector<4x4xf32>
    %1507 = arith.maximumf %1505, %1506 : vector<4x4xf32>
    %c0_1439 = arith.constant 0 : index
    %c10_1440 = arith.constant 10 : index
    %c0_1441 = arith.constant 0 : index
    %c0_1442 = arith.constant 0 : index
    %1508 = vector.load %arg1[%c0_1439, %c10_1440, %c0_1441, %c0_1442] : memref<1x16x5x5xf32, #tpu.memory_space<vmem>>, vector<1x1x4x4xf32>
    %1509 = vector.shape_cast %1508 : vector<1x1x4x4xf32> to vector<4x4xf32>
    %c2_1443 = arith.constant 2 : index
    %c0_1444 = arith.constant 0 : index
    %1510 = memref.load %arg2[%c2_1443, %c0_1444] : memref<8x9xf32, #tpu.memory_space<smem>>
    %1511 = vector.broadcast %1510 : f32 to vector<4x4xf32>
    %1512 = arith.mulf %1509, %1511 : vector<4x4xf32>
    %c0_1445 = arith.constant 0 : index
    %c11_1446 = arith.constant 11 : index
    %c0_1447 = arith.constant 0 : index
    %c0_1448 = arith.constant 0 : index
    %1513 = vector.load %arg1[%c0_1445, %c11_1446, %c0_1447, %c0_1448] : memref<1x16x5x5xf32, #tpu.memory_space<vmem>>, vector<1x1x4x4xf32>
    %1514 = vector.shape_cast %1513 : vector<1x1x4x4xf32> to vector<4x4xf32>
    %c2_1449 = arith.constant 2 : index
    %c1_1450 = arith.constant 1 : index
    %1515 = memref.load %arg2[%c2_1449, %c1_1450] : memref<8x9xf32, #tpu.memory_space<smem>>
    %1516 = vector.broadcast %1515 : f32 to vector<4x4xf32>
    %1517 = arith.mulf %1514, %1516 : vector<4x4xf32>
    %c0_1451 = arith.constant 0 : index
    %c8_1452 = arith.constant 8 : index
    %c0_1453 = arith.constant 0 : index
    %c1_1454 = arith.constant 1 : index
    %1518 = vector.load %arg1[%c0_1451, %c8_1452, %c0_1453, %c1_1454] : memref<1x16x5x5xf32, #tpu.memory_space<vmem>>, vector<1x1x4x4xf32>
    %1519 = vector.shape_cast %1518 : vector<1x1x4x4xf32> to vector<4x4xf32>
    %c2_1455 = arith.constant 2 : index
    %c2_1456 = arith.constant 2 : index
    %1520 = memref.load %arg2[%c2_1455, %c2_1456] : memref<8x9xf32, #tpu.memory_space<smem>>
    %1521 = vector.broadcast %1520 : f32 to vector<4x4xf32>
    %1522 = arith.mulf %1519, %1521 : vector<4x4xf32>
    %1523 = arith.addf %1512, %1522 : vector<4x4xf32>
    %c0_1457 = arith.constant 0 : index
    %c14_1458 = arith.constant 14 : index
    %c0_1459 = arith.constant 0 : index
    %c0_1460 = arith.constant 0 : index
    %1524 = vector.load %arg1[%c0_1457, %c14_1458, %c0_1459, %c0_1460] : memref<1x16x5x5xf32, #tpu.memory_space<vmem>>, vector<1x1x4x4xf32>
    %1525 = vector.shape_cast %1524 : vector<1x1x4x4xf32> to vector<4x4xf32>
    %c2_1461 = arith.constant 2 : index
    %c3_1462 = arith.constant 3 : index
    %1526 = memref.load %arg2[%c2_1461, %c3_1462] : memref<8x9xf32, #tpu.memory_space<smem>>
    %1527 = vector.broadcast %1526 : f32 to vector<4x4xf32>
    %1528 = arith.mulf %1525, %1527 : vector<4x4xf32>
    %1529 = arith.addf %1517, %1528 : vector<4x4xf32>
    %c0_1463 = arith.constant 0 : index
    %c15_1464 = arith.constant 15 : index
    %c0_1465 = arith.constant 0 : index
    %c0_1466 = arith.constant 0 : index
    %1530 = vector.load %arg1[%c0_1463, %c15_1464, %c0_1465, %c0_1466] : memref<1x16x5x5xf32, #tpu.memory_space<vmem>>, vector<1x1x4x4xf32>
    %1531 = vector.shape_cast %1530 : vector<1x1x4x4xf32> to vector<4x4xf32>
    %c2_1467 = arith.constant 2 : index
    %c4_1468 = arith.constant 4 : index
    %1532 = memref.load %arg2[%c2_1467, %c4_1468] : memref<8x9xf32, #tpu.memory_space<smem>>
    %1533 = vector.broadcast %1532 : f32 to vector<4x4xf32>
    %1534 = arith.mulf %1531, %1533 : vector<4x4xf32>
    %1535 = arith.addf %1523, %1534 : vector<4x4xf32>
    %c0_1469 = arith.constant 0 : index
    %c12_1470 = arith.constant 12 : index
    %c0_1471 = arith.constant 0 : index
    %c1_1472 = arith.constant 1 : index
    %1536 = vector.load %arg1[%c0_1469, %c12_1470, %c0_1471, %c1_1472] : memref<1x16x5x5xf32, #tpu.memory_space<vmem>>, vector<1x1x4x4xf32>
    %1537 = vector.shape_cast %1536 : vector<1x1x4x4xf32> to vector<4x4xf32>
    %c2_1473 = arith.constant 2 : index
    %c5_1474 = arith.constant 5 : index
    %1538 = memref.load %arg2[%c2_1473, %c5_1474] : memref<8x9xf32, #tpu.memory_space<smem>>
    %1539 = vector.broadcast %1538 : f32 to vector<4x4xf32>
    %1540 = arith.mulf %1537, %1539 : vector<4x4xf32>
    %1541 = arith.addf %1529, %1540 : vector<4x4xf32>
    %c0_1475 = arith.constant 0 : index
    %c2_1476 = arith.constant 2 : index
    %c1_1477 = arith.constant 1 : index
    %c0_1478 = arith.constant 0 : index
    %1542 = vector.load %arg1[%c0_1475, %c2_1476, %c1_1477, %c0_1478] : memref<1x16x5x5xf32, #tpu.memory_space<vmem>>, vector<1x1x4x4xf32>
    %1543 = vector.shape_cast %1542 : vector<1x1x4x4xf32> to vector<4x4xf32>
    %c2_1479 = arith.constant 2 : index
    %c6_1480 = arith.constant 6 : index
    %1544 = memref.load %arg2[%c2_1479, %c6_1480] : memref<8x9xf32, #tpu.memory_space<smem>>
    %1545 = vector.broadcast %1544 : f32 to vector<4x4xf32>
    %1546 = arith.mulf %1543, %1545 : vector<4x4xf32>
    %1547 = arith.addf %1535, %1546 : vector<4x4xf32>
    %c0_1481 = arith.constant 0 : index
    %c3_1482 = arith.constant 3 : index
    %c1_1483 = arith.constant 1 : index
    %c0_1484 = arith.constant 0 : index
    %1548 = vector.load %arg1[%c0_1481, %c3_1482, %c1_1483, %c0_1484] : memref<1x16x5x5xf32, #tpu.memory_space<vmem>>, vector<1x1x4x4xf32>
    %1549 = vector.shape_cast %1548 : vector<1x1x4x4xf32> to vector<4x4xf32>
    %c2_1485 = arith.constant 2 : index
    %c7_1486 = arith.constant 7 : index
    %1550 = memref.load %arg2[%c2_1485, %c7_1486] : memref<8x9xf32, #tpu.memory_space<smem>>
    %1551 = vector.broadcast %1550 : f32 to vector<4x4xf32>
    %1552 = arith.mulf %1549, %1551 : vector<4x4xf32>
    %1553 = arith.addf %1541, %1552 : vector<4x4xf32>
    %c0_1487 = arith.constant 0 : index
    %c0_1488 = arith.constant 0 : index
    %c1_1489 = arith.constant 1 : index
    %c1_1490 = arith.constant 1 : index
    %1554 = vector.load %arg1[%c0_1487, %c0_1488, %c1_1489, %c1_1490] : memref<1x16x5x5xf32, #tpu.memory_space<vmem>>, vector<1x1x4x4xf32>
    %1555 = vector.shape_cast %1554 : vector<1x1x4x4xf32> to vector<4x4xf32>
    %c2_1491 = arith.constant 2 : index
    %c8_1492 = arith.constant 8 : index
    %1556 = memref.load %arg2[%c2_1491, %c8_1492] : memref<8x9xf32, #tpu.memory_space<smem>>
    %1557 = vector.broadcast %1556 : f32 to vector<4x4xf32>
    %1558 = arith.mulf %1555, %1557 : vector<4x4xf32>
    %1559 = arith.addf %1547, %1558 : vector<4x4xf32>
    %1560 = arith.addf %1559, %1553 : vector<4x4xf32>
    %c2_1493 = arith.constant 2 : index
    %1561 = memref.load %arg3[%c2_1493] : memref<8xf32, #tpu.memory_space<smem>>
    %1562 = vector.broadcast %1561 : f32 to vector<4x4xf32>
    %1563 = arith.addf %1560, %1562 : vector<4x4xf32>
    %cst_1494 = arith.constant 0.000000e+00 : f32
    %1564 = vector.broadcast %cst_1494 : f32 to vector<4x4xf32>
    %1565 = arith.maximumf %1563, %1564 : vector<4x4xf32>
    %c0_1495 = arith.constant 0 : index
    %c10_1496 = arith.constant 10 : index
    %c0_1497 = arith.constant 0 : index
    %c0_1498 = arith.constant 0 : index
    %1566 = vector.load %arg1[%c0_1495, %c10_1496, %c0_1497, %c0_1498] : memref<1x16x5x5xf32, #tpu.memory_space<vmem>>, vector<1x1x4x4xf32>
    %1567 = vector.shape_cast %1566 : vector<1x1x4x4xf32> to vector<4x4xf32>
    %c3_1499 = arith.constant 3 : index
    %c0_1500 = arith.constant 0 : index
    %1568 = memref.load %arg2[%c3_1499, %c0_1500] : memref<8x9xf32, #tpu.memory_space<smem>>
    %1569 = vector.broadcast %1568 : f32 to vector<4x4xf32>
    %1570 = arith.mulf %1567, %1569 : vector<4x4xf32>
    %c0_1501 = arith.constant 0 : index
    %c11_1502 = arith.constant 11 : index
    %c0_1503 = arith.constant 0 : index
    %c0_1504 = arith.constant 0 : index
    %1571 = vector.load %arg1[%c0_1501, %c11_1502, %c0_1503, %c0_1504] : memref<1x16x5x5xf32, #tpu.memory_space<vmem>>, vector<1x1x4x4xf32>
    %1572 = vector.shape_cast %1571 : vector<1x1x4x4xf32> to vector<4x4xf32>
    %c3_1505 = arith.constant 3 : index
    %c1_1506 = arith.constant 1 : index
    %1573 = memref.load %arg2[%c3_1505, %c1_1506] : memref<8x9xf32, #tpu.memory_space<smem>>
    %1574 = vector.broadcast %1573 : f32 to vector<4x4xf32>
    %1575 = arith.mulf %1572, %1574 : vector<4x4xf32>
    %c0_1507 = arith.constant 0 : index
    %c8_1508 = arith.constant 8 : index
    %c0_1509 = arith.constant 0 : index
    %c1_1510 = arith.constant 1 : index
    %1576 = vector.load %arg1[%c0_1507, %c8_1508, %c0_1509, %c1_1510] : memref<1x16x5x5xf32, #tpu.memory_space<vmem>>, vector<1x1x4x4xf32>
    %1577 = vector.shape_cast %1576 : vector<1x1x4x4xf32> to vector<4x4xf32>
    %c3_1511 = arith.constant 3 : index
    %c2_1512 = arith.constant 2 : index
    %1578 = memref.load %arg2[%c3_1511, %c2_1512] : memref<8x9xf32, #tpu.memory_space<smem>>
    %1579 = vector.broadcast %1578 : f32 to vector<4x4xf32>
    %1580 = arith.mulf %1577, %1579 : vector<4x4xf32>
    %1581 = arith.addf %1570, %1580 : vector<4x4xf32>
    %c0_1513 = arith.constant 0 : index
    %c14_1514 = arith.constant 14 : index
    %c0_1515 = arith.constant 0 : index
    %c0_1516 = arith.constant 0 : index
    %1582 = vector.load %arg1[%c0_1513, %c14_1514, %c0_1515, %c0_1516] : memref<1x16x5x5xf32, #tpu.memory_space<vmem>>, vector<1x1x4x4xf32>
    %1583 = vector.shape_cast %1582 : vector<1x1x4x4xf32> to vector<4x4xf32>
    %c3_1517 = arith.constant 3 : index
    %c3_1518 = arith.constant 3 : index
    %1584 = memref.load %arg2[%c3_1517, %c3_1518] : memref<8x9xf32, #tpu.memory_space<smem>>
    %1585 = vector.broadcast %1584 : f32 to vector<4x4xf32>
    %1586 = arith.mulf %1583, %1585 : vector<4x4xf32>
    %1587 = arith.addf %1575, %1586 : vector<4x4xf32>
    %c0_1519 = arith.constant 0 : index
    %c15_1520 = arith.constant 15 : index
    %c0_1521 = arith.constant 0 : index
    %c0_1522 = arith.constant 0 : index
    %1588 = vector.load %arg1[%c0_1519, %c15_1520, %c0_1521, %c0_1522] : memref<1x16x5x5xf32, #tpu.memory_space<vmem>>, vector<1x1x4x4xf32>
    %1589 = vector.shape_cast %1588 : vector<1x1x4x4xf32> to vector<4x4xf32>
    %c3_1523 = arith.constant 3 : index
    %c4_1524 = arith.constant 4 : index
    %1590 = memref.load %arg2[%c3_1523, %c4_1524] : memref<8x9xf32, #tpu.memory_space<smem>>
    %1591 = vector.broadcast %1590 : f32 to vector<4x4xf32>
    %1592 = arith.mulf %1589, %1591 : vector<4x4xf32>
    %1593 = arith.addf %1581, %1592 : vector<4x4xf32>
    %c0_1525 = arith.constant 0 : index
    %c12_1526 = arith.constant 12 : index
    %c0_1527 = arith.constant 0 : index
    %c1_1528 = arith.constant 1 : index
    %1594 = vector.load %arg1[%c0_1525, %c12_1526, %c0_1527, %c1_1528] : memref<1x16x5x5xf32, #tpu.memory_space<vmem>>, vector<1x1x4x4xf32>
    %1595 = vector.shape_cast %1594 : vector<1x1x4x4xf32> to vector<4x4xf32>
    %c3_1529 = arith.constant 3 : index
    %c5_1530 = arith.constant 5 : index
    %1596 = memref.load %arg2[%c3_1529, %c5_1530] : memref<8x9xf32, #tpu.memory_space<smem>>
    %1597 = vector.broadcast %1596 : f32 to vector<4x4xf32>
    %1598 = arith.mulf %1595, %1597 : vector<4x4xf32>
    %1599 = arith.addf %1587, %1598 : vector<4x4xf32>
    %c0_1531 = arith.constant 0 : index
    %c2_1532 = arith.constant 2 : index
    %c1_1533 = arith.constant 1 : index
    %c0_1534 = arith.constant 0 : index
    %1600 = vector.load %arg1[%c0_1531, %c2_1532, %c1_1533, %c0_1534] : memref<1x16x5x5xf32, #tpu.memory_space<vmem>>, vector<1x1x4x4xf32>
    %1601 = vector.shape_cast %1600 : vector<1x1x4x4xf32> to vector<4x4xf32>
    %c3_1535 = arith.constant 3 : index
    %c6_1536 = arith.constant 6 : index
    %1602 = memref.load %arg2[%c3_1535, %c6_1536] : memref<8x9xf32, #tpu.memory_space<smem>>
    %1603 = vector.broadcast %1602 : f32 to vector<4x4xf32>
    %1604 = arith.mulf %1601, %1603 : vector<4x4xf32>
    %1605 = arith.addf %1593, %1604 : vector<4x4xf32>
    %c0_1537 = arith.constant 0 : index
    %c3_1538 = arith.constant 3 : index
    %c1_1539 = arith.constant 1 : index
    %c0_1540 = arith.constant 0 : index
    %1606 = vector.load %arg1[%c0_1537, %c3_1538, %c1_1539, %c0_1540] : memref<1x16x5x5xf32, #tpu.memory_space<vmem>>, vector<1x1x4x4xf32>
    %1607 = vector.shape_cast %1606 : vector<1x1x4x4xf32> to vector<4x4xf32>
    %c3_1541 = arith.constant 3 : index
    %c7_1542 = arith.constant 7 : index
    %1608 = memref.load %arg2[%c3_1541, %c7_1542] : memref<8x9xf32, #tpu.memory_space<smem>>
    %1609 = vector.broadcast %1608 : f32 to vector<4x4xf32>
    %1610 = arith.mulf %1607, %1609 : vector<4x4xf32>
    %1611 = arith.addf %1599, %1610 : vector<4x4xf32>
    %c0_1543 = arith.constant 0 : index
    %c0_1544 = arith.constant 0 : index
    %c1_1545 = arith.constant 1 : index
    %c1_1546 = arith.constant 1 : index
    %1612 = vector.load %arg1[%c0_1543, %c0_1544, %c1_1545, %c1_1546] : memref<1x16x5x5xf32, #tpu.memory_space<vmem>>, vector<1x1x4x4xf32>
    %1613 = vector.shape_cast %1612 : vector<1x1x4x4xf32> to vector<4x4xf32>
    %c3_1547 = arith.constant 3 : index
    %c8_1548 = arith.constant 8 : index
    %1614 = memref.load %arg2[%c3_1547, %c8_1548] : memref<8x9xf32, #tpu.memory_space<smem>>
    %1615 = vector.broadcast %1614 : f32 to vector<4x4xf32>
    %1616 = arith.mulf %1613, %1615 : vector<4x4xf32>
    %1617 = arith.addf %1605, %1616 : vector<4x4xf32>
    %1618 = arith.addf %1617, %1611 : vector<4x4xf32>
    %c3_1549 = arith.constant 3 : index
    %1619 = memref.load %arg3[%c3_1549] : memref<8xf32, #tpu.memory_space<smem>>
    %1620 = vector.broadcast %1619 : f32 to vector<4x4xf32>
    %1621 = arith.addf %1618, %1620 : vector<4x4xf32>
    %cst_1550 = arith.constant 0.000000e+00 : f32
    %1622 = vector.broadcast %cst_1550 : f32 to vector<4x4xf32>
    %1623 = arith.maximumf %1621, %1622 : vector<4x4xf32>
    %c0_1551 = arith.constant 0 : index
    %c10_1552 = arith.constant 10 : index
    %c0_1553 = arith.constant 0 : index
    %c0_1554 = arith.constant 0 : index
    %1624 = vector.load %arg1[%c0_1551, %c10_1552, %c0_1553, %c0_1554] : memref<1x16x5x5xf32, #tpu.memory_space<vmem>>, vector<1x1x4x4xf32>
    %1625 = vector.shape_cast %1624 : vector<1x1x4x4xf32> to vector<4x4xf32>
    %c4_1555 = arith.constant 4 : index
    %c0_1556 = arith.constant 0 : index
    %1626 = memref.load %arg2[%c4_1555, %c0_1556] : memref<8x9xf32, #tpu.memory_space<smem>>
    %1627 = vector.broadcast %1626 : f32 to vector<4x4xf32>
    %1628 = arith.mulf %1625, %1627 : vector<4x4xf32>
    %c0_1557 = arith.constant 0 : index
    %c11_1558 = arith.constant 11 : index
    %c0_1559 = arith.constant 0 : index
    %c0_1560 = arith.constant 0 : index
    %1629 = vector.load %arg1[%c0_1557, %c11_1558, %c0_1559, %c0_1560] : memref<1x16x5x5xf32, #tpu.memory_space<vmem>>, vector<1x1x4x4xf32>
    %1630 = vector.shape_cast %1629 : vector<1x1x4x4xf32> to vector<4x4xf32>
    %c4_1561 = arith.constant 4 : index
    %c1_1562 = arith.constant 1 : index
    %1631 = memref.load %arg2[%c4_1561, %c1_1562] : memref<8x9xf32, #tpu.memory_space<smem>>
    %1632 = vector.broadcast %1631 : f32 to vector<4x4xf32>
    %1633 = arith.mulf %1630, %1632 : vector<4x4xf32>
    %c0_1563 = arith.constant 0 : index
    %c8_1564 = arith.constant 8 : index
    %c0_1565 = arith.constant 0 : index
    %c1_1566 = arith.constant 1 : index
    %1634 = vector.load %arg1[%c0_1563, %c8_1564, %c0_1565, %c1_1566] : memref<1x16x5x5xf32, #tpu.memory_space<vmem>>, vector<1x1x4x4xf32>
    %1635 = vector.shape_cast %1634 : vector<1x1x4x4xf32> to vector<4x4xf32>
    %c4_1567 = arith.constant 4 : index
    %c2_1568 = arith.constant 2 : index
    %1636 = memref.load %arg2[%c4_1567, %c2_1568] : memref<8x9xf32, #tpu.memory_space<smem>>
    %1637 = vector.broadcast %1636 : f32 to vector<4x4xf32>
    %1638 = arith.mulf %1635, %1637 : vector<4x4xf32>
    %1639 = arith.addf %1628, %1638 : vector<4x4xf32>
    %c0_1569 = arith.constant 0 : index
    %c14_1570 = arith.constant 14 : index
    %c0_1571 = arith.constant 0 : index
    %c0_1572 = arith.constant 0 : index
    %1640 = vector.load %arg1[%c0_1569, %c14_1570, %c0_1571, %c0_1572] : memref<1x16x5x5xf32, #tpu.memory_space<vmem>>, vector<1x1x4x4xf32>
    %1641 = vector.shape_cast %1640 : vector<1x1x4x4xf32> to vector<4x4xf32>
    %c4_1573 = arith.constant 4 : index
    %c3_1574 = arith.constant 3 : index
    %1642 = memref.load %arg2[%c4_1573, %c3_1574] : memref<8x9xf32, #tpu.memory_space<smem>>
    %1643 = vector.broadcast %1642 : f32 to vector<4x4xf32>
    %1644 = arith.mulf %1641, %1643 : vector<4x4xf32>
    %1645 = arith.addf %1633, %1644 : vector<4x4xf32>
    %c0_1575 = arith.constant 0 : index
    %c15_1576 = arith.constant 15 : index
    %c0_1577 = arith.constant 0 : index
    %c0_1578 = arith.constant 0 : index
    %1646 = vector.load %arg1[%c0_1575, %c15_1576, %c0_1577, %c0_1578] : memref<1x16x5x5xf32, #tpu.memory_space<vmem>>, vector<1x1x4x4xf32>
    %1647 = vector.shape_cast %1646 : vector<1x1x4x4xf32> to vector<4x4xf32>
    %c4_1579 = arith.constant 4 : index
    %c4_1580 = arith.constant 4 : index
    %1648 = memref.load %arg2[%c4_1579, %c4_1580] : memref<8x9xf32, #tpu.memory_space<smem>>
    %1649 = vector.broadcast %1648 : f32 to vector<4x4xf32>
    %1650 = arith.mulf %1647, %1649 : vector<4x4xf32>
    %1651 = arith.addf %1639, %1650 : vector<4x4xf32>
    %c0_1581 = arith.constant 0 : index
    %c12_1582 = arith.constant 12 : index
    %c0_1583 = arith.constant 0 : index
    %c1_1584 = arith.constant 1 : index
    %1652 = vector.load %arg1[%c0_1581, %c12_1582, %c0_1583, %c1_1584] : memref<1x16x5x5xf32, #tpu.memory_space<vmem>>, vector<1x1x4x4xf32>
    %1653 = vector.shape_cast %1652 : vector<1x1x4x4xf32> to vector<4x4xf32>
    %c4_1585 = arith.constant 4 : index
    %c5_1586 = arith.constant 5 : index
    %1654 = memref.load %arg2[%c4_1585, %c5_1586] : memref<8x9xf32, #tpu.memory_space<smem>>
    %1655 = vector.broadcast %1654 : f32 to vector<4x4xf32>
    %1656 = arith.mulf %1653, %1655 : vector<4x4xf32>
    %1657 = arith.addf %1645, %1656 : vector<4x4xf32>
    %c0_1587 = arith.constant 0 : index
    %c2_1588 = arith.constant 2 : index
    %c1_1589 = arith.constant 1 : index
    %c0_1590 = arith.constant 0 : index
    %1658 = vector.load %arg1[%c0_1587, %c2_1588, %c1_1589, %c0_1590] : memref<1x16x5x5xf32, #tpu.memory_space<vmem>>, vector<1x1x4x4xf32>
    %1659 = vector.shape_cast %1658 : vector<1x1x4x4xf32> to vector<4x4xf32>
    %c4_1591 = arith.constant 4 : index
    %c6_1592 = arith.constant 6 : index
    %1660 = memref.load %arg2[%c4_1591, %c6_1592] : memref<8x9xf32, #tpu.memory_space<smem>>
    %1661 = vector.broadcast %1660 : f32 to vector<4x4xf32>
    %1662 = arith.mulf %1659, %1661 : vector<4x4xf32>
    %1663 = arith.addf %1651, %1662 : vector<4x4xf32>
    %c0_1593 = arith.constant 0 : index
    %c3_1594 = arith.constant 3 : index
    %c1_1595 = arith.constant 1 : index
    %c0_1596 = arith.constant 0 : index
    %1664 = vector.load %arg1[%c0_1593, %c3_1594, %c1_1595, %c0_1596] : memref<1x16x5x5xf32, #tpu.memory_space<vmem>>, vector<1x1x4x4xf32>
    %1665 = vector.shape_cast %1664 : vector<1x1x4x4xf32> to vector<4x4xf32>
    %c4_1597 = arith.constant 4 : index
    %c7_1598 = arith.constant 7 : index
    %1666 = memref.load %arg2[%c4_1597, %c7_1598] : memref<8x9xf32, #tpu.memory_space<smem>>
    %1667 = vector.broadcast %1666 : f32 to vector<4x4xf32>
    %1668 = arith.mulf %1665, %1667 : vector<4x4xf32>
    %1669 = arith.addf %1657, %1668 : vector<4x4xf32>
    %c0_1599 = arith.constant 0 : index
    %c0_1600 = arith.constant 0 : index
    %c1_1601 = arith.constant 1 : index
    %c1_1602 = arith.constant 1 : index
    %1670 = vector.load %arg1[%c0_1599, %c0_1600, %c1_1601, %c1_1602] : memref<1x16x5x5xf32, #tpu.memory_space<vmem>>, vector<1x1x4x4xf32>
    %1671 = vector.shape_cast %1670 : vector<1x1x4x4xf32> to vector<4x4xf32>
    %c4_1603 = arith.constant 4 : index
    %c8_1604 = arith.constant 8 : index
    %1672 = memref.load %arg2[%c4_1603, %c8_1604] : memref<8x9xf32, #tpu.memory_space<smem>>
    %1673 = vector.broadcast %1672 : f32 to vector<4x4xf32>
    %1674 = arith.mulf %1671, %1673 : vector<4x4xf32>
    %1675 = arith.addf %1663, %1674 : vector<4x4xf32>
    %1676 = arith.addf %1675, %1669 : vector<4x4xf32>
    %c4_1605 = arith.constant 4 : index
    %1677 = memref.load %arg3[%c4_1605] : memref<8xf32, #tpu.memory_space<smem>>
    %1678 = vector.broadcast %1677 : f32 to vector<4x4xf32>
    %1679 = arith.addf %1676, %1678 : vector<4x4xf32>
    %cst_1606 = arith.constant 0.000000e+00 : f32
    %1680 = vector.broadcast %cst_1606 : f32 to vector<4x4xf32>
    %1681 = arith.maximumf %1679, %1680 : vector<4x4xf32>
    %c0_1607 = arith.constant 0 : index
    %c10_1608 = arith.constant 10 : index
    %c0_1609 = arith.constant 0 : index
    %c0_1610 = arith.constant 0 : index
    %1682 = vector.load %arg1[%c0_1607, %c10_1608, %c0_1609, %c0_1610] : memref<1x16x5x5xf32, #tpu.memory_space<vmem>>, vector<1x1x4x4xf32>
    %1683 = vector.shape_cast %1682 : vector<1x1x4x4xf32> to vector<4x4xf32>
    %c5_1611 = arith.constant 5 : index
    %c0_1612 = arith.constant 0 : index
    %1684 = memref.load %arg2[%c5_1611, %c0_1612] : memref<8x9xf32, #tpu.memory_space<smem>>
    %1685 = vector.broadcast %1684 : f32 to vector<4x4xf32>
    %1686 = arith.mulf %1683, %1685 : vector<4x4xf32>
    %c0_1613 = arith.constant 0 : index
    %c11_1614 = arith.constant 11 : index
    %c0_1615 = arith.constant 0 : index
    %c0_1616 = arith.constant 0 : index
    %1687 = vector.load %arg1[%c0_1613, %c11_1614, %c0_1615, %c0_1616] : memref<1x16x5x5xf32, #tpu.memory_space<vmem>>, vector<1x1x4x4xf32>
    %1688 = vector.shape_cast %1687 : vector<1x1x4x4xf32> to vector<4x4xf32>
    %c5_1617 = arith.constant 5 : index
    %c1_1618 = arith.constant 1 : index
    %1689 = memref.load %arg2[%c5_1617, %c1_1618] : memref<8x9xf32, #tpu.memory_space<smem>>
    %1690 = vector.broadcast %1689 : f32 to vector<4x4xf32>
    %1691 = arith.mulf %1688, %1690 : vector<4x4xf32>
    %c0_1619 = arith.constant 0 : index
    %c8_1620 = arith.constant 8 : index
    %c0_1621 = arith.constant 0 : index
    %c1_1622 = arith.constant 1 : index
    %1692 = vector.load %arg1[%c0_1619, %c8_1620, %c0_1621, %c1_1622] : memref<1x16x5x5xf32, #tpu.memory_space<vmem>>, vector<1x1x4x4xf32>
    %1693 = vector.shape_cast %1692 : vector<1x1x4x4xf32> to vector<4x4xf32>
    %c5_1623 = arith.constant 5 : index
    %c2_1624 = arith.constant 2 : index
    %1694 = memref.load %arg2[%c5_1623, %c2_1624] : memref<8x9xf32, #tpu.memory_space<smem>>
    %1695 = vector.broadcast %1694 : f32 to vector<4x4xf32>
    %1696 = arith.mulf %1693, %1695 : vector<4x4xf32>
    %1697 = arith.addf %1686, %1696 : vector<4x4xf32>
    %c0_1625 = arith.constant 0 : index
    %c14_1626 = arith.constant 14 : index
    %c0_1627 = arith.constant 0 : index
    %c0_1628 = arith.constant 0 : index
    %1698 = vector.load %arg1[%c0_1625, %c14_1626, %c0_1627, %c0_1628] : memref<1x16x5x5xf32, #tpu.memory_space<vmem>>, vector<1x1x4x4xf32>
    %1699 = vector.shape_cast %1698 : vector<1x1x4x4xf32> to vector<4x4xf32>
    %c5_1629 = arith.constant 5 : index
    %c3_1630 = arith.constant 3 : index
    %1700 = memref.load %arg2[%c5_1629, %c3_1630] : memref<8x9xf32, #tpu.memory_space<smem>>
    %1701 = vector.broadcast %1700 : f32 to vector<4x4xf32>
    %1702 = arith.mulf %1699, %1701 : vector<4x4xf32>
    %1703 = arith.addf %1691, %1702 : vector<4x4xf32>
    %c0_1631 = arith.constant 0 : index
    %c15_1632 = arith.constant 15 : index
    %c0_1633 = arith.constant 0 : index
    %c0_1634 = arith.constant 0 : index
    %1704 = vector.load %arg1[%c0_1631, %c15_1632, %c0_1633, %c0_1634] : memref<1x16x5x5xf32, #tpu.memory_space<vmem>>, vector<1x1x4x4xf32>
    %1705 = vector.shape_cast %1704 : vector<1x1x4x4xf32> to vector<4x4xf32>
    %c5_1635 = arith.constant 5 : index
    %c4_1636 = arith.constant 4 : index
    %1706 = memref.load %arg2[%c5_1635, %c4_1636] : memref<8x9xf32, #tpu.memory_space<smem>>
    %1707 = vector.broadcast %1706 : f32 to vector<4x4xf32>
    %1708 = arith.mulf %1705, %1707 : vector<4x4xf32>
    %1709 = arith.addf %1697, %1708 : vector<4x4xf32>
    %c0_1637 = arith.constant 0 : index
    %c12_1638 = arith.constant 12 : index
    %c0_1639 = arith.constant 0 : index
    %c1_1640 = arith.constant 1 : index
    %1710 = vector.load %arg1[%c0_1637, %c12_1638, %c0_1639, %c1_1640] : memref<1x16x5x5xf32, #tpu.memory_space<vmem>>, vector<1x1x4x4xf32>
    %1711 = vector.shape_cast %1710 : vector<1x1x4x4xf32> to vector<4x4xf32>
    %c5_1641 = arith.constant 5 : index
    %c5_1642 = arith.constant 5 : index
    %1712 = memref.load %arg2[%c5_1641, %c5_1642] : memref<8x9xf32, #tpu.memory_space<smem>>
    %1713 = vector.broadcast %1712 : f32 to vector<4x4xf32>
    %1714 = arith.mulf %1711, %1713 : vector<4x4xf32>
    %1715 = arith.addf %1703, %1714 : vector<4x4xf32>
    %c0_1643 = arith.constant 0 : index
    %c2_1644 = arith.constant 2 : index
    %c1_1645 = arith.constant 1 : index
    %c0_1646 = arith.constant 0 : index
    %1716 = vector.load %arg1[%c0_1643, %c2_1644, %c1_1645, %c0_1646] : memref<1x16x5x5xf32, #tpu.memory_space<vmem>>, vector<1x1x4x4xf32>
    %1717 = vector.shape_cast %1716 : vector<1x1x4x4xf32> to vector<4x4xf32>
    %c5_1647 = arith.constant 5 : index
    %c6_1648 = arith.constant 6 : index
    %1718 = memref.load %arg2[%c5_1647, %c6_1648] : memref<8x9xf32, #tpu.memory_space<smem>>
    %1719 = vector.broadcast %1718 : f32 to vector<4x4xf32>
    %1720 = arith.mulf %1717, %1719 : vector<4x4xf32>
    %1721 = arith.addf %1709, %1720 : vector<4x4xf32>
    %c0_1649 = arith.constant 0 : index
    %c3_1650 = arith.constant 3 : index
    %c1_1651 = arith.constant 1 : index
    %c0_1652 = arith.constant 0 : index
    %1722 = vector.load %arg1[%c0_1649, %c3_1650, %c1_1651, %c0_1652] : memref<1x16x5x5xf32, #tpu.memory_space<vmem>>, vector<1x1x4x4xf32>
    %1723 = vector.shape_cast %1722 : vector<1x1x4x4xf32> to vector<4x4xf32>
    %c5_1653 = arith.constant 5 : index
    %c7_1654 = arith.constant 7 : index
    %1724 = memref.load %arg2[%c5_1653, %c7_1654] : memref<8x9xf32, #tpu.memory_space<smem>>
    %1725 = vector.broadcast %1724 : f32 to vector<4x4xf32>
    %1726 = arith.mulf %1723, %1725 : vector<4x4xf32>
    %1727 = arith.addf %1715, %1726 : vector<4x4xf32>
    %c0_1655 = arith.constant 0 : index
    %c0_1656 = arith.constant 0 : index
    %c1_1657 = arith.constant 1 : index
    %c1_1658 = arith.constant 1 : index
    %1728 = vector.load %arg1[%c0_1655, %c0_1656, %c1_1657, %c1_1658] : memref<1x16x5x5xf32, #tpu.memory_space<vmem>>, vector<1x1x4x4xf32>
    %1729 = vector.shape_cast %1728 : vector<1x1x4x4xf32> to vector<4x4xf32>
    %c5_1659 = arith.constant 5 : index
    %c8_1660 = arith.constant 8 : index
    %1730 = memref.load %arg2[%c5_1659, %c8_1660] : memref<8x9xf32, #tpu.memory_space<smem>>
    %1731 = vector.broadcast %1730 : f32 to vector<4x4xf32>
    %1732 = arith.mulf %1729, %1731 : vector<4x4xf32>
    %1733 = arith.addf %1721, %1732 : vector<4x4xf32>
    %1734 = arith.addf %1733, %1727 : vector<4x4xf32>
    %c5_1661 = arith.constant 5 : index
    %1735 = memref.load %arg3[%c5_1661] : memref<8xf32, #tpu.memory_space<smem>>
    %1736 = vector.broadcast %1735 : f32 to vector<4x4xf32>
    %1737 = arith.addf %1734, %1736 : vector<4x4xf32>
    %cst_1662 = arith.constant 0.000000e+00 : f32
    %1738 = vector.broadcast %cst_1662 : f32 to vector<4x4xf32>
    %1739 = arith.maximumf %1737, %1738 : vector<4x4xf32>
    %c0_1663 = arith.constant 0 : index
    %c10_1664 = arith.constant 10 : index
    %c0_1665 = arith.constant 0 : index
    %c0_1666 = arith.constant 0 : index
    %1740 = vector.load %arg1[%c0_1663, %c10_1664, %c0_1665, %c0_1666] : memref<1x16x5x5xf32, #tpu.memory_space<vmem>>, vector<1x1x4x4xf32>
    %1741 = vector.shape_cast %1740 : vector<1x1x4x4xf32> to vector<4x4xf32>
    %c6_1667 = arith.constant 6 : index
    %c0_1668 = arith.constant 0 : index
    %1742 = memref.load %arg2[%c6_1667, %c0_1668] : memref<8x9xf32, #tpu.memory_space<smem>>
    %1743 = vector.broadcast %1742 : f32 to vector<4x4xf32>
    %1744 = arith.mulf %1741, %1743 : vector<4x4xf32>
    %c0_1669 = arith.constant 0 : index
    %c11_1670 = arith.constant 11 : index
    %c0_1671 = arith.constant 0 : index
    %c0_1672 = arith.constant 0 : index
    %1745 = vector.load %arg1[%c0_1669, %c11_1670, %c0_1671, %c0_1672] : memref<1x16x5x5xf32, #tpu.memory_space<vmem>>, vector<1x1x4x4xf32>
    %1746 = vector.shape_cast %1745 : vector<1x1x4x4xf32> to vector<4x4xf32>
    %c6_1673 = arith.constant 6 : index
    %c1_1674 = arith.constant 1 : index
    %1747 = memref.load %arg2[%c6_1673, %c1_1674] : memref<8x9xf32, #tpu.memory_space<smem>>
    %1748 = vector.broadcast %1747 : f32 to vector<4x4xf32>
    %1749 = arith.mulf %1746, %1748 : vector<4x4xf32>
    %c0_1675 = arith.constant 0 : index
    %c8_1676 = arith.constant 8 : index
    %c0_1677 = arith.constant 0 : index
    %c1_1678 = arith.constant 1 : index
    %1750 = vector.load %arg1[%c0_1675, %c8_1676, %c0_1677, %c1_1678] : memref<1x16x5x5xf32, #tpu.memory_space<vmem>>, vector<1x1x4x4xf32>
    %1751 = vector.shape_cast %1750 : vector<1x1x4x4xf32> to vector<4x4xf32>
    %c6_1679 = arith.constant 6 : index
    %c2_1680 = arith.constant 2 : index
    %1752 = memref.load %arg2[%c6_1679, %c2_1680] : memref<8x9xf32, #tpu.memory_space<smem>>
    %1753 = vector.broadcast %1752 : f32 to vector<4x4xf32>
    %1754 = arith.mulf %1751, %1753 : vector<4x4xf32>
    %1755 = arith.addf %1744, %1754 : vector<4x4xf32>
    %c0_1681 = arith.constant 0 : index
    %c14_1682 = arith.constant 14 : index
    %c0_1683 = arith.constant 0 : index
    %c0_1684 = arith.constant 0 : index
    %1756 = vector.load %arg1[%c0_1681, %c14_1682, %c0_1683, %c0_1684] : memref<1x16x5x5xf32, #tpu.memory_space<vmem>>, vector<1x1x4x4xf32>
    %1757 = vector.shape_cast %1756 : vector<1x1x4x4xf32> to vector<4x4xf32>
    %c6_1685 = arith.constant 6 : index
    %c3_1686 = arith.constant 3 : index
    %1758 = memref.load %arg2[%c6_1685, %c3_1686] : memref<8x9xf32, #tpu.memory_space<smem>>
    %1759 = vector.broadcast %1758 : f32 to vector<4x4xf32>
    %1760 = arith.mulf %1757, %1759 : vector<4x4xf32>
    %1761 = arith.addf %1749, %1760 : vector<4x4xf32>
    %c0_1687 = arith.constant 0 : index
    %c15_1688 = arith.constant 15 : index
    %c0_1689 = arith.constant 0 : index
    %c0_1690 = arith.constant 0 : index
    %1762 = vector.load %arg1[%c0_1687, %c15_1688, %c0_1689, %c0_1690] : memref<1x16x5x5xf32, #tpu.memory_space<vmem>>, vector<1x1x4x4xf32>
    %1763 = vector.shape_cast %1762 : vector<1x1x4x4xf32> to vector<4x4xf32>
    %c6_1691 = arith.constant 6 : index
    %c4_1692 = arith.constant 4 : index
    %1764 = memref.load %arg2[%c6_1691, %c4_1692] : memref<8x9xf32, #tpu.memory_space<smem>>
    %1765 = vector.broadcast %1764 : f32 to vector<4x4xf32>
    %1766 = arith.mulf %1763, %1765 : vector<4x4xf32>
    %1767 = arith.addf %1755, %1766 : vector<4x4xf32>
    %c0_1693 = arith.constant 0 : index
    %c12_1694 = arith.constant 12 : index
    %c0_1695 = arith.constant 0 : index
    %c1_1696 = arith.constant 1 : index
    %1768 = vector.load %arg1[%c0_1693, %c12_1694, %c0_1695, %c1_1696] : memref<1x16x5x5xf32, #tpu.memory_space<vmem>>, vector<1x1x4x4xf32>
    %1769 = vector.shape_cast %1768 : vector<1x1x4x4xf32> to vector<4x4xf32>
    %c6_1697 = arith.constant 6 : index
    %c5_1698 = arith.constant 5 : index
    %1770 = memref.load %arg2[%c6_1697, %c5_1698] : memref<8x9xf32, #tpu.memory_space<smem>>
    %1771 = vector.broadcast %1770 : f32 to vector<4x4xf32>
    %1772 = arith.mulf %1769, %1771 : vector<4x4xf32>
    %1773 = arith.addf %1761, %1772 : vector<4x4xf32>
    %c0_1699 = arith.constant 0 : index
    %c2_1700 = arith.constant 2 : index
    %c1_1701 = arith.constant 1 : index
    %c0_1702 = arith.constant 0 : index
    %1774 = vector.load %arg1[%c0_1699, %c2_1700, %c1_1701, %c0_1702] : memref<1x16x5x5xf32, #tpu.memory_space<vmem>>, vector<1x1x4x4xf32>
    %1775 = vector.shape_cast %1774 : vector<1x1x4x4xf32> to vector<4x4xf32>
    %c6_1703 = arith.constant 6 : index
    %c6_1704 = arith.constant 6 : index
    %1776 = memref.load %arg2[%c6_1703, %c6_1704] : memref<8x9xf32, #tpu.memory_space<smem>>
    %1777 = vector.broadcast %1776 : f32 to vector<4x4xf32>
    %1778 = arith.mulf %1775, %1777 : vector<4x4xf32>
    %1779 = arith.addf %1767, %1778 : vector<4x4xf32>
    %c0_1705 = arith.constant 0 : index
    %c3_1706 = arith.constant 3 : index
    %c1_1707 = arith.constant 1 : index
    %c0_1708 = arith.constant 0 : index
    %1780 = vector.load %arg1[%c0_1705, %c3_1706, %c1_1707, %c0_1708] : memref<1x16x5x5xf32, #tpu.memory_space<vmem>>, vector<1x1x4x4xf32>
    %1781 = vector.shape_cast %1780 : vector<1x1x4x4xf32> to vector<4x4xf32>
    %c6_1709 = arith.constant 6 : index
    %c7_1710 = arith.constant 7 : index
    %1782 = memref.load %arg2[%c6_1709, %c7_1710] : memref<8x9xf32, #tpu.memory_space<smem>>
    %1783 = vector.broadcast %1782 : f32 to vector<4x4xf32>
    %1784 = arith.mulf %1781, %1783 : vector<4x4xf32>
    %1785 = arith.addf %1773, %1784 : vector<4x4xf32>
    %c0_1711 = arith.constant 0 : index
    %c0_1712 = arith.constant 0 : index
    %c1_1713 = arith.constant 1 : index
    %c1_1714 = arith.constant 1 : index
    %1786 = vector.load %arg1[%c0_1711, %c0_1712, %c1_1713, %c1_1714] : memref<1x16x5x5xf32, #tpu.memory_space<vmem>>, vector<1x1x4x4xf32>
    %1787 = vector.shape_cast %1786 : vector<1x1x4x4xf32> to vector<4x4xf32>
    %c6_1715 = arith.constant 6 : index
    %c8_1716 = arith.constant 8 : index
    %1788 = memref.load %arg2[%c6_1715, %c8_1716] : memref<8x9xf32, #tpu.memory_space<smem>>
    %1789 = vector.broadcast %1788 : f32 to vector<4x4xf32>
    %1790 = arith.mulf %1787, %1789 : vector<4x4xf32>
    %1791 = arith.addf %1779, %1790 : vector<4x4xf32>
    %1792 = arith.addf %1791, %1785 : vector<4x4xf32>
    %c6_1717 = arith.constant 6 : index
    %1793 = memref.load %arg3[%c6_1717] : memref<8xf32, #tpu.memory_space<smem>>
    %1794 = vector.broadcast %1793 : f32 to vector<4x4xf32>
    %1795 = arith.addf %1792, %1794 : vector<4x4xf32>
    %cst_1718 = arith.constant 0.000000e+00 : f32
    %1796 = vector.broadcast %cst_1718 : f32 to vector<4x4xf32>
    %1797 = arith.maximumf %1795, %1796 : vector<4x4xf32>
    %c0_1719 = arith.constant 0 : index
    %c10_1720 = arith.constant 10 : index
    %c0_1721 = arith.constant 0 : index
    %c0_1722 = arith.constant 0 : index
    %1798 = vector.load %arg1[%c0_1719, %c10_1720, %c0_1721, %c0_1722] : memref<1x16x5x5xf32, #tpu.memory_space<vmem>>, vector<1x1x4x4xf32>
    %1799 = vector.shape_cast %1798 : vector<1x1x4x4xf32> to vector<4x4xf32>
    %c7_1723 = arith.constant 7 : index
    %c0_1724 = arith.constant 0 : index
    %1800 = memref.load %arg2[%c7_1723, %c0_1724] : memref<8x9xf32, #tpu.memory_space<smem>>
    %1801 = vector.broadcast %1800 : f32 to vector<4x4xf32>
    %1802 = arith.mulf %1799, %1801 : vector<4x4xf32>
    %c0_1725 = arith.constant 0 : index
    %c11_1726 = arith.constant 11 : index
    %c0_1727 = arith.constant 0 : index
    %c0_1728 = arith.constant 0 : index
    %1803 = vector.load %arg1[%c0_1725, %c11_1726, %c0_1727, %c0_1728] : memref<1x16x5x5xf32, #tpu.memory_space<vmem>>, vector<1x1x4x4xf32>
    %1804 = vector.shape_cast %1803 : vector<1x1x4x4xf32> to vector<4x4xf32>
    %c7_1729 = arith.constant 7 : index
    %c1_1730 = arith.constant 1 : index
    %1805 = memref.load %arg2[%c7_1729, %c1_1730] : memref<8x9xf32, #tpu.memory_space<smem>>
    %1806 = vector.broadcast %1805 : f32 to vector<4x4xf32>
    %1807 = arith.mulf %1804, %1806 : vector<4x4xf32>
    %c0_1731 = arith.constant 0 : index
    %c8_1732 = arith.constant 8 : index
    %c0_1733 = arith.constant 0 : index
    %c1_1734 = arith.constant 1 : index
    %1808 = vector.load %arg1[%c0_1731, %c8_1732, %c0_1733, %c1_1734] : memref<1x16x5x5xf32, #tpu.memory_space<vmem>>, vector<1x1x4x4xf32>
    %1809 = vector.shape_cast %1808 : vector<1x1x4x4xf32> to vector<4x4xf32>
    %c7_1735 = arith.constant 7 : index
    %c2_1736 = arith.constant 2 : index
    %1810 = memref.load %arg2[%c7_1735, %c2_1736] : memref<8x9xf32, #tpu.memory_space<smem>>
    %1811 = vector.broadcast %1810 : f32 to vector<4x4xf32>
    %1812 = arith.mulf %1809, %1811 : vector<4x4xf32>
    %1813 = arith.addf %1802, %1812 : vector<4x4xf32>
    %c0_1737 = arith.constant 0 : index
    %c14_1738 = arith.constant 14 : index
    %c0_1739 = arith.constant 0 : index
    %c0_1740 = arith.constant 0 : index
    %1814 = vector.load %arg1[%c0_1737, %c14_1738, %c0_1739, %c0_1740] : memref<1x16x5x5xf32, #tpu.memory_space<vmem>>, vector<1x1x4x4xf32>
    %1815 = vector.shape_cast %1814 : vector<1x1x4x4xf32> to vector<4x4xf32>
    %c7_1741 = arith.constant 7 : index
    %c3_1742 = arith.constant 3 : index
    %1816 = memref.load %arg2[%c7_1741, %c3_1742] : memref<8x9xf32, #tpu.memory_space<smem>>
    %1817 = vector.broadcast %1816 : f32 to vector<4x4xf32>
    %1818 = arith.mulf %1815, %1817 : vector<4x4xf32>
    %1819 = arith.addf %1807, %1818 : vector<4x4xf32>
    %c0_1743 = arith.constant 0 : index
    %c15_1744 = arith.constant 15 : index
    %c0_1745 = arith.constant 0 : index
    %c0_1746 = arith.constant 0 : index
    %1820 = vector.load %arg1[%c0_1743, %c15_1744, %c0_1745, %c0_1746] : memref<1x16x5x5xf32, #tpu.memory_space<vmem>>, vector<1x1x4x4xf32>
    %1821 = vector.shape_cast %1820 : vector<1x1x4x4xf32> to vector<4x4xf32>
    %c7_1747 = arith.constant 7 : index
    %c4_1748 = arith.constant 4 : index
    %1822 = memref.load %arg2[%c7_1747, %c4_1748] : memref<8x9xf32, #tpu.memory_space<smem>>
    %1823 = vector.broadcast %1822 : f32 to vector<4x4xf32>
    %1824 = arith.mulf %1821, %1823 : vector<4x4xf32>
    %1825 = arith.addf %1813, %1824 : vector<4x4xf32>
    %c0_1749 = arith.constant 0 : index
    %c12_1750 = arith.constant 12 : index
    %c0_1751 = arith.constant 0 : index
    %c1_1752 = arith.constant 1 : index
    %1826 = vector.load %arg1[%c0_1749, %c12_1750, %c0_1751, %c1_1752] : memref<1x16x5x5xf32, #tpu.memory_space<vmem>>, vector<1x1x4x4xf32>
    %1827 = vector.shape_cast %1826 : vector<1x1x4x4xf32> to vector<4x4xf32>
    %c7_1753 = arith.constant 7 : index
    %c5_1754 = arith.constant 5 : index
    %1828 = memref.load %arg2[%c7_1753, %c5_1754] : memref<8x9xf32, #tpu.memory_space<smem>>
    %1829 = vector.broadcast %1828 : f32 to vector<4x4xf32>
    %1830 = arith.mulf %1827, %1829 : vector<4x4xf32>
    %1831 = arith.addf %1819, %1830 : vector<4x4xf32>
    %c0_1755 = arith.constant 0 : index
    %c2_1756 = arith.constant 2 : index
    %c1_1757 = arith.constant 1 : index
    %c0_1758 = arith.constant 0 : index
    %1832 = vector.load %arg1[%c0_1755, %c2_1756, %c1_1757, %c0_1758] : memref<1x16x5x5xf32, #tpu.memory_space<vmem>>, vector<1x1x4x4xf32>
    %1833 = vector.shape_cast %1832 : vector<1x1x4x4xf32> to vector<4x4xf32>
    %c7_1759 = arith.constant 7 : index
    %c6_1760 = arith.constant 6 : index
    %1834 = memref.load %arg2[%c7_1759, %c6_1760] : memref<8x9xf32, #tpu.memory_space<smem>>
    %1835 = vector.broadcast %1834 : f32 to vector<4x4xf32>
    %1836 = arith.mulf %1833, %1835 : vector<4x4xf32>
    %1837 = arith.addf %1825, %1836 : vector<4x4xf32>
    %c0_1761 = arith.constant 0 : index
    %c3_1762 = arith.constant 3 : index
    %c1_1763 = arith.constant 1 : index
    %c0_1764 = arith.constant 0 : index
    %1838 = vector.load %arg1[%c0_1761, %c3_1762, %c1_1763, %c0_1764] : memref<1x16x5x5xf32, #tpu.memory_space<vmem>>, vector<1x1x4x4xf32>
    %1839 = vector.shape_cast %1838 : vector<1x1x4x4xf32> to vector<4x4xf32>
    %c7_1765 = arith.constant 7 : index
    %c7_1766 = arith.constant 7 : index
    %1840 = memref.load %arg2[%c7_1765, %c7_1766] : memref<8x9xf32, #tpu.memory_space<smem>>
    %1841 = vector.broadcast %1840 : f32 to vector<4x4xf32>
    %1842 = arith.mulf %1839, %1841 : vector<4x4xf32>
    %1843 = arith.addf %1831, %1842 : vector<4x4xf32>
    %c0_1767 = arith.constant 0 : index
    %c0_1768 = arith.constant 0 : index
    %c1_1769 = arith.constant 1 : index
    %c1_1770 = arith.constant 1 : index
    %1844 = vector.load %arg1[%c0_1767, %c0_1768, %c1_1769, %c1_1770] : memref<1x16x5x5xf32, #tpu.memory_space<vmem>>, vector<1x1x4x4xf32>
    %1845 = vector.shape_cast %1844 : vector<1x1x4x4xf32> to vector<4x4xf32>
    %c7_1771 = arith.constant 7 : index
    %c8_1772 = arith.constant 8 : index
    %1846 = memref.load %arg2[%c7_1771, %c8_1772] : memref<8x9xf32, #tpu.memory_space<smem>>
    %1847 = vector.broadcast %1846 : f32 to vector<4x4xf32>
    %1848 = arith.mulf %1845, %1847 : vector<4x4xf32>
    %1849 = arith.addf %1837, %1848 : vector<4x4xf32>
    %1850 = arith.addf %1849, %1843 : vector<4x4xf32>
    %c7_1773 = arith.constant 7 : index
    %1851 = memref.load %arg3[%c7_1773] : memref<8xf32, #tpu.memory_space<smem>>
    %1852 = vector.broadcast %1851 : f32 to vector<4x4xf32>
    %1853 = arith.addf %1850, %1852 : vector<4x4xf32>
    %cst_1774 = arith.constant 0.000000e+00 : f32
    %1854 = vector.broadcast %cst_1774 : f32 to vector<4x4xf32>
    %1855 = arith.maximumf %1853, %1854 : vector<4x4xf32>
    %cst_1775 = arith.constant 0.000000e+00 : f32
    %1856 = vector.broadcast %cst_1775 : f32 to vector<3x24xf32>
    %cst_1776 = arith.constant 0.000000e+00 : f32
    %1857 = vector.broadcast %cst_1776 : f32 to vector<3x24xf32>
    %1858 = vector.extract_strided_slice %57 {offsets = [0, 0], sizes = [3, 3], strides = [1, 1]} : vector<4x4xf32> to vector<3x3xf32>
    %1859 = tpu.concatenate %1858, %1858, %1858, %1858, %1858, %1858, %1858, %1858 in 1 : vector<3x3xf32>, vector<3x3xf32>, vector<3x3xf32>, vector<3x3xf32>, vector<3x3xf32>, vector<3x3xf32>, vector<3x3xf32>, vector<3x3xf32> -> vector<3x24xf32>
    %c0_1777 = arith.constant 0 : index
    %c0_1778 = arith.constant 0 : index
    %1860 = vector.load %arg4[%c0_1777, %c0_1778] : memref<72x24xf32, #tpu.memory_space<vmem>>, vector<1x24xf32>
    %1861 = vector.shape_cast %1860 : vector<1x24xf32> to vector<24xf32>
    %1862 = vector.shape_cast %1861 : vector<24xf32> to vector<1x24xf32>
    %1863 = vector.broadcast %1862 : vector<1x24xf32> to vector<3x24xf32>
    %1864 = arith.mulf %1859, %1863 : vector<3x24xf32>
    %1865 = arith.addf %1856, %1864 : vector<3x24xf32>
    %1866 = vector.extract_strided_slice %521 {offsets = [0, 0], sizes = [3, 3], strides = [1, 1]} : vector<4x4xf32> to vector<3x3xf32>
    %1867 = tpu.concatenate %1866, %1866, %1866, %1866, %1866, %1866, %1866, %1866 in 1 : vector<3x3xf32>, vector<3x3xf32>, vector<3x3xf32>, vector<3x3xf32>, vector<3x3xf32>, vector<3x3xf32>, vector<3x3xf32>, vector<3x3xf32> -> vector<3x24xf32>
    %c1_1779 = arith.constant 1 : index
    %c0_1780 = arith.constant 0 : index
    %1868 = vector.load %arg4[%c1_1779, %c0_1780] : memref<72x24xf32, #tpu.memory_space<vmem>>, vector<1x24xf32>
    %1869 = vector.shape_cast %1868 : vector<1x24xf32> to vector<24xf32>
    %1870 = vector.shape_cast %1869 : vector<24xf32> to vector<1x24xf32>
    %1871 = vector.broadcast %1870 : vector<1x24xf32> to vector<3x24xf32>
    %1872 = arith.mulf %1867, %1871 : vector<3x24xf32>
    %1873 = arith.addf %1857, %1872 : vector<3x24xf32>
    %1874 = vector.extract_strided_slice %57 {offsets = [0, 1], sizes = [3, 3], strides = [1, 1]} : vector<4x4xf32> to vector<3x3xf32>
    %1875 = tpu.concatenate %1874, %1874, %1874, %1874, %1874, %1874, %1874, %1874 in 1 : vector<3x3xf32>, vector<3x3xf32>, vector<3x3xf32>, vector<3x3xf32>, vector<3x3xf32>, vector<3x3xf32>, vector<3x3xf32>, vector<3x3xf32> -> vector<3x24xf32>
    %c2_1781 = arith.constant 2 : index
    %c0_1782 = arith.constant 0 : index
    %1876 = vector.load %arg4[%c2_1781, %c0_1782] : memref<72x24xf32, #tpu.memory_space<vmem>>, vector<1x24xf32>
    %1877 = vector.shape_cast %1876 : vector<1x24xf32> to vector<24xf32>
    %1878 = vector.shape_cast %1877 : vector<24xf32> to vector<1x24xf32>
    %1879 = vector.broadcast %1878 : vector<1x24xf32> to vector<3x24xf32>
    %1880 = arith.mulf %1875, %1879 : vector<3x24xf32>
    %1881 = arith.addf %1865, %1880 : vector<3x24xf32>
    %1882 = vector.extract_strided_slice %985 {offsets = [0, 0], sizes = [3, 3], strides = [1, 1]} : vector<4x4xf32> to vector<3x3xf32>
    %1883 = tpu.concatenate %1882, %1882, %1882, %1882, %1882, %1882, %1882, %1882 in 1 : vector<3x3xf32>, vector<3x3xf32>, vector<3x3xf32>, vector<3x3xf32>, vector<3x3xf32>, vector<3x3xf32>, vector<3x3xf32>, vector<3x3xf32> -> vector<3x24xf32>
    %c3_1783 = arith.constant 3 : index
    %c0_1784 = arith.constant 0 : index
    %1884 = vector.load %arg4[%c3_1783, %c0_1784] : memref<72x24xf32, #tpu.memory_space<vmem>>, vector<1x24xf32>
    %1885 = vector.shape_cast %1884 : vector<1x24xf32> to vector<24xf32>
    %1886 = vector.shape_cast %1885 : vector<24xf32> to vector<1x24xf32>
    %1887 = vector.broadcast %1886 : vector<1x24xf32> to vector<3x24xf32>
    %1888 = arith.mulf %1883, %1887 : vector<3x24xf32>
    %1889 = arith.addf %1873, %1888 : vector<3x24xf32>
    %1890 = vector.extract_strided_slice %1449 {offsets = [0, 0], sizes = [3, 3], strides = [1, 1]} : vector<4x4xf32> to vector<3x3xf32>
    %1891 = tpu.concatenate %1890, %1890, %1890, %1890, %1890, %1890, %1890, %1890 in 1 : vector<3x3xf32>, vector<3x3xf32>, vector<3x3xf32>, vector<3x3xf32>, vector<3x3xf32>, vector<3x3xf32>, vector<3x3xf32>, vector<3x3xf32> -> vector<3x24xf32>
    %c4_1785 = arith.constant 4 : index
    %c0_1786 = arith.constant 0 : index
    %1892 = vector.load %arg4[%c4_1785, %c0_1786] : memref<72x24xf32, #tpu.memory_space<vmem>>, vector<1x24xf32>
    %1893 = vector.shape_cast %1892 : vector<1x24xf32> to vector<24xf32>
    %1894 = vector.shape_cast %1893 : vector<24xf32> to vector<1x24xf32>
    %1895 = vector.broadcast %1894 : vector<1x24xf32> to vector<3x24xf32>
    %1896 = arith.mulf %1891, %1895 : vector<3x24xf32>
    %1897 = arith.addf %1881, %1896 : vector<3x24xf32>
    %1898 = vector.extract_strided_slice %985 {offsets = [0, 1], sizes = [3, 3], strides = [1, 1]} : vector<4x4xf32> to vector<3x3xf32>
    %1899 = tpu.concatenate %1898, %1898, %1898, %1898, %1898, %1898, %1898, %1898 in 1 : vector<3x3xf32>, vector<3x3xf32>, vector<3x3xf32>, vector<3x3xf32>, vector<3x3xf32>, vector<3x3xf32>, vector<3x3xf32>, vector<3x3xf32> -> vector<3x24xf32>
    %c5_1787 = arith.constant 5 : index
    %c0_1788 = arith.constant 0 : index
    %1900 = vector.load %arg4[%c5_1787, %c0_1788] : memref<72x24xf32, #tpu.memory_space<vmem>>, vector<1x24xf32>
    %1901 = vector.shape_cast %1900 : vector<1x24xf32> to vector<24xf32>
    %1902 = vector.shape_cast %1901 : vector<24xf32> to vector<1x24xf32>
    %1903 = vector.broadcast %1902 : vector<1x24xf32> to vector<3x24xf32>
    %1904 = arith.mulf %1899, %1903 : vector<3x24xf32>
    %1905 = arith.addf %1889, %1904 : vector<3x24xf32>
    %1906 = vector.extract_strided_slice %57 {offsets = [1, 0], sizes = [3, 3], strides = [1, 1]} : vector<4x4xf32> to vector<3x3xf32>
    %1907 = tpu.concatenate %1906, %1906, %1906, %1906, %1906, %1906, %1906, %1906 in 1 : vector<3x3xf32>, vector<3x3xf32>, vector<3x3xf32>, vector<3x3xf32>, vector<3x3xf32>, vector<3x3xf32>, vector<3x3xf32>, vector<3x3xf32> -> vector<3x24xf32>
    %c6_1789 = arith.constant 6 : index
    %c0_1790 = arith.constant 0 : index
    %1908 = vector.load %arg4[%c6_1789, %c0_1790] : memref<72x24xf32, #tpu.memory_space<vmem>>, vector<1x24xf32>
    %1909 = vector.shape_cast %1908 : vector<1x24xf32> to vector<24xf32>
    %1910 = vector.shape_cast %1909 : vector<24xf32> to vector<1x24xf32>
    %1911 = vector.broadcast %1910 : vector<1x24xf32> to vector<3x24xf32>
    %1912 = arith.mulf %1907, %1911 : vector<3x24xf32>
    %1913 = arith.addf %1897, %1912 : vector<3x24xf32>
    %1914 = vector.extract_strided_slice %521 {offsets = [1, 0], sizes = [3, 3], strides = [1, 1]} : vector<4x4xf32> to vector<3x3xf32>
    %1915 = tpu.concatenate %1914, %1914, %1914, %1914, %1914, %1914, %1914, %1914 in 1 : vector<3x3xf32>, vector<3x3xf32>, vector<3x3xf32>, vector<3x3xf32>, vector<3x3xf32>, vector<3x3xf32>, vector<3x3xf32>, vector<3x3xf32> -> vector<3x24xf32>
    %c7_1791 = arith.constant 7 : index
    %c0_1792 = arith.constant 0 : index
    %1916 = vector.load %arg4[%c7_1791, %c0_1792] : memref<72x24xf32, #tpu.memory_space<vmem>>, vector<1x24xf32>
    %1917 = vector.shape_cast %1916 : vector<1x24xf32> to vector<24xf32>
    %1918 = vector.shape_cast %1917 : vector<24xf32> to vector<1x24xf32>
    %1919 = vector.broadcast %1918 : vector<1x24xf32> to vector<3x24xf32>
    %1920 = arith.mulf %1915, %1919 : vector<3x24xf32>
    %1921 = arith.addf %1905, %1920 : vector<3x24xf32>
    %1922 = vector.extract_strided_slice %57 {offsets = [1, 1], sizes = [3, 3], strides = [1, 1]} : vector<4x4xf32> to vector<3x3xf32>
    %1923 = tpu.concatenate %1922, %1922, %1922, %1922, %1922, %1922, %1922, %1922 in 1 : vector<3x3xf32>, vector<3x3xf32>, vector<3x3xf32>, vector<3x3xf32>, vector<3x3xf32>, vector<3x3xf32>, vector<3x3xf32>, vector<3x3xf32> -> vector<3x24xf32>
    %c8_1793 = arith.constant 8 : index
    %c0_1794 = arith.constant 0 : index
    %1924 = vector.load %arg4[%c8_1793, %c0_1794] : memref<72x24xf32, #tpu.memory_space<vmem>>, vector<1x24xf32>
    %1925 = vector.shape_cast %1924 : vector<1x24xf32> to vector<24xf32>
    %1926 = vector.shape_cast %1925 : vector<24xf32> to vector<1x24xf32>
    %1927 = vector.broadcast %1926 : vector<1x24xf32> to vector<3x24xf32>
    %1928 = arith.mulf %1923, %1927 : vector<3x24xf32>
    %1929 = arith.addf %1913, %1928 : vector<3x24xf32>
    %1930 = vector.extract_strided_slice %115 {offsets = [0, 0], sizes = [3, 3], strides = [1, 1]} : vector<4x4xf32> to vector<3x3xf32>
    %1931 = tpu.concatenate %1930, %1930, %1930, %1930, %1930, %1930, %1930, %1930 in 1 : vector<3x3xf32>, vector<3x3xf32>, vector<3x3xf32>, vector<3x3xf32>, vector<3x3xf32>, vector<3x3xf32>, vector<3x3xf32>, vector<3x3xf32> -> vector<3x24xf32>
    %c9_1795 = arith.constant 9 : index
    %c0_1796 = arith.constant 0 : index
    %1932 = vector.load %arg4[%c9_1795, %c0_1796] : memref<72x24xf32, #tpu.memory_space<vmem>>, vector<1x24xf32>
    %1933 = vector.shape_cast %1932 : vector<1x24xf32> to vector<24xf32>
    %1934 = vector.shape_cast %1933 : vector<24xf32> to vector<1x24xf32>
    %1935 = vector.broadcast %1934 : vector<1x24xf32> to vector<3x24xf32>
    %1936 = arith.mulf %1931, %1935 : vector<3x24xf32>
    %1937 = arith.addf %1929, %1936 : vector<3x24xf32>
    %1938 = vector.extract_strided_slice %579 {offsets = [0, 0], sizes = [3, 3], strides = [1, 1]} : vector<4x4xf32> to vector<3x3xf32>
    %1939 = tpu.concatenate %1938, %1938, %1938, %1938, %1938, %1938, %1938, %1938 in 1 : vector<3x3xf32>, vector<3x3xf32>, vector<3x3xf32>, vector<3x3xf32>, vector<3x3xf32>, vector<3x3xf32>, vector<3x3xf32>, vector<3x3xf32> -> vector<3x24xf32>
    %c10_1797 = arith.constant 10 : index
    %c0_1798 = arith.constant 0 : index
    %1940 = vector.load %arg4[%c10_1797, %c0_1798] : memref<72x24xf32, #tpu.memory_space<vmem>>, vector<1x24xf32>
    %1941 = vector.shape_cast %1940 : vector<1x24xf32> to vector<24xf32>
    %1942 = vector.shape_cast %1941 : vector<24xf32> to vector<1x24xf32>
    %1943 = vector.broadcast %1942 : vector<1x24xf32> to vector<3x24xf32>
    %1944 = arith.mulf %1939, %1943 : vector<3x24xf32>
    %1945 = arith.addf %1921, %1944 : vector<3x24xf32>
    %1946 = vector.extract_strided_slice %115 {offsets = [0, 1], sizes = [3, 3], strides = [1, 1]} : vector<4x4xf32> to vector<3x3xf32>
    %1947 = tpu.concatenate %1946, %1946, %1946, %1946, %1946, %1946, %1946, %1946 in 1 : vector<3x3xf32>, vector<3x3xf32>, vector<3x3xf32>, vector<3x3xf32>, vector<3x3xf32>, vector<3x3xf32>, vector<3x3xf32>, vector<3x3xf32> -> vector<3x24xf32>
    %c11_1799 = arith.constant 11 : index
    %c0_1800 = arith.constant 0 : index
    %1948 = vector.load %arg4[%c11_1799, %c0_1800] : memref<72x24xf32, #tpu.memory_space<vmem>>, vector<1x24xf32>
    %1949 = vector.shape_cast %1948 : vector<1x24xf32> to vector<24xf32>
    %1950 = vector.shape_cast %1949 : vector<24xf32> to vector<1x24xf32>
    %1951 = vector.broadcast %1950 : vector<1x24xf32> to vector<3x24xf32>
    %1952 = arith.mulf %1947, %1951 : vector<3x24xf32>
    %1953 = arith.addf %1937, %1952 : vector<3x24xf32>
    %1954 = vector.extract_strided_slice %1043 {offsets = [0, 0], sizes = [3, 3], strides = [1, 1]} : vector<4x4xf32> to vector<3x3xf32>
    %1955 = tpu.concatenate %1954, %1954, %1954, %1954, %1954, %1954, %1954, %1954 in 1 : vector<3x3xf32>, vector<3x3xf32>, vector<3x3xf32>, vector<3x3xf32>, vector<3x3xf32>, vector<3x3xf32>, vector<3x3xf32>, vector<3x3xf32> -> vector<3x24xf32>
    %c12_1801 = arith.constant 12 : index
    %c0_1802 = arith.constant 0 : index
    %1956 = vector.load %arg4[%c12_1801, %c0_1802] : memref<72x24xf32, #tpu.memory_space<vmem>>, vector<1x24xf32>
    %1957 = vector.shape_cast %1956 : vector<1x24xf32> to vector<24xf32>
    %1958 = vector.shape_cast %1957 : vector<24xf32> to vector<1x24xf32>
    %1959 = vector.broadcast %1958 : vector<1x24xf32> to vector<3x24xf32>
    %1960 = arith.mulf %1955, %1959 : vector<3x24xf32>
    %1961 = arith.addf %1945, %1960 : vector<3x24xf32>
    %1962 = vector.extract_strided_slice %1507 {offsets = [0, 0], sizes = [3, 3], strides = [1, 1]} : vector<4x4xf32> to vector<3x3xf32>
    %1963 = tpu.concatenate %1962, %1962, %1962, %1962, %1962, %1962, %1962, %1962 in 1 : vector<3x3xf32>, vector<3x3xf32>, vector<3x3xf32>, vector<3x3xf32>, vector<3x3xf32>, vector<3x3xf32>, vector<3x3xf32>, vector<3x3xf32> -> vector<3x24xf32>
    %c13_1803 = arith.constant 13 : index
    %c0_1804 = arith.constant 0 : index
    %1964 = vector.load %arg4[%c13_1803, %c0_1804] : memref<72x24xf32, #tpu.memory_space<vmem>>, vector<1x24xf32>
    %1965 = vector.shape_cast %1964 : vector<1x24xf32> to vector<24xf32>
    %1966 = vector.shape_cast %1965 : vector<24xf32> to vector<1x24xf32>
    %1967 = vector.broadcast %1966 : vector<1x24xf32> to vector<3x24xf32>
    %1968 = arith.mulf %1963, %1967 : vector<3x24xf32>
    %1969 = arith.addf %1953, %1968 : vector<3x24xf32>
    %1970 = vector.extract_strided_slice %1043 {offsets = [0, 1], sizes = [3, 3], strides = [1, 1]} : vector<4x4xf32> to vector<3x3xf32>
    %1971 = tpu.concatenate %1970, %1970, %1970, %1970, %1970, %1970, %1970, %1970 in 1 : vector<3x3xf32>, vector<3x3xf32>, vector<3x3xf32>, vector<3x3xf32>, vector<3x3xf32>, vector<3x3xf32>, vector<3x3xf32>, vector<3x3xf32> -> vector<3x24xf32>
    %c14_1805 = arith.constant 14 : index
    %c0_1806 = arith.constant 0 : index
    %1972 = vector.load %arg4[%c14_1805, %c0_1806] : memref<72x24xf32, #tpu.memory_space<vmem>>, vector<1x24xf32>
    %1973 = vector.shape_cast %1972 : vector<1x24xf32> to vector<24xf32>
    %1974 = vector.shape_cast %1973 : vector<24xf32> to vector<1x24xf32>
    %1975 = vector.broadcast %1974 : vector<1x24xf32> to vector<3x24xf32>
    %1976 = arith.mulf %1971, %1975 : vector<3x24xf32>
    %1977 = arith.addf %1961, %1976 : vector<3x24xf32>
    %1978 = vector.extract_strided_slice %115 {offsets = [1, 0], sizes = [3, 3], strides = [1, 1]} : vector<4x4xf32> to vector<3x3xf32>
    %1979 = tpu.concatenate %1978, %1978, %1978, %1978, %1978, %1978, %1978, %1978 in 1 : vector<3x3xf32>, vector<3x3xf32>, vector<3x3xf32>, vector<3x3xf32>, vector<3x3xf32>, vector<3x3xf32>, vector<3x3xf32>, vector<3x3xf32> -> vector<3x24xf32>
    %c15_1807 = arith.constant 15 : index
    %c0_1808 = arith.constant 0 : index
    %1980 = vector.load %arg4[%c15_1807, %c0_1808] : memref<72x24xf32, #tpu.memory_space<vmem>>, vector<1x24xf32>
    %1981 = vector.shape_cast %1980 : vector<1x24xf32> to vector<24xf32>
    %1982 = vector.shape_cast %1981 : vector<24xf32> to vector<1x24xf32>
    %1983 = vector.broadcast %1982 : vector<1x24xf32> to vector<3x24xf32>
    %1984 = arith.mulf %1979, %1983 : vector<3x24xf32>
    %1985 = arith.addf %1969, %1984 : vector<3x24xf32>
    %1986 = vector.extract_strided_slice %579 {offsets = [1, 0], sizes = [3, 3], strides = [1, 1]} : vector<4x4xf32> to vector<3x3xf32>
    %1987 = tpu.concatenate %1986, %1986, %1986, %1986, %1986, %1986, %1986, %1986 in 1 : vector<3x3xf32>, vector<3x3xf32>, vector<3x3xf32>, vector<3x3xf32>, vector<3x3xf32>, vector<3x3xf32>, vector<3x3xf32>, vector<3x3xf32> -> vector<3x24xf32>
    %c16 = arith.constant 16 : index
    %c0_1809 = arith.constant 0 : index
    %1988 = vector.load %arg4[%c16, %c0_1809] : memref<72x24xf32, #tpu.memory_space<vmem>>, vector<1x24xf32>
    %1989 = vector.shape_cast %1988 : vector<1x24xf32> to vector<24xf32>
    %1990 = vector.shape_cast %1989 : vector<24xf32> to vector<1x24xf32>
    %1991 = vector.broadcast %1990 : vector<1x24xf32> to vector<3x24xf32>
    %1992 = arith.mulf %1987, %1991 : vector<3x24xf32>
    %1993 = arith.addf %1977, %1992 : vector<3x24xf32>
    %1994 = vector.extract_strided_slice %115 {offsets = [1, 1], sizes = [3, 3], strides = [1, 1]} : vector<4x4xf32> to vector<3x3xf32>
    %1995 = tpu.concatenate %1994, %1994, %1994, %1994, %1994, %1994, %1994, %1994 in 1 : vector<3x3xf32>, vector<3x3xf32>, vector<3x3xf32>, vector<3x3xf32>, vector<3x3xf32>, vector<3x3xf32>, vector<3x3xf32>, vector<3x3xf32> -> vector<3x24xf32>
    %c17 = arith.constant 17 : index
    %c0_1810 = arith.constant 0 : index
    %1996 = vector.load %arg4[%c17, %c0_1810] : memref<72x24xf32, #tpu.memory_space<vmem>>, vector<1x24xf32>
    %1997 = vector.shape_cast %1996 : vector<1x24xf32> to vector<24xf32>
    %1998 = vector.shape_cast %1997 : vector<24xf32> to vector<1x24xf32>
    %1999 = vector.broadcast %1998 : vector<1x24xf32> to vector<3x24xf32>
    %2000 = arith.mulf %1995, %1999 : vector<3x24xf32>
    %2001 = arith.addf %1985, %2000 : vector<3x24xf32>
    %2002 = vector.extract_strided_slice %173 {offsets = [0, 0], sizes = [3, 3], strides = [1, 1]} : vector<4x4xf32> to vector<3x3xf32>
    %2003 = tpu.concatenate %2002, %2002, %2002, %2002, %2002, %2002, %2002, %2002 in 1 : vector<3x3xf32>, vector<3x3xf32>, vector<3x3xf32>, vector<3x3xf32>, vector<3x3xf32>, vector<3x3xf32>, vector<3x3xf32>, vector<3x3xf32> -> vector<3x24xf32>
    %c18 = arith.constant 18 : index
    %c0_1811 = arith.constant 0 : index
    %2004 = vector.load %arg4[%c18, %c0_1811] : memref<72x24xf32, #tpu.memory_space<vmem>>, vector<1x24xf32>
    %2005 = vector.shape_cast %2004 : vector<1x24xf32> to vector<24xf32>
    %2006 = vector.shape_cast %2005 : vector<24xf32> to vector<1x24xf32>
    %2007 = vector.broadcast %2006 : vector<1x24xf32> to vector<3x24xf32>
    %2008 = arith.mulf %2003, %2007 : vector<3x24xf32>
    %2009 = arith.addf %2001, %2008 : vector<3x24xf32>
    %2010 = vector.extract_strided_slice %637 {offsets = [0, 0], sizes = [3, 3], strides = [1, 1]} : vector<4x4xf32> to vector<3x3xf32>
    %2011 = tpu.concatenate %2010, %2010, %2010, %2010, %2010, %2010, %2010, %2010 in 1 : vector<3x3xf32>, vector<3x3xf32>, vector<3x3xf32>, vector<3x3xf32>, vector<3x3xf32>, vector<3x3xf32>, vector<3x3xf32>, vector<3x3xf32> -> vector<3x24xf32>
    %c19 = arith.constant 19 : index
    %c0_1812 = arith.constant 0 : index
    %2012 = vector.load %arg4[%c19, %c0_1812] : memref<72x24xf32, #tpu.memory_space<vmem>>, vector<1x24xf32>
    %2013 = vector.shape_cast %2012 : vector<1x24xf32> to vector<24xf32>
    %2014 = vector.shape_cast %2013 : vector<24xf32> to vector<1x24xf32>
    %2015 = vector.broadcast %2014 : vector<1x24xf32> to vector<3x24xf32>
    %2016 = arith.mulf %2011, %2015 : vector<3x24xf32>
    %2017 = arith.addf %1993, %2016 : vector<3x24xf32>
    %2018 = vector.extract_strided_slice %173 {offsets = [0, 1], sizes = [3, 3], strides = [1, 1]} : vector<4x4xf32> to vector<3x3xf32>
    %2019 = tpu.concatenate %2018, %2018, %2018, %2018, %2018, %2018, %2018, %2018 in 1 : vector<3x3xf32>, vector<3x3xf32>, vector<3x3xf32>, vector<3x3xf32>, vector<3x3xf32>, vector<3x3xf32>, vector<3x3xf32>, vector<3x3xf32> -> vector<3x24xf32>
    %c20 = arith.constant 20 : index
    %c0_1813 = arith.constant 0 : index
    %2020 = vector.load %arg4[%c20, %c0_1813] : memref<72x24xf32, #tpu.memory_space<vmem>>, vector<1x24xf32>
    %2021 = vector.shape_cast %2020 : vector<1x24xf32> to vector<24xf32>
    %2022 = vector.shape_cast %2021 : vector<24xf32> to vector<1x24xf32>
    %2023 = vector.broadcast %2022 : vector<1x24xf32> to vector<3x24xf32>
    %2024 = arith.mulf %2019, %2023 : vector<3x24xf32>
    %2025 = arith.addf %2009, %2024 : vector<3x24xf32>
    %2026 = vector.extract_strided_slice %1101 {offsets = [0, 0], sizes = [3, 3], strides = [1, 1]} : vector<4x4xf32> to vector<3x3xf32>
    %2027 = tpu.concatenate %2026, %2026, %2026, %2026, %2026, %2026, %2026, %2026 in 1 : vector<3x3xf32>, vector<3x3xf32>, vector<3x3xf32>, vector<3x3xf32>, vector<3x3xf32>, vector<3x3xf32>, vector<3x3xf32>, vector<3x3xf32> -> vector<3x24xf32>
    %c21 = arith.constant 21 : index
    %c0_1814 = arith.constant 0 : index
    %2028 = vector.load %arg4[%c21, %c0_1814] : memref<72x24xf32, #tpu.memory_space<vmem>>, vector<1x24xf32>
    %2029 = vector.shape_cast %2028 : vector<1x24xf32> to vector<24xf32>
    %2030 = vector.shape_cast %2029 : vector<24xf32> to vector<1x24xf32>
    %2031 = vector.broadcast %2030 : vector<1x24xf32> to vector<3x24xf32>
    %2032 = arith.mulf %2027, %2031 : vector<3x24xf32>
    %2033 = arith.addf %2017, %2032 : vector<3x24xf32>
    %2034 = vector.extract_strided_slice %1565 {offsets = [0, 0], sizes = [3, 3], strides = [1, 1]} : vector<4x4xf32> to vector<3x3xf32>
    %2035 = tpu.concatenate %2034, %2034, %2034, %2034, %2034, %2034, %2034, %2034 in 1 : vector<3x3xf32>, vector<3x3xf32>, vector<3x3xf32>, vector<3x3xf32>, vector<3x3xf32>, vector<3x3xf32>, vector<3x3xf32>, vector<3x3xf32> -> vector<3x24xf32>
    %c22 = arith.constant 22 : index
    %c0_1815 = arith.constant 0 : index
    %2036 = vector.load %arg4[%c22, %c0_1815] : memref<72x24xf32, #tpu.memory_space<vmem>>, vector<1x24xf32>
    %2037 = vector.shape_cast %2036 : vector<1x24xf32> to vector<24xf32>
    %2038 = vector.shape_cast %2037 : vector<24xf32> to vector<1x24xf32>
    %2039 = vector.broadcast %2038 : vector<1x24xf32> to vector<3x24xf32>
    %2040 = arith.mulf %2035, %2039 : vector<3x24xf32>
    %2041 = arith.addf %2025, %2040 : vector<3x24xf32>
    %2042 = vector.extract_strided_slice %1101 {offsets = [0, 1], sizes = [3, 3], strides = [1, 1]} : vector<4x4xf32> to vector<3x3xf32>
    %2043 = tpu.concatenate %2042, %2042, %2042, %2042, %2042, %2042, %2042, %2042 in 1 : vector<3x3xf32>, vector<3x3xf32>, vector<3x3xf32>, vector<3x3xf32>, vector<3x3xf32>, vector<3x3xf32>, vector<3x3xf32>, vector<3x3xf32> -> vector<3x24xf32>
    %c23 = arith.constant 23 : index
    %c0_1816 = arith.constant 0 : index
    %2044 = vector.load %arg4[%c23, %c0_1816] : memref<72x24xf32, #tpu.memory_space<vmem>>, vector<1x24xf32>
    %2045 = vector.shape_cast %2044 : vector<1x24xf32> to vector<24xf32>
    %2046 = vector.shape_cast %2045 : vector<24xf32> to vector<1x24xf32>
    %2047 = vector.broadcast %2046 : vector<1x24xf32> to vector<3x24xf32>
    %2048 = arith.mulf %2043, %2047 : vector<3x24xf32>
    %2049 = arith.addf %2033, %2048 : vector<3x24xf32>
    %2050 = vector.extract_strided_slice %173 {offsets = [1, 0], sizes = [3, 3], strides = [1, 1]} : vector<4x4xf32> to vector<3x3xf32>
    %2051 = tpu.concatenate %2050, %2050, %2050, %2050, %2050, %2050, %2050, %2050 in 1 : vector<3x3xf32>, vector<3x3xf32>, vector<3x3xf32>, vector<3x3xf32>, vector<3x3xf32>, vector<3x3xf32>, vector<3x3xf32>, vector<3x3xf32> -> vector<3x24xf32>
    %c24 = arith.constant 24 : index
    %c0_1817 = arith.constant 0 : index
    %2052 = vector.load %arg4[%c24, %c0_1817] : memref<72x24xf32, #tpu.memory_space<vmem>>, vector<1x24xf32>
    %2053 = vector.shape_cast %2052 : vector<1x24xf32> to vector<24xf32>
    %2054 = vector.shape_cast %2053 : vector<24xf32> to vector<1x24xf32>
    %2055 = vector.broadcast %2054 : vector<1x24xf32> to vector<3x24xf32>
    %2056 = arith.mulf %2051, %2055 : vector<3x24xf32>
    %2057 = arith.addf %2041, %2056 : vector<3x24xf32>
    %2058 = vector.extract_strided_slice %637 {offsets = [1, 0], sizes = [3, 3], strides = [1, 1]} : vector<4x4xf32> to vector<3x3xf32>
    %2059 = tpu.concatenate %2058, %2058, %2058, %2058, %2058, %2058, %2058, %2058 in 1 : vector<3x3xf32>, vector<3x3xf32>, vector<3x3xf32>, vector<3x3xf32>, vector<3x3xf32>, vector<3x3xf32>, vector<3x3xf32>, vector<3x3xf32> -> vector<3x24xf32>
    %c25 = arith.constant 25 : index
    %c0_1818 = arith.constant 0 : index
    %2060 = vector.load %arg4[%c25, %c0_1818] : memref<72x24xf32, #tpu.memory_space<vmem>>, vector<1x24xf32>
    %2061 = vector.shape_cast %2060 : vector<1x24xf32> to vector<24xf32>
    %2062 = vector.shape_cast %2061 : vector<24xf32> to vector<1x24xf32>
    %2063 = vector.broadcast %2062 : vector<1x24xf32> to vector<3x24xf32>
    %2064 = arith.mulf %2059, %2063 : vector<3x24xf32>
    %2065 = arith.addf %2049, %2064 : vector<3x24xf32>
    %2066 = vector.extract_strided_slice %173 {offsets = [1, 1], sizes = [3, 3], strides = [1, 1]} : vector<4x4xf32> to vector<3x3xf32>
    %2067 = tpu.concatenate %2066, %2066, %2066, %2066, %2066, %2066, %2066, %2066 in 1 : vector<3x3xf32>, vector<3x3xf32>, vector<3x3xf32>, vector<3x3xf32>, vector<3x3xf32>, vector<3x3xf32>, vector<3x3xf32>, vector<3x3xf32> -> vector<3x24xf32>
    %c26 = arith.constant 26 : index
    %c0_1819 = arith.constant 0 : index
    %2068 = vector.load %arg4[%c26, %c0_1819] : memref<72x24xf32, #tpu.memory_space<vmem>>, vector<1x24xf32>
    %2069 = vector.shape_cast %2068 : vector<1x24xf32> to vector<24xf32>
    %2070 = vector.shape_cast %2069 : vector<24xf32> to vector<1x24xf32>
    %2071 = vector.broadcast %2070 : vector<1x24xf32> to vector<3x24xf32>
    %2072 = arith.mulf %2067, %2071 : vector<3x24xf32>
    %2073 = arith.addf %2057, %2072 : vector<3x24xf32>
    %2074 = vector.extract_strided_slice %231 {offsets = [0, 0], sizes = [3, 3], strides = [1, 1]} : vector<4x4xf32> to vector<3x3xf32>
    %2075 = tpu.concatenate %2074, %2074, %2074, %2074, %2074, %2074, %2074, %2074 in 1 : vector<3x3xf32>, vector<3x3xf32>, vector<3x3xf32>, vector<3x3xf32>, vector<3x3xf32>, vector<3x3xf32>, vector<3x3xf32>, vector<3x3xf32> -> vector<3x24xf32>
    %c27 = arith.constant 27 : index
    %c0_1820 = arith.constant 0 : index
    %2076 = vector.load %arg4[%c27, %c0_1820] : memref<72x24xf32, #tpu.memory_space<vmem>>, vector<1x24xf32>
    %2077 = vector.shape_cast %2076 : vector<1x24xf32> to vector<24xf32>
    %2078 = vector.shape_cast %2077 : vector<24xf32> to vector<1x24xf32>
    %2079 = vector.broadcast %2078 : vector<1x24xf32> to vector<3x24xf32>
    %2080 = arith.mulf %2075, %2079 : vector<3x24xf32>
    %2081 = arith.addf %2073, %2080 : vector<3x24xf32>
    %2082 = vector.extract_strided_slice %695 {offsets = [0, 0], sizes = [3, 3], strides = [1, 1]} : vector<4x4xf32> to vector<3x3xf32>
    %2083 = tpu.concatenate %2082, %2082, %2082, %2082, %2082, %2082, %2082, %2082 in 1 : vector<3x3xf32>, vector<3x3xf32>, vector<3x3xf32>, vector<3x3xf32>, vector<3x3xf32>, vector<3x3xf32>, vector<3x3xf32>, vector<3x3xf32> -> vector<3x24xf32>
    %c28 = arith.constant 28 : index
    %c0_1821 = arith.constant 0 : index
    %2084 = vector.load %arg4[%c28, %c0_1821] : memref<72x24xf32, #tpu.memory_space<vmem>>, vector<1x24xf32>
    %2085 = vector.shape_cast %2084 : vector<1x24xf32> to vector<24xf32>
    %2086 = vector.shape_cast %2085 : vector<24xf32> to vector<1x24xf32>
    %2087 = vector.broadcast %2086 : vector<1x24xf32> to vector<3x24xf32>
    %2088 = arith.mulf %2083, %2087 : vector<3x24xf32>
    %2089 = arith.addf %2065, %2088 : vector<3x24xf32>
    %2090 = vector.extract_strided_slice %231 {offsets = [0, 1], sizes = [3, 3], strides = [1, 1]} : vector<4x4xf32> to vector<3x3xf32>
    %2091 = tpu.concatenate %2090, %2090, %2090, %2090, %2090, %2090, %2090, %2090 in 1 : vector<3x3xf32>, vector<3x3xf32>, vector<3x3xf32>, vector<3x3xf32>, vector<3x3xf32>, vector<3x3xf32>, vector<3x3xf32>, vector<3x3xf32> -> vector<3x24xf32>
    %c29 = arith.constant 29 : index
    %c0_1822 = arith.constant 0 : index
    %2092 = vector.load %arg4[%c29, %c0_1822] : memref<72x24xf32, #tpu.memory_space<vmem>>, vector<1x24xf32>
    %2093 = vector.shape_cast %2092 : vector<1x24xf32> to vector<24xf32>
    %2094 = vector.shape_cast %2093 : vector<24xf32> to vector<1x24xf32>
    %2095 = vector.broadcast %2094 : vector<1x24xf32> to vector<3x24xf32>
    %2096 = arith.mulf %2091, %2095 : vector<3x24xf32>
    %2097 = arith.addf %2081, %2096 : vector<3x24xf32>
    %2098 = vector.extract_strided_slice %1159 {offsets = [0, 0], sizes = [3, 3], strides = [1, 1]} : vector<4x4xf32> to vector<3x3xf32>
    %2099 = tpu.concatenate %2098, %2098, %2098, %2098, %2098, %2098, %2098, %2098 in 1 : vector<3x3xf32>, vector<3x3xf32>, vector<3x3xf32>, vector<3x3xf32>, vector<3x3xf32>, vector<3x3xf32>, vector<3x3xf32>, vector<3x3xf32> -> vector<3x24xf32>
    %c30 = arith.constant 30 : index
    %c0_1823 = arith.constant 0 : index
    %2100 = vector.load %arg4[%c30, %c0_1823] : memref<72x24xf32, #tpu.memory_space<vmem>>, vector<1x24xf32>
    %2101 = vector.shape_cast %2100 : vector<1x24xf32> to vector<24xf32>
    %2102 = vector.shape_cast %2101 : vector<24xf32> to vector<1x24xf32>
    %2103 = vector.broadcast %2102 : vector<1x24xf32> to vector<3x24xf32>
    %2104 = arith.mulf %2099, %2103 : vector<3x24xf32>
    %2105 = arith.addf %2089, %2104 : vector<3x24xf32>
    %2106 = vector.extract_strided_slice %1623 {offsets = [0, 0], sizes = [3, 3], strides = [1, 1]} : vector<4x4xf32> to vector<3x3xf32>
    %2107 = tpu.concatenate %2106, %2106, %2106, %2106, %2106, %2106, %2106, %2106 in 1 : vector<3x3xf32>, vector<3x3xf32>, vector<3x3xf32>, vector<3x3xf32>, vector<3x3xf32>, vector<3x3xf32>, vector<3x3xf32>, vector<3x3xf32> -> vector<3x24xf32>
    %c31 = arith.constant 31 : index
    %c0_1824 = arith.constant 0 : index
    %2108 = vector.load %arg4[%c31, %c0_1824] : memref<72x24xf32, #tpu.memory_space<vmem>>, vector<1x24xf32>
    %2109 = vector.shape_cast %2108 : vector<1x24xf32> to vector<24xf32>
    %2110 = vector.shape_cast %2109 : vector<24xf32> to vector<1x24xf32>
    %2111 = vector.broadcast %2110 : vector<1x24xf32> to vector<3x24xf32>
    %2112 = arith.mulf %2107, %2111 : vector<3x24xf32>
    %2113 = arith.addf %2097, %2112 : vector<3x24xf32>
    %2114 = vector.extract_strided_slice %1159 {offsets = [0, 1], sizes = [3, 3], strides = [1, 1]} : vector<4x4xf32> to vector<3x3xf32>
    %2115 = tpu.concatenate %2114, %2114, %2114, %2114, %2114, %2114, %2114, %2114 in 1 : vector<3x3xf32>, vector<3x3xf32>, vector<3x3xf32>, vector<3x3xf32>, vector<3x3xf32>, vector<3x3xf32>, vector<3x3xf32>, vector<3x3xf32> -> vector<3x24xf32>
    %c32 = arith.constant 32 : index
    %c0_1825 = arith.constant 0 : index
    %2116 = vector.load %arg4[%c32, %c0_1825] : memref<72x24xf32, #tpu.memory_space<vmem>>, vector<1x24xf32>
    %2117 = vector.shape_cast %2116 : vector<1x24xf32> to vector<24xf32>
    %2118 = vector.shape_cast %2117 : vector<24xf32> to vector<1x24xf32>
    %2119 = vector.broadcast %2118 : vector<1x24xf32> to vector<3x24xf32>
    %2120 = arith.mulf %2115, %2119 : vector<3x24xf32>
    %2121 = arith.addf %2105, %2120 : vector<3x24xf32>
    %2122 = vector.extract_strided_slice %231 {offsets = [1, 0], sizes = [3, 3], strides = [1, 1]} : vector<4x4xf32> to vector<3x3xf32>
    %2123 = tpu.concatenate %2122, %2122, %2122, %2122, %2122, %2122, %2122, %2122 in 1 : vector<3x3xf32>, vector<3x3xf32>, vector<3x3xf32>, vector<3x3xf32>, vector<3x3xf32>, vector<3x3xf32>, vector<3x3xf32>, vector<3x3xf32> -> vector<3x24xf32>
    %c33 = arith.constant 33 : index
    %c0_1826 = arith.constant 0 : index
    %2124 = vector.load %arg4[%c33, %c0_1826] : memref<72x24xf32, #tpu.memory_space<vmem>>, vector<1x24xf32>
    %2125 = vector.shape_cast %2124 : vector<1x24xf32> to vector<24xf32>
    %2126 = vector.shape_cast %2125 : vector<24xf32> to vector<1x24xf32>
    %2127 = vector.broadcast %2126 : vector<1x24xf32> to vector<3x24xf32>
    %2128 = arith.mulf %2123, %2127 : vector<3x24xf32>
    %2129 = arith.addf %2113, %2128 : vector<3x24xf32>
    %2130 = vector.extract_strided_slice %695 {offsets = [1, 0], sizes = [3, 3], strides = [1, 1]} : vector<4x4xf32> to vector<3x3xf32>
    %2131 = tpu.concatenate %2130, %2130, %2130, %2130, %2130, %2130, %2130, %2130 in 1 : vector<3x3xf32>, vector<3x3xf32>, vector<3x3xf32>, vector<3x3xf32>, vector<3x3xf32>, vector<3x3xf32>, vector<3x3xf32>, vector<3x3xf32> -> vector<3x24xf32>
    %c34 = arith.constant 34 : index
    %c0_1827 = arith.constant 0 : index
    %2132 = vector.load %arg4[%c34, %c0_1827] : memref<72x24xf32, #tpu.memory_space<vmem>>, vector<1x24xf32>
    %2133 = vector.shape_cast %2132 : vector<1x24xf32> to vector<24xf32>
    %2134 = vector.shape_cast %2133 : vector<24xf32> to vector<1x24xf32>
    %2135 = vector.broadcast %2134 : vector<1x24xf32> to vector<3x24xf32>
    %2136 = arith.mulf %2131, %2135 : vector<3x24xf32>
    %2137 = arith.addf %2121, %2136 : vector<3x24xf32>
    %2138 = vector.extract_strided_slice %231 {offsets = [1, 1], sizes = [3, 3], strides = [1, 1]} : vector<4x4xf32> to vector<3x3xf32>
    %2139 = tpu.concatenate %2138, %2138, %2138, %2138, %2138, %2138, %2138, %2138 in 1 : vector<3x3xf32>, vector<3x3xf32>, vector<3x3xf32>, vector<3x3xf32>, vector<3x3xf32>, vector<3x3xf32>, vector<3x3xf32>, vector<3x3xf32> -> vector<3x24xf32>
    %c35 = arith.constant 35 : index
    %c0_1828 = arith.constant 0 : index
    %2140 = vector.load %arg4[%c35, %c0_1828] : memref<72x24xf32, #tpu.memory_space<vmem>>, vector<1x24xf32>
    %2141 = vector.shape_cast %2140 : vector<1x24xf32> to vector<24xf32>
    %2142 = vector.shape_cast %2141 : vector<24xf32> to vector<1x24xf32>
    %2143 = vector.broadcast %2142 : vector<1x24xf32> to vector<3x24xf32>
    %2144 = arith.mulf %2139, %2143 : vector<3x24xf32>
    %2145 = arith.addf %2129, %2144 : vector<3x24xf32>
    %2146 = vector.extract_strided_slice %289 {offsets = [0, 0], sizes = [3, 3], strides = [1, 1]} : vector<4x4xf32> to vector<3x3xf32>
    %2147 = tpu.concatenate %2146, %2146, %2146, %2146, %2146, %2146, %2146, %2146 in 1 : vector<3x3xf32>, vector<3x3xf32>, vector<3x3xf32>, vector<3x3xf32>, vector<3x3xf32>, vector<3x3xf32>, vector<3x3xf32>, vector<3x3xf32> -> vector<3x24xf32>
    %c36 = arith.constant 36 : index
    %c0_1829 = arith.constant 0 : index
    %2148 = vector.load %arg4[%c36, %c0_1829] : memref<72x24xf32, #tpu.memory_space<vmem>>, vector<1x24xf32>
    %2149 = vector.shape_cast %2148 : vector<1x24xf32> to vector<24xf32>
    %2150 = vector.shape_cast %2149 : vector<24xf32> to vector<1x24xf32>
    %2151 = vector.broadcast %2150 : vector<1x24xf32> to vector<3x24xf32>
    %2152 = arith.mulf %2147, %2151 : vector<3x24xf32>
    %2153 = arith.addf %2145, %2152 : vector<3x24xf32>
    %2154 = vector.extract_strided_slice %753 {offsets = [0, 0], sizes = [3, 3], strides = [1, 1]} : vector<4x4xf32> to vector<3x3xf32>
    %2155 = tpu.concatenate %2154, %2154, %2154, %2154, %2154, %2154, %2154, %2154 in 1 : vector<3x3xf32>, vector<3x3xf32>, vector<3x3xf32>, vector<3x3xf32>, vector<3x3xf32>, vector<3x3xf32>, vector<3x3xf32>, vector<3x3xf32> -> vector<3x24xf32>
    %c37 = arith.constant 37 : index
    %c0_1830 = arith.constant 0 : index
    %2156 = vector.load %arg4[%c37, %c0_1830] : memref<72x24xf32, #tpu.memory_space<vmem>>, vector<1x24xf32>
    %2157 = vector.shape_cast %2156 : vector<1x24xf32> to vector<24xf32>
    %2158 = vector.shape_cast %2157 : vector<24xf32> to vector<1x24xf32>
    %2159 = vector.broadcast %2158 : vector<1x24xf32> to vector<3x24xf32>
    %2160 = arith.mulf %2155, %2159 : vector<3x24xf32>
    %2161 = arith.addf %2137, %2160 : vector<3x24xf32>
    %2162 = vector.extract_strided_slice %289 {offsets = [0, 1], sizes = [3, 3], strides = [1, 1]} : vector<4x4xf32> to vector<3x3xf32>
    %2163 = tpu.concatenate %2162, %2162, %2162, %2162, %2162, %2162, %2162, %2162 in 1 : vector<3x3xf32>, vector<3x3xf32>, vector<3x3xf32>, vector<3x3xf32>, vector<3x3xf32>, vector<3x3xf32>, vector<3x3xf32>, vector<3x3xf32> -> vector<3x24xf32>
    %c38 = arith.constant 38 : index
    %c0_1831 = arith.constant 0 : index
    %2164 = vector.load %arg4[%c38, %c0_1831] : memref<72x24xf32, #tpu.memory_space<vmem>>, vector<1x24xf32>
    %2165 = vector.shape_cast %2164 : vector<1x24xf32> to vector<24xf32>
    %2166 = vector.shape_cast %2165 : vector<24xf32> to vector<1x24xf32>
    %2167 = vector.broadcast %2166 : vector<1x24xf32> to vector<3x24xf32>
    %2168 = arith.mulf %2163, %2167 : vector<3x24xf32>
    %2169 = arith.addf %2153, %2168 : vector<3x24xf32>
    %2170 = vector.extract_strided_slice %1217 {offsets = [0, 0], sizes = [3, 3], strides = [1, 1]} : vector<4x4xf32> to vector<3x3xf32>
    %2171 = tpu.concatenate %2170, %2170, %2170, %2170, %2170, %2170, %2170, %2170 in 1 : vector<3x3xf32>, vector<3x3xf32>, vector<3x3xf32>, vector<3x3xf32>, vector<3x3xf32>, vector<3x3xf32>, vector<3x3xf32>, vector<3x3xf32> -> vector<3x24xf32>
    %c39 = arith.constant 39 : index
    %c0_1832 = arith.constant 0 : index
    %2172 = vector.load %arg4[%c39, %c0_1832] : memref<72x24xf32, #tpu.memory_space<vmem>>, vector<1x24xf32>
    %2173 = vector.shape_cast %2172 : vector<1x24xf32> to vector<24xf32>
    %2174 = vector.shape_cast %2173 : vector<24xf32> to vector<1x24xf32>
    %2175 = vector.broadcast %2174 : vector<1x24xf32> to vector<3x24xf32>
    %2176 = arith.mulf %2171, %2175 : vector<3x24xf32>
    %2177 = arith.addf %2161, %2176 : vector<3x24xf32>
    %2178 = vector.extract_strided_slice %1681 {offsets = [0, 0], sizes = [3, 3], strides = [1, 1]} : vector<4x4xf32> to vector<3x3xf32>
    %2179 = tpu.concatenate %2178, %2178, %2178, %2178, %2178, %2178, %2178, %2178 in 1 : vector<3x3xf32>, vector<3x3xf32>, vector<3x3xf32>, vector<3x3xf32>, vector<3x3xf32>, vector<3x3xf32>, vector<3x3xf32>, vector<3x3xf32> -> vector<3x24xf32>
    %c40 = arith.constant 40 : index
    %c0_1833 = arith.constant 0 : index
    %2180 = vector.load %arg4[%c40, %c0_1833] : memref<72x24xf32, #tpu.memory_space<vmem>>, vector<1x24xf32>
    %2181 = vector.shape_cast %2180 : vector<1x24xf32> to vector<24xf32>
    %2182 = vector.shape_cast %2181 : vector<24xf32> to vector<1x24xf32>
    %2183 = vector.broadcast %2182 : vector<1x24xf32> to vector<3x24xf32>
    %2184 = arith.mulf %2179, %2183 : vector<3x24xf32>
    %2185 = arith.addf %2169, %2184 : vector<3x24xf32>
    %2186 = vector.extract_strided_slice %1217 {offsets = [0, 1], sizes = [3, 3], strides = [1, 1]} : vector<4x4xf32> to vector<3x3xf32>
    %2187 = tpu.concatenate %2186, %2186, %2186, %2186, %2186, %2186, %2186, %2186 in 1 : vector<3x3xf32>, vector<3x3xf32>, vector<3x3xf32>, vector<3x3xf32>, vector<3x3xf32>, vector<3x3xf32>, vector<3x3xf32>, vector<3x3xf32> -> vector<3x24xf32>
    %c41 = arith.constant 41 : index
    %c0_1834 = arith.constant 0 : index
    %2188 = vector.load %arg4[%c41, %c0_1834] : memref<72x24xf32, #tpu.memory_space<vmem>>, vector<1x24xf32>
    %2189 = vector.shape_cast %2188 : vector<1x24xf32> to vector<24xf32>
    %2190 = vector.shape_cast %2189 : vector<24xf32> to vector<1x24xf32>
    %2191 = vector.broadcast %2190 : vector<1x24xf32> to vector<3x24xf32>
    %2192 = arith.mulf %2187, %2191 : vector<3x24xf32>
    %2193 = arith.addf %2177, %2192 : vector<3x24xf32>
    %2194 = vector.extract_strided_slice %289 {offsets = [1, 0], sizes = [3, 3], strides = [1, 1]} : vector<4x4xf32> to vector<3x3xf32>
    %2195 = tpu.concatenate %2194, %2194, %2194, %2194, %2194, %2194, %2194, %2194 in 1 : vector<3x3xf32>, vector<3x3xf32>, vector<3x3xf32>, vector<3x3xf32>, vector<3x3xf32>, vector<3x3xf32>, vector<3x3xf32>, vector<3x3xf32> -> vector<3x24xf32>
    %c42 = arith.constant 42 : index
    %c0_1835 = arith.constant 0 : index
    %2196 = vector.load %arg4[%c42, %c0_1835] : memref<72x24xf32, #tpu.memory_space<vmem>>, vector<1x24xf32>
    %2197 = vector.shape_cast %2196 : vector<1x24xf32> to vector<24xf32>
    %2198 = vector.shape_cast %2197 : vector<24xf32> to vector<1x24xf32>
    %2199 = vector.broadcast %2198 : vector<1x24xf32> to vector<3x24xf32>
    %2200 = arith.mulf %2195, %2199 : vector<3x24xf32>
    %2201 = arith.addf %2185, %2200 : vector<3x24xf32>
    %2202 = vector.extract_strided_slice %753 {offsets = [1, 0], sizes = [3, 3], strides = [1, 1]} : vector<4x4xf32> to vector<3x3xf32>
    %2203 = tpu.concatenate %2202, %2202, %2202, %2202, %2202, %2202, %2202, %2202 in 1 : vector<3x3xf32>, vector<3x3xf32>, vector<3x3xf32>, vector<3x3xf32>, vector<3x3xf32>, vector<3x3xf32>, vector<3x3xf32>, vector<3x3xf32> -> vector<3x24xf32>
    %c43 = arith.constant 43 : index
    %c0_1836 = arith.constant 0 : index
    %2204 = vector.load %arg4[%c43, %c0_1836] : memref<72x24xf32, #tpu.memory_space<vmem>>, vector<1x24xf32>
    %2205 = vector.shape_cast %2204 : vector<1x24xf32> to vector<24xf32>
    %2206 = vector.shape_cast %2205 : vector<24xf32> to vector<1x24xf32>
    %2207 = vector.broadcast %2206 : vector<1x24xf32> to vector<3x24xf32>
    %2208 = arith.mulf %2203, %2207 : vector<3x24xf32>
    %2209 = arith.addf %2193, %2208 : vector<3x24xf32>
    %2210 = vector.extract_strided_slice %289 {offsets = [1, 1], sizes = [3, 3], strides = [1, 1]} : vector<4x4xf32> to vector<3x3xf32>
    %2211 = tpu.concatenate %2210, %2210, %2210, %2210, %2210, %2210, %2210, %2210 in 1 : vector<3x3xf32>, vector<3x3xf32>, vector<3x3xf32>, vector<3x3xf32>, vector<3x3xf32>, vector<3x3xf32>, vector<3x3xf32>, vector<3x3xf32> -> vector<3x24xf32>
    %c44 = arith.constant 44 : index
    %c0_1837 = arith.constant 0 : index
    %2212 = vector.load %arg4[%c44, %c0_1837] : memref<72x24xf32, #tpu.memory_space<vmem>>, vector<1x24xf32>
    %2213 = vector.shape_cast %2212 : vector<1x24xf32> to vector<24xf32>
    %2214 = vector.shape_cast %2213 : vector<24xf32> to vector<1x24xf32>
    %2215 = vector.broadcast %2214 : vector<1x24xf32> to vector<3x24xf32>
    %2216 = arith.mulf %2211, %2215 : vector<3x24xf32>
    %2217 = arith.addf %2201, %2216 : vector<3x24xf32>
    %2218 = vector.extract_strided_slice %347 {offsets = [0, 0], sizes = [3, 3], strides = [1, 1]} : vector<4x4xf32> to vector<3x3xf32>
    %2219 = tpu.concatenate %2218, %2218, %2218, %2218, %2218, %2218, %2218, %2218 in 1 : vector<3x3xf32>, vector<3x3xf32>, vector<3x3xf32>, vector<3x3xf32>, vector<3x3xf32>, vector<3x3xf32>, vector<3x3xf32>, vector<3x3xf32> -> vector<3x24xf32>
    %c45 = arith.constant 45 : index
    %c0_1838 = arith.constant 0 : index
    %2220 = vector.load %arg4[%c45, %c0_1838] : memref<72x24xf32, #tpu.memory_space<vmem>>, vector<1x24xf32>
    %2221 = vector.shape_cast %2220 : vector<1x24xf32> to vector<24xf32>
    %2222 = vector.shape_cast %2221 : vector<24xf32> to vector<1x24xf32>
    %2223 = vector.broadcast %2222 : vector<1x24xf32> to vector<3x24xf32>
    %2224 = arith.mulf %2219, %2223 : vector<3x24xf32>
    %2225 = arith.addf %2217, %2224 : vector<3x24xf32>
    %2226 = vector.extract_strided_slice %811 {offsets = [0, 0], sizes = [3, 3], strides = [1, 1]} : vector<4x4xf32> to vector<3x3xf32>
    %2227 = tpu.concatenate %2226, %2226, %2226, %2226, %2226, %2226, %2226, %2226 in 1 : vector<3x3xf32>, vector<3x3xf32>, vector<3x3xf32>, vector<3x3xf32>, vector<3x3xf32>, vector<3x3xf32>, vector<3x3xf32>, vector<3x3xf32> -> vector<3x24xf32>
    %c46 = arith.constant 46 : index
    %c0_1839 = arith.constant 0 : index
    %2228 = vector.load %arg4[%c46, %c0_1839] : memref<72x24xf32, #tpu.memory_space<vmem>>, vector<1x24xf32>
    %2229 = vector.shape_cast %2228 : vector<1x24xf32> to vector<24xf32>
    %2230 = vector.shape_cast %2229 : vector<24xf32> to vector<1x24xf32>
    %2231 = vector.broadcast %2230 : vector<1x24xf32> to vector<3x24xf32>
    %2232 = arith.mulf %2227, %2231 : vector<3x24xf32>
    %2233 = arith.addf %2209, %2232 : vector<3x24xf32>
    %2234 = vector.extract_strided_slice %347 {offsets = [0, 1], sizes = [3, 3], strides = [1, 1]} : vector<4x4xf32> to vector<3x3xf32>
    %2235 = tpu.concatenate %2234, %2234, %2234, %2234, %2234, %2234, %2234, %2234 in 1 : vector<3x3xf32>, vector<3x3xf32>, vector<3x3xf32>, vector<3x3xf32>, vector<3x3xf32>, vector<3x3xf32>, vector<3x3xf32>, vector<3x3xf32> -> vector<3x24xf32>
    %c47 = arith.constant 47 : index
    %c0_1840 = arith.constant 0 : index
    %2236 = vector.load %arg4[%c47, %c0_1840] : memref<72x24xf32, #tpu.memory_space<vmem>>, vector<1x24xf32>
    %2237 = vector.shape_cast %2236 : vector<1x24xf32> to vector<24xf32>
    %2238 = vector.shape_cast %2237 : vector<24xf32> to vector<1x24xf32>
    %2239 = vector.broadcast %2238 : vector<1x24xf32> to vector<3x24xf32>
    %2240 = arith.mulf %2235, %2239 : vector<3x24xf32>
    %2241 = arith.addf %2225, %2240 : vector<3x24xf32>
    %2242 = vector.extract_strided_slice %1275 {offsets = [0, 0], sizes = [3, 3], strides = [1, 1]} : vector<4x4xf32> to vector<3x3xf32>
    %2243 = tpu.concatenate %2242, %2242, %2242, %2242, %2242, %2242, %2242, %2242 in 1 : vector<3x3xf32>, vector<3x3xf32>, vector<3x3xf32>, vector<3x3xf32>, vector<3x3xf32>, vector<3x3xf32>, vector<3x3xf32>, vector<3x3xf32> -> vector<3x24xf32>
    %c48 = arith.constant 48 : index
    %c0_1841 = arith.constant 0 : index
    %2244 = vector.load %arg4[%c48, %c0_1841] : memref<72x24xf32, #tpu.memory_space<vmem>>, vector<1x24xf32>
    %2245 = vector.shape_cast %2244 : vector<1x24xf32> to vector<24xf32>
    %2246 = vector.shape_cast %2245 : vector<24xf32> to vector<1x24xf32>
    %2247 = vector.broadcast %2246 : vector<1x24xf32> to vector<3x24xf32>
    %2248 = arith.mulf %2243, %2247 : vector<3x24xf32>
    %2249 = arith.addf %2233, %2248 : vector<3x24xf32>
    %2250 = vector.extract_strided_slice %1739 {offsets = [0, 0], sizes = [3, 3], strides = [1, 1]} : vector<4x4xf32> to vector<3x3xf32>
    %2251 = tpu.concatenate %2250, %2250, %2250, %2250, %2250, %2250, %2250, %2250 in 1 : vector<3x3xf32>, vector<3x3xf32>, vector<3x3xf32>, vector<3x3xf32>, vector<3x3xf32>, vector<3x3xf32>, vector<3x3xf32>, vector<3x3xf32> -> vector<3x24xf32>
    %c49 = arith.constant 49 : index
    %c0_1842 = arith.constant 0 : index
    %2252 = vector.load %arg4[%c49, %c0_1842] : memref<72x24xf32, #tpu.memory_space<vmem>>, vector<1x24xf32>
    %2253 = vector.shape_cast %2252 : vector<1x24xf32> to vector<24xf32>
    %2254 = vector.shape_cast %2253 : vector<24xf32> to vector<1x24xf32>
    %2255 = vector.broadcast %2254 : vector<1x24xf32> to vector<3x24xf32>
    %2256 = arith.mulf %2251, %2255 : vector<3x24xf32>
    %2257 = arith.addf %2241, %2256 : vector<3x24xf32>
    %2258 = vector.extract_strided_slice %1275 {offsets = [0, 1], sizes = [3, 3], strides = [1, 1]} : vector<4x4xf32> to vector<3x3xf32>
    %2259 = tpu.concatenate %2258, %2258, %2258, %2258, %2258, %2258, %2258, %2258 in 1 : vector<3x3xf32>, vector<3x3xf32>, vector<3x3xf32>, vector<3x3xf32>, vector<3x3xf32>, vector<3x3xf32>, vector<3x3xf32>, vector<3x3xf32> -> vector<3x24xf32>
    %c50 = arith.constant 50 : index
    %c0_1843 = arith.constant 0 : index
    %2260 = vector.load %arg4[%c50, %c0_1843] : memref<72x24xf32, #tpu.memory_space<vmem>>, vector<1x24xf32>
    %2261 = vector.shape_cast %2260 : vector<1x24xf32> to vector<24xf32>
    %2262 = vector.shape_cast %2261 : vector<24xf32> to vector<1x24xf32>
    %2263 = vector.broadcast %2262 : vector<1x24xf32> to vector<3x24xf32>
    %2264 = arith.mulf %2259, %2263 : vector<3x24xf32>
    %2265 = arith.addf %2249, %2264 : vector<3x24xf32>
    %2266 = vector.extract_strided_slice %347 {offsets = [1, 0], sizes = [3, 3], strides = [1, 1]} : vector<4x4xf32> to vector<3x3xf32>
    %2267 = tpu.concatenate %2266, %2266, %2266, %2266, %2266, %2266, %2266, %2266 in 1 : vector<3x3xf32>, vector<3x3xf32>, vector<3x3xf32>, vector<3x3xf32>, vector<3x3xf32>, vector<3x3xf32>, vector<3x3xf32>, vector<3x3xf32> -> vector<3x24xf32>
    %c51 = arith.constant 51 : index
    %c0_1844 = arith.constant 0 : index
    %2268 = vector.load %arg4[%c51, %c0_1844] : memref<72x24xf32, #tpu.memory_space<vmem>>, vector<1x24xf32>
    %2269 = vector.shape_cast %2268 : vector<1x24xf32> to vector<24xf32>
    %2270 = vector.shape_cast %2269 : vector<24xf32> to vector<1x24xf32>
    %2271 = vector.broadcast %2270 : vector<1x24xf32> to vector<3x24xf32>
    %2272 = arith.mulf %2267, %2271 : vector<3x24xf32>
    %2273 = arith.addf %2257, %2272 : vector<3x24xf32>
    %2274 = vector.extract_strided_slice %811 {offsets = [1, 0], sizes = [3, 3], strides = [1, 1]} : vector<4x4xf32> to vector<3x3xf32>
    %2275 = tpu.concatenate %2274, %2274, %2274, %2274, %2274, %2274, %2274, %2274 in 1 : vector<3x3xf32>, vector<3x3xf32>, vector<3x3xf32>, vector<3x3xf32>, vector<3x3xf32>, vector<3x3xf32>, vector<3x3xf32>, vector<3x3xf32> -> vector<3x24xf32>
    %c52 = arith.constant 52 : index
    %c0_1845 = arith.constant 0 : index
    %2276 = vector.load %arg4[%c52, %c0_1845] : memref<72x24xf32, #tpu.memory_space<vmem>>, vector<1x24xf32>
    %2277 = vector.shape_cast %2276 : vector<1x24xf32> to vector<24xf32>
    %2278 = vector.shape_cast %2277 : vector<24xf32> to vector<1x24xf32>
    %2279 = vector.broadcast %2278 : vector<1x24xf32> to vector<3x24xf32>
    %2280 = arith.mulf %2275, %2279 : vector<3x24xf32>
    %2281 = arith.addf %2265, %2280 : vector<3x24xf32>
    %2282 = vector.extract_strided_slice %347 {offsets = [1, 1], sizes = [3, 3], strides = [1, 1]} : vector<4x4xf32> to vector<3x3xf32>
    %2283 = tpu.concatenate %2282, %2282, %2282, %2282, %2282, %2282, %2282, %2282 in 1 : vector<3x3xf32>, vector<3x3xf32>, vector<3x3xf32>, vector<3x3xf32>, vector<3x3xf32>, vector<3x3xf32>, vector<3x3xf32>, vector<3x3xf32> -> vector<3x24xf32>
    %c53 = arith.constant 53 : index
    %c0_1846 = arith.constant 0 : index
    %2284 = vector.load %arg4[%c53, %c0_1846] : memref<72x24xf32, #tpu.memory_space<vmem>>, vector<1x24xf32>
    %2285 = vector.shape_cast %2284 : vector<1x24xf32> to vector<24xf32>
    %2286 = vector.shape_cast %2285 : vector<24xf32> to vector<1x24xf32>
    %2287 = vector.broadcast %2286 : vector<1x24xf32> to vector<3x24xf32>
    %2288 = arith.mulf %2283, %2287 : vector<3x24xf32>
    %2289 = arith.addf %2273, %2288 : vector<3x24xf32>
    %2290 = vector.extract_strided_slice %405 {offsets = [0, 0], sizes = [3, 3], strides = [1, 1]} : vector<4x4xf32> to vector<3x3xf32>
    %2291 = tpu.concatenate %2290, %2290, %2290, %2290, %2290, %2290, %2290, %2290 in 1 : vector<3x3xf32>, vector<3x3xf32>, vector<3x3xf32>, vector<3x3xf32>, vector<3x3xf32>, vector<3x3xf32>, vector<3x3xf32>, vector<3x3xf32> -> vector<3x24xf32>
    %c54 = arith.constant 54 : index
    %c0_1847 = arith.constant 0 : index
    %2292 = vector.load %arg4[%c54, %c0_1847] : memref<72x24xf32, #tpu.memory_space<vmem>>, vector<1x24xf32>
    %2293 = vector.shape_cast %2292 : vector<1x24xf32> to vector<24xf32>
    %2294 = vector.shape_cast %2293 : vector<24xf32> to vector<1x24xf32>
    %2295 = vector.broadcast %2294 : vector<1x24xf32> to vector<3x24xf32>
    %2296 = arith.mulf %2291, %2295 : vector<3x24xf32>
    %2297 = arith.addf %2289, %2296 : vector<3x24xf32>
    %2298 = vector.extract_strided_slice %869 {offsets = [0, 0], sizes = [3, 3], strides = [1, 1]} : vector<4x4xf32> to vector<3x3xf32>
    %2299 = tpu.concatenate %2298, %2298, %2298, %2298, %2298, %2298, %2298, %2298 in 1 : vector<3x3xf32>, vector<3x3xf32>, vector<3x3xf32>, vector<3x3xf32>, vector<3x3xf32>, vector<3x3xf32>, vector<3x3xf32>, vector<3x3xf32> -> vector<3x24xf32>
    %c55 = arith.constant 55 : index
    %c0_1848 = arith.constant 0 : index
    %2300 = vector.load %arg4[%c55, %c0_1848] : memref<72x24xf32, #tpu.memory_space<vmem>>, vector<1x24xf32>
    %2301 = vector.shape_cast %2300 : vector<1x24xf32> to vector<24xf32>
    %2302 = vector.shape_cast %2301 : vector<24xf32> to vector<1x24xf32>
    %2303 = vector.broadcast %2302 : vector<1x24xf32> to vector<3x24xf32>
    %2304 = arith.mulf %2299, %2303 : vector<3x24xf32>
    %2305 = arith.addf %2281, %2304 : vector<3x24xf32>
    %2306 = vector.extract_strided_slice %405 {offsets = [0, 1], sizes = [3, 3], strides = [1, 1]} : vector<4x4xf32> to vector<3x3xf32>
    %2307 = tpu.concatenate %2306, %2306, %2306, %2306, %2306, %2306, %2306, %2306 in 1 : vector<3x3xf32>, vector<3x3xf32>, vector<3x3xf32>, vector<3x3xf32>, vector<3x3xf32>, vector<3x3xf32>, vector<3x3xf32>, vector<3x3xf32> -> vector<3x24xf32>
    %c56 = arith.constant 56 : index
    %c0_1849 = arith.constant 0 : index
    %2308 = vector.load %arg4[%c56, %c0_1849] : memref<72x24xf32, #tpu.memory_space<vmem>>, vector<1x24xf32>
    %2309 = vector.shape_cast %2308 : vector<1x24xf32> to vector<24xf32>
    %2310 = vector.shape_cast %2309 : vector<24xf32> to vector<1x24xf32>
    %2311 = vector.broadcast %2310 : vector<1x24xf32> to vector<3x24xf32>
    %2312 = arith.mulf %2307, %2311 : vector<3x24xf32>
    %2313 = arith.addf %2297, %2312 : vector<3x24xf32>
    %2314 = vector.extract_strided_slice %1333 {offsets = [0, 0], sizes = [3, 3], strides = [1, 1]} : vector<4x4xf32> to vector<3x3xf32>
    %2315 = tpu.concatenate %2314, %2314, %2314, %2314, %2314, %2314, %2314, %2314 in 1 : vector<3x3xf32>, vector<3x3xf32>, vector<3x3xf32>, vector<3x3xf32>, vector<3x3xf32>, vector<3x3xf32>, vector<3x3xf32>, vector<3x3xf32> -> vector<3x24xf32>
    %c57 = arith.constant 57 : index
    %c0_1850 = arith.constant 0 : index
    %2316 = vector.load %arg4[%c57, %c0_1850] : memref<72x24xf32, #tpu.memory_space<vmem>>, vector<1x24xf32>
    %2317 = vector.shape_cast %2316 : vector<1x24xf32> to vector<24xf32>
    %2318 = vector.shape_cast %2317 : vector<24xf32> to vector<1x24xf32>
    %2319 = vector.broadcast %2318 : vector<1x24xf32> to vector<3x24xf32>
    %2320 = arith.mulf %2315, %2319 : vector<3x24xf32>
    %2321 = arith.addf %2305, %2320 : vector<3x24xf32>
    %2322 = vector.extract_strided_slice %1797 {offsets = [0, 0], sizes = [3, 3], strides = [1, 1]} : vector<4x4xf32> to vector<3x3xf32>
    %2323 = tpu.concatenate %2322, %2322, %2322, %2322, %2322, %2322, %2322, %2322 in 1 : vector<3x3xf32>, vector<3x3xf32>, vector<3x3xf32>, vector<3x3xf32>, vector<3x3xf32>, vector<3x3xf32>, vector<3x3xf32>, vector<3x3xf32> -> vector<3x24xf32>
    %c58 = arith.constant 58 : index
    %c0_1851 = arith.constant 0 : index
    %2324 = vector.load %arg4[%c58, %c0_1851] : memref<72x24xf32, #tpu.memory_space<vmem>>, vector<1x24xf32>
    %2325 = vector.shape_cast %2324 : vector<1x24xf32> to vector<24xf32>
    %2326 = vector.shape_cast %2325 : vector<24xf32> to vector<1x24xf32>
    %2327 = vector.broadcast %2326 : vector<1x24xf32> to vector<3x24xf32>
    %2328 = arith.mulf %2323, %2327 : vector<3x24xf32>
    %2329 = arith.addf %2313, %2328 : vector<3x24xf32>
    %2330 = vector.extract_strided_slice %1333 {offsets = [0, 1], sizes = [3, 3], strides = [1, 1]} : vector<4x4xf32> to vector<3x3xf32>
    %2331 = tpu.concatenate %2330, %2330, %2330, %2330, %2330, %2330, %2330, %2330 in 1 : vector<3x3xf32>, vector<3x3xf32>, vector<3x3xf32>, vector<3x3xf32>, vector<3x3xf32>, vector<3x3xf32>, vector<3x3xf32>, vector<3x3xf32> -> vector<3x24xf32>
    %c59 = arith.constant 59 : index
    %c0_1852 = arith.constant 0 : index
    %2332 = vector.load %arg4[%c59, %c0_1852] : memref<72x24xf32, #tpu.memory_space<vmem>>, vector<1x24xf32>
    %2333 = vector.shape_cast %2332 : vector<1x24xf32> to vector<24xf32>
    %2334 = vector.shape_cast %2333 : vector<24xf32> to vector<1x24xf32>
    %2335 = vector.broadcast %2334 : vector<1x24xf32> to vector<3x24xf32>
    %2336 = arith.mulf %2331, %2335 : vector<3x24xf32>
    %2337 = arith.addf %2321, %2336 : vector<3x24xf32>
    %2338 = vector.extract_strided_slice %405 {offsets = [1, 0], sizes = [3, 3], strides = [1, 1]} : vector<4x4xf32> to vector<3x3xf32>
    %2339 = tpu.concatenate %2338, %2338, %2338, %2338, %2338, %2338, %2338, %2338 in 1 : vector<3x3xf32>, vector<3x3xf32>, vector<3x3xf32>, vector<3x3xf32>, vector<3x3xf32>, vector<3x3xf32>, vector<3x3xf32>, vector<3x3xf32> -> vector<3x24xf32>
    %c60 = arith.constant 60 : index
    %c0_1853 = arith.constant 0 : index
    %2340 = vector.load %arg4[%c60, %c0_1853] : memref<72x24xf32, #tpu.memory_space<vmem>>, vector<1x24xf32>
    %2341 = vector.shape_cast %2340 : vector<1x24xf32> to vector<24xf32>
    %2342 = vector.shape_cast %2341 : vector<24xf32> to vector<1x24xf32>
    %2343 = vector.broadcast %2342 : vector<1x24xf32> to vector<3x24xf32>
    %2344 = arith.mulf %2339, %2343 : vector<3x24xf32>
    %2345 = arith.addf %2329, %2344 : vector<3x24xf32>
    %2346 = vector.extract_strided_slice %869 {offsets = [1, 0], sizes = [3, 3], strides = [1, 1]} : vector<4x4xf32> to vector<3x3xf32>
    %2347 = tpu.concatenate %2346, %2346, %2346, %2346, %2346, %2346, %2346, %2346 in 1 : vector<3x3xf32>, vector<3x3xf32>, vector<3x3xf32>, vector<3x3xf32>, vector<3x3xf32>, vector<3x3xf32>, vector<3x3xf32>, vector<3x3xf32> -> vector<3x24xf32>
    %c61 = arith.constant 61 : index
    %c0_1854 = arith.constant 0 : index
    %2348 = vector.load %arg4[%c61, %c0_1854] : memref<72x24xf32, #tpu.memory_space<vmem>>, vector<1x24xf32>
    %2349 = vector.shape_cast %2348 : vector<1x24xf32> to vector<24xf32>
    %2350 = vector.shape_cast %2349 : vector<24xf32> to vector<1x24xf32>
    %2351 = vector.broadcast %2350 : vector<1x24xf32> to vector<3x24xf32>
    %2352 = arith.mulf %2347, %2351 : vector<3x24xf32>
    %2353 = arith.addf %2337, %2352 : vector<3x24xf32>
    %2354 = vector.extract_strided_slice %405 {offsets = [1, 1], sizes = [3, 3], strides = [1, 1]} : vector<4x4xf32> to vector<3x3xf32>
    %2355 = tpu.concatenate %2354, %2354, %2354, %2354, %2354, %2354, %2354, %2354 in 1 : vector<3x3xf32>, vector<3x3xf32>, vector<3x3xf32>, vector<3x3xf32>, vector<3x3xf32>, vector<3x3xf32>, vector<3x3xf32>, vector<3x3xf32> -> vector<3x24xf32>
    %c62 = arith.constant 62 : index
    %c0_1855 = arith.constant 0 : index
    %2356 = vector.load %arg4[%c62, %c0_1855] : memref<72x24xf32, #tpu.memory_space<vmem>>, vector<1x24xf32>
    %2357 = vector.shape_cast %2356 : vector<1x24xf32> to vector<24xf32>
    %2358 = vector.shape_cast %2357 : vector<24xf32> to vector<1x24xf32>
    %2359 = vector.broadcast %2358 : vector<1x24xf32> to vector<3x24xf32>
    %2360 = arith.mulf %2355, %2359 : vector<3x24xf32>
    %2361 = arith.addf %2345, %2360 : vector<3x24xf32>
    %2362 = vector.extract_strided_slice %463 {offsets = [0, 0], sizes = [3, 3], strides = [1, 1]} : vector<4x4xf32> to vector<3x3xf32>
    %2363 = tpu.concatenate %2362, %2362, %2362, %2362, %2362, %2362, %2362, %2362 in 1 : vector<3x3xf32>, vector<3x3xf32>, vector<3x3xf32>, vector<3x3xf32>, vector<3x3xf32>, vector<3x3xf32>, vector<3x3xf32>, vector<3x3xf32> -> vector<3x24xf32>
    %c63 = arith.constant 63 : index
    %c0_1856 = arith.constant 0 : index
    %2364 = vector.load %arg4[%c63, %c0_1856] : memref<72x24xf32, #tpu.memory_space<vmem>>, vector<1x24xf32>
    %2365 = vector.shape_cast %2364 : vector<1x24xf32> to vector<24xf32>
    %2366 = vector.shape_cast %2365 : vector<24xf32> to vector<1x24xf32>
    %2367 = vector.broadcast %2366 : vector<1x24xf32> to vector<3x24xf32>
    %2368 = arith.mulf %2363, %2367 : vector<3x24xf32>
    %2369 = arith.addf %2361, %2368 : vector<3x24xf32>
    %2370 = vector.extract_strided_slice %927 {offsets = [0, 0], sizes = [3, 3], strides = [1, 1]} : vector<4x4xf32> to vector<3x3xf32>
    %2371 = tpu.concatenate %2370, %2370, %2370, %2370, %2370, %2370, %2370, %2370 in 1 : vector<3x3xf32>, vector<3x3xf32>, vector<3x3xf32>, vector<3x3xf32>, vector<3x3xf32>, vector<3x3xf32>, vector<3x3xf32>, vector<3x3xf32> -> vector<3x24xf32>
    %c64 = arith.constant 64 : index
    %c0_1857 = arith.constant 0 : index
    %2372 = vector.load %arg4[%c64, %c0_1857] : memref<72x24xf32, #tpu.memory_space<vmem>>, vector<1x24xf32>
    %2373 = vector.shape_cast %2372 : vector<1x24xf32> to vector<24xf32>
    %2374 = vector.shape_cast %2373 : vector<24xf32> to vector<1x24xf32>
    %2375 = vector.broadcast %2374 : vector<1x24xf32> to vector<3x24xf32>
    %2376 = arith.mulf %2371, %2375 : vector<3x24xf32>
    %2377 = arith.addf %2353, %2376 : vector<3x24xf32>
    %2378 = vector.extract_strided_slice %463 {offsets = [0, 1], sizes = [3, 3], strides = [1, 1]} : vector<4x4xf32> to vector<3x3xf32>
    %2379 = tpu.concatenate %2378, %2378, %2378, %2378, %2378, %2378, %2378, %2378 in 1 : vector<3x3xf32>, vector<3x3xf32>, vector<3x3xf32>, vector<3x3xf32>, vector<3x3xf32>, vector<3x3xf32>, vector<3x3xf32>, vector<3x3xf32> -> vector<3x24xf32>
    %c65 = arith.constant 65 : index
    %c0_1858 = arith.constant 0 : index
    %2380 = vector.load %arg4[%c65, %c0_1858] : memref<72x24xf32, #tpu.memory_space<vmem>>, vector<1x24xf32>
    %2381 = vector.shape_cast %2380 : vector<1x24xf32> to vector<24xf32>
    %2382 = vector.shape_cast %2381 : vector<24xf32> to vector<1x24xf32>
    %2383 = vector.broadcast %2382 : vector<1x24xf32> to vector<3x24xf32>
    %2384 = arith.mulf %2379, %2383 : vector<3x24xf32>
    %2385 = arith.addf %2369, %2384 : vector<3x24xf32>
    %2386 = vector.extract_strided_slice %1391 {offsets = [0, 0], sizes = [3, 3], strides = [1, 1]} : vector<4x4xf32> to vector<3x3xf32>
    %2387 = tpu.concatenate %2386, %2386, %2386, %2386, %2386, %2386, %2386, %2386 in 1 : vector<3x3xf32>, vector<3x3xf32>, vector<3x3xf32>, vector<3x3xf32>, vector<3x3xf32>, vector<3x3xf32>, vector<3x3xf32>, vector<3x3xf32> -> vector<3x24xf32>
    %c66 = arith.constant 66 : index
    %c0_1859 = arith.constant 0 : index
    %2388 = vector.load %arg4[%c66, %c0_1859] : memref<72x24xf32, #tpu.memory_space<vmem>>, vector<1x24xf32>
    %2389 = vector.shape_cast %2388 : vector<1x24xf32> to vector<24xf32>
    %2390 = vector.shape_cast %2389 : vector<24xf32> to vector<1x24xf32>
    %2391 = vector.broadcast %2390 : vector<1x24xf32> to vector<3x24xf32>
    %2392 = arith.mulf %2387, %2391 : vector<3x24xf32>
    %2393 = arith.addf %2377, %2392 : vector<3x24xf32>
    %2394 = vector.extract_strided_slice %1855 {offsets = [0, 0], sizes = [3, 3], strides = [1, 1]} : vector<4x4xf32> to vector<3x3xf32>
    %2395 = tpu.concatenate %2394, %2394, %2394, %2394, %2394, %2394, %2394, %2394 in 1 : vector<3x3xf32>, vector<3x3xf32>, vector<3x3xf32>, vector<3x3xf32>, vector<3x3xf32>, vector<3x3xf32>, vector<3x3xf32>, vector<3x3xf32> -> vector<3x24xf32>
    %c67 = arith.constant 67 : index
    %c0_1860 = arith.constant 0 : index
    %2396 = vector.load %arg4[%c67, %c0_1860] : memref<72x24xf32, #tpu.memory_space<vmem>>, vector<1x24xf32>
    %2397 = vector.shape_cast %2396 : vector<1x24xf32> to vector<24xf32>
    %2398 = vector.shape_cast %2397 : vector<24xf32> to vector<1x24xf32>
    %2399 = vector.broadcast %2398 : vector<1x24xf32> to vector<3x24xf32>
    %2400 = arith.mulf %2395, %2399 : vector<3x24xf32>
    %2401 = arith.addf %2385, %2400 : vector<3x24xf32>
    %2402 = vector.extract_strided_slice %1391 {offsets = [0, 1], sizes = [3, 3], strides = [1, 1]} : vector<4x4xf32> to vector<3x3xf32>
    %2403 = tpu.concatenate %2402, %2402, %2402, %2402, %2402, %2402, %2402, %2402 in 1 : vector<3x3xf32>, vector<3x3xf32>, vector<3x3xf32>, vector<3x3xf32>, vector<3x3xf32>, vector<3x3xf32>, vector<3x3xf32>, vector<3x3xf32> -> vector<3x24xf32>
    %c68 = arith.constant 68 : index
    %c0_1861 = arith.constant 0 : index
    %2404 = vector.load %arg4[%c68, %c0_1861] : memref<72x24xf32, #tpu.memory_space<vmem>>, vector<1x24xf32>
    %2405 = vector.shape_cast %2404 : vector<1x24xf32> to vector<24xf32>
    %2406 = vector.shape_cast %2405 : vector<24xf32> to vector<1x24xf32>
    %2407 = vector.broadcast %2406 : vector<1x24xf32> to vector<3x24xf32>
    %2408 = arith.mulf %2403, %2407 : vector<3x24xf32>
    %2409 = arith.addf %2393, %2408 : vector<3x24xf32>
    %2410 = vector.extract_strided_slice %463 {offsets = [1, 0], sizes = [3, 3], strides = [1, 1]} : vector<4x4xf32> to vector<3x3xf32>
    %2411 = tpu.concatenate %2410, %2410, %2410, %2410, %2410, %2410, %2410, %2410 in 1 : vector<3x3xf32>, vector<3x3xf32>, vector<3x3xf32>, vector<3x3xf32>, vector<3x3xf32>, vector<3x3xf32>, vector<3x3xf32>, vector<3x3xf32> -> vector<3x24xf32>
    %c69 = arith.constant 69 : index
    %c0_1862 = arith.constant 0 : index
    %2412 = vector.load %arg4[%c69, %c0_1862] : memref<72x24xf32, #tpu.memory_space<vmem>>, vector<1x24xf32>
    %2413 = vector.shape_cast %2412 : vector<1x24xf32> to vector<24xf32>
    %2414 = vector.shape_cast %2413 : vector<24xf32> to vector<1x24xf32>
    %2415 = vector.broadcast %2414 : vector<1x24xf32> to vector<3x24xf32>
    %2416 = arith.mulf %2411, %2415 : vector<3x24xf32>
    %2417 = arith.addf %2401, %2416 : vector<3x24xf32>
    %2418 = vector.extract_strided_slice %927 {offsets = [1, 0], sizes = [3, 3], strides = [1, 1]} : vector<4x4xf32> to vector<3x3xf32>
    %2419 = tpu.concatenate %2418, %2418, %2418, %2418, %2418, %2418, %2418, %2418 in 1 : vector<3x3xf32>, vector<3x3xf32>, vector<3x3xf32>, vector<3x3xf32>, vector<3x3xf32>, vector<3x3xf32>, vector<3x3xf32>, vector<3x3xf32> -> vector<3x24xf32>
    %c70 = arith.constant 70 : index
    %c0_1863 = arith.constant 0 : index
    %2420 = vector.load %arg4[%c70, %c0_1863] : memref<72x24xf32, #tpu.memory_space<vmem>>, vector<1x24xf32>
    %2421 = vector.shape_cast %2420 : vector<1x24xf32> to vector<24xf32>
    %2422 = vector.shape_cast %2421 : vector<24xf32> to vector<1x24xf32>
    %2423 = vector.broadcast %2422 : vector<1x24xf32> to vector<3x24xf32>
    %2424 = arith.mulf %2419, %2423 : vector<3x24xf32>
    %2425 = arith.addf %2409, %2424 : vector<3x24xf32>
    %2426 = vector.extract_strided_slice %463 {offsets = [1, 1], sizes = [3, 3], strides = [1, 1]} : vector<4x4xf32> to vector<3x3xf32>
    %2427 = tpu.concatenate %2426, %2426, %2426, %2426, %2426, %2426, %2426, %2426 in 1 : vector<3x3xf32>, vector<3x3xf32>, vector<3x3xf32>, vector<3x3xf32>, vector<3x3xf32>, vector<3x3xf32>, vector<3x3xf32>, vector<3x3xf32> -> vector<3x24xf32>
    %c71 = arith.constant 71 : index
    %c0_1864 = arith.constant 0 : index
    %2428 = vector.load %arg4[%c71, %c0_1864] : memref<72x24xf32, #tpu.memory_space<vmem>>, vector<1x24xf32>
    %2429 = vector.shape_cast %2428 : vector<1x24xf32> to vector<24xf32>
    %2430 = vector.shape_cast %2429 : vector<24xf32> to vector<1x24xf32>
    %2431 = vector.broadcast %2430 : vector<1x24xf32> to vector<3x24xf32>
    %2432 = arith.mulf %2427, %2431 : vector<3x24xf32>
    %2433 = arith.addf %2417, %2432 : vector<3x24xf32>
    %2434 = arith.addf %2433, %2425 : vector<3x24xf32>
    %c0_1865 = arith.constant 0 : index
    %c0_1866 = arith.constant 0 : index
    %2435 = vector.load %arg5[%c0_1865, %c0_1866] : memref<1x24xf32, #tpu.memory_space<vmem>>, vector<1x24xf32>
    %2436 = vector.shape_cast %2435 : vector<1x24xf32> to vector<24xf32>
    %2437 = vector.shape_cast %2436 : vector<24xf32> to vector<1x24xf32>
    %2438 = vector.broadcast %2437 : vector<1x24xf32> to vector<3x24xf32>
    %2439 = arith.addf %2434, %2438 : vector<3x24xf32>
    %cst_1867 = arith.constant 0.000000e+00 : f32
    %2440 = vector.broadcast %cst_1867 : f32 to vector<3x24xf32>
    %2441 = arith.maximumf %2439, %2440 : vector<3x24xf32>
    %c0_1868 = arith.constant 0 : index
    %c0_1869 = arith.constant 0 : index
    %c0_1870 = arith.constant 0 : index
    %2442 = vector.load %arg6[%c0_1868, %c0_1869, %c0_1870] : memref<1x3x24xf32, #tpu.memory_space<vmem>>, vector<1x3x24xf32>
    %2443 = vector.shape_cast %2442 : vector<1x3x24xf32> to vector<3x24xf32>
    %2444 = vector.shape_cast %2441 : vector<3x24xf32> to vector<1x3x24xf32>
    tpu.vector_store %arg6[%c0_1868, %c0_1869, %c0_1870], %2444 {strides = array<i32>} : memref<1x3x24xf32, #tpu.memory_space<vmem>>, vector<1x3x24xf32>,
    return
  }
  func.func @transform_0(%arg0: i32) -> (i32, i32, i32, i32) {
    %c0_i32 = arith.constant 0 : i32
    %c0_i32_0 = arith.constant 0 : i32
    %c0_i32_1 = arith.constant 0 : i32
    %c0_i32_2 = arith.constant 0 : i32
    return %arg0, %c0_i32, %c0_i32_0, %c0_i32_1 : i32, i32, i32, i32
  }
  func.func @transform_1(%arg0: i32) -> (i32, i32) {
    %c0_i32 = arith.constant 0 : i32
    %c0_i32_0 = arith.constant 0 : i32
    %c0_i32_1 = arith.constant 0 : i32
    return %c0_i32, %c0_i32_0 : i32, i32
  }
  func.func @transform_2(%arg0: i32) -> i32 {
    %c0_i32 = arith.constant 0 : i32
    %c0_i32_0 = arith.constant 0 : i32
    return %c0_i32 : i32
  }
  func.func @transform_3(%arg0: i32) -> (i32, i32) {
    %c0_i32 = arith.constant 0 : i32
    %c0_i32_0 = arith.constant 0 : i32
    %c0_i32_1 = arith.constant 0 : i32
    return %c0_i32, %c0_i32_0 : i32, i32
  }
  func.func @transform_4(%arg0: i32) -> (i32, i32) {
    %c0_i32 = arith.constant 0 : i32
    %c0_i32_0 = arith.constant 0 : i32
    %c0_i32_1 = arith.constant 0 : i32
    return %c0_i32, %c0_i32_0 : i32, i32
  }
  func.func @transform_5(%arg0: i32) -> (i32, i32, i32) {
    %c0_i32 = arith.constant 0 : i32
    %c0_i32_0 = arith.constant 0 : i32
    %c0_i32_1 = arith.constant 0 : i32
    return %arg0, %c0_i32, %c0_i32_0 : i32, i32, i32
  }
}

</mosaic_0001>

<bundles_post_ra>
// kernel: conv2d_subsampling_forward.1
= control target key start
LH: loop header
LB: loop body
LE: loop exit
PB: predicated region body
PF: predicated region fallthrough
CT: control target
= control target key end

     0   :  { %10 = vsyncpa [#allocation3], 0  ;;  %s7142_s0 = inlined_call_operand.vmem [shape: f32[2,16,5,5], index: 0, kind: input, shape index: {}]   ;;  %s7143_s1 = inlined_call_operand.vmem [shape: f32[8,9], index: 1, kind: input, shape index: {}]   ;;  %s7144_s2 = inlined_call_operand.vmem [shape: f32[8], index: 2, kind: input, shape index: {}]   ;;  %s7145_s3 = inlined_call_operand.vmem [shape: f32[72,24], index: 3, kind: input, shape index: {}]   ;;  %s7146_s4 = inlined_call_operand.vmem [shape: f32[1,24], index: 4, kind: input, shape index: {}]   ;;  %s7147_s5 = inlined_call_operand.vmem [shape: f32[2,3,24], index: 5, kind: output, shape index: {}]  }
   0x1   :  { %11 = vsyncpa [#allocation5], 0  ;;  %s3672_s18 = smov 0  }
   0x2 LB: > { %s3678_s19 = sadd.s32 4294967295, %s3623_s18   ;;  %p3341_p0 = scmp.ge.s32.totalorder %s3623_s18, 1  ;;  %s3623_s18 = sphi %s3672_s18, %s17_s18  }
   0x3   : > { %p158_p1 = scmp.lt.s32.totalorder %s3623_s18, 3  ;;  %s171_s22 = sshll.u32 %s7143_s1, 4  ;;  %s172_s22 = int_to_ptr.vmem [resolvable:$true] %s171_s22 }
   0x4   : > { %p7148_p3 = scmp.eq.s32.totalorder %s3678_s19, 0  ;;  %s182_s26 = sshll.u32 %s7144_s2, 4  ;;  %s183_s26 = int_to_ptr.vmem [resolvable:$true] %s182_s26 }
   0x5   : > { %p3685_p2 = pnand %p3341_p0, %p158_p1  ;;  %s3579_s28 = scalar_lea.vmem %s172_s22, 128 }
   0x6   : > { %p3580_p6 = scmp.ne.s32.totalorder %s172_s22, %s3579_s28  ;;  %p3587_p10 = scmp.lt.s32.totalorder %s172_s22, %s172_s22 }
   0x7   : > { %s7236_s23 = scalar_select %p3685_p2, 1, 0 }
   0x8   : > { %p3531_p4 = pneg %p3685_p2  ;;  %p3588_p11 = scmp.lt.s32.totalorder %s3579_s28, %s3579_s28 }
   0xa   : > { %p3697_p5 = pnand %p7148_p3, %p3531_p4  ;;  %p3589_p12 = por %p3588_p11, %p3587_p10 }
   0xc   : > { %p3581_p7 = pneg %p3697_p5 }
   0xe   : > { %p3582_p8 = pnand %p3581_p7, %p3580_p6 }
  0x10   : > { %p3583_p9 = pneg %p3582_p8 }
  0x12   : > { %p3590_p13 = pnand %p3589_p12, %p3583_p9 }
  0x14   : > { %3593 = shalt.err (!%p3590_p13)
}
  0x15   : > { %s3625_s29 = smov [#allocation2]   ;;  %s3594_s30 = scalar_lea.vmem %s183_s26, 16 }
  0x16   : > { %3534 = dma.vmem_to_smem (!%p3697_p5), %s172_s22, 128, %s3625_s29, [#allocation3]  }
  0x17   : > { %p3595_p0 = scmp.ne.s32.totalorder %s183_s26, %s3594_s30  ;;  %p3602_p3 = scmp.lt.s32.totalorder %s183_s26, %s183_s26 }
  0x18   : > { %p3603_p2 = scmp.lt.s32.totalorder %s3594_s30, %s3594_s30 }
  0x19   : > { %p3597_p1 = pnand %p3595_p0, %p3581_p7 }
  0x1a   : > { %p3604_p6 = por %p3603_p2, %p3602_p3 }
  0x1b   : > { %p3598_p4 = pneg %p3597_p1 }
  0x1d   : > { %p3605_p8 = pnand %p3604_p6, %p3598_p4 }
  0x1f   : > { %3608 = shalt.err (!%p3605_p8)
}
  0x20   : > { %s3626_s6 = smov [#allocation4]   ;;  %p7238_p9 = scmp.ne.s32.totalorder %s7236_s23, 0 }
  0x21   : > { %3537 = dma.vmem_to_smem (!%p3697_p5), %s183_s26, 16, %s3626_s6, [#allocation5]  }
  0x22   : > { %209 = sbr.rel (%p7238_p9) target bundleno = 1013 (0x3f5), region = 40 }
  0x29   : > { %p7239_p10 = scmp.eq.s32.totalorder %s3678_s19, 0 }
  0x2b   : > { %3614 = dma.done.wait (%p7239_p10), [#allocation3], 128   ;;  %p7240_p11 = pmov %p7239_p10 }
  0x2c   : > { %p7241_p7 = pmov %p7239_p10 }
  0x2d   : > { %3616 = vsyncadd (%p7240_p11), [#allocation3], 4294967168 }
  0x2e   : > { %3618 = dma.done.wait (%p7241_p7), [#allocation5], 16   ;;  %p7242_p2 = pmov %p7241_p7 }
  0x30   : > { %3620 = vsyncadd (%p7242_p2), [#allocation5], 4294967280 }
  0x31   : > { %219 = sfence }
  0x32   : > { %p241_p3 = scmp.lt.s32.totalorder %s3678_s19, 1  ;;  %s3366_s7 = sld [smem:[#allocation2 + $0x8]]  ;;  %vm1267_vm0 = vcmask 23552   ;;  %vm1269_vm1 = vcmask 48128   ;;  %vm1271_vm2 = vcmask 72704   ;;  %vm1273_vm3 = vcmask 97280  }
  0x33   : > { %s251_s8 = sld [smem:[#allocation2]]  ;;  %s3354_s9 = sld [smem:[#allocation2 + $0x2]]  ;;  %vm1275_vm4 = vcmask 121856   ;;  %vm1277_vm5 = vcmask 146432   ;;  %vm1279_vm6 = vcmask 171008   ;;  %vm3262_vm7 = vcmask 190464  }
  0x34   : > { %s7809_s19 = smov (!%p241_p3, %s3678_s19), 1  ;;  %s3358_s10 = sld [smem:[#allocation2 + $0x4]] }
  0x35   : > { %s3522_s11 = sshll.u32 %s7809_s19, 7  ;;  %s3362_s12 = sld [smem:[#allocation2 + $0x6]] }
  0x36   : > { %s3725_s15 = scalar_lea.vmem %s7142_s0, %s3522_s11  ;;  %s3727_s16 = sld [smem:[#allocation2 + $0x82]] }
  0x37   : > { %v3730_v0 = vld [vmem:[%s3725_s15 + $0x40] sm:$0xf]  ;;  %v3742_v5 = vld [vmem:[%s3725_s15 + $0x10] sm:$0xf]  ;;  %v3745_v6 = vld [vmem:[%s3725_s15 + $0x28] sm:$0xf] }
  0x38   : > { %v3732_v1 = vstv %s3366_s7  ;;  %v3737_v3 = vld [vmem:[%s3725_s15] sm:$0xf]  ;;  %v3748_v7 = vld [vmem:[%s3725_s15 + $0x68] sm:$0xf]  ;;  %s3627_s17 = smov 127   ;;  %s3759_s20 = sld [smem:[#allocation2 + $0x1]] }
  0x39   : > { %v607_v2 = vmul.f32 %v3730_v0, %v3732_v1  ;;  %v3739_v4 = vstv %s251_s8  ;;  %v3753_v9 = vstv %s3354_s9  ;;  %s3761_s21 = sld [smem:[#allocation2 + $0x3]]  ;;  %v3764_v12 = vld [vmem:[%s3725_s15 + $0x50] sm:$0xf]  ;;  %s3774_s22 = sld [smem:[#allocation2 + $0x5]]  ;;  %v3788_v21 = vld [vmem:[%s3725_s15 + $0x1] sm:$0xf] }
  0x3a   : > { %7243 = vst [vmem:[#allocation8_spill] sm:$0xff] %v3739_v4  ;;  %v253_v8 = vmul.f32 %v3739_v4, %v3737_v3  ;;  %v3755_v10 = vstv %s3358_s10  ;;  %v833_v11 = vmul.f32 %v3730_v0, %v3739_v4  ;;  %v263_v13 = vmul.f32 %v3742_v5, %v3753_v9  ;;  %s3780_s23 = sld [smem:[#allocation2 + $0x7]]  ;;  %v3783_v19 = vld [vmem:[%s3725_s15 + $0x11] sm:$0xf]  ;;  %s3794_s24 = sld [smem:[#allocation2 + $0x88]] }
  0x3b   : > { %609 = vrot.lane.b32.xlu1 %v607_v2, %s3627_s17  ;;  %7244 = vst [vmem:[#allocation9_spill] sm:$0xff] %v3755_v10  ;;  %v275_v14 = vmul.f32 %v3745_v6, %v3755_v10  ;;  %v3770_v15 = vstv %s3362_s12  ;;  %v583_v16 = vmul.f32 %v3753_v9, %v3737_v3  ;;  %v835_v17 = vmul.f32 %v3764_v12, %v3753_v9  ;;  %v3801_v27 = vld [vmem:[%s3725_s15 + $0x8] sm:$0xf]  ;;  %s3803_s25 = sld [smem:[#allocation2 + $0x85]]  ;;  %v3808_v30 = vld [vmem:[%s3725_s15 + $0x20] sm:$0xf] }
  0x3c   : > { %7245 = vst [vmem:[#allocation10_spill] sm:$0xff] %v3770_v15  ;;  %v843_v18 = vmul.f32 %v3748_v7, %v3755_v10  ;;  %v287_v20 = vmul.f32 %v3730_v0, %v3770_v15  ;;  %v264_v22 = vadd.f32 %v263_v13, %v253_v8  ;;  %v3792_v23 = vstv %s3727_s16  ;;  %v3811_v31 = vld [vmem:[%s3725_s15 + $0x30] sm:$0xf]  ;;  %v3823_v36 = vld [vmem:[%s3725_s15 + $0x48] sm:$0xf]  ;;  %s3825_s26 = sld [smem:[#allocation2 + $0x105]] }
  0x3d   : > { %585 = vrot.lane.b32.xlu0 %v583_v16, %s3627_s17  ;;  %v836_v24 = vadd.f32 %v835_v17, %v833_v11  ;;  %v850_v25 = vmul.f32 %v3788_v21, %v3770_v15  ;;  %v618_v26 = vmul.f32 %v3792_v23, %v3737_v3  ;;  %v299_v28 = vmul.f32 %v3764_v12, %v3732_v1  ;;  %s3827_s27 = sld [smem:[#allocation2 + $0x102]]  ;;  %v3837_v41 = vld [vmem:[%s3725_s15 + $0x70] sm:$0xf]  ;;  %v3851_v49 = vld [vmem:[%s3725_s15 + $0x60] sm:$0xf]  ;;  %s3385_s29 = sld [smem:[#allocation2 + $0x108]] }
  0x3e   : > { %v276_v29 = vadd.f32 %v275_v14, %v264_v22  ;;  %v856_v32 = vmul.f32 %v3783_v19, %v3732_v1  ;;  %v3817_v34 = vstv %s3759_s20  ;;  %s3839_s28 = sld [smem:[#allocation2 + $0x182]]  ;;  %v3854_v50 = vld [vmem:[%s3725_s15 + $0x9] sm:$0xf]  ;;  %s3395_s30 = sld [smem:[#allocation2 + $0x188]] }
  0x3f   : > { %v844_v33 = vadd.f32 %v843_v18, %v836_v24  ;;  %620 = vrot.lane.b32.xlu1 %v618_v26, %s3627_s17  ;;  %7246 = vst [vmem:[#allocation11_spill] sm:$0xff] %v3817_v34  ;;  %v3820_v35 = vstv %s3761_s21  ;;  %v258_v38 = vmul.f32 %v3801_v27, %v3817_v34  ;;  %v3834_v40 = vstv %s3774_s22  ;;  %s3392_s6 = sld [smem:[#allocation2 + $0x185]]  ;;  %s3399_s8 = sld [smem:[#allocation2 + $0x202]] }
  0x40   : > { %7247 = vst [vmem:[#allocation12_spill] sm:$0xff] %v3820_v35  ;;  %v288_v37 = vadd.f32 %v287_v20, %v276_v29  ;;  %v269_v39 = vmul.f32 %v3808_v30, %v3820_v35  ;;  %v281_v43 = vmul.f32 %v3811_v31, %v3834_v40  ;;  %v3844_v44 = vstv %s3780_s23  ;;  %s3402_s7 = sld [smem:[#allocation2 + $0x205]]  ;;  %s3409_s9 = sld [smem:[#allocation2 + $0x282]] }
  0x41   : > { %v851_v42 = vadd.f32 %v850_v25, %v844_v33  ;;  %7248 = vst [vmem:[#allocation13_spill] sm:$0xff] %v3844_v44  ;;  %v293_v47 = vmul.f32 %v3823_v36, %v3844_v44  ;;  %v595_v48 = vmul.f32 %v3808_v30, %v3834_v40  ;;  %v834_v52 = vmul.f32 %v3823_v36, %v3817_v34  ;;  %s3405_s10 = sld [smem:[#allocation2 + $0x208]]  ;;  %s3412_s12 = sld [smem:[#allocation2 + $0x285]] }
  0x42   : > { %v300_v45 = vadd.f32 %v299_v28, %v288_v37  ;;  %v270_v46 = vadd.f32 %v269_v39, %v258_v38  ;;  %v839_v53 = vmul.f32 %v3851_v49, %v3820_v35  ;;  %v847_v54 = vmul.f32 %v3837_v41, %v3834_v40  ;;  %s3415_s11 = sld [smem:[#allocation2 + $0x288]]  ;;  %s3422_s13 = sld [smem:[#allocation2 + $0x305]] }
  0x43   : > { %v857_v51 = vadd.f32 %v856_v32, %v851_v42  ;;  %597 = vrot.lane.b32.xlu0 %v595_v48, %s3627_s17  ;;  %v3864_v56 = vstv %s3794_s24  ;;  %v3867_v57 = vstv %s3803_s25  ;;  %v853_v59 = vmul.f32 %v3854_v50, %v3844_v44  ;;  %s3419_s14 = sld [smem:[#allocation2 + $0x302]]  ;;  %s3425_s20 = sld [smem:[#allocation2 + $0x308]] }
  0x44   : > { %v282_v55 = vadd.f32 %v281_v43, %v270_v46  ;;  %v840_v58 = vadd.f32 %v839_v53, %v834_v52  ;;  %v638_v60 = vmul.f32 %v3730_v0, %v3864_v56  ;;  %v628_v62 = vmul.f32 %v3808_v30, %v3867_v57  ;;  %s3429_s16 = sld [smem:[#allocation2 + $0x382]]  ;;  %s3367_s21 = sld [smem:[#allocation2 + $0x80]] }
  0x45   : > { %v3877_v2 = vstv %s3825_s26  ;;  %v3880_v8 = vstv %s3827_s27  ;;  %v3888_v14 = vstv %s3839_s28  ;;  %v3897_v22 = vstv %s3385_s29  ;;  %s3371_s22 = sld [smem:[#allocation2 + $0x84]]  ;;  %s3936_s23 = sld [smem:[#allocation2 + $0x385]] }
  0x46   : > { %v294_v61 = vadd.f32 %v293_v47, %v282_v55  ;;  %v848_v63 = vadd.f32 %v847_v54, %v840_v58  ;;  %640 = vrot.lane.b32.xlu1 %v638_v60, %s3627_s17  ;;  %v659_v13 = vmul.f32 %v3808_v30, %v3877_v2  ;;  %v649_v17 = vmul.f32 %v3880_v8, %v3737_v3  ;;  %s3941_s24 = sld [smem:[#allocation2 + $0x388]]  ;;  %s3943_s25 = sld [smem:[#allocation2 + $0x86]] }
  0x47   : > { %630 = vrot.lane.b32.xlu0 %v628_v62, %s3627_s17  ;;  %v680_v20 = vmul.f32 %v3888_v14, %v3737_v3  ;;  %v669_v24 = vmul.f32 %v3730_v0, %v3897_v22  ;;  %v3902_v25 = vstv %s3395_s30  ;;  %v3904_v26 = vstv %s3392_s6  ;;  %s3950_s26 = sld [smem:[#allocation2 + $0x81]]  ;;  %s3952_s27 = sld [smem:[#allocation2 + $0x83]] }
  0x48   : > { %v3882_v11 = vadd.f32 %v300_v45, %v294_v61  ;;  %v854_v16 = vadd.f32 %v853_v59, %v848_v63  ;;  %v700_v28 = vmul.f32 %v3730_v0, %v3902_v25  ;;  %v690_v29 = vmul.f32 %v3808_v30, %v3904_v26  ;;  %s3966_s28 = sld [smem:[#allocation2 + $0x87]]  ;;  %s4004_s29 = sld [smem:[#allocation2 + $0x101]] }
  0x49   : > { %v3912_v32 = vstv %s3402_s7  ;;  %v3914_v33 = vstv %s3399_s8  ;;  %v3922_v39 = vstv %s3409_s9  ;;  %v3924_v42 = vstv %s3405_s10  ;;  %s4006_s30 = sld [smem:[#allocation2 + $0x103]]  ;;  %s4052_s6 = sld [smem:[#allocation2 + $0x100]] }
  0x4a   : > { %7249 = vst [vmem:[#allocation14_spill] sm:$0xff] %v3882_v11  ;;  %v3892_v18 = vadd.f32 %v857_v51, %v854_v16  ;;  %661 = vrot.lane.b32.xlu1 %v659_v13, %s3627_s17  ;;  %v721_v37 = vmul.f32 %v3808_v30, %v3912_v32  ;;  %v711_v38 = vmul.f32 %v3914_v33, %v3737_v3  ;;  %v3932_v46 = vstv %s3415_s11  ;;  %s4058_s7 = sld [smem:[#allocation2 + $0x104]]  ;;  %s4066_s8 = sld [smem:[#allocation2 + $0x107]] }
  0x4b   : > { %651 = vrot.lane.b32.xlu0 %v649_v17, %s3627_s17  ;;  %v742_v43 = vmul.f32 %v3922_v39, %v3737_v3  ;;  %v731_v45 = vmul.f32 %v3730_v0, %v3924_v42  ;;  %v3934_v47 = vstv %s3412_s12  ;;  %v762_v48 = vmul.f32 %v3730_v0, %v3932_v46  ;;  %s4082_s9 = sld [smem:[#allocation2 + $0x180]]  ;;  %s4084_s10 = sld [smem:[#allocation2 + $0x184]] }
  0x4c   : > { %7250 = vst [vmem:[#allocation15_spill] sm:$0xff] %v3892_v18  ;;  %v752_v51 = vmul.f32 %v3808_v30, %v3934_v47  ;;  %v3948_v52 = vstv %s3422_s13  ;;  %v3954_v53 = vstv %s3419_s14  ;;  %v3956_v54 = vstv %s3429_s16  ;;  %s4094_s11 = sld [smem:[#allocation2 + $0x106]]  ;;  %s4137_s13 = sld [smem:[#allocation2 + $0x181]] }
  0x4d   : > { %v3960_v55 = vmul.f32 %v3730_v0, %v3753_v9  ;;  %v3964_v58 = vmul.f32 %v3788_v21, %v3732_v1  ;;  %v314_v59 = vmul.f32 %v3742_v5, %v3792_v23  ;;  %v863_v60 = vmul.f32 %v3764_v12, %v3792_v23  ;;  %s4126_s12 = sld [smem:[#allocation2 + $0x186]]  ;;  %s4154_s14 = sld [smem:[#allocation2 + $0x183]] }
  0x4e   : > { %682 = vrot.lane.b32.xlu1 %v680_v20, %s3627_s17  ;;  %v783_v61 = vmul.f32 %v3808_v30, %v3948_v52  ;;  %v3975_v62 = vstv %s3425_s20  ;;  %v875_v9 = vmul.f32 %v3783_v19, %v3864_v56  ;;  %v773_v1 = vmul.f32 %v3954_v53, %v3737_v3  ;;  %s4171_s16 = sld [smem:[#allocation2 + $0x187]]  ;;  %s4193_s20 = sld [smem:[#allocation2 + $0x201]] }
  0x4f   : > { %671 = vrot.lane.b32.xlu0 %v669_v24, %s3627_s17  ;;  %v3984_v63 = vmul.f32 %v3730_v0, %v3792_v23  ;;  %v3986_v13 = vstv %s3367_s21  ;;  %v326_v16 = vmul.f32 %v3811_v31, %v3867_v57  ;;  %v804_v17 = vmul.f32 %v3956_v54, %v3737_v3  ;;  %s4195_s21 = sld [smem:[#allocation2 + $0x203]] }
  0x50   : > { %7251 = vst [vmem:[#allocation16_spill] sm:$0xff] %v3986_v13  ;;  %v3992_v20 = vstv %s3371_s22  ;;  %v861_v24 = vmul.f32 %v3730_v0, %v3986_v13  ;;  %v793_v23 = vmul.f32 %v3730_v0, %v3975_v62  ;;  %v4025_v18 = vstv %s3952_s27  ;;  %s4243_s22 = sld [smem:[#allocation2 + $0x200]]  ;;  %s4311_s27 = sld [smem:[#allocation2 + $0x206]] }
  0x51   : > { %7252 = vst [vmem:[#allocation17_spill] sm:$0xff] %v3992_v20  ;;  %7256 = vst [vmem:[#allocation21_spill] sm:$0xff] %v4025_v18  ;;  %v1050_v10 = vmul.f32 %v3788_v21, %v3864_v56  ;;  %v4159_v4 = vstv %s4082_s9  ;;  %s4406_s9 = sld [smem:[#allocation2 + $0x303]] }
  0x52   : > { %702 = vrot.lane.b32.xlu1 %v700_v28, %s3627_s17  ;;  %v322_v28 = vmul.f32 %v3745_v6, %v3992_v20  ;;  %7265 = vst [vmem:[#allocation30_spill] sm:$0xff] %v4159_v4  ;;  %v4191_v11 = vstv %s4137_s13  ;;  %s4467_s13 = sld [smem:[#allocation2 + $0x380]] }
  0x53   : > { %692 = vrot.lane.b32.xlu0 %v690_v29, %s3627_s17  ;;  %v867_v29 = vmul.f32 %v3748_v7, %v3992_v20  ;;  %7267 = vst [vmem:[#allocation32_spill] sm:$0xff] %v4191_v11 }
  0x56   : > { %723 = vrot.lane.b32.xlu1 %v721_v37, %s3627_s17  ;;  %v308_v37 = vmul.f32 %v3986_v13, %v3737_v3  ;;  %v4022_v13 = vstv %s3950_s26  ;;  %s4288_s26 = sld [smem:[#allocation2 + $0x284]] }
  0x57   : > { %713 = vrot.lane.b32.xlu0 %v711_v38, %s3627_s17  ;;  %v4010_v38 = vstv %s3936_s23  ;;  %7255 = vst [vmem:[#allocation20_spill] sm:$0xff] %v4022_v13  ;;  %v311_v35 = vmul.f32 %v3801_v27, %v4022_v13  ;;  %s4253_s23 = sld [smem:[#allocation2 + $0x204]] }
  0x58   : > { %7253 = vst [vmem:[#allocation18_spill] sm:$0xff] %v4010_v38  ;;  %v814_v15 = vmul.f32 %v3808_v30, %v4010_v38 }
  0x5a   : > { %744 = vrot.lane.b32.xlu1 %v742_v43, %s3627_s17  ;;  %v4013_v43 = vstv %s3941_s24  ;;  %s4267_s24 = sld [smem:[#allocation2 + $0x207]] }
  0x5b   : > { %733 = vrot.lane.b32.xlu0 %v731_v45, %s3627_s17  ;;  %v864_v45 = vadd.f32 %v863_v60, %v861_v24  ;;  %v318_v60 = vmul.f32 %v3808_v30, %v4025_v18 }
  0x5d   : > { %v868_v44 = vadd.f32 %v867_v29, %v864_v45  ;;  %v824_v29 = vmul.f32 %v3730_v0, %v4013_v43 }
  0x5e   : > { %764 = vrot.lane.b32.xlu1 %v762_v48, %s3627_s17  ;;  %v4016_v48 = vstv %s3943_s25  ;;  %s4286_s25 = sld [smem:[#allocation2 + $0x280]] }
  0x5f   : > { %754 = vrot.lane.b32.xlu0 %v752_v51, %s3627_s17  ;;  %7254 = vst [vmem:[#allocation19_spill] sm:$0xff] %v4016_v48  ;;  %v315_v51 = vadd.f32 %v314_v59, %v308_v37  ;;  %v330_v20 = vmul.f32 %v3730_v0, %v4016_v48  ;;  %v338_v59 = vmul.f32 %v3764_v12, %v3864_v56  ;;  %v4038_v37 = vstv %s3966_s28  ;;  %s4325_s28 = sld [smem:[#allocation2 + $0x286]] }
  0x60   : > { %7257 = vst [vmem:[#allocation22_spill] sm:$0xff] %v4038_v37  ;;  %v334_v34 = vmul.f32 %v3823_v36, %v4038_v37 }
  0x61   : > { %v323_v24 = vadd.f32 %v322_v28, %v315_v51  ;;  %v862_v51 = vmul.f32 %v3823_v36, %v4022_v13  ;;  %v4064_v13 = vstv %s4006_s30  ;;  %s4348_s30 = sld [smem:[#allocation2 + $0x283]] }
  0x62   : > { %785 = vrot.lane.b32.xlu1 %v783_v61, %s3627_s17  ;;  %v871_v61 = vmul.f32 %v3788_v21, %v4016_v48  ;;  %v319_v48 = vadd.f32 %v318_v60, %v311_v35  ;;  %v365_v35 = vmul.f32 %v3811_v31, %v3877_v2  ;;  %7259 = vst [vmem:[#allocation24_spill] sm:$0xff] %v4064_v13 }
  0x63   : > { %775 = vrot.lane.b32.xlu0 %v773_v1, %s3627_s17  ;;  %v869_v1 = vmul.f32 %v3837_v41, %v3867_v57  ;;  %v331_v28 = vadd.f32 %v330_v20, %v323_v24  ;;  %v4061_v24 = vstv %s4004_s29  ;;  %s4327_s29 = sld [smem:[#allocation2 + $0x281]] }
  0x64   : > { %v872_v45 = vadd.f32 %v871_v61, %v868_v44  ;;  %v327_v61 = vadd.f32 %v326_v16, %v319_v48  ;;  %7258 = vst [vmem:[#allocation23_spill] sm:$0xff] %v4061_v24  ;;  %v350_v16 = vmul.f32 %v3801_v27, %v4061_v24  ;;  %v357_v48 = vmul.f32 %v3808_v30, %v4064_v13 }
  0x65   : > { %v339_v60 = vadd.f32 %v338_v59, %v331_v28  ;;  %v888_v59 = vmul.f32 %v3837_v41, %v3877_v2  ;;  %v882_v28 = vmul.f32 %v3764_v12, %v3880_v8 }
  0x66   : > { %806 = vrot.lane.b32.xlu1 %v804_v17, %s3627_s17  ;;  %v865_v17 = vmul.f32 %v3851_v49, %v4025_v18  ;;  %v876_v44 = vadd.f32 %v875_v9, %v872_v45  ;;  %v1008_v18 = vmul.f32 %v3851_v49, %v3834_v40  ;;  %v335_v9 = vadd.f32 %v334_v34, %v327_v61 }
  0x67   : > { %795 = vrot.lane.b32.xlu0 %v793_v23, %s3627_s17  ;;  %v873_v23 = vmul.f32 %v3854_v50, %v4038_v37  ;;  %v353_v45 = vmul.f32 %v3742_v5, %v3880_v8  ;;  %v392_v34 = vmul.f32 %v3742_v5, %v3888_v14  ;;  %v901_v40 = vmul.f32 %v3764_v12, %v3888_v14 }
  0x68   : > { %v866_v20 = vadd.f32 %v865_v17, %v862_v51  ;;  %v4090_v51 = vadd.f32 %v339_v60, %v335_v9  ;;  %v881_v17 = vmul.f32 %v3823_v36, %v4061_v24  ;;  %v4106_v60 = vmul.f32 %v3764_v12, %v3902_v25 }
  0x69   : > { %v4110_v9 = vmul.f32 %v3783_v19, %v3902_v25  ;;  %v358_v37 = vadd.f32 %v357_v48, %v350_v16  ;;  %v4124_v24 = vstv %s4052_s6  ;;  %v4133_v16 = vstv %s4058_s7  ;;  %s4364_s6 = sld [smem:[#allocation2 + $0x287]]  ;;  %s4373_s7 = sld [smem:[#allocation4]] }
  0x6a   : > { %826 = vrot.lane.b32.xlu1 %v824_v29, %s3627_s17  ;;  %v870_v29 = vadd.f32 %v869_v1, %v866_v20  ;;  %7260 = vst [vmem:[#allocation25_spill] sm:$0xff] %v4090_v51  ;;  %v4100_v1 = vmul.f32 %v3783_v19, %v3897_v22  ;;  %v884_v20 = vmul.f32 %v3851_v49, %v4064_v13  ;;  %7262 = vst [vmem:[#allocation27_spill] sm:$0xff] %v4124_v24 }
  0x6b   : > { %816 = vrot.lane.b32.xlu0 %v814_v15, %s3627_s17  ;;  %v377_v15 = vmul.f32 %v3764_v12, %v3897_v22  ;;  %v4114_v51 = vmul.f32 %v3811_v31, %v3904_v26  ;;  %7263 = vst [vmem:[#allocation28_spill] sm:$0xff] %v4133_v16  ;;  %v886_v56 = vmul.f32 %v3748_v7, %v4133_v16 }
  0x6c   : > { %v874_v61 = vadd.f32 %v873_v23, %v870_v29  ;;  %v1040_v23 = vmul.f32 %v3851_v49, %v3867_v57  ;;  %v885_v13 = vadd.f32 %v884_v20, %v881_v17  ;;  %v4140_v57 = vstv %s4066_s8  ;;  %s4394_s8 = sld [smem:[#allocation2 + $0x301]] }
  0x6d   : > { %7264 = vst [vmem:[#allocation29_spill] sm:$0xff] %v4140_v57  ;;  %v366_v48 = vadd.f32 %v365_v35, %v358_v37  ;;  %v373_v17 = vmul.f32 %v3823_v36, %v4140_v57  ;;  %v899_v35 = vmul.f32 %v3730_v0, %v4159_v4 }
  0x6e   : > { %1010 = vrot.lane.b32.xlu1 %v1008_v18, %s3627_s17  ;;  %v4121_v29 = vadd.f32 %v876_v44, %v874_v61  ;;  %v1061_v18 = vmul.f32 %v3730_v0, %v3880_v8  ;;  %v361_v44 = vmul.f32 %v3745_v6, %v4133_v16  ;;  %v347_v8 = vmul.f32 %v4124_v24, %v3737_v3 }
  0x6f   : > { %998 = vrot.lane.b32.xlu0 %v3960_v55, %s3627_s17  ;;  %v880_v55 = vmul.f32 %v3730_v0, %v4124_v24  ;;  %v892_v61 = vmul.f32 %v3854_v50, %v4140_v57  ;;  %v4162_v24 = vstv %s4084_s10  ;;  %s4432_s10 = sld [smem:[#allocation2 + $0x307]] }
  0x70   : > { %7261 = vst [vmem:[#allocation26_spill] sm:$0xff] %v4121_v29  ;;  %v889_v29 = vadd.f32 %v888_v59, %v885_v13  ;;  %v354_v16 = vadd.f32 %v353_v45, %v347_v8  ;;  %7266 = vst [vmem:[#allocation31_spill] sm:$0xff] %v4162_v24  ;;  %v400_v37 = vmul.f32 %v3745_v6, %v4162_v24 }
  0x71   : > { %v883_v20 = vadd.f32 %v882_v28, %v880_v55  ;;  %v4169_v28 = vstv %s4094_s11  ;;  %v386_v13 = vmul.f32 %v4159_v4, %v3737_v3  ;;  %v1071_v45 = vmul.f32 %v3851_v49, %v3877_v2  ;;  %s4437_s11 = sld [smem:[#allocation2 + $0x300]] }
  0x72   : > { %1032 = vrot.lane.b32.xlu1 %v3984_v63, %s3627_s17  ;;  %v362_v55 = vadd.f32 %v361_v44, %v354_v16  ;;  %v369_v59 = vmul.f32 %v3730_v0, %v4169_v28  ;;  %v902_v8 = vadd.f32 %v901_v40, %v899_v35  ;;  %v890_v16 = vmul.f32 %v3788_v21, %v4169_v28 }
  0x73   : > { %1021 = vrot.lane.b32.xlu0 %v3964_v58, %s3627_s17  ;;  %v887_v63 = vadd.f32 %v886_v56, %v883_v20  ;;  %v905_v58 = vmul.f32 %v3748_v7, %v4162_v24  ;;  %v374_v56 = vadd.f32 %v373_v17, %v366_v48  ;;  %v893_v44 = vadd.f32 %v892_v61, %v889_v29 }
  0x74   : > { %v393_v20 = vadd.f32 %v392_v34, %v386_v13  ;;  %v370_v24 = vadd.f32 %v369_v59, %v362_v55  ;;  %v4186_v4 = vstv %s4126_s12  ;;  %v1081_v29 = vmul.f32 %v3788_v21, %v3897_v22  ;;  %s4449_s12 = sld [smem:[#allocation2 + $0x304]] }
  0x75   : > { %v906_v57 = vadd.f32 %v905_v58, %v902_v8  ;;  %v891_v38 = vadd.f32 %v890_v16, %v887_v63  ;;  %v909_v34 = vmul.f32 %v3788_v21, %v4186_v4  ;;  %v1092_v48 = vmul.f32 %v3730_v0, %v3888_v14 }
  0x76   : > { %1052 = vrot.lane.b32.xlu1 %v1050_v10, %s3627_s17  ;;  %v408_v10 = vmul.f32 %v3730_v0, %v4186_v4  ;;  %v401_v2 = vadd.f32 %v400_v37, %v393_v20  ;;  %v378_v40 = vadd.f32 %v377_v15, %v370_v24  ;;  %v4208_v61 = vstv %s4154_s14  ;;  %s4481_s14 = sld [smem:[#allocation2 + $0x384]] }
  0x77   : > { %1042 = vrot.lane.b32.xlu0 %v1040_v23, %s3627_s17  ;;  %v389_v23 = vmul.f32 %v3801_v27, %v4191_v11  ;;  %v895_v17 = vadd.f32 %v4100_v1, %v891_v38  ;;  %7268 = vst [vmem:[#allocation33_spill] sm:$0xff] %v4208_v61  ;;  %v910_v15 = vadd.f32 %v909_v34, %v906_v57  ;;  %v4224_v38 = vstv %s4171_s16  ;;  %s4483_s16 = sld [smem:[#allocation2 + $0x306]] }
  0x78   : > { %v4211_v24 = vadd.f32 %v378_v40, %v374_v56  ;;  %v409_v63 = vadd.f32 %v408_v10, %v401_v2  ;;  %v396_v37 = vmul.f32 %v3808_v30, %v4208_v61  ;;  %v907_v35 = vmul.f32 %v3837_v41, %v3904_v26 }
  0x79   : > { %v4219_v22 = vmul.f32 %v3811_v31, %v3912_v32  ;;  %v4221_v14 = vadd.f32 %v895_v17, %v893_v44  ;;  %v914_v1 = vadd.f32 %v4110_v9, %v910_v15  ;;  %v412_v55 = vmul.f32 %v3823_v36, %v4224_v38 }
  0x7a   : > { %1073 = vrot.lane.b32.xlu1 %v1071_v45, %s3627_s17  ;;  %7269 = vst [vmem:[#allocation34_spill] sm:$0xff] %v4211_v24  ;;  %v397_v57 = vadd.f32 %v396_v37, %v389_v23  ;;  %v4232_v58 = vmul.f32 %v3837_v41, %v3912_v32  ;;  %v4236_v13 = vmul.f32 %v3742_v5, %v3914_v33  ;;  %v4262_v44 = vstv %s4193_s20  ;;  %s4497_s20 = sld [smem:[#allocation2 + $0x381]] }
  0x7b   : > { %1063 = vrot.lane.b32.xlu0 %v1061_v18, %s3627_s17  ;;  %7270 = vst [vmem:[#allocation35_spill] sm:$0xff] %v4221_v14  ;;  %v417_v18 = vadd.f32 %v4106_v60, %v409_v63  ;;  %v1112_v9 = vmul.f32 %v3788_v21, %v3902_v25  ;;  %v900_v60 = vmul.f32 %v3823_v36, %v4191_v11  ;;  %v4265_v20 = vstv %s4195_s21  ;;  %s3628_s21 = smov 6  }
  0x7c   : > { %v920_v59 = vmul.f32 %v3764_v12, %v3914_v33  ;;  %v1102_v45 = vmul.f32 %v3851_v49, %v3904_v26  ;;  %v405_v56 = vadd.f32 %v4114_v51, %v397_v57  ;;  %v903_v8 = vmul.f32 %v3851_v49, %v4208_v61 }
  0x7d   : > { %v4257_v25 = vmul.f32 %v3742_v5, %v3922_v39  ;;  %v911_v16 = vmul.f32 %v3854_v50, %v4224_v38  ;;  %v428_v10 = vmul.f32 %v3801_v27, %v4262_v44  ;;  %v435_v2 = vmul.f32 %v3808_v30, %v4265_v20 }
  0x7e   : > { %1094 = vrot.lane.b32.xlu1 %v1092_v48, %s3627_s17  ;;  %v413_v26 = vadd.f32 %v412_v55, %v405_v56  ;;  %v904_v51 = vadd.f32 %v903_v8, %v900_v60  ;;  %v939_v40 = vmul.f32 %v3764_v12, %v3922_v39  ;;  %v4277_v34 = vmul.f32 %v3764_v12, %v3924_v42 }
  0x7f   : > { %1083 = vrot.lane.b32.xlu0 %v1081_v29, %s3627_s17  ;;  %v4281_v23 = vmul.f32 %v3783_v19, %v3924_v42  ;;  %v1133_v29 = vmul.f32 %v3851_v49, %v3912_v32  ;;  %v1123_v48 = vmul.f32 %v3730_v0, %v3914_v33  ;;  %v919_v63 = vmul.f32 %v3823_v36, %v4262_v44 }
  0x80   : > { %v908_v17 = vadd.f32 %v907_v35, %v904_v51  ;;  %v4293_v15 = vadd.f32 %v417_v18, %v413_v26  ;;  %v4299_v37 = vmul.f32 %v3764_v12, %v3932_v46  ;;  %v4303_v32 = vmul.f32 %v3783_v19, %v3932_v46 }
  0x81   : > { %v4307_v57 = vmul.f32 %v3811_v31, %v3934_v47  ;;  %v922_v33 = vmul.f32 %v3851_v49, %v4265_v20  ;;  %v1143_v35 = vmul.f32 %v3788_v21, %v3924_v42  ;;  %v1154_v18 = vmul.f32 %v3730_v0, %v3922_v39 }
  0x82   : > { %1114 = vrot.lane.b32.xlu1 %v1112_v9, %s3627_s17  ;;  %7271 = vst [vmem:[#allocation36_spill] sm:$0xff] %v4293_v15  ;;  %v912_v55 = vadd.f32 %v911_v16, %v908_v17  ;;  %v436_v9 = vadd.f32 %v435_v2, %v428_v10  ;;  %v1164_v60 = vmul.f32 %v3851_v49, %v3934_v47  ;;  %v4323_v8 = vstv %s4243_s22  ;;  %s4508_s22 = sld [smem:[#allocation2 + $0x383]] }
  0x83   : > { %1104 = vrot.lane.b32.xlu0 %v1102_v45, %s3627_s17  ;;  %v1174_v45 = vmul.f32 %v3788_v21, %v3932_v46  ;;  %v923_v56 = vadd.f32 %v922_v33, %v919_v63  ;;  %v1185_v39 = vmul.f32 %v3730_v0, %v3954_v53  ;;  %v4335_v16 = vstv %s4253_s23  ;;  %s3629_s23 = smov 3  }
  0x84   : > { %v4332_v42 = vadd.f32 %v914_v1, %v912_v55  ;;  %v918_v46 = vmul.f32 %v3730_v0, %v4323_v8  ;;  %v4340_v26 = vstv %s4267_s24  ;;  %v439_v51 = vmul.f32 %v3745_v6, %v4335_v16  ;;  %s4526_s24 = sld [smem:[#allocation2 + $0x387]] }
  0x85   : > { %v924_v10 = vmul.f32 %v3748_v7, %v4335_v16  ;;  %v425_v2 = vmul.f32 %v4323_v8, %v3737_v3  ;;  %v444_v1 = vadd.f32 %v4219_v22, %v436_v9  ;;  %v927_v63 = vadd.f32 %v4232_v58, %v923_v56 }
  0x86   : > { %1135 = vrot.lane.b32.xlu1 %v1133_v29, %s3627_s17  ;;  %7272 = vst [vmem:[#allocation37_spill] sm:$0xff] %v4332_v42  ;;  %v451_v29 = vmul.f32 %v3823_v36, %v4340_v26  ;;  %v921_v17 = vadd.f32 %v920_v59, %v918_v46  ;;  %v4359_v55 = vstv %s4286_s25  ;;  %v4362_v42 = vstv %s4288_s26  ;;  %s3630_s25 = smov 12   ;;  %s4541_s26 = sld [smem:[#allocation2 + $0x386]] }
  0x87   : > { %1125 = vrot.lane.b32.xlu0 %v1123_v48, %s3627_s17  ;;  %v930_v48 = vmul.f32 %v3854_v50, %v4340_v26  ;;  %v432_v33 = vadd.f32 %v4236_v13, %v425_v2  ;;  %v1195_v22 = vmul.f32 %v3851_v49, %v3948_v52  ;;  %v943_v58 = vmul.f32 %v3748_v7, %v4362_v42 }
  0x88   : > { %v925_v59 = vadd.f32 %v924_v10, %v921_v17  ;;  %v478_v9 = vmul.f32 %v3745_v6, %v4362_v42  ;;  %v4380_v56 = vstv %s4311_s27  ;;  %v452_v46 = vadd.f32 %v451_v29, %v444_v1  ;;  %s3631_s27 = smov 9  }
  0x89   : > { %v440_v13 = vadd.f32 %v439_v51, %v432_v33  ;;  %v447_v2 = vmul.f32 %v3730_v0, %v4380_v56  ;;  %v928_v17 = vmul.f32 %v3788_v21, %v4380_v56  ;;  %v931_v51 = vadd.f32 %v930_v48, %v927_v63 }
  0x8a   : > { %1156 = vrot.lane.b32.xlu1 %v1154_v18, %s3627_s17  ;;  %v937_v18 = vmul.f32 %v3730_v0, %v4359_v55  ;;  %v4389_v15 = vstv %s4325_s28  ;;  %v4392_v14 = vstv %s4327_s29  ;;  %v4404_v48 = vstv %s4348_s30  ;;  %s3632_s28 = smov 18   ;;  %s3633_s29 = smov 15  }
  0x8b   : > { %1145 = vrot.lane.b32.xlu0 %v1143_v35, %s3627_s17  ;;  %v464_v35 = vmul.f32 %v4359_v55, %v3737_v3  ;;  %7273 = vst [vmem:[#allocation38_spill] sm:$0xff] %v4389_v15  ;;  %v929_v1 = vadd.f32 %v928_v17, %v925_v59  ;;  %v448_v29 = vadd.f32 %v447_v2, %v440_v13  ;;  %s3634_s30 = smov 2  }
  0x8c   : > { %v940_v10 = vadd.f32 %v939_v40, %v937_v18  ;;  %v486_v18 = vmul.f32 %v3730_v0, %v4389_v15  ;;  %v1216_v13 = vmul.f32 %v3730_v0, %v3956_v54 }
  0x8d   : > { %v471_v33 = vadd.f32 %v4257_v25, %v464_v35  ;;  %v467_v25 = vmul.f32 %v3801_v27, %v4392_v14  ;;  %v933_v63 = vadd.f32 %v4281_v23, %v929_v1  ;;  %v456_v59 = vadd.f32 %v4277_v34, %v448_v29  ;;  %v7279_v29 = vld [vmem:[#allocation18_spill] sm:$0xff] }
  0x8e   : > { %1176 = vrot.lane.b32.xlu1 %v1174_v45, %s3627_s17  ;;  %v944_v40 = vadd.f32 %v943_v58, %v940_v10  ;;  %v947_v45 = vmul.f32 %v3788_v21, %v4389_v15  ;;  %v474_v58 = vmul.f32 %v3808_v30, %v4404_v48  ;;  %v4418_v10 = vstv %s4364_s6  ;;  %s3635_s6 = smov 21  }
  0x8f   : > { %1166 = vrot.lane.b32.xlu0 %v1164_v60, %s3627_s17  ;;  %v479_v24 = vadd.f32 %v478_v9, %v471_v33  ;;  %v1205_v60 = vmul.f32 %v3788_v21, %v3975_v62  ;;  %7274 = vst [vmem:[#allocation39_spill] sm:$0xff] %v4418_v10  ;;  %v4421_v2 = vadd.f32 %v933_v63, %v931_v51  ;;  %v4428_v33 = vstv %s4373_s7  ;;  %s3636_s7 = smov 8  }
  0x90   : > { %v948_v9 = vadd.f32 %v947_v45, %v944_v40  ;;  %v4423_v23 = vadd.f32 %v456_v59, %v452_v46  ;;  %v475_v34 = vadd.f32 %v474_v58, %v467_v25  ;;  %v490_v17 = vmul.f32 %v3823_v36, %v4418_v10 }
  0x91   : > { %v487_v35 = vadd.f32 %v486_v18, %v479_v24  ;;  %7275 = vst [vmem:[#allocation40_spill] sm:$0xff] %v4421_v2  ;;  %v945_v46 = vmul.f32 %v3837_v41, %v3934_v47  ;;  %v4447_v51 = vstv %s4394_s8  ;;  %v1226_v47 = vmul.f32 %v3851_v49, %v7279_v29  ;;  %s3637_s8 = smov 14  }
  0x92   : > { %1197 = vrot.lane.b32.xlu1 %v1195_v22, %s3627_s17  ;;  %7276 = vst [vmem:[#allocation41_spill] sm:$0xff] %v4423_v23  ;;  %v952_v22 = vadd.f32 %v4303_v32, %v948_v9  ;;  %v483_v24 = vadd.f32 %v4307_v57, %v475_v34  ;;  %v1236_v32 = vmul.f32 %v3788_v21, %v4013_v43  ;;  %7277 = vst [vmem:[#allocation42_spill] sm:$0xff] %v4447_v51  ;;  %v7278_v57 = vld [vmem:[#allocation14_spill] sm:$0xff] }
  0x93   : > { %1187 = vrot.lane.b32.xlu0 %v1185_v39, %s3627_s17  ;;  %v495_v40 = vadd.f32 %v4299_v37, %v487_v35  ;;  %v938_v39 = vmul.f32 %v3823_v36, %v4392_v14  ;;  %v941_v37 = vmul.f32 %v3851_v49, %v4404_v48  ;;  %v304_v1 = vadd.f32 %v4428_v33, %v7278_v57 }
  0x94   : > { %v491_v18 = vadd.f32 %v490_v17, %v483_v24  ;;  %v506_v45 = vmul.f32 %v3801_v27, %v4447_v51  ;;  %v949_v63 = vmul.f32 %v3854_v50, %v4418_v10  ;;  %v4461_v59 = vstv %s4406_s9  ;;  %s3638_s9 = smov 5  }
  0x95   : > { %v942_v25 = vadd.f32 %v941_v37, %v938_v39  ;;  %7280 = vst [vmem:[#allocation14_spill] sm:$0xff] %v4461_v59  ;;  %v957_v35 = vmul.f32 %v3823_v36, %v4447_v51  ;;  %v960_v34 = vmul.f32 %v3851_v49, %v4461_v59  ;;  %v4476_v17 = vmax.f32 %v304_v1, 0.0 }
  0x96   : > { %1218 = vrot.lane.b32.xlu1 %v1216_v13, %s3627_s17  ;;  %v4463_v58 = vadd.f32 %v495_v40, %v491_v18  ;;  %v513_v13 = vmul.f32 %v3808_v30, %v4461_v59  ;;  %v964_v40 = vmul.f32 %v3837_v41, %v3948_v52  ;;  %v958_v39 = vmul.f32 %v3764_v12, %v3954_v53 }
  0x97   : > { %1207 = vrot.lane.b32.xlu0 %v1205_v60, %s3627_s17  ;;  %v521_v60 = vmul.f32 %v3811_v31, %v3948_v52  ;;  %v946_v9 = vadd.f32 %v945_v46, %v942_v25  ;;  %7282 = vst [vmem:[#allocation43_spill] sm:$0xff] %v4476_v17  ;;  %v961_v37 = vadd.f32 %v960_v34, %v957_v35  ;;  %v4495_v1 = vstv %s4437_s11  ;;  %s3640_s11 = smov 11  }
  0x98   : > { %7281 = vst [vmem:[#allocation18_spill] sm:$0xff] %v4463_v58  ;;  %v514_v24 = vadd.f32 %v513_v13, %v506_v45  ;;  %v509_v57 = vmul.f32 %v3742_v5, %v3954_v53  ;;  %v4504_v45 = vstv %s4449_s12  ;;  %v956_v25 = vmul.f32 %v3730_v0, %v4495_v1  ;;  %v7285_v53 = vld [vmem:[#allocation8_spill] sm:$0xff]  ;;  %s3641_s12 = smov 17  }
  0x99   : > { %v950_v46 = vadd.f32 %v949_v63, %v946_v9  ;;  %v4514_v63 = vmul.f32 %v3742_v5, %v7285_v53  ;;  %v962_v13 = vmul.f32 %v3748_v7, %v4504_v45  ;;  %v548_v9 = vmul.f32 %v3742_v5, %v3956_v54 }
  0x9a   : > { %1238 = vrot.lane.b32.xlu1 %v1236_v32, %s3627_s17  ;;  %v4488_v32 = vstv %s4432_s10  ;;  %v522_v18 = vadd.f32 %v521_v60, %v514_v24  ;;  %v503_v60 = vmul.f32 %v4495_v1, %v3737_v3  ;;  %v965_v35 = vadd.f32 %v964_v40, %v961_v37  ;;  %s3639_s10 = smov 20  }
  0x9b   : > { %1228 = vrot.lane.b32.xlu0 %v1226_v47, %s3627_s17  ;;  %7283 = vst [vmem:[#allocation44_spill] sm:$0xff] %v4488_v32  ;;  %v529_v52 = vmul.f32 %v3823_v36, %v4488_v32  ;;  %v4501_v47 = vadd.f32 %v952_v22, %v950_v46  ;;  %v517_v22 = vmul.f32 %v3745_v6, %v4504_v45  ;;  %v4533_v2 = vstv %s4467_s13  ;;  %s4814_s13 = sld [smem:[#allocation4 + $0x1]] }
  0x9c   : > { %v968_v34 = vmul.f32 %v3854_v50, %v4488_v32  ;;  %v959_v24 = vadd.f32 %v958_v39, %v956_v25  ;;  %v977_v46 = vmul.f32 %v3764_v12, %v3956_v54  ;;  %v510_v58 = vadd.f32 %v509_v57, %v503_v60  ;;  %7286 = vst [vmem:[#allocation8_spill] sm:$0xff] %v4533_v2 }
  0x9d   : > { %7284 = vst [vmem:[#allocation45_spill] sm:$0xff] %v4501_v47  ;;  %v533_v47 = vmul.f32 %v3764_v12, %v3975_v62  ;;  %v970_v5 = vmul.f32 %v3783_v19, %v3975_v62  ;;  %v530_v40 = vadd.f32 %v529_v52, %v522_v18  ;;  %v975_v54 = vmul.f32 %v3730_v0, %v4533_v2 }
  0x9e   : > { %1249 = vrot.lane.b32.xlu1 %v4476_v17, %s3628_s21  ;;  %v963_v39 = vadd.f32 %v962_v13, %v959_v24  ;;  %v518_v37 = vadd.f32 %v517_v22, %v510_v58  ;;  %v4546_v57 = vstv %s4481_s14  ;;  %v542_v62 = vmul.f32 %v4533_v2, %v3737_v3  ;;  %s3386_s14 = sld [smem:[#allocation4 + $0x2]] }
  0x9f   : > { %1246 = vrot.lane.b32.xlu0 %v4476_v17, %s3629_s23  ;;  %7287 = vst [vmem:[#allocation46_spill] sm:$0xff] %v4546_v57  ;;  %v4551_v25 = vstv %s4483_s16  ;;  %v969_v52 = vadd.f32 %v968_v34, %v965_v35  ;;  %v556_v18 = vmul.f32 %v3745_v6, %v4546_v57  ;;  %v978_v24 = vadd.f32 %v977_v46, %v975_v54  ;;  %s3396_s16 = sld [smem:[#allocation4 + $0x3]] }
  0xa0   : > { %7288 = vst [vmem:[#allocation47_spill] sm:$0xff] %v4551_v25  ;;  %v525_v13 = vmul.f32 %v3730_v0, %v4551_v25  ;;  %v966_v60 = vmul.f32 %v3788_v21, %v4551_v25  ;;  %v981_v58 = vmul.f32 %v3748_v7, %v4546_v57  ;;  %v549_v22 = vadd.f32 %v548_v9, %v542_v62  ;;  %v4585_v62 = vld [vmem:[%s3725_s15 + $0x38] sm:$0xf]  ;;  %v7333_v25 = vld [vmem:[#allocation28_spill] sm:$0xff] }
  0xa1   : > { %v4562_v23 = vstv %s4497_s20  ;;  %v4569_v35 = vstv %s4508_s22  ;;  %v560_v34 = vmul.f32 %v3811_v31, %v7279_v29  ;;  %v983_v7 = vmul.f32 %v3837_v41, %v7279_v29  ;;  %s3406_s20 = sld [smem:[#allocation4 + $0x4]]  ;;  %s3416_s22 = sld [smem:[#allocation4 + $0x5]] }
  0xa2   : > { %1255 = vrot.lane.b32.xlu1 %v4476_v17, %s3630_s25  ;;  %7289 = vst [vmem:[#allocation48_spill] sm:$0xff] %v4562_v23  ;;  %v967_v3 = vadd.f32 %v966_v60, %v963_v39  ;;  %v526_v6 = vadd.f32 %v525_v13, %v518_v37  ;;  %v545_v0 = vmul.f32 %v3801_v27, %v4562_v23  ;;  %7290 = vst [vmem:[#allocation49_spill] sm:$0xff] %v4569_v35 }
  0xa3   : > { %1252 = vrot.lane.b32.xlu0 %v4476_v17, %s3631_s27  ;;  %v572_v9 = vmul.f32 %v3764_v12, %v4013_v43  ;;  %v552_v46 = vmul.f32 %v3808_v30, %v4569_v35  ;;  %v557_v27 = vadd.f32 %v556_v18, %v549_v22  ;;  %v4582_v37 = vstv %s4526_s24  ;;  %s3426_s24 = sld [smem:[#allocation4 + $0x6]] }
  0xa4   : > { %v971_v39 = vadd.f32 %v970_v5, %v967_v3  ;;  %v534_v54 = vadd.f32 %v533_v47, %v526_v6  ;;  %7291 = vst [vmem:[#allocation50_spill] sm:$0xff] %v4582_v37  ;;  %v568_v12 = vmul.f32 %v3823_v36, %v4582_v37  ;;  %v976_v29 = vmul.f32 %v3823_v36, %v4562_v23  ;;  %v4605_v36 = vld [vmem:[%s3725_s15 + $0x18] sm:$0xf]  ;;  %v3567_v3 = vld [vmem:[%s3725_s15 + $0x40] sm:$0xf]  ;;  %v7331_v23 = vld [vmem:[#allocation22_spill] sm:$0xff] }
  0xa5   : > { %v553_v41 = vadd.f32 %v552_v46, %v545_v0  ;;  %v979_v13 = vmul.f32 %v3851_v49, %v4569_v35  ;;  %v982_v30 = vadd.f32 %v981_v58, %v978_v24  ;;  %v4600_v18 = vstv %s4541_s26  ;;  %v7295_v58 = vld [vmem:[#allocation9_spill] sm:$0xff]  ;;  %v4618_v46 = vld [vmem:[%s3725_s15 + $0x50] sm:$0xf] }
  0xa6   : > { %1261 = vrot.lane.b32.xlu1 %v4476_v17, %s3632_s28  ;;  %v4595_v47 = vadd.f32 %v971_v39, %v969_v52  ;;  %v4597_v5 = vadd.f32 %v534_v54, %v530_v40  ;;  %7294 = vst [vmem:[#allocation53_spill] sm:$0xff] %v4600_v18  ;;  %v987_v22 = vmul.f32 %v3854_v50, %v4582_v37 }
  0xa7   : > { %1258 = vrot.lane.b32.xlu0 %v4476_v17, %s3633_s29  ;;  %v561_v60 = vadd.f32 %v560_v34, %v553_v41  ;;  %v980_v49 = vadd.f32 %v979_v13, %v976_v29  ;;  %v564_v24 = vmul.f32 %v3567_v3, %v4600_v18  ;;  %v989_v40 = vmul.f32 %v3783_v19, %v4013_v43  ;;  %v7296_v34 = vld [vmem:[#allocation10_spill] sm:$0xff]  ;;  %v7297_v19 = vld [vmem:[#allocation11_spill] sm:$0xff] }
  0xa8   : > { %7292 = vst [vmem:[#allocation51_spill] sm:$0xff] %v4595_v47  ;;  %7293 = vst [vmem:[#allocation52_spill] sm:$0xff] %v4597_v5  ;;  %v593_v6 = vmul.f32 %v4585_v62, %v7295_v58  ;;  %v985_v0 = vmul.f32 %v3788_v21, %v4600_v18  ;;  %v601_v39 = vmul.f32 %v4618_v46, %v7296_v34  ;;  %v7298_v21 = vld [vmem:[#allocation12_spill] sm:$0xff] }
  0xa9   : > { %v569_v54 = vadd.f32 %v568_v12, %v561_v60  ;;  %v984_v41 = vadd.f32 %v983_v7, %v980_v49  ;;  %v565_v29 = vadd.f32 %v564_v24, %v557_v27  ;;  %v582_v43 = vmul.f32 %v4605_v36, %v7297_v19  ;;  %v4632_v60 = vld [vmem:[%s3725_s15 + $0x58] sm:$0xf] }
  0xaa   : > { %1327 = vrot.lane.b32.xlu1 %v4476_v17, %s3634_s30  ;;  %v589_v3 = vmul.f32 %v3811_v31, %v7298_v21  ;;  %v986_v47 = vadd.f32 %v985_v0, %v982_v30 }
  0xab   : > { %1264 = vrot.lane.b32.xlu0 %v4476_v17, %s3635_s6  ;;  %v988_v5 = vadd.f32 %v987_v22, %v984_v41  ;;  %v573_v12 = vadd.f32 %v572_v9, %v565_v29  ;;  %v7301_v9 = vld [vmem:[#allocation13_spill] sm:$0xff] }
  0xac   : > { %v990_v27 = vadd.f32 %v989_v40, %v986_v47  ;;  %v605_v30 = vmul.f32 %v4632_v60, %v7301_v9 }
  0xad   : > { %v610_v52 = vpop.permute.xlu1 %609 }
  0xae   : > { %1333 = vrot.lane.b32.xlu1 %v4476_v17, %s3636_s7  ;;  %v4640_v31 = vadd.f32 %v990_v27, %v988_v5 }
  0xaf   : > { %v586_v50 = vpop.permute.xlu0 %585  ;;  %1324 = vrot.lane.b32.xlu0 %v4476_v17, %s3627_s17 }
  0xb0   : > { %v588_v13 = vadd.f32 %v586_v50, %v4514_v63  ;;  %v4634_v63 = vadd.f32 %v573_v12, %v569_v54  ;;  %v590_v50 = vadd.f32 %v589_v3, %v582_v43  ;;  %7300 = vst [vmem:[#allocation10_spill] sm:$0xff] %v4640_v31  ;;  %v7309_v3 = vld [vmem:[#allocation15_spill] sm:$0xff]  ;;  %v995_v31 = vmul.f32 %v4632_v60, %v7297_v19 }
  0xb1   : > { %v4636_v24 = vpop.permute.xlu1 %620  ;;  %v859_v12 = vadd.f32 %v7309_v3, %v4428_v33 }
  0xb2   : > { %v594_v7 = vadd.f32 %v593_v6, %v588_v13  ;;  %7299 = vst [vmem:[#allocation9_spill] sm:$0xff] %v4634_v63  ;;  %1339 = vrot.lane.b32.xlu1 %v4476_v17, %s3637_s8  ;;  %v4726_v63 = vld [vmem:[%s3725_s15 + $0x70] sm:$0xf] }
  0xb3   : > { %1330 = vrot.lane.b32.xlu0 %v4476_v17, %s3638_s9 }
  0xb4   : > { %v602_v49 = vadd.f32 %v601_v39, %v594_v7 }
  0xb5   : > { %v598_v47 = vpop.permute.xlu0 %597 }
  0xb6   : > { %v612_v22 = vadd.f32 %v610_v52, %v602_v49  ;;  %v600_v40 = vadd.f32 %v598_v47, %v590_v50  ;;  %1345 = vrot.lane.b32.xlu1 %v4476_v17, %s3639_s10  ;;  %v4681_v49 = vmax.f32 %v859_v12, 0.0 }
  0xb7   : > { %1336 = vrot.lane.b32.xlu0 %v4476_v17, %s3640_s11 }
  0xb8   : > { %v606_v5 = vadd.f32 %v605_v30, %v600_v40  ;;  %v4650_v6 = vpop.permute.xlu1 %640 }
  0xb9   : > { %7302 = vst [vmem:[#allocation11_spill] sm:$0xff] %v4650_v6  ;;  %v4652_v0 = vpop.permute.xlu0 %630 }
  0xba   : > { %7303 = vst [vmem:[#allocation12_spill] sm:$0xff] %v4652_v0  ;;  %v613_v39 = vadd.f32 %v612_v22, %v606_v5  ;;  %v7328_v0 = vld [vmem:[#allocation19_spill] sm:$0xff] }
  0xbb   : > { %1342 = vrot.lane.b32.xlu0 %v4476_v17, %s3641_s12 }
  0xbc   : > { %v614_v52 = vadd.f32 %v613_v39, %v4428_v33  ;;  %v4657_v54 = vpop.permute.xlu1 %661 }
  0xbd   : > { %7304 = vst [vmem:[#allocation13_spill] sm:$0xff] %v4657_v54  ;;  %v4659_v41 = vpop.permute.xlu0 %651 }
  0xbe   : > { %7305 = vst [vmem:[#allocation54_spill] sm:$0xff] %v4659_v41  ;;  %v4661_v29 = vmax.f32 %v614_v52, 0.0 }
  0xc0   : > { %7306 = vst [vmem:[#allocation55_spill] sm:$0xff] %v4661_v29  ;;  %1289 = vrot.lane.b32.xlu1 %v4661_v29, %s3629_s23  ;;  %1292 = vrot.lane.b32.xlu0 %v4661_v29, %s3628_s21  ;;  %v4667_v13 = vpop.permute.xlu1 %682 }
  0xc1   : > { %7307 = vst [vmem:[#allocation56_spill] sm:$0xff] %v4667_v13  ;;  %v4669_v43 = vpop.permute.xlu0 %671 }
  0xc2   : > { %7308 = vst [vmem:[#allocation57_spill] sm:$0xff] %v4669_v43 }
  0xc4   : > { %1295 = vrot.lane.b32.xlu1 %v4661_v29, %s3631_s27  ;;  %1298 = vrot.lane.b32.xlu0 %v4661_v29, %s3630_s25  ;;  %v4677_v7 = vpop.permute.xlu1 %702 }
  0xc5   : > { %7310 = vst [vmem:[#allocation15_spill] sm:$0xff] %v4677_v7  ;;  %v4679_v27 = vpop.permute.xlu0 %692 }
  0xc6   : > { %7311 = vst [vmem:[#allocation58_spill] sm:$0xff] %v4679_v27  ;;  %v7327_v27 = vld [vmem:[#allocation17_spill] sm:$0xff] }
  0xc8   : > { %1301 = vrot.lane.b32.xlu1 %v4661_v29, %s3633_s29  ;;  %1304 = vrot.lane.b32.xlu0 %v4661_v29, %s3632_s28  ;;  %v4687_v50 = vpop.permute.xlu1 %723 }
  0xc9   : > { %7312 = vst [vmem:[#allocation59_spill] sm:$0xff] %v4687_v50  ;;  %v4689_v30 = vpop.permute.xlu0 %713  ;;  %v7325_v50 = vld [vmem:[#allocation20_spill] sm:$0xff] }
  0xca   : > { %7313 = vst [vmem:[#allocation60_spill] sm:$0xff] %v4689_v30 }
  0xcc   : > { %1307 = vrot.lane.b32.xlu1 %v4661_v29, %s3635_s6  ;;  %v4693_v47 = vpop.permute.xlu1 %744  ;;  %1363 = vrot.lane.b32.xlu0 %v4681_v49, %s3629_s23  ;;  %v1002_v29 = vmul.f32 %v4726_v63, %v7298_v21 }
  0xcd   : > { %7314 = vst [vmem:[#allocation61_spill] sm:$0xff] %v4693_v47  ;;  %v4697_v22 = vpop.permute.xlu0 %733 }
  0xce   : > { %7315 = vst [vmem:[#allocation62_spill] sm:$0xff] %v4697_v22  ;;  %v7324_v22 = vld [vmem:[#allocation16_spill] sm:$0xff] }
  0xcf   : > { %v1028_v21 = vmul.f32 %v4618_v46, %v7324_v22 }
  0xd0   : > { %1366 = vrot.lane.b32.xlu1 %v4681_v49, %s3628_s21  ;;  %v4701_v40 = vpop.permute.xlu1 %764  ;;  %1369 = vrot.lane.b32.xlu0 %v4681_v49, %s3631_s27 }
  0xd1   : > { %7316 = vst [vmem:[#allocation63_spill] sm:$0xff] %v4701_v40  ;;  %v4705_v5 = vpop.permute.xlu0 %754  ;;  %v1003_v40 = vadd.f32 %v1002_v29, %v995_v31  ;;  %v4753_v29 = vld [vmem:[%s3725_s15 + $0x11] sm:$0xf] }
  0xd2   : > { %7317 = vst [vmem:[#allocation64_spill] sm:$0xff] %v4705_v5 }
  0xd4   : > { %1372 = vrot.lane.b32.xlu1 %v4681_v49, %s3630_s25  ;;  %v4709_v39 = vpop.permute.xlu1 %785  ;;  %1375 = vrot.lane.b32.xlu0 %v4681_v49, %s3633_s29 }
  0xd5   : > { %7318 = vst [vmem:[#allocation65_spill] sm:$0xff] %v4709_v39  ;;  %v4713_v52 = vpop.permute.xlu0 %775 }
  0xd6   : > { %7319 = vst [vmem:[#allocation66_spill] sm:$0xff] %v4713_v52  ;;  %v4735_v52 = vld [vmem:[%s3725_s15 + $0x78] sm:$0xf] }
  0xd7   : > { %v1006_v19 = vmul.f32 %v4735_v52, %v7295_v58  ;;  %v1014_v58 = vmul.f32 %v4753_v29, %v7296_v34  ;;  %v1038_v13 = vmul.f32 %v4735_v52, %v7327_v27 }
  0xd8   : > { %1378 = vrot.lane.b32.xlu1 %v4681_v49, %s3632_s28  ;;  %v4717_v3 = vpop.permute.xlu1 %806  ;;  %1381 = vrot.lane.b32.xlu0 %v4681_v49, %s3635_s6 }
  0xd9   : > { %7320 = vst [vmem:[#allocation67_spill] sm:$0xff] %v4717_v3  ;;  %v4721_v12 = vpop.permute.xlu0 %795  ;;  %v994_v3 = vmul.f32 %v4618_v46, %v7285_v53 }
  0xda   : > { %7321 = vst [vmem:[#allocation68_spill] sm:$0xff] %v4721_v12  ;;  %v4740_v12 = vld [vmem:[%s3725_s15 + $0x19] sm:$0xf] }
  0xdb   : > { %v1017_v53 = vmul.f32 %v4740_v12, %v7301_v9  ;;  %v7329_v9 = vld [vmem:[#allocation23_spill] sm:$0xff] }
  0xdc   : > { %v4730_v17 = vpop.permute.xlu1 %826 }
  0xdd   : > { %7322 = vst [vmem:[#allocation69_spill] sm:$0xff] %v4730_v17  ;;  %v4732_v39 = vpop.permute.xlu0 %816  ;;  %v1029_v17 = vmul.f32 %v4632_v60, %v7325_v50 }
  0xde   : > { %7323 = vst [vmem:[#allocation70_spill] sm:$0xff] %v4732_v39  ;;  %v7326_v39 = vld [vmem:[#allocation21_spill] sm:$0xff] }
  0xdf   : > { %v1036_v30 = vmul.f32 %v4726_v63, %v7326_v39 }
  0xe0   : > { %v1011_v5 = vpop.permute.xlu1 %1010 }
  0xe1   : > { %v999_v47 = vpop.permute.xlu0 %998  ;;  %v1013_v31 = vadd.f32 %v1011_v5, %v1003_v40  ;;  %v1037_v37 = vadd.f32 %v1036_v30, %v1029_v17  ;;  %v1060_v40 = vmul.f32 %v4632_v60, %v7329_v9  ;;  %v7330_v5 = vld [vmem:[#allocation24_spill] sm:$0xff] }
  0xe2   : > { %v1001_v7 = vadd.f32 %v999_v47, %v994_v3  ;;  %v1046_v47 = vmul.f32 %v4753_v29, %v7328_v0  ;;  %v1067_v57 = vmul.f32 %v4726_v63, %v7330_v5 }
  0xe3   : > { %v1018_v3 = vadd.f32 %v1017_v53, %v1013_v31 }
  0xe4   : > { %v1007_v43 = vadd.f32 %v1006_v19, %v1001_v7  ;;  %v1033_v54 = vpop.permute.xlu1 %1032  ;;  %v1048_v7 = vmul.f32 %v4740_v12, %v7331_v23 }
  0xe5   : > { %v1022_v41 = vpop.permute.xlu0 %1021  ;;  %v1035_v6 = vadd.f32 %v1033_v54, %v1028_v21  ;;  %v7332_v21 = vld [vmem:[#allocation27_spill] sm:$0xff] }
  0xe6   : > { %v1015_v18 = vadd.f32 %v1014_v58, %v1007_v43  ;;  %v1059_v53 = vmul.f32 %v4618_v46, %v7332_v21  ;;  %v1068_v43 = vadd.f32 %v1067_v57, %v1060_v40  ;;  %v1091_v57 = vmul.f32 %v4632_v60, %v4191_v11 }
  0xe7   : > { %v1039_v34 = vadd.f32 %v1038_v13, %v1035_v6  ;;  %v1069_v6 = vmul.f32 %v4735_v52, %v7333_v25 }
  0xe8   : > { %v1024_v35 = vadd.f32 %v1022_v41, %v1015_v18  ;;  %v1053_v19 = vpop.permute.xlu1 %1052  ;;  %v7334_v18 = vld [vmem:[#allocation29_spill] sm:$0xff] }
  0xe9   : > { %v1043_v2 = vpop.permute.xlu0 %1042  ;;  %v1047_v54 = vadd.f32 %v1046_v47, %v1039_v34  ;;  %v1079_v41 = vmul.f32 %v4740_v12, %v7334_v18 }
  0xea   : > { %v1025_v17 = vadd.f32 %v1024_v35, %v1018_v3  ;;  %v1045_v30 = vadd.f32 %v1043_v2, %v1037_v37  ;;  %v1077_v35 = vmul.f32 %v4753_v29, %v4169_v28  ;;  %v7335_v2 = vld [vmem:[#allocation30_spill] sm:$0xff] }
  0xeb   : > { %v1055_v31 = vadd.f32 %v1053_v19, %v1047_v54  ;;  %v1090_v37 = vmul.f32 %v4618_v46, %v7335_v2 }
  0xec   : > { %v1026_v58 = vadd.f32 %v1025_v17, %v4428_v33  ;;  %v1049_v9 = vadd.f32 %v1048_v7, %v1045_v30  ;;  %v1074_v13 = vpop.permute.xlu1 %1073  ;;  %v1098_v33 = vmul.f32 %v4726_v63, %v4208_v61  ;;  %v7337_v7 = vld [vmem:[#allocation31_spill] sm:$0xff] }
  0xed   : > { %v1064_v5 = vpop.permute.xlu0 %1063  ;;  %v1076_v34 = vadd.f32 %v1074_v13, %v1068_v43  ;;  %v1100_v19 = vmul.f32 %v4735_v52, %v7337_v7  ;;  %v1129_v43 = vmul.f32 %v4726_v63, %v4265_v20  ;;  %v1110_v13 = vmul.f32 %v4740_v12, %v4224_v38 }
  0xee   : > { %v4782_v47 = vmax.f32 %v1026_v58, 0.0  ;;  %v4784_v3 = vadd.f32 %v1055_v31, %v1049_v9  ;;  %v1066_v40 = vadd.f32 %v1064_v5, %v1059_v53  ;;  %v1099_v61 = vadd.f32 %v1098_v33, %v1091_v57 }
  0xef   : > { %v1108_v9 = vmul.f32 %v4753_v29, %v4186_v4  ;;  %v1080_v31 = vadd.f32 %v1079_v41, %v1076_v34  ;;  %v1122_v53 = vmul.f32 %v4632_v60, %v4262_v44 }
  0xf0   : > { %7336 = vst [vmem:[#allocation16_spill] sm:$0xff] %v4782_v47  ;;  %v1070_v54 = vadd.f32 %v1069_v6, %v1066_v40  ;;  %1399 = vrot.lane.b32.xlu1 %v4782_v47, %s3629_s23  ;;  %1402 = vrot.lane.b32.xlu0 %v4782_v47, %s3628_s21  ;;  %v1095_v17 = vpop.permute.xlu1 %1094  ;;  %v1121_v40 = vmul.f32 %v4618_v46, %v4323_v8 }
  0xf1   : > { %v1084_v30 = vpop.permute.xlu0 %1083  ;;  %v1097_v11 = vadd.f32 %v1095_v17, %v1090_v37 }
  0xf2   : > { %v1078_v5 = vadd.f32 %v1077_v35, %v1070_v54  ;;  %v1131_v54 = vmul.f32 %v4735_v52, %v4335_v16 }
  0xf3   : > { %v1101_v58 = vadd.f32 %v1100_v19, %v1097_v11  ;;  %v1130_v11 = vadd.f32 %v1129_v43, %v1122_v53 }
  0xf4   : > { %v1086_v6 = vadd.f32 %v1084_v30, %v1078_v5  ;;  %1405 = vrot.lane.b32.xlu1 %v4782_v47, %s3631_s27  ;;  %1408 = vrot.lane.b32.xlu0 %v4782_v47, %s3630_s25  ;;  %v1115_v37 = vpop.permute.xlu1 %1114  ;;  %v1141_v30 = vmul.f32 %v4740_v12, %v4340_v26  ;;  %v1160_v5 = vmul.f32 %v4726_v63, %v4404_v48 }
  0xf5   : > { %v1105_v41 = vpop.permute.xlu0 %1104  ;;  %v1109_v35 = vadd.f32 %v1108_v9, %v1101_v58  ;;  %v1152_v9 = vmul.f32 %v4618_v46, %v4359_v55 }
  0xf6   : > { %v4804_v57 = vadd.f32 %v1086_v6, %v1080_v31  ;;  %v1107_v33 = vadd.f32 %v1105_v41, %v1099_v61  ;;  %v1153_v31 = vmul.f32 %v4632_v60, %v4392_v14  ;;  %v1139_v6 = vmul.f32 %v4753_v29, %v4380_v56 }
  0xf7   : > { %v1117_v34 = vadd.f32 %v1115_v37, %v1109_v35  ;;  %v4831_v37 = vld [vmem:[%s3725_s15 + $0x10] sm:$0xf] }
  0xf8   : > { %v1111_v19 = vadd.f32 %v1110_v13, %v1107_v33  ;;  %1411 = vrot.lane.b32.xlu1 %v4782_v47, %s3633_s29  ;;  %1414 = vrot.lane.b32.xlu0 %v4782_v47, %s3632_s28  ;;  %v1136_v17 = vpop.permute.xlu1 %1135  ;;  %v1162_v13 = vmul.f32 %v4735_v52, %v4362_v42  ;;  %v616_v41 = vmul.f32 %v4831_v37, %v7324_v22 }
  0xf9   : > { %v1126_v61 = vpop.permute.xlu0 %1125  ;;  %v1138_v58 = vadd.f32 %v1136_v17, %v1130_v11  ;;  %v1184_v22 = vmul.f32 %v4632_v60, %v4447_v51 }
  0xfa   : > { %v4824_v53 = vadd.f32 %v1117_v34, %v1111_v19  ;;  %v1128_v43 = vadd.f32 %v1126_v61, %v1121_v40  ;;  %v1161_v34 = vadd.f32 %v1160_v5, %v1153_v31  ;;  %v1170_v19 = vmul.f32 %v4753_v29, %v4389_v15 }
  0xfb   : > { %v1142_v17 = vadd.f32 %v1141_v30, %v1138_v58  ;;  %v623_v30 = vadd.f32 %v4636_v24, %v616_v41  ;;  %v1183_v24 = vmul.f32 %v4618_v46, %v4495_v1  ;;  %v634_v41 = vmul.f32 %v4618_v46, %v7328_v0 }
  0xfc   : > { %v1132_v35 = vadd.f32 %v1131_v54, %v1128_v43  ;;  %1417 = vrot.lane.b32.xlu1 %v4782_v47, %s3635_s6  ;;  %1434 = vrot.lane.b32.xlu0 %v4681_v49, %s3627_s17  ;;  %v1157_v33 = vpop.permute.xlu1 %1156  ;;  %v1191_v54 = vmul.f32 %v4726_v63, %v4461_v59  ;;  %v626_v43 = vmul.f32 %v4585_v62, %v7327_v27 }
  0xfd   : > { %v1146_v40 = vpop.permute.xlu0 %1145  ;;  %v1159_v11 = vadd.f32 %v1157_v33, %v1152_v9  ;;  %v617_v47 = vmul.f32 %v4605_v36, %v7325_v50  ;;  %v4850_v9 = vld [vmem:[%s3725_s15 + $0x30] sm:$0xf]  ;;  %v1172_v27 = vmul.f32 %v4740_v12, %v4418_v10  ;;  %v4862_v50 = vstv %s4814_s13 }
  0xfe   : > { %v1140_v61 = vadd.f32 %v1139_v6, %v1132_v35  ;;  %v624_v31 = vmul.f32 %v4850_v9, %v7326_v39  ;;  %v627_v10 = vadd.f32 %v626_v43, %v623_v30  ;;  %v1203_v0 = vmul.f32 %v4740_v12, %v4488_v32 }
  0xff   : > { %v1163_v5 = vadd.f32 %v1162_v13, %v1159_v11  ;;  %v1192_v13 = vadd.f32 %v1191_v54, %v1184_v22  ;;  %v7338_v11 = vld [vmem:[#allocation25_spill] sm:$0xff]  ;;  %v7340_v54 = vld [vmem:[#allocation8_spill] sm:$0xff] }
 0x100   : > { %v1148_v58 = vadd.f32 %v1146_v40, %v1140_v61  ;;  %1437 = vrot.lane.b32.xlu1 %v4681_v49, %s3634_s30  ;;  %1440 = vrot.lane.b32.xlu0 %v4681_v49, %s3638_s9  ;;  %v1177_v6 = vpop.permute.xlu1 %1176  ;;  %v625_v40 = vadd.f32 %v624_v31, %v617_v47  ;;  %v343_v61 = vadd.f32 %v4862_v50, %v7338_v11  ;;  %v7339_v47 = vld [vmem:[#allocation47_spill] sm:$0xff]  ;;  %v7341_v31 = vld [vmem:[#allocation48_spill] sm:$0xff] }
 0x101   : > { %v1167_v35 = vpop.permute.xlu0 %1166  ;;  %v1171_v33 = vadd.f32 %v1170_v19, %v1163_v5  ;;  %v1201_v22 = vmul.f32 %v4753_v29, %v7339_v47  ;;  %v1214_v43 = vmul.f32 %v4618_v46, %v7340_v54  ;;  %v1215_v5 = vmul.f32 %v4632_v60, %v7341_v31 }
 0x102   : > { %v4864_v59 = vadd.f32 %v1148_v58, %v1142_v17  ;;  %v1169_v39 = vadd.f32 %v1167_v35, %v1161_v34  ;;  %v1193_v34 = vmul.f32 %v4735_v52, %v4504_v45  ;;  %v4892_v11 = vmax.f32 %v343_v61, 0.0 }
 0x103   : > { %v1179_v51 = vadd.f32 %v1177_v6, %v1171_v33  ;;  %v7342_v6 = vld [vmem:[#allocation49_spill] sm:$0xff]  ;;  %v7343_v33 = vld [vmem:[#allocation46_spill] sm:$0xff] }
 0x104   : > { %v1173_v15 = vadd.f32 %v1172_v27, %v1169_v39  ;;  %1443 = vrot.lane.b32.xlu1 %v4681_v49, %s3636_s7  ;;  %1446 = vrot.lane.b32.xlu0 %v4681_v49, %s3640_s11  ;;  %v1198_v19 = vpop.permute.xlu1 %1197  ;;  %v1222_v35 = vmul.f32 %v4726_v63, %v7342_v6  ;;  %v1224_v39 = vmul.f32 %v4735_v52, %v7343_v33  ;;  %v7345_v63 = vld [vmem:[#allocation53_spill] sm:$0xff]  ;;  %v7346_v52 = vld [vmem:[#allocation12_spill] sm:$0xff] }
 0x105   : > { %v1188_v17 = vpop.permute.xlu0 %1187  ;;  %v1200_v27 = vadd.f32 %v1198_v19, %v1192_v13  ;;  %7344 = vst [vmem:[#allocation20_spill] sm:$0xff] %v4892_v11  ;;  %v1232_v19 = vmul.f32 %v4753_v29, %v7345_v63  ;;  %v633_v61 = vadd.f32 %v7346_v52, %v625_v40  ;;  %v7348_v29 = vld [vmem:[#allocation11_spill] sm:$0xff] }
 0x106   : > { %v4886_v30 = vadd.f32 %v1179_v51, %v1173_v15  ;;  %v1190_v58 = vadd.f32 %v1188_v17, %v1183_v24  ;;  %v635_v15 = vadd.f32 %v634_v41, %v627_v10  ;;  %v636_v51 = vmul.f32 %v4632_v60, %v7331_v23  ;;  %v7347_v10 = vld [vmem:[#allocation50_spill] sm:$0xff] }
 0x107   : > { %v1204_v17 = vadd.f32 %v1203_v0, %v1200_v27  ;;  %v1234_v23 = vmul.f32 %v4740_v12, %v7347_v10 }
 0x108   : > { %v1194_v32 = vadd.f32 %v1193_v34, %v1190_v58  ;;  %1449 = vrot.lane.b32.xlu1 %v4681_v49, %s3637_s8  ;;  %1452 = vrot.lane.b32.xlu0 %v4681_v49, %s3641_s12  ;;  %v1219_v54 = vpop.permute.xlu1 %1218  ;;  %v1223_v58 = vadd.f32 %v1222_v35, %v1215_v5  ;;  %v643_v63 = vadd.f32 %v7348_v29, %v635_v15 }
 0x109   : > { %v1208_v24 = vpop.permute.xlu0 %1207  ;;  %v1221_v13 = vadd.f32 %v1219_v54, %v1214_v43  ;;  %v637_v40 = vadd.f32 %v636_v51, %v633_v61 }
 0x10a   : > { %v1202_v34 = vadd.f32 %v1201_v22, %v1194_v32 }
 0x10b   : > { %v1225_v33 = vadd.f32 %v1224_v39, %v1221_v13  ;;  %v644_v35 = vadd.f32 %v643_v63, %v637_v40 }
 0x10c   : > { %v1210_v6 = vadd.f32 %v1208_v24, %v1202_v34  ;;  %1455 = vrot.lane.b32.xlu1 %v4681_v49, %s3639_s10  ;;  %1503 = vrot.lane.b32.xlu0 %v4892_v11, %s3629_s23  ;;  %v1239_v41 = vpop.permute.xlu1 %1238 }
 0x10d   : > { %v1229_v54 = vpop.permute.xlu0 %1228  ;;  %v1233_v43 = vadd.f32 %v1232_v19, %v1225_v33  ;;  %v645_v39 = vadd.f32 %v644_v35, %v4862_v50  ;;  %v1057_v35 = vadd.f32 %v4784_v3, %v4862_v50 }
 0x10e   : > { %v4910_v0 = vadd.f32 %v1210_v6, %v1204_v17  ;;  %v1231_v32 = vadd.f32 %v1229_v54, %v1223_v58 }
 0x10f   : > { %v1241_v22 = vadd.f32 %v1239_v41, %v1233_v43  ;;  %v4937_v24 = vmax.f32 %v645_v39, 0.0  ;;  %v5017_v39 = vmax.f32 %v1057_v35, 0.0 }
 0x110   : > { %7349 = vst [vmem:[#allocation21_spill] sm:$0xff] %v4910_v0  ;;  %v1235_v5 = vadd.f32 %v1234_v23, %v1231_v32  ;;  %1506 = vrot.lane.b32.xlu1 %v4892_v11, %s3628_s21  ;;  %1509 = vrot.lane.b32.xlu0 %v4892_v11, %s3631_s27  ;;  %v4916_v27 = vpop.permute.xlu1 %1249  ;;  %v7354_v23 = vld [vmem:[#allocation26_spill] sm:$0xff]  ;;  %v647_v0 = vmul.f32 %v4831_v37, %v7332_v21 }
 0x111   : > { %v4918_v12 = vpop.permute.xlu0 %1246  ;;  %7351 = vst [vmem:[#allocation19_spill] sm:$0xff] %v4937_v24  ;;  %v878_v41 = vadd.f32 %v7354_v23, %v4862_v50  ;;  %7359 = vst [vmem:[#allocation25_spill] sm:$0xff] %v5017_v39  ;;  %v7367_v21 = vld [vmem:[#allocation54_spill] sm:$0xff] }
 0x112   : > { %v4920_v33 = vadd.f32 %v1241_v22, %v1235_v5 }
 0x113   : > { %v4981_v54 = vmax.f32 %v878_v41, 0.0 }
 0x114   : > { %7350 = vst [vmem:[#allocation17_spill] sm:$0xff] %v4920_v33  ;;  %1512 = vrot.lane.b32.xlu1 %v4892_v11, %s3630_s25  ;;  %1515 = vrot.lane.b32.xlu0 %v4892_v11, %s3633_s29  ;;  %v4929_v15 = vpop.permute.xlu1 %1255 }
 0x115   : > { %v4926_v6 = vpop.permute.xlu0 %1252  ;;  %7355 = vst [vmem:[#allocation28_spill] sm:$0xff] %v4981_v54 }
 0x118   : > { %1518 = vrot.lane.b32.xlu1 %v4892_v11, %s3632_s28  ;;  %1521 = vrot.lane.b32.xlu0 %v4892_v11, %s3635_s6  ;;  %v4943_v13 = vpop.permute.xlu1 %1261 }
 0x119   : > { %v4935_v51 = vpop.permute.xlu0 %1258  ;;  %7352 = vst [vmem:[#allocation22_spill] sm:$0xff] %v4943_v13 }
 0x11c   : > { %1539 = vrot.lane.b32.xlu1 %v4937_v24, %s3629_s23  ;;  %1542 = vrot.lane.b32.xlu0 %v4937_v24, %s3628_s21  ;;  %v4951_v19 = vpop.permute.xlu1 %1327 }
 0x11d   : > { %v4945_v63 = vpop.permute.xlu0 %1264 }
 0x11e   : > { %7353 = vst [vmem:[#allocation27_spill] sm:$0xff] %v4945_v63 }
 0x120   : > { %1545 = vrot.lane.b32.xlu1 %v4937_v24, %s3631_s27  ;;  %1548 = vrot.lane.b32.xlu0 %v4937_v24, %s3630_s25  ;;  %v4959_v61 = vpop.permute.xlu1 %1333 }
 0x121   : > { %v4953_v52 = vpop.permute.xlu0 %1324 }
 0x124   : > { %1551 = vrot.lane.b32.xlu1 %v4937_v24, %s3633_s29  ;;  %1554 = vrot.lane.b32.xlu0 %v4937_v24, %s3632_s28  ;;  %v4971_v34 = vpop.permute.xlu1 %1339 }
 0x125   : > { %v4961_v17 = vpop.permute.xlu0 %1330 }
 0x128   : > { %1557 = vrot.lane.b32.xlu1 %v4937_v24, %s3635_s6  ;;  %1574 = vrot.lane.b32.xlu0 %v4892_v11, %s3627_s17  ;;  %v4983_v43 = vpop.permute.xlu1 %1345 }
 0x129   : > { %v4973_v58 = vpop.permute.xlu0 %1336  ;;  %7356 = vst [vmem:[#allocation29_spill] sm:$0xff] %v4983_v43 }
 0x12c   : > { %1577 = vrot.lane.b32.xlu1 %v4892_v11, %s3634_s30  ;;  %1580 = vrot.lane.b32.xlu0 %v4892_v11, %s3638_s9 }
 0x12d   : > { %v4985_v29 = vpop.permute.xlu0 %1342 }
 0x12e   : > { %7357 = vst [vmem:[#allocation30_spill] sm:$0xff] %v4985_v29 }
 0x130   : > { %1583 = vrot.lane.b32.xlu1 %v4892_v11, %s3636_s7  ;;  %1586 = vrot.lane.b32.xlu0 %v4892_v11, %s3640_s11 }
 0x132   : > { %v4995_v40 = vpop.permute.xlu1 %1289  ;;  %v4997_v32 = vpop.permute.xlu0 %1292 }
 0x134   : > { %1589 = vrot.lane.b32.xlu1 %v4892_v11, %s3637_s8  ;;  %1592 = vrot.lane.b32.xlu0 %v4892_v11, %s3641_s12 }
 0x136   : > { %v5003_v22 = vpop.permute.xlu1 %1295  ;;  %v5005_v5 = vpop.permute.xlu0 %1298 }
 0x137   : > { %7358 = vst [vmem:[#allocation31_spill] sm:$0xff] %v5005_v5  ;;  %v5064_v5 = vstv %s3386_s14 }
 0x138   : > { %1595 = vrot.lane.b32.xlu1 %v4892_v11, %s3639_s10  ;;  %1613 = vrot.lane.b32.xlu0 %v4981_v54, %s3629_s23  ;;  %v654_v11 = vadd.f32 %v7367_v21, %v647_v0  ;;  %v7373_v21 = vld [vmem:[#allocation57_spill] sm:$0xff] }
 0x13a   : > { %v5019_v23 = vpop.permute.xlu1 %1301  ;;  %v5021_v41 = vpop.permute.xlu0 %1304 }
 0x13b   : > { %7360 = vst [vmem:[#allocation47_spill] sm:$0xff] %v5019_v23  ;;  %7361 = vst [vmem:[#allocation48_spill] sm:$0xff] %v5021_v41  ;;  %v7365_v41 = vld [vmem:[#allocation23_spill] sm:$0xff]  ;;  %v657_v23 = vmul.f32 %v4585_v62, %v7333_v25 }
 0x13c   : > { %1616 = vrot.lane.b32.xlu1 %v4981_v54, %s3628_s21  ;;  %1619 = vrot.lane.b32.xlu0 %v4981_v54, %s3631_s27  ;;  %v648_v43 = vmul.f32 %v4605_v36, %v7365_v41 }
 0x13d   : > { %v658_v13 = vadd.f32 %v657_v23, %v654_v11 }
 0x13e   : > { %v5027_v33 = vpop.permute.xlu1 %1307  ;;  %v5029_v3 = vpop.permute.xlu0 %1363 }
 0x13f   : > { %7362 = vst [vmem:[#allocation12_spill] sm:$0xff] %v5027_v33 }
 0x140   : > { %1622 = vrot.lane.b32.xlu1 %v4981_v54, %s3630_s25  ;;  %1625 = vrot.lane.b32.xlu0 %v4981_v54, %s3633_s29 }
 0x142   : > { %v5039_v50 = vpop.permute.xlu1 %1366  ;;  %v5041_v35 = vpop.permute.xlu0 %1369 }
 0x144   : > { %1628 = vrot.lane.b32.xlu1 %v4981_v54, %s3632_s28  ;;  %1631 = vrot.lane.b32.xlu0 %v4981_v54, %s3635_s6 }
 0x146   : > { %v5049_v24 = vpop.permute.xlu1 %1372  ;;  %v5051_v33 = vpop.permute.xlu0 %1375 }
 0x147   : > { %7363 = vst [vmem:[#allocation11_spill] sm:$0xff] %v5049_v24  ;;  %7364 = vst [vmem:[#allocation26_spill] sm:$0xff] %v5051_v33  ;;  %v7368_v33 = vld [vmem:[#allocation34_spill] sm:$0xff] }
 0x148   : > { %1649 = vrot.lane.b32.xlu1 %v5017_v39, %s3629_s23  ;;  %1652 = vrot.lane.b32.xlu0 %v5017_v39, %s3628_s21  ;;  %v382_v29 = vadd.f32 %v5064_v5, %v7368_v33  ;;  %v667_v33 = vmul.f32 %v4632_v60, %v7334_v18 }
 0x14a   : > { %v5074_v24 = vpop.permute.xlu1 %1378  ;;  %v5076_v25 = vpop.permute.xlu0 %1381  ;;  %v5078_v0 = vmax.f32 %v382_v29, 0.0 }
 0x14b   : > { %7369 = vst [vmem:[#allocation23_spill] sm:$0xff] %v5074_v24 }
 0x14c   : > { %1655 = vrot.lane.b32.xlu1 %v5017_v39, %s3631_s27  ;;  %1658 = vrot.lane.b32.xlu0 %v5017_v39, %s3630_s25  ;;  %7371 = vst [vmem:[#allocation54_spill] sm:$0xff] %v5078_v0 }
 0x150   : > { %1661 = vrot.lane.b32.xlu1 %v5017_v39, %s3633_s29  ;;  %1664 = vrot.lane.b32.xlu0 %v5017_v39, %s3632_s28 }
 0x154   : > { %1667 = vrot.lane.b32.xlu1 %v5017_v39, %s3635_s6  ;;  %1684 = vrot.lane.b32.xlu0 %v4981_v54, %s3627_s17  ;;  %v7366_v39 = vld [vmem:[#allocation24_spill] sm:$0xff] }
 0x155   : > { %v655_v63 = vmul.f32 %v4850_v9, %v7366_v39  ;;  %v665_v39 = vmul.f32 %v4618_v46, %v4169_v28  ;;  %7370 = vst [vmem:[#allocation24_spill] sm:$0xff] %v5076_v25 }
 0x157   : > { %v656_v41 = vadd.f32 %v655_v63, %v648_v43  ;;  %v7372_v63 = vld [vmem:[#allocation13_spill] sm:$0xff]  ;;  %v666_v43 = vadd.f32 %v665_v39, %v658_v13 }
 0x158   : > { %1687 = vrot.lane.b32.xlu1 %v4981_v54, %s3634_s30  ;;  %1690 = vrot.lane.b32.xlu0 %v4981_v54, %s3638_s9 }
 0x159   : > { %v664_v11 = vadd.f32 %v7372_v63, %v656_v41  ;;  %v674_v25 = vadd.f32 %v7373_v21, %v666_v43 }
 0x15b   : > { %v668_v29 = vadd.f32 %v667_v33, %v664_v11 }
 0x15c   : > { %1693 = vrot.lane.b32.xlu1 %v4981_v54, %s3636_s7  ;;  %1696 = vrot.lane.b32.xlu0 %v4981_v54, %s3640_s11 }
 0x15d   : > { %v675_v18 = vadd.f32 %v674_v25, %v668_v29 }
 0x15f   : > { %v676_v39 = vadd.f32 %v675_v18, %v5064_v5 }
 0x160   : > { %1699 = vrot.lane.b32.xlu1 %v4981_v54, %s3637_s8  ;;  %1702 = vrot.lane.b32.xlu0 %v4981_v54, %s3641_s12 }
 0x161   : > { %v5121_v25 = vmax.f32 %v676_v39, 0.0 }
 0x162   : > { %v5087_v23 = vpop.permute.xlu1 %1399  ;;  %v5089_v28 = vpop.permute.xlu0 %1402 }
 0x163   : > { %7377 = vst [vmem:[#allocation71_spill] sm:$0xff] %v5121_v25 }
 0x164   : > { %1705 = vrot.lane.b32.xlu1 %v4981_v54, %s3639_s10  ;;  %1753 = vrot.lane.b32.xlu0 %v5078_v0, %s3629_s23 }
 0x166   : > { %v5096_v24 = vpop.permute.xlu1 %1405  ;;  %v5098_v10 = vpop.permute.xlu0 %1408 }
 0x168   : > { %1756 = vrot.lane.b32.xlu1 %v5078_v0, %s3628_s21  ;;  %1759 = vrot.lane.b32.xlu0 %v5078_v0, %s3631_s27 }
 0x16a   : > { %v5104_v13 = vpop.permute.xlu1 %1411  ;;  %v5106_v41 = vpop.permute.xlu0 %1414 }
 0x16b   : > { %7374 = vst [vmem:[#allocation34_spill] sm:$0xff] %v5104_v13  ;;  %7375 = vst [vmem:[#allocation13_spill] sm:$0xff] %v5106_v41  ;;  %v7389_v41 = vld [vmem:[#allocation35_spill] sm:$0xff]  ;;  %v7417_v13 = vld [vmem:[#allocation36_spill] sm:$0xff] }
 0x16c   : > { %1762 = vrot.lane.b32.xlu1 %v5078_v0, %s3630_s25  ;;  %1765 = vrot.lane.b32.xlu0 %v5078_v0, %s3633_s29 }
 0x16e   : > { %v5113_v33 = vpop.permute.xlu1 %1417  ;;  %v5115_v63 = vpop.permute.xlu0 %1434 }
 0x16f   : > { %7376 = vst [vmem:[#allocation57_spill] sm:$0xff] %v5113_v33 }
 0x170   : > { %1768 = vrot.lane.b32.xlu1 %v5078_v0, %s3632_s28  ;;  %1771 = vrot.lane.b32.xlu0 %v5078_v0, %s3635_s6 }
 0x172   : > { %v5123_v11 = vpop.permute.xlu1 %1437  ;;  %v5125_v43 = vpop.permute.xlu0 %1440 }
 0x173   : > { %7378 = vst [vmem:[#allocation72_spill] sm:$0xff] %v5125_v43 }
 0x174   : > { %1789 = vrot.lane.b32.xlu1 %v5121_v25, %s3629_s23  ;;  %1792 = vrot.lane.b32.xlu0 %v5121_v25, %s3628_s21 }
 0x176   : > { %v5131_v29 = vpop.permute.xlu1 %1443  ;;  %v5133_v21 = vpop.permute.xlu0 %1446 }
 0x177   : > { %7379 = vst [vmem:[#allocation73_spill] sm:$0xff] %v5131_v29  ;;  %7380 = vst [vmem:[#allocation74_spill] sm:$0xff] %v5133_v21  ;;  %v5272_v29 = vstv %s3396_s16 }
 0x178   : > { %1795 = vrot.lane.b32.xlu1 %v5121_v25, %s3631_s27  ;;  %1798 = vrot.lane.b32.xlu0 %v5121_v25, %s3630_s25  ;;  %v421_v43 = vadd.f32 %v5272_v29, %v7417_v13 }
 0x17a   : > { %v5139_v18 = vpop.permute.xlu1 %1449  ;;  %v5141_v39 = vpop.permute.xlu0 %1452 }
 0x17b   : > { %7381 = vst [vmem:[#allocation75_spill] sm:$0xff] %v5139_v18  ;;  %7382 = vst [vmem:[#allocation76_spill] sm:$0xff] %v5141_v39 }
 0x17c   : > { %1801 = vrot.lane.b32.xlu1 %v5121_v25, %s3633_s29  ;;  %1804 = vrot.lane.b32.xlu0 %v5121_v25, %s3632_s28 }
 0x17e   : > { %v5147_v54 = vpop.permute.xlu1 %1455  ;;  %v5149_v33 = vpop.permute.xlu0 %1503 }
 0x17f   : > { %7383 = vst [vmem:[#allocation77_spill] sm:$0xff] %v5147_v54  ;;  %7384 = vst [vmem:[#allocation78_spill] sm:$0xff] %v5149_v33 }
 0x180   : > { %1807 = vrot.lane.b32.xlu1 %v5121_v25, %s3635_s6  ;;  %1824 = vrot.lane.b32.xlu0 %v5078_v0, %s3627_s17  ;;  %v897_v25 = vadd.f32 %v7389_v41, %v5064_v5 }
 0x182   : > { %v5155_v21 = vpop.permute.xlu1 %1506  ;;  %v5157_v18 = vpop.permute.xlu0 %1509  ;;  %v5177_v33 = vmax.f32 %v897_v25, 0.0 }
 0x183   : > { %7385 = vst [vmem:[#allocation79_spill] sm:$0xff] %v5155_v21  ;;  %7386 = vst [vmem:[#allocation80_spill] sm:$0xff] %v5157_v18 }
 0x184   : > { %1827 = vrot.lane.b32.xlu1 %v5078_v0, %s3634_s30  ;;  %1830 = vrot.lane.b32.xlu0 %v5078_v0, %s3638_s9  ;;  %7392 = vst [vmem:[#allocation84_spill] sm:$0xff] %v5177_v33 }
 0x186   : > { %v5163_v39 = vpop.permute.xlu1 %1512  ;;  %v5165_v54 = vpop.permute.xlu0 %1515 }
 0x187   : > { %7387 = vst [vmem:[#allocation81_spill] sm:$0xff] %v5163_v39  ;;  %7388 = vst [vmem:[#allocation82_spill] sm:$0xff] %v5165_v54  ;;  %v7413_v39 = vld [vmem:[#allocation32_spill] sm:$0xff] }
 0x188   : > { %1833 = vrot.lane.b32.xlu1 %v5078_v0, %s3636_s7  ;;  %1836 = vrot.lane.b32.xlu0 %v5078_v0, %s3640_s11 }
 0x18a   : > { %v5173_v18 = vpop.permute.xlu1 %1518  ;;  %v5175_v21 = vpop.permute.xlu0 %1521 }
 0x18b   : > { %7390 = vst [vmem:[#allocation35_spill] sm:$0xff] %v5173_v18  ;;  %7391 = vst [vmem:[#allocation83_spill] sm:$0xff] %v5175_v21 }
 0x18c   : > { %1839 = vrot.lane.b32.xlu1 %v5078_v0, %s3637_s8  ;;  %1842 = vrot.lane.b32.xlu0 %v5078_v0, %s3641_s12 }
 0x18e   : > { %v5183_v54 = vpop.permute.xlu1 %1539  ;;  %v5185_v41 = vpop.permute.xlu0 %1542 }
 0x18f   : > { %7393 = vst [vmem:[#allocation85_spill] sm:$0xff] %v5183_v54  ;;  %7394 = vst [vmem:[#allocation86_spill] sm:$0xff] %v5185_v41 }
 0x190   : > { %1845 = vrot.lane.b32.xlu1 %v5078_v0, %s3639_s10  ;;  %1863 = vrot.lane.b32.xlu0 %v5177_v33, %s3629_s23  ;;  %v1088_v0 = vadd.f32 %v4804_v57, %v5064_v5 }
 0x192   : > { %v5191_v18 = vpop.permute.xlu1 %1545  ;;  %v5193_v25 = vpop.permute.xlu0 %1548 }
 0x193   : > { %7395 = vst [vmem:[#allocation87_spill] sm:$0xff] %v5191_v18  ;;  %7396 = vst [vmem:[#allocation88_spill] sm:$0xff] %v5193_v25 }
 0x194   : > { %1866 = vrot.lane.b32.xlu1 %v5177_v33, %s3628_s21  ;;  %1869 = vrot.lane.b32.xlu0 %v5177_v33, %s3631_s27 }
 0x196   : > { %v5199_v21 = vpop.permute.xlu1 %1551  ;;  %v5201_v54 = vpop.permute.xlu0 %1554 }
 0x197   : > { %7397 = vst [vmem:[#allocation89_spill] sm:$0xff] %v5199_v21  ;;  %7398 = vst [vmem:[#allocation90_spill] sm:$0xff] %v5201_v54  ;;  %v5217_v54 = vmax.f32 %v1088_v0, 0.0 }
 0x198   : > { %1872 = vrot.lane.b32.xlu1 %v5177_v33, %s3630_s25  ;;  %1875 = vrot.lane.b32.xlu0 %v5177_v33, %s3633_s29 }
 0x199   : > { %7401 = vst [vmem:[#allocation93_spill] sm:$0xff] %v5217_v54 }
 0x19a   : > { %v5209_v25 = vpop.permute.xlu1 %1557  ;;  %v5211_v18 = vpop.permute.xlu0 %1574 }
 0x19b   : > { %7399 = vst [vmem:[#allocation91_spill] sm:$0xff] %v5209_v25  ;;  %7400 = vst [vmem:[#allocation92_spill] sm:$0xff] %v5211_v18  ;;  %v679_v18 = vmul.f32 %v4605_v36, %v7413_v39  ;;  %v696_v36 = vmul.f32 %v4618_v46, %v4186_v4  ;;  %v5286_v39 = vmax.f32 %v421_v43, 0.0  ;;  %v7422_v43 = vld [vmem:[#allocation15_spill] sm:$0xff] }
 0x19c   : > { %1878 = vrot.lane.b32.xlu1 %v5177_v33, %s3632_s28  ;;  %1881 = vrot.lane.b32.xlu0 %v5177_v33, %s3635_s6 }
 0x19d   : > { %7420 = vst [vmem:[#allocation104_spill] sm:$0xff] %v5286_v39 }
 0x19e   : > { %v5219_v21 = vpop.permute.xlu1 %1577  ;;  %v5221_v41 = vpop.permute.xlu0 %1580 }
 0x19f   : > { %7402 = vst [vmem:[#allocation94_spill] sm:$0xff] %v5219_v21  ;;  %7403 = vst [vmem:[#allocation95_spill] sm:$0xff] %v5221_v41  ;;  %v7414_v21 = vld [vmem:[#allocation33_spill] sm:$0xff] }
 0x1a0   : > { %1899 = vrot.lane.b32.xlu1 %v5217_v54, %s3629_s23  ;;  %1902 = vrot.lane.b32.xlu0 %v5217_v54, %s3628_s21 }
 0x1a2   : > { %v5227_v57 = vpop.permute.xlu1 %1583  ;;  %v5229_v5 = vpop.permute.xlu0 %1586 }
 0x1a3   : > { %7404 = vst [vmem:[#allocation96_spill] sm:$0xff] %v5227_v57  ;;  %7405 = vst [vmem:[#allocation97_spill] sm:$0xff] %v5229_v5 }
 0x1a4   : > { %1905 = vrot.lane.b32.xlu1 %v5217_v54, %s3631_s27  ;;  %1908 = vrot.lane.b32.xlu0 %v5217_v54, %s3630_s25 }
 0x1a6   : > { %v5235_v0 = vpop.permute.xlu1 %1589  ;;  %v5237_v25 = vpop.permute.xlu0 %1592 }
 0x1a7   : > { %7406 = vst [vmem:[#allocation98_spill] sm:$0xff] %v5235_v0  ;;  %7407 = vst [vmem:[#allocation99_spill] sm:$0xff] %v5237_v25  ;;  %v678_v25 = vmul.f32 %v4831_v37, %v7335_v2  ;;  %v686_v2 = vmul.f32 %v4850_v9, %v7414_v21 }
 0x1a8   : > { %1911 = vrot.lane.b32.xlu1 %v5217_v54, %s3633_s29  ;;  %1914 = vrot.lane.b32.xlu0 %v5217_v54, %s3632_s28 }
 0x1aa   : > { %v5243_v41 = vpop.permute.xlu1 %1595  ;;  %v5245_v57 = vpop.permute.xlu0 %1613 }
 0x1ab   : > { %7408 = vst [vmem:[#allocation100_spill] sm:$0xff] %v5243_v41  ;;  %7409 = vst [vmem:[#allocation101_spill] sm:$0xff] %v5245_v57  ;;  %v688_v41 = vmul.f32 %v4585_v62, %v7337_v7  ;;  %v687_v7 = vadd.f32 %v686_v2, %v679_v18 }
 0x1ac   : > { %1917 = vrot.lane.b32.xlu1 %v5217_v54, %s3635_s6  ;;  %1934 = vrot.lane.b32.xlu0 %v5177_v33, %s3627_s17  ;;  %v7412_v54 = vld [vmem:[#allocation56_spill] sm:$0xff] }
 0x1ad   : > { %v685_v57 = vadd.f32 %v7412_v54, %v678_v25  ;;  %v7421_v25 = vld [vmem:[#allocation58_spill] sm:$0xff] }
 0x1ae   : > { %v5253_v0 = vpop.permute.xlu1 %1616  ;;  %v5255_v5 = vpop.permute.xlu0 %1619 }
 0x1af   : > { %7410 = vst [vmem:[#allocation102_spill] sm:$0xff] %v5253_v0  ;;  %7411 = vst [vmem:[#allocation103_spill] sm:$0xff] %v5255_v5  ;;  %v689_v62 = vadd.f32 %v688_v41, %v685_v57  ;;  %v698_v41 = vmul.f32 %v4632_v60, %v4224_v38  ;;  %v695_v57 = vadd.f32 %v7421_v25, %v687_v7 }
 0x1b0   : > { %1937 = vrot.lane.b32.xlu1 %v5177_v33, %s3634_s30  ;;  %1940 = vrot.lane.b32.xlu0 %v5177_v33, %s3638_s9 }
 0x1b1   : > { %v697_v13 = vadd.f32 %v696_v36, %v689_v62  ;;  %v699_v2 = vadd.f32 %v698_v41, %v695_v57 }
 0x1b2   : > { %v5268_v0 = vpop.permute.xlu1 %1622  ;;  %v5270_v5 = vpop.permute.xlu0 %1625 }
 0x1b3   : > { %7415 = vst [vmem:[#allocation56_spill] sm:$0xff] %v5268_v0  ;;  %7416 = vst [vmem:[#allocation32_spill] sm:$0xff] %v5270_v5  ;;  %v705_v18 = vadd.f32 %v7422_v43, %v697_v13  ;;  %v5495_v0 = vld [vmem:[%s3725_s15 + $0x50] sm:$0xf] }
 0x1b4   : > { %1943 = vrot.lane.b32.xlu1 %v5177_v33, %s3636_s7  ;;  %1946 = vrot.lane.b32.xlu0 %v5177_v33, %s3640_s11 }
 0x1b5   : > { %v706_v38 = vadd.f32 %v705_v18, %v699_v2 }
 0x1b6   : > { %v5282_v54 = vpop.permute.xlu1 %1628  ;;  %v5284_v21 = vpop.permute.xlu0 %1631 }
 0x1b7   : > { %7418 = vst [vmem:[#allocation33_spill] sm:$0xff] %v5282_v54  ;;  %7419 = vst [vmem:[#allocation36_spill] sm:$0xff] %v5284_v21  ;;  %v707_v7 = vadd.f32 %v706_v38, %v5272_v29  ;;  %v7438_v54 = vld [vmem:[#allocation37_spill] sm:$0xff] }
 0x1b8   : > { %1949 = vrot.lane.b32.xlu1 %v5177_v33, %s3637_s8  ;;  %1952 = vrot.lane.b32.xlu0 %v5177_v33, %s3641_s12 }
 0x1b9   : > { %v5329_v25 = vmax.f32 %v707_v7, 0.0 }
 0x1ba   : > { %v5295_v4 = vpop.permute.xlu1 %1649  ;;  %v5297_v46 = vpop.permute.xlu0 %1652 }
 0x1bb   : > { %7426 = vst [vmem:[#allocation106_spill] sm:$0xff] %v5329_v25 }
 0x1bc   : > { %1955 = vrot.lane.b32.xlu1 %v5177_v33, %s3639_s10  ;;  %2003 = vrot.lane.b32.xlu0 %v5286_v39, %s3629_s23 }
 0x1be   : > { %v5304_v21 = vpop.permute.xlu1 %1655  ;;  %v5306_v62 = vpop.permute.xlu0 %1658 }
 0x1c0   : > { %2006 = vrot.lane.b32.xlu1 %v5286_v39, %s3628_s21  ;;  %2009 = vrot.lane.b32.xlu0 %v5286_v39, %s3631_s27 }
 0x1c2   : > { %v5312_v60 = vpop.permute.xlu1 %1661  ;;  %v5314_v36 = vpop.permute.xlu0 %1664 }
 0x1c3   : > { %7423 = vst [vmem:[#allocation58_spill] sm:$0xff] %v5314_v36 }
 0x1c4   : > { %2012 = vrot.lane.b32.xlu1 %v5286_v39, %s3630_s25  ;;  %2015 = vrot.lane.b32.xlu0 %v5286_v39, %s3633_s29 }
 0x1c6   : > { %v5321_v13 = vpop.permute.xlu1 %1667  ;;  %v5323_v41 = vpop.permute.xlu0 %1684 }
 0x1c7   : > { %7424 = vst [vmem:[#allocation15_spill] sm:$0xff] %v5321_v13  ;;  %7425 = vst [vmem:[#allocation105_spill] sm:$0xff] %v5323_v41  ;;  %v5486_v41 = vstv %s3406_s20 }
 0x1c8   : > { %2018 = vrot.lane.b32.xlu1 %v5286_v39, %s3632_s28  ;;  %2021 = vrot.lane.b32.xlu0 %v5286_v39, %s3635_s6 }
 0x1ca   : > { %v5331_v57 = vpop.permute.xlu1 %1687  ;;  %v5333_v43 = vpop.permute.xlu0 %1690 }
 0x1cb   : > { %7427 = vst [vmem:[#allocation107_spill] sm:$0xff] %v5331_v57  ;;  %7428 = vst [vmem:[#allocation108_spill] sm:$0xff] %v5333_v43  ;;  %v7464_v57 = vld [vmem:[#allocation41_spill] sm:$0xff] }
 0x1cc   : > { %2039 = vrot.lane.b32.xlu1 %v5329_v25, %s3629_s23  ;;  %2042 = vrot.lane.b32.xlu0 %v5329_v25, %s3628_s21 }
 0x1ce   : > { %v5339_v18 = vpop.permute.xlu1 %1693  ;;  %v5341_v2 = vpop.permute.xlu0 %1696 }
 0x1cf   : > { %7429 = vst [vmem:[#allocation109_spill] sm:$0xff] %v5339_v18  ;;  %7430 = vst [vmem:[#allocation110_spill] sm:$0xff] %v5341_v2 }
 0x1d0   : > { %2045 = vrot.lane.b32.xlu1 %v5329_v25, %s3631_s27  ;;  %2048 = vrot.lane.b32.xlu0 %v5329_v25, %s3630_s25 }
 0x1d2   : > { %v5347_v38 = vpop.permute.xlu1 %1699  ;;  %v5349_v7 = vpop.permute.xlu0 %1702 }
 0x1d3   : > { %7431 = vst [vmem:[#allocation111_spill] sm:$0xff] %v5347_v38  ;;  %7432 = vst [vmem:[#allocation112_spill] sm:$0xff] %v5349_v7 }
 0x1d4   : > { %2051 = vrot.lane.b32.xlu1 %v5329_v25, %s3633_s29  ;;  %2054 = vrot.lane.b32.xlu0 %v5329_v25, %s3632_s28 }
 0x1d6   : > { %v5355_v33 = vpop.permute.xlu1 %1705  ;;  %v5357_v18 = vpop.permute.xlu0 %1753 }
 0x1d7   : > { %7433 = vst [vmem:[#allocation113_spill] sm:$0xff] %v5355_v33 }
 0x1d8   : > { %2057 = vrot.lane.b32.xlu1 %v5329_v25, %s3635_s6  ;;  %2074 = vrot.lane.b32.xlu0 %v5286_v39, %s3627_s17  ;;  %v916_v25 = vadd.f32 %v7438_v54, %v5272_v29 }
 0x1da   : > { %v5363_v2 = vpop.permute.xlu1 %1756  ;;  %v5365_v38 = vpop.permute.xlu0 %1759 }
 0x1db   : > { %7434 = vst [vmem:[#allocation114_spill] sm:$0xff] %v5363_v2  ;;  %7435 = vst [vmem:[#allocation115_spill] sm:$0xff] %v5365_v38  ;;  %v5385_v38 = vmax.f32 %v916_v25, 0.0 }
 0x1dc   : > { %2077 = vrot.lane.b32.xlu1 %v5286_v39, %s3634_s30  ;;  %2080 = vrot.lane.b32.xlu0 %v5286_v39, %s3638_s9 }
 0x1dd   : > { %7441 = vst [vmem:[#allocation119_spill] sm:$0xff] %v5385_v38 }
 0x1de   : > { %v5371_v7 = vpop.permute.xlu1 %1762  ;;  %v5373_v33 = vpop.permute.xlu0 %1765 }
 0x1df   : > { %7436 = vst [vmem:[#allocation116_spill] sm:$0xff] %v5371_v7  ;;  %7437 = vst [vmem:[#allocation117_spill] sm:$0xff] %v5373_v33 }
 0x1e0   : > { %2083 = vrot.lane.b32.xlu1 %v5286_v39, %s3636_s7  ;;  %2086 = vrot.lane.b32.xlu0 %v5286_v39, %s3640_s11 }
 0x1e2   : > { %v5381_v43 = vpop.permute.xlu1 %1768  ;;  %v5383_v5 = vpop.permute.xlu0 %1771 }
 0x1e3   : > { %7439 = vst [vmem:[#allocation37_spill] sm:$0xff] %v5381_v43  ;;  %7440 = vst [vmem:[#allocation118_spill] sm:$0xff] %v5383_v5 }
 0x1e4   : > { %2089 = vrot.lane.b32.xlu1 %v5286_v39, %s3637_s8  ;;  %2092 = vrot.lane.b32.xlu0 %v5286_v39, %s3641_s12 }
 0x1e6   : > { %v5391_v33 = vpop.permute.xlu1 %1789  ;;  %v5393_v54 = vpop.permute.xlu0 %1792 }
 0x1e7   : > { %7442 = vst [vmem:[#allocation120_spill] sm:$0xff] %v5391_v33  ;;  %7443 = vst [vmem:[#allocation121_spill] sm:$0xff] %v5393_v54 }
 0x1e8   : > { %2095 = vrot.lane.b32.xlu1 %v5286_v39, %s3639_s10  ;;  %2113 = vrot.lane.b32.xlu0 %v5385_v38, %s3629_s23  ;;  %v1119_v39 = vadd.f32 %v4824_v53, %v5272_v29 }
 0x1ea   : > { %v5399_v43 = vpop.permute.xlu1 %1795  ;;  %v5401_v25 = vpop.permute.xlu0 %1798 }
 0x1eb   : > { %7444 = vst [vmem:[#allocation122_spill] sm:$0xff] %v5399_v43  ;;  %7445 = vst [vmem:[#allocation123_spill] sm:$0xff] %v5401_v25 }
 0x1ec   : > { %2116 = vrot.lane.b32.xlu1 %v5385_v38, %s3628_s21  ;;  %2119 = vrot.lane.b32.xlu0 %v5385_v38, %s3631_s27 }
 0x1ee   : > { %v5407_v5 = vpop.permute.xlu1 %1801  ;;  %v5409_v33 = vpop.permute.xlu0 %1804 }
 0x1ef   : > { %7446 = vst [vmem:[#allocation124_spill] sm:$0xff] %v5407_v5  ;;  %7447 = vst [vmem:[#allocation125_spill] sm:$0xff] %v5409_v33  ;;  %v5425_v33 = vmax.f32 %v1119_v39, 0.0 }
 0x1f0   : > { %2122 = vrot.lane.b32.xlu1 %v5385_v38, %s3630_s25  ;;  %2125 = vrot.lane.b32.xlu0 %v5385_v38, %s3633_s29 }
 0x1f1   : > { %7450 = vst [vmem:[#allocation128_spill] sm:$0xff] %v5425_v33 }
 0x1f2   : > { %v5417_v25 = vpop.permute.xlu1 %1807  ;;  %v5419_v43 = vpop.permute.xlu0 %1824 }
 0x1f3   : > { %7448 = vst [vmem:[#allocation126_spill] sm:$0xff] %v5417_v25  ;;  %7449 = vst [vmem:[#allocation127_spill] sm:$0xff] %v5419_v43 }
 0x1f4   : > { %2128 = vrot.lane.b32.xlu1 %v5385_v38, %s3632_s28  ;;  %2131 = vrot.lane.b32.xlu0 %v5385_v38, %s3635_s6 }
 0x1f6   : > { %v5427_v5 = vpop.permute.xlu1 %1827  ;;  %v5429_v54 = vpop.permute.xlu0 %1830 }
 0x1f7   : > { %7451 = vst [vmem:[#allocation129_spill] sm:$0xff] %v5427_v5  ;;  %7452 = vst [vmem:[#allocation130_spill] sm:$0xff] %v5429_v54 }
 0x1f8   : > { %2149 = vrot.lane.b32.xlu1 %v5425_v33, %s3629_s23  ;;  %2152 = vrot.lane.b32.xlu0 %v5425_v33, %s3628_s21 }
 0x1fa   : > { %v5435_v53 = vpop.permute.xlu1 %1833  ;;  %v5437_v29 = vpop.permute.xlu0 %1836 }
 0x1fb   : > { %7453 = vst [vmem:[#allocation131_spill] sm:$0xff] %v5435_v53  ;;  %7454 = vst [vmem:[#allocation132_spill] sm:$0xff] %v5437_v29 }
 0x1fc   : > { %2155 = vrot.lane.b32.xlu1 %v5425_v33, %s3631_s27  ;;  %2158 = vrot.lane.b32.xlu0 %v5425_v33, %s3630_s25 }
 0x1fe   : > { %v5443_v39 = vpop.permute.xlu1 %1839  ;;  %v5445_v25 = vpop.permute.xlu0 %1842 }
 0x1ff   : > { %7455 = vst [vmem:[#allocation133_spill] sm:$0xff] %v5443_v39  ;;  %7456 = vst [vmem:[#allocation134_spill] sm:$0xff] %v5445_v25  ;;  %v709_v25 = vmul.f32 %v4831_v37, %v4323_v8  ;;  %v5477_v8 = vld [vmem:[%s3725_s15 + $0x38] sm:$0xf] }
 0x200   : > { %2161 = vrot.lane.b32.xlu1 %v5425_v33, %s3633_s29  ;;  %2164 = vrot.lane.b32.xlu0 %v5425_v33, %s3632_s28 }
 0x202   : > { %v5451_v53 = vpop.permute.xlu1 %1845  ;;  %v5453_v29 = vpop.permute.xlu0 %1863 }
 0x203   : > { %7457 = vst [vmem:[#allocation135_spill] sm:$0xff] %v5451_v53  ;;  %7458 = vst [vmem:[#allocation136_spill] sm:$0xff] %v5453_v29  ;;  %v5470_v53 = vld [vmem:[%s3725_s15 + $0x18] sm:$0xf]  ;;  %v717_v29 = vmul.f32 %v4850_v9, %v4265_v20 }
 0x204   : > { %2167 = vrot.lane.b32.xlu1 %v5425_v33, %s3635_s6  ;;  %2184 = vrot.lane.b32.xlu0 %v5385_v38, %s3627_s17  ;;  %v710_v33 = vmul.f32 %v5470_v53, %v4262_v44  ;;  %v460_v44 = vadd.f32 %v5486_v41, %v7464_v57  ;;  %v5510_v57 = vld [vmem:[%s3725_s15 + $0x58] sm:$0xf] }
 0x206   : > { %v5461_v39 = vpop.permute.xlu1 %1866  ;;  %v5463_v54 = vpop.permute.xlu0 %1869  ;;  %v718_v20 = vadd.f32 %v717_v29, %v710_v33  ;;  %v729_v33 = vmul.f32 %v5510_v57, %v4340_v26 }
 0x207   : > { %7459 = vst [vmem:[#allocation137_spill] sm:$0xff] %v5461_v39  ;;  %7460 = vst [vmem:[#allocation138_spill] sm:$0xff] %v5463_v54  ;;  %v719_v54 = vmul.f32 %v5477_v8, %v4335_v16  ;;  %v7461_v39 = vld [vmem:[#allocation60_spill] sm:$0xff] }
 0x208   : > { %2187 = vrot.lane.b32.xlu1 %v5385_v38, %s3634_s30  ;;  %2190 = vrot.lane.b32.xlu0 %v5385_v38, %s3638_s9  ;;  %v716_v7 = vadd.f32 %v7461_v39, %v709_v25  ;;  %v727_v25 = vmul.f32 %v5495_v0, %v4380_v56 }
 0x20a   : > { %v5482_v43 = vpop.permute.xlu1 %1872  ;;  %v5484_v5 = vpop.permute.xlu0 %1875  ;;  %v720_v16 = vadd.f32 %v719_v54, %v716_v7  ;;  %v7468_v7 = vld [vmem:[#allocation59_spill] sm:$0xff] }
 0x20b   : > { %7462 = vst [vmem:[#allocation60_spill] sm:$0xff] %v5482_v43  ;;  %7463 = vst [vmem:[#allocation139_spill] sm:$0xff] %v5484_v5  ;;  %v5503_v43 = vmax.f32 %v460_v44, 0.0  ;;  %v726_v54 = vadd.f32 %v7468_v7, %v718_v20 }
 0x20c   : > { %2193 = vrot.lane.b32.xlu1 %v5385_v38, %s3636_s7  ;;  %2196 = vrot.lane.b32.xlu0 %v5385_v38, %s3640_s11  ;;  %v728_v56 = vadd.f32 %v727_v25, %v720_v16 }
 0x20d   : > { %7467 = vst [vmem:[#allocation141_spill] sm:$0xff] %v5503_v43  ;;  %v730_v44 = vadd.f32 %v729_v33, %v726_v54 }
 0x20e   : > { %v5499_v39 = vpop.permute.xlu1 %1878  ;;  %v5501_v5 = vpop.permute.xlu0 %1881 }
 0x20f   : > { %7465 = vst [vmem:[#allocation41_spill] sm:$0xff] %v5499_v39  ;;  %7466 = vst [vmem:[#allocation140_spill] sm:$0xff] %v5501_v5  ;;  %v7469_v5 = vld [vmem:[#allocation62_spill] sm:$0xff] }
 0x210   : > { %2199 = vrot.lane.b32.xlu1 %v5385_v38, %s3637_s8  ;;  %2202 = vrot.lane.b32.xlu0 %v5385_v38, %s3641_s12  ;;  %v736_v2 = vadd.f32 %v7469_v5, %v728_v56 }
 0x212   : > { %v5515_v29 = vpop.permute.xlu1 %1899  ;;  %v5517_v39 = vpop.permute.xlu0 %1902  ;;  %v737_v26 = vadd.f32 %v736_v2, %v730_v44 }
 0x214   : > { %2205 = vrot.lane.b32.xlu1 %v5385_v38, %s3639_s10  ;;  %2253 = vrot.lane.b32.xlu0 %v5503_v43, %s3629_s23  ;;  %v738_v5 = vadd.f32 %v737_v26, %v5486_v41 }
 0x216   : > { %v5524_v13 = vpop.permute.xlu1 %1905  ;;  %v5526_v36 = vpop.permute.xlu0 %1908  ;;  %v5549_v2 = vmax.f32 %v738_v5, 0.0 }
 0x218   : > { %2256 = vrot.lane.b32.xlu1 %v5503_v43, %s3628_s21  ;;  %2259 = vrot.lane.b32.xlu0 %v5503_v43, %s3631_s27  ;;  %7472 = vst [vmem:[#allocation142_spill] sm:$0xff] %v5549_v2 }
 0x21a   : > { %v5532_v20 = vpop.permute.xlu1 %1911  ;;  %v5534_v16 = vpop.permute.xlu0 %1914 }
 0x21b   : > { %7470 = vst [vmem:[#allocation59_spill] sm:$0xff] %v5534_v16 }
 0x21c   : > { %2262 = vrot.lane.b32.xlu1 %v5503_v43, %s3630_s25  ;;  %2265 = vrot.lane.b32.xlu0 %v5503_v43, %s3633_s29 }
 0x21e   : > { %v5541_v25 = vpop.permute.xlu1 %1917  ;;  %v5543_v33 = vpop.permute.xlu0 %1934 }
 0x21f   : > { %7471 = vst [vmem:[#allocation62_spill] sm:$0xff] %v5541_v25 }
 0x220   : > { %2268 = vrot.lane.b32.xlu1 %v5503_v43, %s3632_s28  ;;  %2271 = vrot.lane.b32.xlu0 %v5503_v43, %s3635_s6 }
 0x222   : > { %v5551_v7 = vpop.permute.xlu1 %1937  ;;  %v5553_v54 = vpop.permute.xlu0 %1940 }
 0x223   : > { %7473 = vst [vmem:[#allocation143_spill] sm:$0xff] %v5553_v54  ;;  %v7483_v54 = vld [vmem:[#allocation40_spill] sm:$0xff] }
 0x224   : > { %2289 = vrot.lane.b32.xlu1 %v5549_v2, %s3629_s23  ;;  %2292 = vrot.lane.b32.xlu0 %v5549_v2, %s3628_s21 }
 0x226   : > { %v5559_v56 = vpop.permute.xlu1 %1943  ;;  %v5561_v44 = vpop.permute.xlu0 %1946 }
 0x227   : > { %7474 = vst [vmem:[#allocation144_spill] sm:$0xff] %v5559_v56  ;;  %7475 = vst [vmem:[#allocation145_spill] sm:$0xff] %v5561_v44 }
 0x228   : > { %2295 = vrot.lane.b32.xlu1 %v5549_v2, %s3631_s27  ;;  %2298 = vrot.lane.b32.xlu0 %v5549_v2, %s3630_s25 }
 0x22a   : > { %v5567_v26 = vpop.permute.xlu1 %1949  ;;  %v5569_v5 = vpop.permute.xlu0 %1952 }
 0x22b   : > { %7476 = vst [vmem:[#allocation146_spill] sm:$0xff] %v5567_v26  ;;  %7477 = vst [vmem:[#allocation147_spill] sm:$0xff] %v5569_v5 }
 0x22c   : > { %2301 = vrot.lane.b32.xlu1 %v5549_v2, %s3633_s29  ;;  %2304 = vrot.lane.b32.xlu0 %v5549_v2, %s3632_s28 }
 0x22e   : > { %v5575_v38 = vpop.permute.xlu1 %1955  ;;  %v5577_v56 = vpop.permute.xlu0 %2003 }
 0x22f   : > { %7478 = vst [vmem:[#allocation148_spill] sm:$0xff] %v5575_v38 }
 0x230   : > { %2307 = vrot.lane.b32.xlu1 %v5549_v2, %s3635_s6  ;;  %2324 = vrot.lane.b32.xlu0 %v5503_v43, %s3627_s17  ;;  %v935_v2 = vadd.f32 %v7483_v54, %v5486_v41 }
 0x232   : > { %v5583_v44 = vpop.permute.xlu1 %2006  ;;  %v5585_v26 = vpop.permute.xlu0 %2009  ;;  %v5605_v25 = vmax.f32 %v935_v2, 0.0 }
 0x233   : > { %7479 = vst [vmem:[#allocation149_spill] sm:$0xff] %v5583_v44  ;;  %7480 = vst [vmem:[#allocation150_spill] sm:$0xff] %v5585_v26 }
 0x234   : > { %2327 = vrot.lane.b32.xlu1 %v5503_v43, %s3634_s30  ;;  %2330 = vrot.lane.b32.xlu0 %v5503_v43, %s3638_s9  ;;  %7486 = vst [vmem:[#allocation154_spill] sm:$0xff] %v5605_v25 }
 0x236   : > { %v5591_v5 = vpop.permute.xlu1 %2012  ;;  %v5593_v38 = vpop.permute.xlu0 %2015 }
 0x237   : > { %7481 = vst [vmem:[#allocation151_spill] sm:$0xff] %v5591_v5  ;;  %7482 = vst [vmem:[#allocation152_spill] sm:$0xff] %v5593_v38  ;;  %v741_v5 = vmul.f32 %v5470_v53, %v4392_v14  ;;  %v7510_v14 = vld [vmem:[#allocation38_spill] sm:$0xff] }
 0x238   : > { %2333 = vrot.lane.b32.xlu1 %v5503_v43, %s3636_s7  ;;  %2336 = vrot.lane.b32.xlu0 %v5503_v43, %s3640_s11 }
 0x23a   : > { %v5601_v26 = vpop.permute.xlu1 %2018  ;;  %v5603_v44 = vpop.permute.xlu0 %2021 }
 0x23b   : > { %7484 = vst [vmem:[#allocation40_spill] sm:$0xff] %v5601_v26  ;;  %7485 = vst [vmem:[#allocation153_spill] sm:$0xff] %v5603_v44 }
 0x23c   : > { %2339 = vrot.lane.b32.xlu1 %v5503_v43, %s3637_s8  ;;  %2342 = vrot.lane.b32.xlu0 %v5503_v43, %s3641_s12 }
 0x23e   : > { %v5611_v38 = vpop.permute.xlu1 %2039  ;;  %v5613_v54 = vpop.permute.xlu0 %2042 }
 0x23f   : > { %7487 = vst [vmem:[#allocation155_spill] sm:$0xff] %v5611_v38  ;;  %7488 = vst [vmem:[#allocation156_spill] sm:$0xff] %v5613_v54 }
 0x240   : > { %2345 = vrot.lane.b32.xlu1 %v5503_v43, %s3639_s10  ;;  %2363 = vrot.lane.b32.xlu0 %v5605_v25, %s3629_s23 }
 0x242   : > { %v5619_v26 = vpop.permute.xlu1 %2045  ;;  %v5621_v2 = vpop.permute.xlu0 %2048 }
 0x243   : > { %7489 = vst [vmem:[#allocation157_spill] sm:$0xff] %v5619_v26  ;;  %7490 = vst [vmem:[#allocation158_spill] sm:$0xff] %v5621_v2  ;;  %v1150_v26 = vadd.f32 %v4864_v59, %v5486_v41 }
 0x244   : > { %2366 = vrot.lane.b32.xlu1 %v5605_v25, %s3628_s21  ;;  %2369 = vrot.lane.b32.xlu0 %v5605_v25, %s3631_s27 }
 0x246   : > { %v5627_v44 = vpop.permute.xlu1 %2051  ;;  %v5629_v38 = vpop.permute.xlu0 %2054 }
 0x247   : > { %7491 = vst [vmem:[#allocation159_spill] sm:$0xff] %v5627_v44  ;;  %7492 = vst [vmem:[#allocation160_spill] sm:$0xff] %v5629_v38  ;;  %v5645_v38 = vmax.f32 %v1150_v26, 0.0 }
 0x248   : > { %2372 = vrot.lane.b32.xlu1 %v5605_v25, %s3630_s25  ;;  %2375 = vrot.lane.b32.xlu0 %v5605_v25, %s3633_s29 }
 0x249   : > { %7495 = vst [vmem:[#allocation163_spill] sm:$0xff] %v5645_v38 }
 0x24a   : > { %v5637_v2 = vpop.permute.xlu1 %2057  ;;  %v5639_v54 = vpop.permute.xlu0 %2074 }
 0x24b   : > { %7493 = vst [vmem:[#allocation161_spill] sm:$0xff] %v5637_v2  ;;  %7494 = vst [vmem:[#allocation162_spill] sm:$0xff] %v5639_v54  ;;  %v7509_v54 = vld [vmem:[#allocation18_spill] sm:$0xff] }
 0x24c   : > { %2378 = vrot.lane.b32.xlu1 %v5605_v25, %s3632_s28  ;;  %2381 = vrot.lane.b32.xlu0 %v5605_v25, %s3635_s6 }
 0x24e   : > { %v5647_v44 = vpop.permute.xlu1 %2077  ;;  %v5649_v43 = vpop.permute.xlu0 %2080 }
 0x24f   : > { %7496 = vst [vmem:[#allocation164_spill] sm:$0xff] %v5647_v44  ;;  %7497 = vst [vmem:[#allocation165_spill] sm:$0xff] %v5649_v43 }
 0x250   : > { %2399 = vrot.lane.b32.xlu1 %v5645_v38, %s3629_s23  ;;  %2402 = vrot.lane.b32.xlu0 %v5645_v38, %s3628_s21 }
 0x252   : > { %v5655_v59 = vpop.permute.xlu1 %2083  ;;  %v5657_v41 = vpop.permute.xlu0 %2086 }
 0x253   : > { %7498 = vst [vmem:[#allocation166_spill] sm:$0xff] %v5655_v59  ;;  %7499 = vst [vmem:[#allocation167_spill] sm:$0xff] %v5657_v41 }
 0x254   : > { %2405 = vrot.lane.b32.xlu1 %v5645_v38, %s3631_s27  ;;  %2408 = vrot.lane.b32.xlu0 %v5645_v38, %s3630_s25 }
 0x256   : > { %v5663_v26 = vpop.permute.xlu1 %2089  ;;  %v5665_v2 = vpop.permute.xlu0 %2092 }
 0x257   : > { %7500 = vst [vmem:[#allocation168_spill] sm:$0xff] %v5663_v26  ;;  %7501 = vst [vmem:[#allocation169_spill] sm:$0xff] %v5665_v2  ;;  %v740_v2 = vmul.f32 %v4831_v37, %v4359_v55  ;;  %v748_v55 = vmul.f32 %v4850_v9, %v4404_v48 }
 0x258   : > { %2411 = vrot.lane.b32.xlu1 %v5645_v38, %s3633_s29  ;;  %2414 = vrot.lane.b32.xlu0 %v5645_v38, %s3632_s28 }
 0x259   : > { %v749_v48 = vadd.f32 %v748_v55, %v741_v5 }
 0x25a   : > { %v5671_v43 = vpop.permute.xlu1 %2095  ;;  %v5673_v59 = vpop.permute.xlu0 %2113 }
 0x25b   : > { %7502 = vst [vmem:[#allocation170_spill] sm:$0xff] %v5671_v43  ;;  %7503 = vst [vmem:[#allocation171_spill] sm:$0xff] %v5673_v59  ;;  %v750_v59 = vmul.f32 %v5477_v8, %v4362_v42 }
 0x25c   : > { %2417 = vrot.lane.b32.xlu1 %v5645_v38, %s3635_s6  ;;  %2434 = vrot.lane.b32.xlu0 %v5605_v25, %s3627_s17  ;;  %v7506_v38 = vld [vmem:[#allocation61_spill] sm:$0xff] }
 0x25d   : > { %v747_v43 = vadd.f32 %v7506_v38, %v740_v2  ;;  %v758_v38 = vmul.f32 %v5495_v0, %v7510_v14 }
 0x25e   : > { %v5681_v26 = vpop.permute.xlu1 %2116  ;;  %v5683_v41 = vpop.permute.xlu0 %2119 }
 0x25f   : > { %7504 = vst [vmem:[#allocation172_spill] sm:$0xff] %v5681_v26  ;;  %7505 = vst [vmem:[#allocation173_spill] sm:$0xff] %v5683_v41  ;;  %v5700_v26 = vstv %s3416_s22  ;;  %v751_v42 = vadd.f32 %v750_v59, %v747_v43  ;;  %v7515_v59 = vld [vmem:[#allocation64_spill] sm:$0xff] }
 0x260   : > { %2437 = vrot.lane.b32.xlu1 %v5605_v25, %s3634_s30  ;;  %2440 = vrot.lane.b32.xlu0 %v5605_v25, %s3638_s9  ;;  %v499_v44 = vadd.f32 %v5700_v26, %v7509_v54  ;;  %v757_v16 = vadd.f32 %v7515_v59, %v749_v48 }
 0x261   : > { %v759_v54 = vadd.f32 %v758_v38, %v751_v42 }
 0x262   : > { %v5696_v37 = vpop.permute.xlu1 %2122  ;;  %v5698_v41 = vpop.permute.xlu0 %2125 }
 0x263   : > { %7507 = vst [vmem:[#allocation61_spill] sm:$0xff] %v5696_v37  ;;  %7508 = vst [vmem:[#allocation174_spill] sm:$0xff] %v5698_v41  ;;  %v5714_v41 = vmax.f32 %v499_v44, 0.0  ;;  %v7514_v37 = vld [vmem:[#allocation39_spill] sm:$0xff] }
 0x264   : > { %2443 = vrot.lane.b32.xlu1 %v5605_v25, %s3636_s7  ;;  %2446 = vrot.lane.b32.xlu0 %v5605_v25, %s3640_s11  ;;  %v760_v43 = vmul.f32 %v5510_v57, %v7514_v37  ;;  %v7517_v44 = vld [vmem:[#allocation63_spill] sm:$0xff] }
 0x265   : > { %7513 = vst [vmem:[#allocation175_spill] sm:$0xff] %v5714_v41  ;;  %v767_v55 = vadd.f32 %v7517_v44, %v759_v54 }
 0x266   : > { %v5710_v9 = vpop.permute.xlu1 %2128  ;;  %v5712_v2 = vpop.permute.xlu0 %2131 }
 0x267   : > { %7511 = vst [vmem:[#allocation18_spill] sm:$0xff] %v5710_v9  ;;  %7512 = vst [vmem:[#allocation38_spill] sm:$0xff] %v5712_v2  ;;  %v761_v2 = vadd.f32 %v760_v43, %v757_v16 }
 0x268   : > { %2449 = vrot.lane.b32.xlu1 %v5605_v25, %s3637_s8  ;;  %2452 = vrot.lane.b32.xlu0 %v5605_v25, %s3641_s12 }
 0x269   : > { %v768_v37 = vadd.f32 %v767_v55, %v761_v2 }
 0x26a   : > { %v5723_v14 = vpop.permute.xlu1 %2149  ;;  %v5725_v5 = vpop.permute.xlu0 %2152 }
 0x26b   : > { %7516 = vst [vmem:[#allocation39_spill] sm:$0xff] %v5725_v5  ;;  %v769_v16 = vadd.f32 %v768_v37, %v5700_v26 }
 0x26c   : > { %2455 = vrot.lane.b32.xlu1 %v5605_v25, %s3639_s10  ;;  %2503 = vrot.lane.b32.xlu0 %v5714_v41, %s3629_s23 }
 0x26d   : > { %v5757_v2 = vmax.f32 %v769_v16, 0.0 }
 0x26e   : > { %v5732_v9 = vpop.permute.xlu1 %2155  ;;  %v5734_v42 = vpop.permute.xlu0 %2158 }
 0x26f   : > { %7518 = vst [vmem:[#allocation64_spill] sm:$0xff] %v5732_v9  ;;  %7519 = vst [vmem:[#allocation63_spill] sm:$0xff] %v5734_v42 }
 0x270   : > { %2506 = vrot.lane.b32.xlu1 %v5714_v41, %s3628_s21  ;;  %2509 = vrot.lane.b32.xlu0 %v5714_v41, %s3631_s27  ;;  %7524 = vst [vmem:[#allocation180_spill] sm:$0xff] %v5757_v2 }
 0x272   : > { %v5740_v38 = vpop.permute.xlu1 %2161  ;;  %v5742_v48 = vpop.permute.xlu0 %2164 }
 0x273   : > { %7520 = vst [vmem:[#allocation176_spill] sm:$0xff] %v5740_v38  ;;  %7521 = vst [vmem:[#allocation177_spill] sm:$0xff] %v5742_v48  ;;  %v7565_v38 = vld [vmem:[#allocation52_spill] sm:$0xff] }
 0x274   : > { %2512 = vrot.lane.b32.xlu1 %v5714_v41, %s3630_s25  ;;  %2515 = vrot.lane.b32.xlu0 %v5714_v41, %s3633_s29 }
 0x276   : > { %v5749_v54 = vpop.permute.xlu1 %2167  ;;  %v5751_v43 = vpop.permute.xlu0 %2184 }
 0x277   : > { %7522 = vst [vmem:[#allocation178_spill] sm:$0xff] %v5749_v54  ;;  %7523 = vst [vmem:[#allocation179_spill] sm:$0xff] %v5751_v43  ;;  %v7537_v43 = vld [vmem:[#allocation45_spill] sm:$0xff] }
 0x278   : > { %2518 = vrot.lane.b32.xlu1 %v5714_v41, %s3632_s28  ;;  %2521 = vrot.lane.b32.xlu0 %v5714_v41, %s3635_s6 }
 0x27a   : > { %v5759_v59 = vpop.permute.xlu1 %2187  ;;  %v5761_v44 = vpop.permute.xlu0 %2190 }
 0x27b   : > { %7525 = vst [vmem:[#allocation181_spill] sm:$0xff] %v5759_v59  ;;  %7526 = vst [vmem:[#allocation182_spill] sm:$0xff] %v5761_v44 }
 0x27c   : > { %2539 = vrot.lane.b32.xlu1 %v5757_v2, %s3629_s23  ;;  %2542 = vrot.lane.b32.xlu0 %v5757_v2, %s3628_s21 }
 0x27e   : > { %v5767_v55 = vpop.permute.xlu1 %2193  ;;  %v5769_v37 = vpop.permute.xlu0 %2196 }
 0x27f   : > { %7527 = vst [vmem:[#allocation183_spill] sm:$0xff] %v5767_v55  ;;  %7528 = vst [vmem:[#allocation184_spill] sm:$0xff] %v5769_v37 }
 0x280   : > { %2545 = vrot.lane.b32.xlu1 %v5757_v2, %s3631_s27  ;;  %2548 = vrot.lane.b32.xlu0 %v5757_v2, %s3630_s25 }
 0x282   : > { %v5775_v16 = vpop.permute.xlu1 %2199  ;;  %v5777_v25 = vpop.permute.xlu0 %2202 }
 0x283   : > { %7529 = vst [vmem:[#allocation185_spill] sm:$0xff] %v5775_v16  ;;  %7530 = vst [vmem:[#allocation186_spill] sm:$0xff] %v5777_v25 }
 0x284   : > { %2551 = vrot.lane.b32.xlu1 %v5757_v2, %s3633_s29  ;;  %2554 = vrot.lane.b32.xlu0 %v5757_v2, %s3632_s28 }
 0x286   : > { %v5783_v44 = vpop.permute.xlu1 %2205  ;;  %v5785_v55 = vpop.permute.xlu0 %2253 }
 0x287   : > { %7531 = vst [vmem:[#allocation187_spill] sm:$0xff] %v5783_v44  ;;  %7532 = vst [vmem:[#allocation188_spill] sm:$0xff] %v5785_v55  ;;  %v5914_v55 = vstv %s3426_s24 }
 0x288   : > { %2557 = vrot.lane.b32.xlu1 %v5757_v2, %s3635_s6  ;;  %2574 = vrot.lane.b32.xlu0 %v5714_v41, %s3627_s17  ;;  %v954_v2 = vadd.f32 %v7537_v43, %v5700_v26  ;;  %v538_v42 = vadd.f32 %v5914_v55, %v7565_v38  ;;  %v7568_v38 = vld [vmem:[#allocation44_spill] sm:$0xff] }
 0x28a   : > { %v5791_v37 = vpop.permute.xlu1 %2256  ;;  %v5793_v16 = vpop.permute.xlu0 %2259  ;;  %v5813_v54 = vmax.f32 %v954_v2, 0.0 }
 0x28b   : > { %7533 = vst [vmem:[#allocation189_spill] sm:$0xff] %v5791_v37  ;;  %7534 = vst [vmem:[#allocation190_spill] sm:$0xff] %v5793_v16 }
 0x28c   : > { %2577 = vrot.lane.b32.xlu1 %v5714_v41, %s3634_s30  ;;  %2580 = vrot.lane.b32.xlu0 %v5714_v41, %s3638_s9  ;;  %7540 = vst [vmem:[#allocation194_spill] sm:$0xff] %v5813_v54 }
 0x28e   : > { %v5799_v25 = vpop.permute.xlu1 %2262  ;;  %v5801_v44 = vpop.permute.xlu0 %2265 }
 0x28f   : > { %7535 = vst [vmem:[#allocation191_spill] sm:$0xff] %v5799_v25  ;;  %7536 = vst [vmem:[#allocation192_spill] sm:$0xff] %v5801_v44 }
 0x290   : > { %2583 = vrot.lane.b32.xlu1 %v5714_v41, %s3636_s7  ;;  %2586 = vrot.lane.b32.xlu0 %v5714_v41, %s3640_s11 }
 0x292   : > { %v5809_v59 = vpop.permute.xlu1 %2268  ;;  %v5811_v16 = vpop.permute.xlu0 %2271 }
 0x293   : > { %7538 = vst [vmem:[#allocation45_spill] sm:$0xff] %v5809_v59  ;;  %7539 = vst [vmem:[#allocation193_spill] sm:$0xff] %v5811_v16 }
 0x294   : > { %2589 = vrot.lane.b32.xlu1 %v5714_v41, %s3637_s8  ;;  %2592 = vrot.lane.b32.xlu0 %v5714_v41, %s3641_s12 }
 0x296   : > { %v5819_v44 = vpop.permute.xlu1 %2289  ;;  %v5821_v43 = vpop.permute.xlu0 %2292 }
 0x297   : > { %7541 = vst [vmem:[#allocation195_spill] sm:$0xff] %v5819_v44  ;;  %7542 = vst [vmem:[#allocation196_spill] sm:$0xff] %v5821_v43 }
 0x298   : > { %2595 = vrot.lane.b32.xlu1 %v5714_v41, %s3639_s10  ;;  %2613 = vrot.lane.b32.xlu0 %v5813_v54, %s3629_s23 }
 0x29a   : > { %v5827_v59 = vpop.permute.xlu1 %2295  ;;  %v5829_v2 = vpop.permute.xlu0 %2298 }
 0x29b   : > { %7543 = vst [vmem:[#allocation197_spill] sm:$0xff] %v5827_v59  ;;  %7544 = vst [vmem:[#allocation198_spill] sm:$0xff] %v5829_v2  ;;  %v1181_v59 = vadd.f32 %v4886_v30, %v5700_v26 }
 0x29c   : > { %2616 = vrot.lane.b32.xlu1 %v5813_v54, %s3628_s21  ;;  %2619 = vrot.lane.b32.xlu0 %v5813_v54, %s3631_s27 }
 0x29e   : > { %v5835_v16 = vpop.permute.xlu1 %2301  ;;  %v5837_v44 = vpop.permute.xlu0 %2304 }
 0x29f   : > { %7545 = vst [vmem:[#allocation199_spill] sm:$0xff] %v5835_v16  ;;  %7546 = vst [vmem:[#allocation200_spill] sm:$0xff] %v5837_v44  ;;  %v5853_v44 = vmax.f32 %v1181_v59, 0.0 }
 0x2a0   : > { %2622 = vrot.lane.b32.xlu1 %v5813_v54, %s3630_s25  ;;  %2625 = vrot.lane.b32.xlu0 %v5813_v54, %s3633_s29 }
 0x2a1   : > { %7549 = vst [vmem:[#allocation203_spill] sm:$0xff] %v5853_v44 }
 0x2a2   : > { %v5845_v2 = vpop.permute.xlu1 %2307  ;;  %v5847_v43 = vpop.permute.xlu0 %2324 }
 0x2a3   : > { %7547 = vst [vmem:[#allocation201_spill] sm:$0xff] %v5845_v2  ;;  %7548 = vst [vmem:[#allocation202_spill] sm:$0xff] %v5847_v43  ;;  %v7561_v43 = vld [vmem:[#allocation14_spill] sm:$0xff] }
 0x2a4   : > { %2628 = vrot.lane.b32.xlu1 %v5813_v54, %s3632_s28  ;;  %2631 = vrot.lane.b32.xlu0 %v5813_v54, %s3635_s6 }
 0x2a6   : > { %v5855_v16 = vpop.permute.xlu1 %2327  ;;  %v5857_v41 = vpop.permute.xlu0 %2330 }
 0x2a7   : > { %7550 = vst [vmem:[#allocation204_spill] sm:$0xff] %v5855_v16  ;;  %7551 = vst [vmem:[#allocation205_spill] sm:$0xff] %v5857_v41 }
 0x2a8   : > { %2649 = vrot.lane.b32.xlu1 %v5853_v44, %s3629_s23  ;;  %2652 = vrot.lane.b32.xlu0 %v5853_v44, %s3628_s21 }
 0x2aa   : > { %v5863_v30 = vpop.permute.xlu1 %2333  ;;  %v5865_v26 = vpop.permute.xlu0 %2336 }
 0x2ab   : > { %7552 = vst [vmem:[#allocation206_spill] sm:$0xff] %v5863_v30  ;;  %7553 = vst [vmem:[#allocation207_spill] sm:$0xff] %v5865_v26 }
 0x2ac   : > { %2655 = vrot.lane.b32.xlu1 %v5853_v44, %s3631_s27  ;;  %2658 = vrot.lane.b32.xlu0 %v5853_v44, %s3630_s25 }
 0x2ae   : > { %v5871_v59 = vpop.permute.xlu1 %2339  ;;  %v5873_v2 = vpop.permute.xlu0 %2342 }
 0x2af   : > { %7554 = vst [vmem:[#allocation208_spill] sm:$0xff] %v5871_v59  ;;  %7555 = vst [vmem:[#allocation209_spill] sm:$0xff] %v5873_v2  ;;  %v5888_v59 = vld [vmem:[%s3725_s15 + $0x10] sm:$0xf] }
 0x2b0   : > { %2661 = vrot.lane.b32.xlu1 %v5853_v44, %s3633_s29  ;;  %2664 = vrot.lane.b32.xlu0 %v5853_v44, %s3632_s28  ;;  %v771_v2 = vmul.f32 %v5888_v59, %v4495_v1  ;;  %v781_v1 = vmul.f32 %v5477_v8, %v4504_v45  ;;  %v789_v45 = vmul.f32 %v5495_v0, %v7339_v47 }
 0x2b2   : > { %v5879_v30 = vpop.permute.xlu1 %2345  ;;  %v5881_v26 = vpop.permute.xlu0 %2363 }
 0x2b3   : > { %7556 = vst [vmem:[#allocation210_spill] sm:$0xff] %v5879_v30  ;;  %7557 = vst [vmem:[#allocation211_spill] sm:$0xff] %v5881_v26  ;;  %v7560_v26 = vld [vmem:[#allocation42_spill] sm:$0xff] }
 0x2b4   : > { %2667 = vrot.lane.b32.xlu1 %v5853_v44, %s3635_s6  ;;  %2684 = vrot.lane.b32.xlu0 %v5813_v54, %s3627_s17  ;;  %v772_v30 = vmul.f32 %v5470_v53, %v7560_v26  ;;  %v5903_v44 = vld [vmem:[%s3725_s15 + $0x30] sm:$0xf]  ;;  %s6008_s15 = sld [smem:[#allocation4 + $0x7]] }
 0x2b5   : > { %v779_v16 = vmul.f32 %v5903_v44, %v7561_v43 }
 0x2b6   : > { %v5892_v41 = vpop.permute.xlu1 %2366  ;;  %v5894_v25 = vpop.permute.xlu0 %2369 }
 0x2b7   : > { %7558 = vst [vmem:[#allocation212_spill] sm:$0xff] %v5892_v41  ;;  %7559 = vst [vmem:[#allocation213_spill] sm:$0xff] %v5894_v25  ;;  %v7562_v41 = vld [vmem:[#allocation66_spill] sm:$0xff]  ;;  %v780_v43 = vadd.f32 %v779_v16, %v772_v30  ;;  %v7569_v16 = vld [vmem:[#allocation65_spill] sm:$0xff] }
 0x2b8   : > { %2687 = vrot.lane.b32.xlu1 %v5813_v54, %s3634_s30  ;;  %2690 = vrot.lane.b32.xlu0 %v5813_v54, %s3638_s9  ;;  %v778_v37 = vadd.f32 %v7562_v41, %v771_v2 }
 0x2ba   : > { %v5910_v25 = vpop.permute.xlu1 %2372  ;;  %v5912_v48 = vpop.permute.xlu0 %2375  ;;  %v782_v26 = vadd.f32 %v781_v1, %v778_v37  ;;  %v788_v37 = vadd.f32 %v7569_v16, %v780_v43 }
 0x2bb   : > { %7563 = vst [vmem:[#allocation42_spill] sm:$0xff] %v5910_v25  ;;  %7564 = vst [vmem:[#allocation14_spill] sm:$0xff] %v5912_v48  ;;  %v5928_v48 = vmax.f32 %v538_v42, 0.0  ;;  %v791_v25 = vmul.f32 %v5510_v57, %v7568_v38 }
 0x2bc   : > { %2693 = vrot.lane.b32.xlu1 %v5813_v54, %s3636_s7  ;;  %2696 = vrot.lane.b32.xlu0 %v5813_v54, %s3640_s11  ;;  %v790_v30 = vadd.f32 %v789_v45, %v782_v26 }
 0x2bd   : > { %v792_v42 = vadd.f32 %v791_v25, %v788_v37 }
 0x2be   : > { %v5924_v41 = vpop.permute.xlu1 %2378  ;;  %v5926_v2 = vpop.permute.xlu0 %2381 }
 0x2bf   : > { %7566 = vst [vmem:[#allocation66_spill] sm:$0xff] %v5924_v41  ;;  %7567 = vst [vmem:[#allocation52_spill] sm:$0xff] %v5926_v2  ;;  %v7570_v2 = vld [vmem:[#allocation68_spill] sm:$0xff] }
 0x2c0   : > { %2699 = vrot.lane.b32.xlu1 %v5813_v54, %s3637_s8  ;;  %2702 = vrot.lane.b32.xlu0 %v5813_v54, %s3641_s12  ;;  %v798_v41 = vadd.f32 %v7570_v2, %v790_v30  ;;  %v7573_v30 = vld [vmem:[#allocation43_spill] sm:$0xff] }
 0x2c2   : > { %v5937_v1 = vpop.permute.xlu1 %2399  ;;  %v5939_v47 = vpop.permute.xlu0 %2402  ;;  %v799_v43 = vadd.f32 %v798_v41, %v792_v42  ;;  %v1268_v42 = vsel %vm1267_vm0, %v7573_v30, %v4918_v12 }
 0x2c4   : > { %2705 = vrot.lane.b32.xlu1 %v5813_v54, %s3639_s10  ;;  %2753 = vrot.lane.b32.xlu0 %v5928_v48, %s3629_s23  ;;  %v800_v25 = vadd.f32 %v799_v43, %v5914_v55  ;;  %v1348_v43 = vsel %vm1267_vm0, %v4953_v52, %v4951_v19  ;;  %v1384_v19 = vsel %vm1267_vm0, %v4681_v49, %v5029_v3 }
 0x2c5   : > { %v1349_v12 = vsel %vm1269_vm1, %v1348_v43, %v4961_v17  ;;  %v1385_v49 = vsel %vm1269_vm1, %v1384_v19, %v5039_v50  ;;  %v7581_v50 = vld [vmem:[#allocation49_spill] sm:$0xff] }
 0x2c6   : > { %v5946_v9 = vpop.permute.xlu1 %2405  ;;  %v5948_v5 = vpop.permute.xlu0 %2408  ;;  %v5971_v41 = vmax.f32 %v800_v25, 0.0  ;;  %v810_v19 = vmul.f32 %v5903_v44, %v7581_v50 }
 0x2c8   : > { %2756 = vrot.lane.b32.xlu1 %v5928_v48, %s3628_s21  ;;  %2759 = vrot.lane.b32.xlu0 %v5928_v48, %s3631_s27  ;;  %7571 = vst [vmem:[#allocation44_spill] sm:$0xff] %v5971_v41 }
 0x2ca   : > { %v5954_v26 = vpop.permute.xlu1 %2411  ;;  %v5956_v45 = vpop.permute.xlu0 %2414 }
 0x2cc   : > { %2762 = vrot.lane.b32.xlu1 %v5928_v48, %s3630_s25  ;;  %2765 = vrot.lane.b32.xlu0 %v5928_v48, %s3633_s29 }
 0x2ce   : > { %v5963_v2 = vpop.permute.xlu1 %2417  ;;  %v5965_v38 = vpop.permute.xlu0 %2434 }
 0x2d0   : > { %2768 = vrot.lane.b32.xlu1 %v5928_v48, %s3632_s28  ;;  %2771 = vrot.lane.b32.xlu0 %v5928_v48, %s3635_s6 }
 0x2d2   : > { %v5973_v16 = vpop.permute.xlu1 %2437  ;;  %v5975_v37 = vpop.permute.xlu0 %2440 }
 0x2d3   : > { %7572 = vst [vmem:[#allocation65_spill] sm:$0xff] %v5975_v37  ;;  %v1270_v37 = vsel %vm1269_vm1, %v1268_v42, %v4916_v27  ;;  %v1350_v42 = vsel %vm1271_vm2, %v1349_v12, %v4959_v61 }
 0x2d4   : > { %2789 = vrot.lane.b32.xlu1 %v5971_v41, %s3629_s23  ;;  %2792 = vrot.lane.b32.xlu0 %v5971_v41, %s3628_s21  ;;  %v1272_v27 = vsel %vm1271_vm2, %v1270_v37, %v4926_v6  ;;  %v7578_v6 = vld [vmem:[#allocation55_spill] sm:$0xff]  ;;  %v7579_v37 = vld [vmem:[#allocation16_spill] sm:$0xff] }
 0x2d5   : > { %v1274_v17 = vsel %vm1273_vm3, %v1272_v27, %v4929_v15  ;;  %v1310_v3 = vsel %vm1267_vm0, %v7578_v6, %v4995_v40  ;;  %v1420_v61 = vsel %vm1267_vm0, %v7579_v37, %v5087_v23  ;;  %v1351_v15 = vsel %vm1273_vm3, %v1350_v42, %v4973_v58  ;;  %v7582_v27 = vld [vmem:[#allocation8_spill] sm:$0xff] }
 0x2d6   : > { %v5987_v25 = vpop.permute.xlu1 %2443  ;;  %v5989_v54 = vpop.permute.xlu0 %2446  ;;  %v802_v40 = vmul.f32 %v5888_v59, %v7582_v27  ;;  %v1386_v6 = vsel %vm1271_vm2, %v1385_v49, %v5041_v35  ;;  %v1311_v58 = vsel %vm1269_vm1, %v1310_v3, %v4997_v32  ;;  %v1421_v23 = vsel %vm1269_vm1, %v1420_v61, %v5089_v28  ;;  %v7583_v32 = vld [vmem:[#allocation46_spill] sm:$0xff] }
 0x2d7   : > { %7574 = vst [vmem:[#allocation68_spill] sm:$0xff] %v5987_v25  ;;  %7575 = vst [vmem:[#allocation43_spill] sm:$0xff] %v5989_v54  ;;  %v1352_v35 = vsel %vm1275_vm4, %v1351_v15, %v4971_v34  ;;  %v1422_v44 = vsel %vm1271_vm2, %v1421_v23, %v5096_v24  ;;  %v812_v28 = vmul.f32 %v5477_v8, %v7583_v32  ;;  %v7586_v24 = vld [vmem:[#allocation67_spill] sm:$0xff]  ;;  %v6073_v61 = vstv %s6008_s15  ;;  %v7588_v8 = vld [vmem:[#allocation30_spill] sm:$0xff] }
 0x2d8   : > { %2795 = vrot.lane.b32.xlu1 %v5971_v41, %s3631_s27  ;;  %2798 = vrot.lane.b32.xlu0 %v5971_v41, %s3630_s25  ;;  %v809_v37 = vadd.f32 %v7586_v24, %v802_v40  ;;  %v7590_v15 = vld [vmem:[#allocation72_spill] sm:$0xff]  ;;  %v7591_v40 = vld [vmem:[#allocation26_spill] sm:$0xff]  ;;  %v7593_v23 = vld [vmem:[#allocation73_spill] sm:$0xff] }
 0x2da   : > { %v6002_v52 = vpop.permute.xlu1 %2449  ;;  %v6004_v30 = vpop.permute.xlu0 %2452 }
 0x2db   : > { %7576 = vst [vmem:[#allocation214_spill] sm:$0xff] %v6002_v52  ;;  %7577 = vst [vmem:[#allocation215_spill] sm:$0xff] %v6004_v30  ;;  %v803_v30 = vmul.f32 %v5470_v53, %v7341_v31  ;;  %v1276_v31 = vsel %vm1275_vm4, %v1274_v17, %v4935_v51  ;;  %v1312_v53 = vsel %vm1271_vm2, %v1311_v58, %v5003_v22  ;;  %v7584_v17 = vld [vmem:[#allocation50_spill] sm:$0xff]  ;;  %v7585_v22 = vld [vmem:[#allocation11_spill] sm:$0xff] }
 0x2dc   : > { %2801 = vrot.lane.b32.xlu1 %v5971_v41, %s3633_s29  ;;  %2804 = vrot.lane.b32.xlu0 %v5971_v41, %s3632_s28  ;;  %v1458_v51 = vsel %vm1267_vm0, %v5115_v63, %v5123_v11  ;;  %v6067_v34 = vmul.f32 %v5510_v57, %v7584_v17  ;;  %v1387_v3 = vsel %vm1273_vm3, %v1386_v6, %v7585_v22  ;;  %v7587_v63 = vld [vmem:[#allocation22_spill] sm:$0xff]  ;;  %v7612_v52 = vld [vmem:[#allocation12_spill] sm:$0xff] }
 0x2dd   : > { %v811_v49 = vadd.f32 %v810_v19, %v803_v30  ;;  %v1278_v11 = vsel %vm1277_vm5, %v1276_v31, %v7587_v63  ;;  %v1353_v57 = vsel %vm1277_vm5, %v1352_v35, %v7588_v8  ;;  %v7589_v30 = vld [vmem:[#allocation31_spill] sm:$0xff]  ;;  %v1423_v19 = vsel %vm1273_vm3, %v1422_v44, %v5098_v10  ;;  %v7592_v31 = vld [vmem:[#allocation34_spill] sm:$0xff]  ;;  %v7595_v35 = vld [vmem:[#allocation20_spill] sm:$0xff] }
 0x2de   : > { %v6026_v43 = vpop.permute.xlu1 %2455  ;;  %v6028_v12 = vpop.permute.xlu0 %2503  ;;  %v1313_v50 = vsel %vm1273_vm3, %v1312_v53, %v7589_v30  ;;  %v1459_v27 = vsel %vm1269_vm1, %v1458_v51, %v7590_v15  ;;  %v1388_v6 = vsel %vm1275_vm4, %v1387_v3, %v7591_v40  ;;  %v1424_v58 = vsel %vm1275_vm4, %v1423_v19, %v7592_v31  ;;  %v7594_v17 = vld [vmem:[#allocation78_spill] sm:$0xff]  ;;  %v7596_v10 = vld [vmem:[#allocation51_spill] sm:$0xff]  ;;  %v7597_v51 = vld [vmem:[#allocation53_spill] sm:$0xff] }
 0x2df   : > { %7580 = vst [vmem:[#allocation55_spill] sm:$0xff] %v6026_v43  ;;  %v1460_v32 = vsel %vm1271_vm2, %v1459_v27, %v7593_v23  ;;  %v1524_v22 = vsel %vm1267_vm0, %v7595_v35, %v7594_v17  ;;  %v973_v44 = vadd.f32 %v7596_v10, %v5914_v55  ;;  %v820_v3 = vmul.f32 %v5495_v0, %v7597_v51  ;;  %v7598_v63 = vld [vmem:[#allocation9_spill] sm:$0xff]  ;;  %v3447_v30 = vld [vmem:[%s7145_s3] ss:$0 sm:$0xff]  ;;  %v7599_v19 = vld [vmem:[#allocation47_spill] sm:$0xff] }
 0x2e0   : > { %2807 = vrot.lane.b32.xlu1 %v5971_v41, %s3635_s6  ;;  %2824 = vrot.lane.b32.xlu0 %v5928_v48, %s3627_s17  ;;  %v6108_v8 = vadd.f32 %v6073_v61, %v7598_v63  ;;  %v1314_v15 = vsel %vm1275_vm4, %v1313_v50, %v7599_v19  ;;  %v813_v27 = vadd.f32 %v812_v28, %v809_v37  ;;  %v3453_v40 = vld [vmem:[%s7145_s3 + $0x6] ss:$0 sm:$0xff]  ;;  %v7600_v31 = vld [vmem:[#allocation27_spill] sm:$0xff]  ;;  %v3449_v0 = vld [vmem:[%s7145_s3 + $0x2] ss:$0 sm:$0xff] }
 0x2e1   : > { %v1280_v23 = vsel %vm1279_vm6, %v1278_v11, %v7600_v31  ;;  %v7601_v17 = vld [vmem:[#allocation29_spill] sm:$0xff]  ;;  %v7602_v28 = vld [vmem:[#allocation23_spill] sm:$0xff]  ;;  %v7604_v11 = vld [vmem:[#allocation74_spill] sm:$0xff]  ;;  %v6155_v25 = vmax.f32 %v973_v44, 0.0 }
 0x2e2   : > { %v6059_v59 = vpop.permute.xlu1 %2506  ;;  %v6061_v42 = vpop.permute.xlu0 %2509  ;;  %v1354_v35 = vsel %vm1279_vm6, %v1353_v57, %v7601_v17  ;;  %v1389_v37 = vsel %vm1277_vm5, %v1388_v6, %v7602_v28  ;;  %v7603_v50 = vld [vmem:[#allocation13_spill] sm:$0xff]  ;;  %v1461_v51 = vsel %vm1273_vm3, %v1460_v32, %v7604_v11  ;;  %v7605_v63 = vld [vmem:[#allocation79_spill] sm:$0xff]  ;;  %v7606_v31 = vld [vmem:[#allocation48_spill] sm:$0xff] }
 0x2e3   : > { %v1425_v10 = vsel %vm1277_vm5, %v1424_v58, %v7603_v50  ;;  %v1525_v19 = vsel %vm1269_vm1, %v1524_v22, %v7605_v63  ;;  %v1315_v57 = vsel %vm1277_vm5, %v1314_v15, %v7606_v31  ;;  %v3451_v17 = vld [vmem:[%s7145_s3 + $0x4] ss:$0 sm:$0xff]  ;;  %v7607_v41 = vld [vmem:[#allocation57_spill] sm:$0xff]  ;;  %v7608_v6 = vld [vmem:[#allocation75_spill] sm:$0xff]  ;;  %v1286_v63 = vmul.f32 %v3447_v30, %v1280_v23 }
 0x2e4   : > { %2827 = vrot.lane.b32.xlu1 %v5928_v48, %s3634_s30  ;;  %2830 = vrot.lane.b32.xlu0 %v5928_v48, %s3638_s9  ;;  %v1426_v43 = vsel %vm1279_vm6, %v1425_v10, %v7607_v41  ;;  %v1462_v28 = vsel %vm1275_vm4, %v1461_v51, %v7608_v6  ;;  %v7609_v58 = vld [vmem:[#allocation94_spill] sm:$0xff]  ;;  %v7610_v50 = vld [vmem:[#allocation92_spill] sm:$0xff]  ;;  %v1477_v15 = vmul.f32 %v3453_v40, %v1280_v23 }
 0x2e5   : > { %v1598_v32 = vsel %vm1267_vm0, %v7610_v50, %v7609_v58  ;;  %v1360_v31 = vmul.f32 %v3449_v0, %v1354_v35  ;;  %v1316_v54 = vsel %vm1279_vm6, %v1315_v57, %v7612_v52  ;;  %v3450_v41 = vld [vmem:[%s7145_s3 + $0x3] ss:$0 sm:$0xff]  ;;  %v7615_v50 = vld [vmem:[#allocation25_spill] sm:$0xff]  ;;  %v3448_v52 = vld [vmem:[%s7145_s3 + $0x1] ss:$0 sm:$0xff]  ;;  %v1432_v44 = vmul.f32 %v3451_v17, %v1426_v43 }
 0x2e6   : > { %v6098_v53 = vpop.permute.xlu1 %2512  ;;  %v6100_v24 = vpop.permute.xlu0 %2515  ;;  %v7613_v10 = vld [vmem:[#allocation24_spill] sm:$0xff]  ;;  %v1670_v30 = vsel %vm1267_vm0, %v7615_v50, %v5295_v4  ;;  %v7617_v0 = vld [vmem:[#allocation81_spill] sm:$0xff]  ;;  %v7619_v57 = vld [vmem:[#allocation70_spill] sm:$0xff] }
 0x2e7   : > { %v1390_v51 = vsel %vm1279_vm6, %v1389_v37, %v7613_v10  ;;  %v7614_v6 = vld [vmem:[#allocation80_spill] sm:$0xff]  ;;  %v6181_v10 = vadd.f32 %v7619_v57, %v811_v49  ;;  %v3455_v49 = vld [vmem:[%s7145_s3 + $0x8] ss:$0 sm:$0xff]  ;;  %v1322_v57 = vmul.f32 %v3448_v52, %v1316_v54 }
 0x2e8   : > { %2833 = vrot.lane.b32.xlu1 %v5928_v48, %s3636_s7  ;;  %2836 = vrot.lane.b32.xlu0 %v5928_v48, %s3640_s11  ;;  %v1526_v58 = vsel %vm1271_vm2, %v1525_v19, %v7614_v6  ;;  %v7616_v40 = vld [vmem:[#allocation76_spill] sm:$0xff]  ;;  %v7618_v19 = vld [vmem:[#allocation95_spill] sm:$0xff]  ;;  %v821_v6 = vadd.f32 %v820_v3, %v813_v27  ;;  %v1396_v27 = vmul.f32 %v3450_v41, %v1390_v51 }
 0x2e9   : > { %v1463_v23 = vsel %vm1277_vm5, %v1462_v28, %v7616_v40  ;;  %v1527_v37 = vsel %vm1273_vm3, %v1526_v58, %v7617_v0  ;;  %v1599_v4 = vsel %vm1269_vm1, %v1598_v32, %v7618_v19  ;;  %v3452_v50 = vld [vmem:[%s7145_s3 + $0x5] ss:$0 sm:$0xff]  ;;  %v3454_v3 = vld [vmem:[%s7145_s3 + $0x7] ss:$0 sm:$0xff]  ;;  %v1361_v32 = vadd.f32 %v1360_v31, %v1286_v63  ;;  %v7624_v0 = vld [vmem:[#allocation85_spill] sm:$0xff] }
 0x2ea   : > { %v6149_v11 = vpop.permute.xlu1 %2518  ;;  %v6151_v22 = vpop.permute.xlu0 %2521  ;;  %v7621_v17 = vld [vmem:[#allocation96_spill] sm:$0xff]  ;;  %v7625_v19 = vld [vmem:[#allocation19_spill] sm:$0xff]  ;;  %v1487_v52 = vmul.f32 %v3454_v3, %v1316_v54  ;;  %v3456_v3 = vld [vmem:[%s7145_s3 + $0x9] ss:$0 sm:$0xff] }
 0x2eb   : > { %7611 = vst [vmem:[#allocation16_spill] sm:$0xff] %v6151_v22  ;;  %v7620_v22 = vld [vmem:[#allocation77_spill] sm:$0xff]  ;;  %v1600_v28 = vsel %vm1271_vm2, %v1599_v4, %v7621_v17  ;;  %v1479_v4 = vrot.slane %v1477_v15, 1  ;;  %v7626_v17 = vld [vmem:[#allocation82_spill] sm:$0xff]  ;;  %v1433_v63 = vadd.f32 %v1432_v44, %v1361_v32  ;;  %v7627_v41 = vld [vmem:[#allocation35_spill] sm:$0xff]  ;;  %v1397_v44 = vadd.f32 %v1396_v27, %v1322_v57 }
 0x2ec   : > { %2839 = vrot.lane.b32.xlu1 %v5928_v48, %s3637_s8  ;;  %2842 = vrot.lane.b32.xlu0 %v5928_v48, %s3641_s12  ;;  %v1464_v43 = vsel %vm1279_vm6, %v1463_v23, %v7620_v22  ;;  %v1560_v22 = vsel %vm1267_vm0, %v7625_v19, %v7624_v0  ;;  %v1671_v23 = vsel %vm1269_vm1, %v1670_v30, %v5297_v46  ;;  %v7628_v46 = vld [vmem:[#allocation97_spill] sm:$0xff]  ;;  %v7634_v32 = vld [vmem:[#allocation28_spill] sm:$0xff] }
 0x2ed   : > { %v1470_v31 = vmul.f32 %v3452_v50, %v1464_v43  ;;  %v1601_v15 = vsel %vm1273_vm3, %v1600_v28, %v7628_v46  ;;  %v1497_v30 = vmul.f32 %v3455_v49, %v1354_v35  ;;  %v7632_v50 = vld [vmem:[#allocation87_spill] sm:$0xff]  ;;  %v7635_v35 = vld [vmem:[#allocation69_spill] sm:$0xff]  ;;  %v7638_v46 = vld [vmem:[#allocation54_spill] sm:$0xff] }
 0x2ee   : > { %v6190_v40 = vpop.permute.xlu1 %2539  ;;  %v6192_v58 = vpop.permute.xlu0 %2542  ;;  %v6233_v49 = vadd.f32 %v7635_v35, %v821_v6  ;;  %v7637_v6 = vld [vmem:[#allocation99_spill] sm:$0xff] }
 0x2ef   : > { %7622 = vst [vmem:[#allocation49_spill] sm:$0xff] %v6190_v40  ;;  %7623 = vst [vmem:[#allocation8_spill] sm:$0xff] %v6192_v58  ;;  %v1528_v58 = vsel %vm1275_vm4, %v1527_v37, %v7626_v17  ;;  %v1672_v40 = vsel %vm1271_vm2, %v1671_v23, %v5304_v21  ;;  %v7629_v37 = vld [vmem:[#allocation86_spill] sm:$0xff] }
 0x2f0   : > { %2845 = vrot.lane.b32.xlu1 %v5928_v48, %s3639_s10  ;;  %2863 = vrot.lane.b32.xlu0 %v6155_v25, %s3629_s23  ;;  %v1529_v51 = vsel %vm1277_vm5, %v1528_v58, %v7627_v41  ;;  %v1561_v0 = vsel %vm1269_vm1, %v1560_v22, %v7629_v37  ;;  %v7630_v21 = vld [vmem:[#allocation98_spill] sm:$0xff]  ;;  %v7633_v58 = vld [vmem:[#allocation101_spill] sm:$0xff]  ;;  %v1673_v54 = vsel %vm1273_vm3, %v1672_v40, %v5306_v62  ;;  %v7636_v22 = vld [vmem:[#allocation83_spill] sm:$0xff]  ;;  %v1499_v37 = vrot.slane %v1497_v30, 1 }
 0x2f1   : > { %v1602_v19 = vsel %vm1275_vm4, %v1601_v15, %v7630_v21  ;;  %v1562_v43 = vsel %vm1271_vm2, %v1561_v0, %v7632_v50  ;;  %v1634_v28 = vsel %vm1267_vm0, %v7634_v32, %v7633_v58  ;;  %v1530_v27 = vsel %vm1279_vm6, %v1529_v51, %v7636_v22  ;;  %v7639_v51 = vld [vmem:[#allocation88_spill] sm:$0xff]  ;;  %v7644_v30 = vld [vmem:[#allocation89_spill] sm:$0xff] }
 0x2f2   : > { %v6221_v23 = vpop.permute.xlu1 %2545  ;;  %v6223_v17 = vpop.permute.xlu0 %2548  ;;  %v1674_v57 = vsel %vm1275_vm4, %v1673_v54, %v5312_v60  ;;  %v1481_v62 = vadd.f32 %v1479_v4, %v1433_v63  ;;  %v1471_v40 = vadd.f32 %v1470_v31, %v1397_v44  ;;  %v1603_v41 = vsel %vm1277_vm5, %v1602_v19, %v7637_v6  ;;  %v3458_v60 = vld [vmem:[%s7145_s3 + $0xb] ss:$0 sm:$0xff]  ;;  %v7640_v21 = vld [vmem:[#allocation100_spill] sm:$0xff]  ;;  %v7641_v4 = vld [vmem:[#allocation102_spill] sm:$0xff] }
 0x2f3   : > { %7631 = vst [vmem:[#allocation46_spill] sm:$0xff] %v6223_v17  ;;  %v1774_v15 = vsel %vm1267_vm0, %v7638_v46, %v5357_v18  ;;  %v1563_v0 = vsel %vm1273_vm3, %v1562_v43, %v7639_v51  ;;  %v1604_v50 = vsel %vm1279_vm6, %v1603_v41, %v7640_v21  ;;  %v1635_v63 = vsel %vm1269_vm1, %v1634_v28, %v7641_v4  ;;  %v7645_v43 = vld [vmem:[#allocation58_spill] sm:$0xff]  ;;  %v7646_v54 = vld [vmem:[#allocation21_spill] sm:$0xff]  ;;  %v7647_v28 = vld [vmem:[#allocation15_spill] sm:$0xff] }
 0x2f4   : > { %2866 = vrot.lane.b32.xlu1 %v6155_v25, %s3628_s21  ;;  %2869 = vrot.lane.b32.xlu0 %v6155_v25, %s3631_s27  ;;  %v1489_v44 = vrot.slane %v1487_v52, 1  ;;  %v1536_v18 = vmul.f32 %v3456_v3, %v1530_v27  ;;  %v1564_v58 = vsel %vm1275_vm4, %v1563_v0, %v7644_v30  ;;  %v1675_v32 = vsel %vm1277_vm5, %v1674_v57, %v7645_v43  ;;  %v3460_v22 = vld [vmem:[%s7145_s3 + $0xd] ss:$0 sm:$0xff]  ;;  %v7648_v41 = vld [vmem:[#allocation114_spill] sm:$0xff]  ;;  %v7649_v51 = vld [vmem:[#allocation103_spill] sm:$0xff] }
 0x2f5   : > { %v1212_v35 = vadd.f32 %v7646_v54, %v5914_v55  ;;  %v1676_v6 = vsel %vm1279_vm6, %v1675_v32, %v7647_v28  ;;  %v1775_v52 = vsel %vm1269_vm1, %v1774_v15, %v7648_v41  ;;  %v1501_v3 = vadd.f32 %v1499_v37, %v1481_v62  ;;  %v3462_v55 = vld [vmem:[%s7145_s3 + $0xf] ss:$0 sm:$0xff]  ;;  %v7650_v21 = vld [vmem:[#allocation90_spill] sm:$0xff]  ;;  %v7651_v15 = vld [vmem:[#allocation56_spill] sm:$0xff] }
 0x2f6   : > { %v6260_v31 = vpop.permute.xlu1 %2551  ;;  %v6262_v19 = vpop.permute.xlu0 %2554  ;;  %v1491_v57 = vadd.f32 %v1489_v44, %v1471_v40  ;;  %v1610_v46 = vmul.f32 %v3458_v60, %v1604_v50  ;;  %v1636_v0 = vsel %vm1271_vm2, %v1635_v63, %v7649_v51  ;;  %v1565_v4 = vsel %vm1277_vm5, %v1564_v58, %v7650_v21  ;;  %v7652_v43 = vld [vmem:[#allocation107_spill] sm:$0xff]  ;;  %v7653_v32 = vld [vmem:[#allocation105_spill] sm:$0xff]  ;;  %v7700_v17 = vld [vmem:[#allocation162_spill] sm:$0xff] }
 0x2f7   : > { %7642 = vst [vmem:[#allocation50_spill] sm:$0xff] %v6260_v31  ;;  %7643 = vst [vmem:[#allocation11_spill] sm:$0xff] %v6262_v19  ;;  %v1637_v30 = vsel %vm1273_vm3, %v1636_v0, %v7651_v15  ;;  %v1708_v54 = vsel %vm1267_vm0, %v7653_v32, %v7652_v43  ;;  %v7654_v62 = vld [vmem:[#allocation129_spill] sm:$0xff]  ;;  %v7655_v37 = vld [vmem:[#allocation127_spill] sm:$0xff]  ;;  %v1537_v60 = vadd.f32 %v1536_v18, %v1501_v3  ;;  %v6307_v15 = vmax.f32 %v1212_v35, 0.0 }
 0x2f8   : > { %2872 = vrot.lane.b32.xlu1 %v6155_v25, %s3630_s25  ;;  %2875 = vrot.lane.b32.xlu0 %v6155_v25, %s3633_s29  ;;  %v1848_v28 = vsel %vm1267_vm0, %v7655_v37, %v7654_v62  ;;  %v3457_v63 = vld [vmem:[%s7145_s3 + $0xa] ss:$0 sm:$0xff]  ;;  %v7657_v44 = vld [vmem:[#allocation91_spill] sm:$0xff]  ;;  %v1682_v51 = vmul.f32 %v3460_v22, %v1676_v6  ;;  %v1727_v43 = vmul.f32 %v3462_v55, %v1530_v27  ;;  %v7660_v32 = vld [vmem:[#allocation116_spill] sm:$0xff] }
 0x2f9   : > { %v1566_v58 = vsel %vm1279_vm6, %v1565_v4, %v7657_v44  ;;  %v7658_v0 = vld [vmem:[#allocation115_spill] sm:$0xff]  ;;  %7659 = vst [vmem:[#allocation22_spill] sm:$0xff] %v6307_v15  ;;  %v7661_v37 = vld [vmem:[#allocation93_spill] sm:$0xff]  ;;  %v3464_v22 = vld [vmem:[%s7145_s3 + $0x11] ss:$0 sm:$0xff]  ;;  %v1611_v35 = vadd.f32 %v1610_v46, %v1537_v60 }
 0x2fa   : > { %v6296_v41 = vpop.permute.xlu1 %2557  ;;  %v6298_v40 = vpop.permute.xlu0 %2574  ;;  %v1776_v21 = vsel %vm1271_vm2, %v1775_v52, %v7658_v0  ;;  %v1920_v18 = vsel %vm1267_vm0, %v7661_v37, %v5515_v29  ;;  %v7662_v6 = vld [vmem:[#allocation32_spill] sm:$0xff]  ;;  %v7664_v55 = vld [vmem:[#allocation130_spill] sm:$0xff]  ;;  %v1572_v44 = vmul.f32 %v3457_v63, %v1566_v58  ;;  %v7665_v0 = vld [vmem:[#allocation33_spill] sm:$0xff] }
 0x2fb   : > { %7656 = vst [vmem:[#allocation67_spill] sm:$0xff] %v6296_v41  ;;  %v1777_v62 = vsel %vm1273_vm3, %v1776_v21, %v7660_v32  ;;  %v1638_v27 = vsel %vm1275_vm4, %v1637_v30, %v7662_v6  ;;  %v7663_v52 = vld [vmem:[#allocation108_spill] sm:$0xff]  ;;  %v1849_v29 = vsel %vm1269_vm1, %v1848_v28, %v7664_v55  ;;  %v3463_v4 = vld [vmem:[%s7145_s3 + $0x10] ss:$0 sm:$0xff]  ;;  %v7666_v32 = vld [vmem:[#allocation109_spill] sm:$0xff]  ;;  %v1683_v6 = vadd.f32 %v1682_v51, %v1611_v35 }
 0x2fc   : > { %2878 = vrot.lane.b32.xlu1 %v6155_v25, %s3632_s28  ;;  %2881 = vrot.lane.b32.xlu0 %v6155_v25, %s3635_s6  ;;  %v1709_v3 = vsel %vm1269_vm1, %v1708_v54, %v7663_v52  ;;  %v1639_v21 = vsel %vm1277_vm5, %v1638_v27, %v7665_v0  ;;  %v7667_v60 = vld [vmem:[#allocation131_spill] sm:$0xff]  ;;  %v7668_v28 = vld [vmem:[#allocation117_spill] sm:$0xff]  ;;  %v7669_v55 = vld [vmem:[#allocation120_spill] sm:$0xff]  ;;  %v1921_v27 = vsel %vm1269_vm1, %v1920_v18, %v5517_v39  ;;  %v1729_v0 = vrot.slane %v1727_v43, 1 }
 0x2fd   : > { %v1710_v46 = vsel %vm1271_vm2, %v1709_v3, %v7666_v32  ;;  %v1850_v30 = vsel %vm1271_vm2, %v1849_v29, %v7667_v60  ;;  %v1778_v52 = vsel %vm1275_vm4, %v1777_v62, %v7668_v28  ;;  %v7670_v41 = vld [vmem:[#allocation71_spill] sm:$0xff]  ;;  %v1747_v3 = vmul.f32 %v3464_v22, %v1604_v50  ;;  %v7671_v32 = vld [vmem:[#allocation37_spill] sm:$0xff]  ;;  %v7673_v43 = vld [vmem:[#allocation110_spill] sm:$0xff] }
 0x2fe   : > { %v6336_v37 = vpop.permute.xlu1 %2577  ;;  %v6338_v54 = vpop.permute.xlu0 %2580  ;;  %v1810_v63 = vsel %vm1267_vm0, %v7670_v41, %v7669_v55  ;;  %v1779_v29 = vsel %vm1277_vm5, %v1778_v52, %v7671_v32  ;;  %v1922_v60 = vsel %vm1271_vm2, %v1921_v27, %v5524_v13  ;;  %v6355_v51 = vmul.f32 %v3463_v4, %v1566_v58  ;;  %v3459_v39 = vld [vmem:[%s7145_s3 + $0xc] ss:$0 sm:$0xff]  ;;  %v7672_v41 = vld [vmem:[#allocation36_spill] sm:$0xff]  ;;  %v7675_v22 = vld [vmem:[#allocation111_spill] sm:$0xff] }
 0x2ff   : > { %v1640_v50 = vsel %vm1279_vm6, %v1639_v21, %v7672_v41  ;;  %v1711_v62 = vsel %vm1273_vm3, %v1710_v46, %v7673_v43  ;;  %v7674_v18 = vld [vmem:[#allocation132_spill] sm:$0xff]  ;;  %v7676_v28 = vld [vmem:[#allocation121_spill] sm:$0xff]  ;;  %v1731_v46 = vadd.f32 %v1729_v0, %v1683_v6  ;;  %v7680_v43 = vld [vmem:[#allocation118_spill] sm:$0xff] }
 0x300   : > { %2899 = vrot.lane.b32.xlu1 %v6307_v15, %s3629_s23  ;;  %2902 = vrot.lane.b32.xlu0 %v6307_v15, %s3628_s21  ;;  %v1851_v13 = vsel %vm1273_vm3, %v1850_v30, %v7674_v18  ;;  %v1712_v35 = vsel %vm1275_vm4, %v1711_v62, %v7675_v22  ;;  %v1811_v58 = vsel %vm1269_vm1, %v1810_v63, %v7676_v28  ;;  %v7677_v4 = vld [vmem:[#allocation133_spill] sm:$0xff]  ;;  %v7678_v55 = vld [vmem:[#allocation136_spill] sm:$0xff]  ;;  %v3465_v30 = vld [vmem:[%s7145_s3 + $0x12] ss:$0 sm:$0xff]  ;;  %v1749_v28 = vrot.slane %v1747_v3, 1 }
 0x301   : > { %v1852_v52 = vsel %vm1275_vm4, %v1851_v13, %v7677_v4  ;;  %v7679_v27 = vld [vmem:[#allocation84_spill] sm:$0xff]  ;;  %v1780_v62 = vsel %vm1279_vm6, %v1779_v29, %v7680_v43  ;;  %v7681_v63 = vld [vmem:[#allocation122_spill] sm:$0xff]  ;;  %v1923_v13 = vsel %vm1273_vm3, %v1922_v60, %v5526_v36  ;;  %v1573_v22 = vadd.f32 %v1572_v44, %v1491_v57  ;;  %v7686_v3 = vld [vmem:[#allocation123_spill] sm:$0xff] }
 0x302   : > { %v1884_v32 = vsel %vm1267_vm0, %v7679_v27, %v7678_v55  ;;  %v6375_v21 = vpop.permute.xlu1 %2583  ;;  %v6377_v41 = vpop.permute.xlu0 %2586  ;;  %v1812_v18 = vsel %vm1271_vm2, %v1811_v58, %v7681_v63  ;;  %v1646_v4 = vmul.f32 %v3459_v39, %v1640_v50  ;;  %v1924_v55 = vsel %vm1275_vm4, %v1923_v13, %v5532_v20  ;;  %v7682_v6 = vld [vmem:[#allocation112_spill] sm:$0xff]  ;;  %v7683_v29 = vld [vmem:[#allocation134_spill] sm:$0xff]  ;;  %v7684_v27 = vld [vmem:[#allocation137_spill] sm:$0xff] }
 0x303   : > { %v1713_v0 = vsel %vm1277_vm5, %v1712_v35, %v7682_v6  ;;  %v1853_v58 = vsel %vm1277_vm5, %v1852_v52, %v7683_v29  ;;  %v1885_v36 = vsel %vm1269_vm1, %v1884_v32, %v7684_v27  ;;  %v7685_v57 = vld [vmem:[#allocation104_spill] sm:$0xff]  ;;  %v1786_v20 = vmul.f32 %v3465_v30, %v1780_v62  ;;  %v3467_v39 = vld [vmem:[%s7145_s3 + $0x14] ss:$0 sm:$0xff]  ;;  %v7687_v50 = vld [vmem:[#allocation135_spill] sm:$0xff] }
 0x304   : > { %2905 = vrot.lane.b32.xlu1 %v6307_v15, %s3631_s27  ;;  %2908 = vrot.lane.b32.xlu0 %v6307_v15, %s3630_s25  ;;  %v2024_v44 = vsel %vm1267_vm0, %v7685_v57, %v5577_v56  ;;  %v1813_v60 = vsel %vm1273_vm3, %v1812_v18, %v7686_v3  ;;  %v1854_v35 = vsel %vm1279_vm6, %v1853_v58, %v7687_v50  ;;  %v3461_v56 = vld [vmem:[%s7145_s3 + $0xe] ss:$0 sm:$0xff]  ;;  %v3471_v13 = vld [vmem:[%s7145_s3 + $0x18] ss:$0 sm:$0xff]  ;;  %v7689_v6 = vld [vmem:[#allocation124_spill] sm:$0xff] }
 0x305   : > { %v1958_v52 = vsel %vm1267_vm0, %v5543_v33, %v5551_v7  ;;  %v7688_v30 = vld [vmem:[#allocation113_spill] sm:$0xff]  ;;  %v1751_v18 = vadd.f32 %v1749_v28, %v1731_v46  ;;  %v1814_v29 = vsel %vm1275_vm4, %v1813_v60, %v7689_v6  ;;  %v7690_v33 = vld [vmem:[#allocation59_spill] sm:$0xff]  ;;  %v7691_v58 = vld [vmem:[#allocation138_spill] sm:$0xff]  ;;  %v1860_v60 = vmul.f32 %v3467_v39, %v1854_v35 }
 0x306   : > { %v6413_v32 = vpop.permute.xlu1 %2589  ;;  %v6415_v43 = vpop.permute.xlu0 %2592  ;;  %v1714_v63 = vsel %vm1279_vm6, %v1713_v0, %v7688_v30  ;;  %v1925_v7 = vsel %vm1277_vm5, %v1924_v55, %v7690_v33  ;;  %v1886_v27 = vsel %vm1271_vm2, %v1885_v36, %v7691_v58  ;;  %v3469_v57 = vld [vmem:[%s7145_s3 + $0x16] ss:$0 sm:$0xff]  ;;  %v7693_v28 = vld [vmem:[#allocation149_spill] sm:$0xff]  ;;  %v1647_v55 = vadd.f32 %v1646_v4, %v1573_v22  ;;  %v7694_v50 = vld [vmem:[#allocation60_spill] sm:$0xff] }
 0x307   : > { %v7692_v3 = vld [vmem:[#allocation62_spill] sm:$0xff]  ;;  %v2025_v0 = vsel %vm1269_vm1, %v2024_v44, %v7693_v28  ;;  %v1887_v36 = vsel %vm1273_vm3, %v1886_v27, %v7694_v50  ;;  %v7695_v30 = vld [vmem:[#allocation143_spill] sm:$0xff]  ;;  %v1720_v33 = vmul.f32 %v3461_v56, %v1714_v63  ;;  %v1787_v58 = vadd.f32 %v1786_v20, %v1751_v18  ;;  %v7697_v31 = vld [vmem:[#allocation125_spill] sm:$0xff] }
 0x308   : > { %v1926_v46 = vsel %vm1279_vm6, %v1925_v7, %v7692_v3  ;;  %2911 = vrot.lane.b32.xlu1 %v6307_v15, %s3633_s29  ;;  %2914 = vrot.lane.b32.xlu0 %v6307_v15, %s3632_s28  ;;  %v1959_v6 = vsel %vm1269_vm1, %v1958_v52, %v7695_v30  ;;  %v1977_v7 = vmul.f32 %v3471_v13, %v1780_v62  ;;  %v7696_v3 = vld [vmem:[#allocation144_spill] sm:$0xff]  ;;  %v7698_v39 = vld [vmem:[#allocation150_spill] sm:$0xff]  ;;  %v7702_v63 = vld [vmem:[#allocation139_spill] sm:$0xff] }
 0x309   : > { %v1960_v44 = vsel %vm1271_vm2, %v1959_v6, %v7696_v3  ;;  %v1815_v22 = vsel %vm1277_vm5, %v1814_v29, %v7697_v31  ;;  %v1932_v4 = vmul.f32 %v3469_v57, %v1926_v46  ;;  %v2026_v27 = vsel %vm1271_vm2, %v2025_v0, %v7698_v39  ;;  %v7699_v50 = vld [vmem:[#allocation164_spill] sm:$0xff]  ;;  %v3466_v62 = vld [vmem:[%s7145_s3 + $0x13] ss:$0 sm:$0xff]  ;;  %v7703_v31 = vld [vmem:[#allocation151_spill] sm:$0xff] }
 0x30a   : > { %v6448_v28 = vpop.permute.xlu1 %2595  ;;  %v6450_v19 = vpop.permute.xlu0 %2613  ;;  %v2098_v52 = vsel %vm1267_vm0, %v7700_v17, %v7699_v50  ;;  %v7701_v20 = vld [vmem:[#allocation126_spill] sm:$0xff]  ;;  %v1888_v18 = vsel %vm1275_vm4, %v1887_v36, %v7702_v63  ;;  %v2027_v13 = vsel %vm1273_vm3, %v2026_v27, %v7703_v31  ;;  %v1861_v17 = vadd.f32 %v1860_v60, %v1787_v58  ;;  %v7704_v29 = vld [vmem:[#allocation41_spill] sm:$0xff]  ;;  %v7706_v30 = vld [vmem:[#allocation128_spill] sm:$0xff] }
 0x30b   : > { %v6464_v56 = vsel %vm1279_vm6, %v1815_v22, %v7701_v20  ;;  %v1889_v57 = vsel %vm1277_vm5, %v1888_v18, %v7704_v29  ;;  %v7705_v46 = vld [vmem:[#allocation145_spill] sm:$0xff]  ;;  %v2170_v36 = vsel %vm1267_vm0, %v7706_v30, %v5723_v14  ;;  %v823_v6 = vadd.f32 %v6067_v34, %v6181_v10  ;;  %v3473_v22 = vld [vmem:[%s7145_s3 + $0x1a] ss:$0 sm:$0xff]  ;;  %v7707_v39 = vld [vmem:[#allocation146_spill] sm:$0xff] }
 0x30c   : > { %2917 = vrot.lane.b32.xlu1 %v6307_v15, %s3635_s6  ;;  %2934 = vrot.lane.b32.xlu0 %v6155_v25, %s3627_s17  ;;  %v1961_v0 = vsel %vm1273_vm3, %v1960_v44, %v7705_v46  ;;  %v1721_v3 = vadd.f32 %v1720_v33, %v1647_v55  ;;  %v7708_v58 = vld [vmem:[#allocation165_spill] sm:$0xff]  ;;  %v1822_v14 = vmul.f32 %v3466_v62, %v6464_v56  ;;  %v7709_v63 = vld [vmem:[#allocation152_spill] sm:$0xff]  ;;  %v7710_v10 = vld [vmem:[#allocation166_spill] sm:$0xff]  ;;  %v1739_v33 = vrot.slane %v6355_v51, 1 }
 0x30d   : > { %v1962_v60 = vsel %vm1275_vm4, %v1961_v0, %v7707_v39  ;;  %v2099_v27 = vsel %vm1269_vm1, %v2098_v52, %v7708_v58  ;;  %v1933_v20 = vadd.f32 %v1932_v4, %v1861_v17  ;;  %v2028_v34 = vsel %vm1275_vm4, %v2027_v13, %v7709_v63  ;;  %v3468_v18 = vld [vmem:[%s7145_s3 + $0x15] ss:$0 sm:$0xff]  ;;  %v7711_v52 = vld [vmem:[#allocation140_spill] sm:$0xff]  ;;  %v7713_v62 = vld [vmem:[#allocation39_spill] sm:$0xff] }
 0x30e   : > { %v6490_v50 = vpop.permute.xlu1 %2616  ;;  %v6492_v44 = vpop.permute.xlu0 %2619  ;;  %v2100_v55 = vsel %vm1271_vm2, %v2099_v27, %v7710_v10  ;;  %v1890_v31 = vsel %vm1279_vm6, %v1889_v57, %v7711_v52  ;;  %v7712_v29 = vld [vmem:[#allocation40_spill] sm:$0xff]  ;;  %v2171_v4 = vsel %vm1269_vm1, %v2170_v36, %v7713_v62  ;;  %v1979_v51 = vrot.slane %v1977_v7, 1  ;;  %v7714_v17 = vld [vmem:[#allocation147_spill] sm:$0xff]  ;;  %v3470_v36 = vld [vmem:[%s7145_s3 + $0x17] ss:$0 sm:$0xff] }
 0x30f   : > { %v2029_v46 = vsel %vm1277_vm5, %v2028_v34, %v7712_v29  ;;  %v1997_v13 = vmul.f32 %v3473_v22, %v1854_v35  ;;  %v1963_v0 = vsel %vm1277_vm5, %v1962_v60, %v7714_v17  ;;  %v7715_v30 = vld [vmem:[#allocation64_spill] sm:$0xff]  ;;  %v830_v39 = vadd.f32 %v6233_v49, %v823_v6  ;;  %v7717_v34 = vld [vmem:[#allocation167_spill] sm:$0xff]  ;;  %v7718_v6 = vld [vmem:[#allocation153_spill] sm:$0xff] }
 0x310   : > { %2937 = vrot.lane.b32.xlu1 %v6155_v25, %s3634_s30  ;;  %2940 = vrot.lane.b32.xlu0 %v6155_v25, %s3638_s9  ;;  %v2172_v57 = vsel %vm1271_vm2, %v2171_v4, %v7715_v30  ;;  %v1741_v58 = vadd.f32 %v1739_v33, %v1721_v3  ;;  %v7716_v27 = vld [vmem:[#allocation148_spill] sm:$0xff]  ;;  %v2101_v7 = vsel %vm1273_vm3, %v2100_v55, %v7717_v34  ;;  %v3474_v49 = vld [vmem:[%s7145_s3 + $0x1b] ss:$0 sm:$0xff]  ;;  %v7721_v4 = vld [vmem:[#allocation106_spill] sm:$0xff] }
 0x311   : > { %v1964_v63 = vsel %vm1279_vm6, %v1963_v0, %v7716_v27  ;;  %v1896_v60 = vmul.f32 %v3468_v18, %v1890_v31  ;;  %v1981_v10 = vadd.f32 %v1979_v51, %v1933_v20  ;;  %v2030_v3 = vsel %vm1279_vm6, %v2029_v46, %v7718_v6  ;;  %v7719_v33 = vld [vmem:[#allocation168_spill] sm:$0xff]  ;;  %v7720_v62 = vld [vmem:[#allocation155_spill] sm:$0xff]  ;;  %v7726_v34 = vld [vmem:[#allocation169_spill] sm:$0xff] }
 0x312   : > { %v6525_v35 = vpop.permute.xlu1 %2622  ;;  %v6527_v22 = vpop.permute.xlu0 %2625  ;;  %v2102_v52 = vsel %vm1275_vm4, %v2101_v7, %v7719_v33  ;;  %v1823_v29 = vadd.f32 %v1822_v14, %v1741_v58  ;;  %v2060_v55 = vsel %vm1267_vm0, %v7721_v4, %v7720_v62  ;;  %v7722_v17 = vld [vmem:[#allocation63_spill] sm:$0xff]  ;;  %v1999_v20 = vrot.slane %v1997_v13, 1  ;;  %v7723_v31 = vld [vmem:[#allocation176_spill] sm:$0xff]  ;;  %v7725_v14 = vld [vmem:[#allocation141_spill] sm:$0xff] }
 0x313   : > { %v2173_v0 = vsel %vm1273_vm3, %v2172_v57, %v7722_v17  ;;  %v1970_v18 = vmul.f32 %v3470_v36, %v1964_v63  ;;  %v7724_v51 = vld [vmem:[#allocation188_spill] sm:$0xff]  ;;  %v831_v58 = vadd.f32 %v830_v39, %v6073_v61  ;;  %v3472_v57 = vld [vmem:[%s7145_s3 + $0x19] ss:$0 sm:$0xff]  ;;  %v2036_v27 = vmul.f32 %v3474_v49, %v2030_v3  ;;  %v3476_v49 = vld [vmem:[%s7145_s3 + $0x1d] ss:$0 sm:$0xff] }
 0x314   : > { %2943 = vrot.lane.b32.xlu1 %v6155_v25, %s3636_s7  ;;  %2946 = vrot.lane.b32.xlu0 %v6155_v25, %s3640_s11  ;;  %v2174_v46 = vsel %vm1275_vm4, %v2173_v0, %v7723_v31  ;;  %v2274_v30 = vsel %vm1267_vm0, %v7725_v14, %v7724_v51  ;;  %v2103_v7 = vsel %vm1277_vm5, %v2102_v52, %v7726_v34  ;;  %v3480_v33 = vld [vmem:[%s7145_s3 + $0x21] ss:$0 sm:$0xff]  ;;  %v7730_v4 = vld [vmem:[#allocation170_spill] sm:$0xff]  ;;  %v6571_v17 = vmax.f32 %v6108_v8, 0.0  ;;  %v7731_v0 = vld [vmem:[#allocation157_spill] sm:$0xff] }
 0x315   : > { %v1897_v36 = vadd.f32 %v1896_v60, %v1823_v29  ;;  %v2001_v63 = vadd.f32 %v1999_v20, %v1981_v10  ;;  %v7729_v62 = vld [vmem:[#allocation156_spill] sm:$0xff]  ;;  %v2104_v52 = vsel %vm1279_vm6, %v2103_v7, %v7730_v4  ;;  %v7732_v10 = vld [vmem:[#allocation177_spill] sm:$0xff]  ;;  %v1987_v8 = vmul.f32 %v3472_v57, %v6464_v56  ;;  %v7735_v34 = vld [vmem:[#allocation178_spill] sm:$0xff] }
 0x316   : > { %v6556_v6 = vpop.permute.xlu1 %2628  ;;  %v6558_v13 = vpop.permute.xlu0 %2631  ;;  %v2061_v39 = vsel %vm1269_vm1, %v2060_v55, %v7729_v62  ;;  %v2175_v29 = vsel %vm1277_vm5, %v2174_v46, %v7732_v10  ;;  %v7733_v20 = vld [vmem:[#allocation189_spill] sm:$0xff]  ;;  %v7734_v55 = vld [vmem:[#allocation10_spill] sm:$0xff]  ;;  %v3478_v46 = vld [vmem:[%s7145_s3 + $0x1f] ss:$0 sm:$0xff]  ;;  %v2227_v62 = vmul.f32 %v3480_v33, %v2030_v3 }
 0x317   : > { %7727 = vst [vmem:[#allocation30_spill] sm:$0xff] %v6556_v6  ;;  %7728 = vst [vmem:[#allocation31_spill] sm:$0xff] %v6558_v13  ;;  %v2062_v60 = vsel %vm1271_vm2, %v2061_v39, %v7731_v0  ;;  %v2275_v31 = vsel %vm1269_vm1, %v2274_v30, %v7733_v20  ;;  %v6585_v51 = vadd.f32 %v7734_v55, %v6073_v61  ;;  %v7736_v4 = vld [vmem:[#allocation204_spill] sm:$0xff]  ;;  %v7737_v0 = vld [vmem:[#allocation202_spill] sm:$0xff] }
 0x318   : > { %2949 = vrot.lane.b32.xlu1 %v6155_v25, %s3637_s8  ;;  %2952 = vrot.lane.b32.xlu0 %v6155_v25, %s3641_s12  ;;  %v1971_v14 = vadd.f32 %v1970_v18, %v1897_v36  ;;  %v2176_v30 = vsel %vm1279_vm6, %v2175_v29, %v7735_v34  ;;  %v2037_v7 = vadd.f32 %v2036_v27, %v2001_v63  ;;  %v7738_v15 = vld [vmem:[#allocation158_spill] sm:$0xff]  ;;  %v7739_v18 = vld [vmem:[#allocation171_spill] sm:$0xff]  ;;  %v6605_v27 = vmax.f32 %v831_v58, 0.0 }
 0x319   : > { %v2110_v39 = vmul.f32 %v3476_v49, %v2104_v52  ;;  %v2348_v10 = vsel %vm1267_vm0, %v7737_v0, %v7736_v4  ;;  %v2063_v56 = vsel %vm1273_vm3, %v2062_v60, %v7738_v15  ;;  %v7740_v57 = vld [vmem:[#allocation119_spill] sm:$0xff]  ;;  %v7741_v13 = vld [vmem:[#allocation190_spill] sm:$0xff]  ;;  %v2182_v63 = vmul.f32 %v3478_v46, %v2176_v30  ;;  %v7747_v30 = vld [vmem:[#allocation205_spill] sm:$0xff] }
 0x31a   : > { %v2650_v20 = vpop.permute.xlu1 %2649  ;;  %v2653_v55 = vpop.permute.xlu0 %2652  ;;  %v2134_v36 = vsel %vm1267_vm0, %v7740_v57, %v7739_v18  ;;  %v2276_v6 = vsel %vm1271_vm2, %v2275_v31, %v7741_v13  ;;  %v7742_v29 = vld [vmem:[#allocation203_spill] sm:$0xff]  ;;  %v7745_v13 = vld [vmem:[#allocation17_spill] sm:$0xff]  ;;  %v1989_v58 = vrot.slane %v1987_v8, 1  ;;  %v7748_v0 = vld [vmem:[#allocation172_spill] sm:$0xff] }
 0x31b   : > { %v2670_v3 = vsel %vm1267_vm0, %v7742_v29, %v2650_v20  ;;  %v7743_v33 = vld [vmem:[#allocation191_spill] sm:$0xff]  ;;  %v6618_v60 = vadd.f32 %v7745_v13, %v6073_v61  ;;  %v2111_v4 = vadd.f32 %v2110_v39, %v2037_v7  ;;  %v2135_v20 = vsel %vm1269_vm1, %v2134_v36, %v7748_v0  ;;  %v7749_v18 = vld [vmem:[#allocation206_spill] sm:$0xff]  ;;  %v7757_v0 = vld [vmem:[#allocation208_spill] sm:$0xff] }
 0x31c   : > { %v2277_v49 = vsel %vm1273_vm3, %v2276_v6, %v7743_v33  ;;  %v7744_v34 = vld [vmem:[#allocation163_spill] sm:$0xff]  ;;  %2955 = vrot.lane.b32.xlu1 %v6155_v25, %s3639_s10  ;;  %3003 = vrot.lane.b32.xlu0 %v6571_v17, %s3629_s23  ;;  %v2349_v6 = vsel %vm1269_vm1, %v2348_v10, %v7747_v30  ;;  %v2671_v61 = vsel %vm1269_vm1, %v2670_v3, %v2653_v55  ;;  %v2229_v7 = vrot.slane %v2227_v62, 1  ;;  %v7753_v3 = vld [vmem:[#allocation173_spill] sm:$0xff] }
 0x31d   : > { %v2420_v15 = vsel %vm1267_vm0, %v7744_v34, %v5937_v1  ;;  %v7746_v31 = vld [vmem:[#allocation159_spill] sm:$0xff]  ;;  %v3482_v1 = vld [vmem:[%s7145_s3 + $0x23] ss:$0 sm:$0xff]  ;;  %v2350_v57 = vsel %vm1271_vm2, %v2349_v6, %v7749_v18  ;;  %v1991_v33 = vadd.f32 %v1989_v58, %v1971_v14  ;;  %v2183_v39 = vadd.f32 %v2182_v63, %v2111_v4  ;;  %v7756_v6 = vld [vmem:[#allocation61_spill] sm:$0xff] }
 0x31e   : > { %v2064_v46 = vsel %vm1275_vm4, %v2063_v56, %v7746_v31  ;;  %v2656_v8 = vpop.permute.xlu1 %2655  ;;  %v2659_v29 = vpop.permute.xlu0 %2658  ;;  %v7750_v56 = vld [vmem:[#allocation192_spill] sm:$0xff]  ;;  %v2421_v10 = vsel %vm1269_vm1, %v2420_v15, %v5939_v47  ;;  %v7751_v31 = vld [vmem:[#allocation45_spill] sm:$0xff]  ;;  %v2247_v47 = vmul.f32 %v3482_v1, %v2104_v52  ;;  %v2136_v62 = vsel %vm1271_vm2, %v2135_v20, %v7753_v3  ;;  %v7754_v63 = vld [vmem:[#allocation207_spill] sm:$0xff] }
 0x31f   : > { %v2278_v34 = vsel %vm1275_vm4, %v2277_v49, %v7750_v56  ;;  %v2672_v13 = vsel %vm1271_vm2, %v2671_v61, %v2656_v8  ;;  %v2422_v30 = vsel %vm1271_vm2, %v2421_v10, %v5946_v9  ;;  %v7752_v14 = vld [vmem:[#allocation160_spill] sm:$0xff]  ;;  %v2351_v49 = vsel %vm1273_vm3, %v2350_v57, %v7754_v63  ;;  %v3475_v9 = vld [vmem:[%s7145_s3 + $0x1c] ss:$0 sm:$0xff]  ;;  %v7755_v15 = vld [vmem:[#allocation161_spill] sm:$0xff] }
 0x320   : > { %v2279_v36 = vsel %vm1277_vm5, %v2278_v34, %v7751_v31  ;;  %3006 = vrot.lane.b32.xlu1 %v6571_v17, %s3628_s21  ;;  %3009 = vrot.lane.b32.xlu0 %v6571_v17, %s3631_s27  ;;  %v2065_v55 = vsel %vm1277_vm5, %v2064_v46, %v7752_v14  ;;  %v2137_v4 = vsel %vm1273_vm3, %v2136_v62, %v7756_v6  ;;  %v7758_v18 = vld [vmem:[#allocation181_spill] sm:$0xff]  ;;  %v7759_v57 = vld [vmem:[#allocation179_spill] sm:$0xff]  ;;  %v3483_v8 = vld [vmem:[%s7145_s3 + $0x24] ss:$0 sm:$0xff]  ;;  %v2249_v3 = vrot.slane %v2247_v47, 1 }
 0x321   : > { %v6656_v58 = vsel %vm1279_vm6, %v2065_v55, %v7755_v15  ;;  %v2352_v52 = vsel %vm1275_vm4, %v2351_v49, %v7757_v0  ;;  %v2673_v46 = vsel %vm1273_vm3, %v2672_v13, %v2659_v29  ;;  %v2208_v61 = vsel %vm1267_vm0, %v7759_v57, %v7758_v18  ;;  %v7760_v56 = vld [vmem:[#allocation193_spill] sm:$0xff]  ;;  %v7761_v13 = vld [vmem:[#allocation175_spill] sm:$0xff]  ;;  %v7765_v49 = vld [vmem:[#allocation210_spill] sm:$0xff] }
 0x322   : > { %v2662_v1 = vpop.permute.xlu1 %2661  ;;  %v2665_v20 = vpop.permute.xlu0 %2664  ;;  %v2280_v34 = vsel %vm1279_vm6, %v2279_v36, %v7760_v56  ;;  %v2423_v10 = vsel %vm1273_vm3, %v2422_v30, %v5948_v5  ;;  %v2231_v14 = vadd.f32 %v2229_v7, %v2183_v39  ;;  %v2524_v55 = vsel %vm1267_vm0, %v7761_v13, %v6028_v12  ;;  %v7762_v5 = vld [vmem:[#allocation174_spill] sm:$0xff]  ;;  %v7763_v7 = vld [vmem:[#allocation209_spill] sm:$0xff]  ;;  %v3485_v12 = vld [vmem:[%s7145_s3 + $0x26] ss:$0 sm:$0xff] }
 0x323   : > { %v2674_v31 = vsel %vm1275_vm4, %v2673_v46, %v2662_v1  ;;  %v2424_v29 = vsel %vm1275_vm4, %v2423_v10, %v5954_v26  ;;  %v2072_v36 = vmul.f32 %v3475_v9, %v6656_v58  ;;  %v2138_v30 = vsel %vm1275_vm4, %v2137_v4, %v7762_v5  ;;  %v7764_v26 = vld [vmem:[#allocation18_spill] sm:$0xff]  ;;  %v3487_v57 = vld [vmem:[%s7145_s3 + $0x28] ss:$0 sm:$0xff]  ;;  %v7768_v56 = vld [vmem:[#allocation183_spill] sm:$0xff] }
 0x324   : > { %3012 = vrot.lane.b32.xlu1 %v6571_v17, %s3630_s25  ;;  %3039 = vrot.lane.b32.xlu0 %v6605_v27, %s3629_s23  ;;  %v2353_v39 = vsel %vm1277_vm5, %v2352_v52, %v7763_v7  ;;  %v2139_v62 = vsel %vm1277_vm5, %v2138_v30, %v7764_v26  ;;  %v2286_v63 = vmul.f32 %v3483_v8, %v2280_v34  ;;  %v7766_v0 = vld [vmem:[#allocation182_spill] sm:$0xff]  ;;  %v7771_v13 = vld [vmem:[#allocation211_spill] sm:$0xff] }
 0x325   : > { %v2354_v15 = vsel %vm1279_vm6, %v2353_v39, %v7765_v49  ;;  %v2675_v9 = vsel %vm1277_vm5, %v2674_v31, %v2665_v20  ;;  %v2209_v4 = vsel %vm1269_vm1, %v2208_v61, %v7766_v0  ;;  %v2425_v52 = vsel %vm1277_vm5, %v2424_v29, %v5956_v45  ;;  %v3477_v30 = vld [vmem:[%s7145_s3 + $0x1e] ss:$0 sm:$0xff] }
 0x326   : > { %v2668_v47 = vpop.permute.xlu1 %2667  ;;  %v2685_v6 = vpop.permute.xlu0 %2684  ;;  %v2525_v46 = vsel %vm1269_vm1, %v2524_v55, %v6059_v59  ;;  %v2251_v18 = vadd.f32 %v2249_v3, %v2231_v14  ;;  %v2426_v20 = vsel %vm1279_vm6, %v2425_v52, %v5963_v2  ;;  %v2598_v61 = vsel %vm1267_vm0, %v6298_v40, %v6336_v37  ;;  %v7767_v59 = vld [vmem:[#allocation38_spill] sm:$0xff]  ;;  %v3489_v2 = vld [vmem:[%s7145_s3 + $0x2a] ss:$0 sm:$0xff]  ;;  %v7769_v37 = vld [vmem:[#allocation195_spill] sm:$0xff] }
 0x327   : > { %v6703_v1 = vsel %vm1279_vm6, %v2675_v9, %v2668_v47  ;;  %v6717_v45 = vadd.f32 %v2072_v36, %v1991_v33  ;;  %v2140_v8 = vsel %vm1279_vm6, %v2139_v62, %v7767_v59  ;;  %v2210_v10 = vsel %vm1271_vm2, %v2209_v4, %v7768_v56  ;;  %v7770_v14 = vld [vmem:[#allocation142_spill] sm:$0xff]  ;;  %v7775_v47 = vld [vmem:[#allocation196_spill] sm:$0xff]  ;;  %v7776_v52 = vld [vmem:[#allocation197_spill] sm:$0xff] }
 0x328   : > { %3074 = vrot.lane.b32.xlu1 %v6571_v17, %s3627_s17  ;;  %3077 = vrot.lane.b32.xlu0 %v6571_v17, %s3634_s30  ;;  %v2360_v31 = vmul.f32 %v3485_v12, %v2354_v15  ;;  %v2287_v40 = vadd.f32 %v2286_v63, %v2251_v18  ;;  %v2310_v29 = vsel %vm1267_vm0, %v7770_v14, %v7769_v37  ;;  %v7772_v55 = vld [vmem:[#allocation154_spill] sm:$0xff]  ;;  %v7773_v63 = vld [vmem:[#allocation184_spill] sm:$0xff] }
 0x329   : > { %v2384_v33 = vsel %vm1267_vm0, %v7772_v55, %v7771_v13  ;;  %v2526_v36 = vsel %vm1271_vm2, %v2525_v46, %v6061_v42  ;;  %v2432_v7 = vmul.f32 %v3487_v57, %v2426_v20  ;;  %v2599_v26 = vsel %vm1269_vm1, %v2598_v61, %v6338_v54  ;;  %v3491_v46 = vld [vmem:[%s7145_s3 + $0x2c] ss:$0 sm:$0xff]  ;;  %v7777_v18 = vld [vmem:[#allocation212_spill] sm:$0xff]  ;;  %v7780_v13 = vld [vmem:[#allocation187_spill] sm:$0xff] }
 0x32a   : > { %v2688_v3 = vpop.permute.xlu1 %2687  ;;  %v2691_v5 = vpop.permute.xlu0 %2690  ;;  %v2527_v39 = vsel %vm1273_vm3, %v2526_v36, %v6098_v53  ;;  %v2211_v12 = vsel %vm1273_vm3, %v2210_v10, %v7773_v63  ;;  %v2600_v42 = vsel %vm1271_vm2, %v2599_v26, %v6375_v21  ;;  %v7774_v53 = vld [vmem:[#allocation185_spill] sm:$0xff]  ;;  %v2477_v54 = vmul.f32 %v3489_v2, %v2280_v34  ;;  %v7778_v2 = vld [vmem:[#allocation186_spill] sm:$0xff]  ;;  %v7781_v55 = vld [vmem:[#allocation199_spill] sm:$0xff] }
 0x32b   : > { %v2708_v62 = vsel %vm1267_vm0, %v2685_v6, %v2688_v3  ;;  %v2212_v9 = vsel %vm1275_vm4, %v2211_v12, %v7774_v53  ;;  %v2311_v6 = vsel %vm1269_vm1, %v2310_v29, %v7775_v47  ;;  %v2361_v0 = vadd.f32 %v2360_v31, %v2287_v40  ;;  %v7782_v36 = vld [vmem:[#allocation213_spill] sm:$0xff]  ;;  %v7784_v26 = vld [vmem:[#allocation42_spill] sm:$0xff] }
 0x32c   : > { %v2709_v49 = vsel %vm1269_vm1, %v2708_v62, %v2691_v5  ;;  %3042 = vrot.lane.b32.xlu1 %v6605_v27, %s3628_s21  ;;  %3080 = vrot.lane.b32.xlu0 %v6571_v17, %s3638_s9  ;;  %v2146_v4 = vmul.f32 %v3477_v30, %v2140_v8  ;;  %v2312_v21 = vsel %vm1271_vm2, %v2311_v6, %v7776_v52  ;;  %v6770_v31 = vmax.f32 %v6585_v51, 0.0  ;;  %v3492_v5 = vld [vmem:[%s7145_s3 + $0x2d] ss:$0 sm:$0xff]  ;;  %v7783_v30 = vld [vmem:[#allocation16_spill] sm:$0xff] }
 0x32d   : > { %v2385_v57 = vsel %vm1269_vm1, %v2384_v33, %v7777_v18  ;;  %v2528_v20 = vsel %vm1275_vm4, %v2527_v39, %v6100_v24  ;;  %v2433_v59 = vadd.f32 %v2432_v7, %v2361_v0  ;;  %v2601_v8 = vsel %vm1273_vm3, %v2600_v42, %v6377_v41  ;;  %v7779_v41 = vld [vmem:[#allocation198_spill] sm:$0xff]  ;;  %v7786_v0 = vld [vmem:[#allocation68_spill] sm:$0xff] }
 0x32e   : > { %v2694_v61 = vpop.permute.xlu1 %2693  ;;  %v2697_v34 = vpop.permute.xlu0 %2696  ;;  %v2529_v56 = vsel %vm1277_vm5, %v2528_v20, %v6149_v11  ;;  %v2213_v40 = vsel %vm1277_vm5, %v2212_v9, %v7778_v2  ;;  %v2602_v24 = vsel %vm1275_vm4, %v2601_v8, %v6413_v32  ;;  %v2479_v11 = vrot.slane %v2477_v54, 1  ;;  %v3494_v9 = vld [vmem:[%s7145_s3 + $0x2f] ss:$0 sm:$0xff] }
 0x32f   : > { %v2710_v10 = vsel %vm1271_vm2, %v2709_v49, %v2694_v61  ;;  %v2313_v14 = vsel %vm1273_vm3, %v2312_v21, %v7779_v41  ;;  %v2497_v51 = vmul.f32 %v3491_v46, %v2354_v15  ;;  %v2458_v29 = vsel %vm1267_vm0, %v5965_v38, %v5973_v16  ;;  %v3481_v38 = vld [vmem:[%s7145_s3 + $0x22] ss:$0 sm:$0xff]  ;;  %v3479_v16 = vld [vmem:[%s7145_s3 + $0x20] ss:$0 sm:$0xff]  ;;  %v7785_v49 = vld [vmem:[#allocation65_spill] sm:$0xff] }
 0x330   : > { %v2711_v37 = vsel %vm1273_vm3, %v2710_v10, %v2697_v34  ;;  %3015 = vrot.lane.b32.xlu1 %v6571_v17, %s3633_s29  ;;  %3045 = vrot.lane.b32.xlu0 %v6605_v27, %s3631_s27  ;;  %v2214_v32 = vsel %vm1279_vm6, %v2213_v40, %v7780_v13  ;;  %v2314_v33 = vsel %vm1275_vm4, %v2313_v14, %v7781_v55  ;;  %v3496_v61 = vld [vmem:[%s7145_s3 + $0x31] ss:$0 sm:$0xff]  ;;  %v7791_v41 = vld [vmem:[#allocation49_spill] sm:$0xff]  ;;  %v7792_v14 = vld [vmem:[#allocation180_spill] sm:$0xff] }
 0x331   : > { %v2386_v3 = vsel %vm1271_vm2, %v2385_v57, %v7782_v36  ;;  %v2530_v15 = vsel %vm1279_vm6, %v2529_v56, %v7783_v30  ;;  %v2481_v63 = vadd.f32 %v2479_v11, %v2433_v59  ;;  %v2603_v12 = vsel %vm1277_vm5, %v2602_v24, %v6415_v43  ;;  %v7787_v57 = vld [vmem:[#allocation200_spill] sm:$0xff]  ;;  %v7788_v59 = vld [vmem:[#allocation14_spill] sm:$0xff] }
 0x332   : > { %v2700_v7 = vpop.permute.xlu1 %2699  ;;  %v2703_v39 = vpop.permute.xlu0 %2702  ;;  %v2387_v62 = vsel %vm1273_vm3, %v2386_v3, %v7784_v26  ;;  %v2459_v53 = vsel %vm1269_vm1, %v2458_v29, %v7785_v49  ;;  %v2604_v54 = vsel %vm1279_vm6, %v2603_v12, %v6448_v28  ;;  %v6821_v43 = vmax.f32 %v6618_v60, 0.0  ;;  %v3498_v24 = vld [vmem:[%s7145_s3 + $0x33] ss:$0 sm:$0xff] }
 0x333   : > { %v2712_v42 = vsel %vm1275_vm4, %v2711_v37, %v2700_v7  ;;  %v2499_v6 = vrot.slane %v2497_v51, 1  ;;  %v2460_v52 = vsel %vm1271_vm2, %v2459_v53, %v7786_v0  ;;  %v2536_v21 = vmul.f32 %v3492_v5, %v2530_v15  ;;  %v7793_v29 = vld [vmem:[#allocation194_spill] sm:$0xff] }
 0x334   : > { %v2713_v47 = vsel %vm1277_vm5, %v2712_v42, %v2703_v39  ;;  %3083 = vrot.lane.b32.xlu1 %v6571_v17, %s3636_s7  ;;  %3113 = vrot.lane.b32.xlu0 %v6770_v31, %s3629_s23  ;;  %v2237_v46 = vmul.f32 %v3481_v38, %v6656_v58  ;;  %v2147_v28 = vadd.f32 %v2146_v4, %v6717_v45  ;;  %v7789_v58 = vld [vmem:[#allocation66_spill] sm:$0xff]  ;;  %v7790_v4 = vld [vmem:[#allocation43_spill] sm:$0xff]  ;;  %v3486_v39 = vld [vmem:[%s7145_s3 + $0x27] ss:$0 sm:$0xff] }
 0x335   : > { %v2220_v18 = vmul.f32 %v3479_v16, %v2214_v32  ;;  %v2315_v20 = vsel %vm1277_vm5, %v2314_v33, %v7787_v57  ;;  %v2388_v56 = vsel %vm1275_vm4, %v2387_v62, %v7788_v59  ;;  %v2501_v8 = vadd.f32 %v2499_v6, %v2481_v63  ;;  %v7794_v33 = vld [vmem:[#allocation201_spill] sm:$0xff]  ;;  %v7795_v3 = vld [vmem:[#allocation214_spill] sm:$0xff]  ;;  %v7797_v63 = vld [vmem:[#allocation8_spill] sm:$0xff] }
 0x336   : > { %v2706_v34 = vpop.permute.xlu1 %2705  ;;  %v2754_v60 = vpop.permute.xlu0 %2753  ;;  %v2610_v10 = vmul.f32 %v3494_v9, %v2604_v54  ;;  %v2389_v45 = vsel %vm1277_vm5, %v2388_v56, %v7789_v58  ;;  %v2461_v40 = vsel %vm1273_vm3, %v2460_v52, %v7790_v4  ;;  %v2560_v51 = vsel %vm1267_vm0, %v7792_v14, %v7791_v41  ;;  %v3500_v42 = vld [vmem:[%s7145_s3 + $0x35] ss:$0 sm:$0xff]  ;;  %v7798_v9 = vld [vmem:[#allocation215_spill] sm:$0xff]  ;;  %v3490_v57 = vld [vmem:[%s7145_s3 + $0x2b] ss:$0 sm:$0xff] }
 0x337   : > { %v6835_v2 = vsel %vm1279_vm6, %v2713_v47, %v2706_v34  ;;  %v2774_v37 = vsel %vm1267_vm0, %v5928_v48, %v2754_v60  ;;  %v2537_v11 = vadd.f32 %v2536_v21, %v2501_v8  ;;  %v2634_v13 = vsel %vm1267_vm0, %v7793_v29, %v6450_v19  ;;  %v3484_v48 = vld [vmem:[%s7145_s3 + $0x25] ss:$0 sm:$0xff]  ;;  %v7800_v59 = vld [vmem:[#allocation46_spill] sm:$0xff]  ;;  %v7802_v29 = vld [vmem:[#allocation11_spill] sm:$0xff] }
 0x338   : > { %3149 = vrot.lane.b32.xlu1 %v6821_v43, %s3629_s23  ;;  %3018 = vrot.lane.b32.xlu0 %v6571_v17, %s3632_s28  ;;  %v2682_v32 = vmul.f32 %v3496_v61, %v6703_v1  ;;  %v2221_v55 = vadd.f32 %v2220_v18, %v2147_v28  ;;  %v2316_v36 = vsel %vm1279_vm6, %v2315_v20, %v7794_v33  ;;  %v7796_v19 = vld [vmem:[#allocation52_spill] sm:$0xff]  ;;  %v2239_v62 = vrot.slane %v2237_v46, 1  ;;  %v7799_v46 = vld [vmem:[#allocation55_spill] sm:$0xff]  ;;  %v3488_v20 = vld [vmem:[%s7145_s3 + $0x29] ss:$0 sm:$0xff] }
 0x339   : > { %v2462_v5 = vsel %vm1275_vm4, %v2461_v40, %v7795_v3  ;;  %v2390_v1 = vsel %vm1279_vm6, %v2389_v45, %v7796_v19  ;;  %v2727_v38 = vmul.f32 %v3498_v24, %v2530_v15  ;;  %v2611_v16 = vadd.f32 %v2610_v10, %v2537_v11  ;;  %v7801_v58 = vld [vmem:[#allocation50_spill] sm:$0xff]  ;;  %v7804_v33 = vld [vmem:[#allocation67_spill] sm:$0xff] }
 0x33a   : > { %v2757_v30 = vpop.permute.xlu1 %2756  ;;  %v2760_v7 = vpop.permute.xlu0 %2759  ;;  %v2561_v12 = vsel %vm1269_vm1, %v2560_v51, %v7797_v63  ;;  %v2635_v49 = vsel %vm1269_vm1, %v2634_v13, %v6490_v50  ;;  %v2322_v15 = vmul.f32 %v3484_v48, %v2316_v36  ;;  %v2463_v47 = vsel %vm1277_vm5, %v2462_v5, %v7798_v9  ;;  %v3495_v19 = vld [vmem:[%s7145_s3 + $0x30] ss:$0 sm:$0xff] }
 0x33b   : > { %v2775_v26 = vsel %vm1269_vm1, %v2774_v37, %v2757_v30  ;;  %v2562_v6 = vsel %vm1271_vm2, %v2561_v12, %v6221_v23  ;;  %v2683_v0 = vadd.f32 %v2682_v32, %v2611_v16  ;;  %v2241_v52 = vadd.f32 %v2239_v62, %v2221_v55  ;;  %v7803_v32 = vld [vmem:[#allocation30_spill] sm:$0xff] }
 0x33c   : > { %v2776_v53 = vsel %vm1271_vm2, %v2775_v26, %v2760_v7  ;;  %3048 = vrot.lane.b32.xlu1 %v6605_v27, %s3630_s25  ;;  %3086 = vrot.lane.b32.xlu0 %v6571_v17, %s3640_s11  ;;  %v2396_v21 = vmul.f32 %v3486_v39, %v2390_v1  ;;  %v2464_v50 = vsel %vm1279_vm6, %v2463_v47, %v7799_v46  ;;  %v2729_v61 = vrot.slane %v2727_v38, 1  ;;  %v7805_v1 = vld [vmem:[#allocation31_spill] sm:$0xff]  ;;  %v7806_v26 = vld [vmem:[#allocation44_spill] sm:$0xff] }
 0x33d   : > { %v2747_v34 = vmul.f32 %v3500_v42, %v2604_v54  ;;  %v2636_v23 = vsel %vm1271_vm2, %v2635_v49, %v6492_v44  ;;  %v2563_v56 = vsel %vm1273_vm3, %v2562_v6, %v7800_v59  ;;  %v2323_v54 = vadd.f32 %v2322_v15, %v2241_v52  ;;  %v3497_v49 = vld [vmem:[%s7145_s3 + $0x32] ss:$0 sm:$0xff]  ;;  %v3499_v6 = vld [vmem:[%s7145_s3 + $0x34] ss:$0 sm:$0xff] }
 0x33e   : > { %v2763_v28 = vpop.permute.xlu1 %2762  ;;  %v2766_v18 = vpop.permute.xlu0 %2765  ;;  %v2637_v8 = vsel %vm1273_vm3, %v2636_v23, %v6525_v35  ;;  %v2564_v44 = vsel %vm1275_vm4, %v2563_v56, %v7801_v58  ;;  %v2731_v45 = vadd.f32 %v2729_v61, %v2683_v0  ;;  %v2487_v4 = vmul.f32 %v3490_v57, %v2316_v36  ;;  %v3501_v35 = vld [vmem:[%s7145_s3 + $0x36] ss:$0 sm:$0xff] }
 0x33f   : > { %v2777_v60 = vsel %vm1273_vm3, %v2776_v53, %v2763_v28  ;;  %v2470_v40 = vmul.f32 %v3488_v20, %v2464_v50  ;;  %v2397_v11 = vadd.f32 %v2396_v21, %v2323_v54  ;;  %v2749_v41 = vrot.slane %v2747_v34, 1 }
 0x340   : > { %v2778_v10 = vsel %vm1275_vm4, %v2777_v60, %v2766_v18  ;;  %3116 = vrot.lane.b32.xlu1 %v6770_v31, %s3628_s21  ;;  %3152 = vrot.lane.b32.xlu0 %v6821_v43, %s3628_s21  ;;  %v2638_v14 = vsel %vm1275_vm4, %v2637_v8, %v6527_v22  ;;  %v2565_v13 = vsel %vm1277_vm5, %v2564_v44, %v7802_v29  ;;  %v3493_v22 = vld [vmem:[%s7145_s3 + $0x2e] ss:$0 sm:$0xff]  ;;  %v2489_v63 = vrot.slane %v2487_v4, 1  ;;  %v3503_v29 = vld [vmem:[%s7145_s3 + $0x38] ss:$0 sm:$0xff] }
 0x341   : > { %v2639_v55 = vsel %vm1277_vm5, %v2638_v14, %v7803_v32  ;;  %v2566_v36 = vsel %vm1279_vm6, %v2565_v13, %v7804_v33  ;;  %v2751_v3 = vadd.f32 %v2749_v41, %v2731_v45  ;;  %v2471_v30 = vadd.f32 %v2470_v40, %v2397_v11 }
 0x342   : > { %v2769_v24 = vpop.permute.xlu1 %2768  ;;  %v2772_v37 = vpop.permute.xlu0 %2771  ;;  %v2640_v38 = vsel %vm1279_vm6, %v2639_v55, %v7805_v1  ;;  %v2572_v12 = vmul.f32 %v3493_v22, %v2566_v36  ;;  %v2720_v21 = vmul.f32 %v3497_v49, %v6835_v2  ;;  %v2737_v50 = vmul.f32 %v3499_v6, %v2566_v36  ;;  %v3502_v2 = vld [vmem:[%s7145_s3 + $0x37] ss:$0 sm:$0xff] }
 0x343   : > { %v2779_v51 = vsel %vm1277_vm5, %v2778_v10, %v2769_v24  ;;  %v2491_v53 = vadd.f32 %v2489_v63, %v2471_v30  ;;  %v2646_v15 = vmul.f32 %v3495_v19, %v2640_v38 }
 0x344   : > { %v6919_v48 = vsel %vm1279_vm6, %v2779_v51, %v2772_v37  ;;  %3021 = vrot.lane.b32.xlu1 %v6571_v17, %s3635_s6  ;;  %3051 = vrot.lane.b32.xlu0 %v6605_v27, %s3633_s29  ;;  %v2739_v23 = vrot.slane %v2737_v50, 1 }
 0x345   : > { %v2786_v5 = vmul.f32 %v3501_v35, %v6919_v48  ;;  %v2573_v52 = vadd.f32 %v2572_v12, %v2491_v53 }
 0x346   : > { %v2790_v7 = vpop.permute.xlu1 %2789  ;;  %v2793_v39 = vpop.permute.xlu0 %2792 }
 0x347   : > { %v6936_v16 = vadd.f32 %v2786_v5, %v2751_v3  ;;  %v2810_v62 = vsel %vm1267_vm0, %v7806_v26, %v2790_v7  ;;  %v2647_v28 = vadd.f32 %v2646_v15, %v2573_v52  ;;  %v7807_v15 = vld [vmem:[#allocation22_spill] sm:$0xff] }
 0x348   : > { %v2811_v42 = vsel %vm1269_vm1, %v2810_v62, %v2793_v39  ;;  %3089 = vrot.lane.b32.xlu1 %v6571_v17, %s3637_s8  ;;  %3119 = vrot.lane.b32.xlu0 %v6770_v31, %s3631_s27 }
 0x349   : > { %v2721_v61 = vadd.f32 %v2720_v21, %v2647_v28  ;;  %v3507_v28 = vld [vmem:[%s7145_s3 + $0x3c] ss:$0 sm:$0xff] }
 0x34a   : > { %v2796_v9 = vpop.permute.xlu1 %2795  ;;  %v2799_v47 = vpop.permute.xlu0 %2798 }
 0x34b   : > { %v2812_v0 = vsel %vm1271_vm2, %v2811_v42, %v2796_v9  ;;  %v2741_v8 = vadd.f32 %v2739_v23, %v2721_v61  ;;  %v3505_v61 = vld [vmem:[%s7145_s3 + $0x3a] ss:$0 sm:$0xff] }
 0x34c   : > { %v2813_v46 = vsel %vm1273_vm3, %v2812_v0, %v2799_v47  ;;  %3155 = vrot.lane.b32.xlu1 %v6821_v43, %s3631_s27  ;;  %3184 = vrot.lane.b32.xlu0 %v6770_v31, %s3627_s17 }
 0x34e   : > { %v2802_v18 = vpop.permute.xlu1 %2801  ;;  %v2805_v57 = vpop.permute.xlu0 %2804 }
 0x34f   : > { %v2814_v20 = vsel %vm1275_vm4, %v2813_v46, %v2802_v18 }
 0x350   : > { %v2815_v34 = vsel %vm1277_vm5, %v2814_v20, %v2805_v57  ;;  %3187 = vrot.lane.b32.xlu1 %v6770_v31, %s3634_s30  ;;  %3054 = vrot.lane.b32.xlu0 %v6605_v27, %s3632_s28  ;;  %v3509_v20 = vld [vmem:[%s7145_s3 + $0x3e] ss:$0 sm:$0xff] }
 0x352   : > { %v2808_v60 = vpop.permute.xlu1 %2807  ;;  %v2825_v59 = vpop.permute.xlu0 %2824 }
 0x353   : > { %v6968_v56 = vsel %vm1279_vm6, %v2815_v34, %v2808_v60  ;;  %v2977_v34 = vmul.f32 %v3507_v28, %v6919_v48  ;;  %v3510_v28 = vld [vmem:[%s7145_s3 + $0x3f] ss:$0 sm:$0xff] }
 0x354   : > { %v2822_v10 = vmul.f32 %v3502_v2, %v6968_v56  ;;  %3092 = vrot.lane.b32.xlu1 %v6571_v17, %s3641_s12  ;;  %3122 = vrot.lane.b32.xlu0 %v6770_v31, %s3630_s25 }
 0x356   : > { %v2823_v54 = vadd.f32 %v2822_v10, %v2741_v8  ;;  %v2828_v58 = vpop.permute.xlu1 %2827  ;;  %v2831_v44 = vpop.permute.xlu0 %2830  ;;  %v2979_v10 = vrot.slane %v2977_v34, 1 }
 0x357   : > { %v2848_v45 = vsel %vm1267_vm0, %v2825_v59, %v2828_v58 }
 0x358   : > { %v2849_v4 = vsel %vm1269_vm1, %v2848_v45, %v2831_v44  ;;  %3158 = vrot.lane.b32.xlu1 %v6821_v43, %s3630_s25  ;;  %3190 = vrot.lane.b32.xlu0 %v6770_v31, %s3638_s9 }
 0x35a   : > { %v2834_v40 = vpop.permute.xlu1 %2833  ;;  %v2837_v24 = vpop.permute.xlu0 %2836 }
 0x35b   : > { %v2850_v35 = vsel %vm1271_vm2, %v2849_v4, %v2834_v40 }
 0x35c   : > { %v2851_v37 = vsel %vm1273_vm3, %v2850_v35, %v2837_v24  ;;  %3057 = vrot.lane.b32.xlu1 %v6605_v27, %s3635_s6  ;;  %3095 = vrot.lane.b32.xlu0 %v6571_v17, %s3639_s10 }
 0x35e   : > { %v2840_v11 = vpop.permute.xlu1 %2839  ;;  %v2843_v41 = vpop.permute.xlu0 %2842 }
 0x35f   : > { %v2852_v14 = vsel %vm1275_vm4, %v2851_v37, %v2840_v11 }
 0x360   : > { %v2853_v51 = vsel %vm1277_vm5, %v2852_v14, %v2843_v41  ;;  %3125 = vrot.lane.b32.xlu1 %v6770_v31, %s3633_s29  ;;  %3161 = vrot.lane.b32.xlu0 %v6821_v43, %s3633_s29 }
 0x362   : > { %v2846_v13 = vpop.permute.xlu1 %2845  ;;  %v2864_v32 = vpop.permute.xlu0 %2863 }
 0x363   : > { %v2854_v55 = vsel %vm1279_vm6, %v2853_v51, %v2846_v13  ;;  %v2884_v33 = vsel %vm1267_vm0, %v6155_v25, %v2864_v32 }
 0x364   : > { %v2860_v22 = vmul.f32 %v3503_v29, %v2854_v55  ;;  %3193 = vrot.lane.b32.xlu1 %v6770_v31, %s3636_s7  ;;  %3128 = vrot.lane.b32.xlu0 %v6770_v31, %s3632_s28  ;;  %v2997_v59 = vmul.f32 %v3509_v20, %v2854_v55  ;;  %v3508_v29 = vld [vmem:[%s7145_s3 + $0x3d] ss:$0 sm:$0xff]  ;;  %v3506_v55 = vld [vmem:[%s7145_s3 + $0x3b] ss:$0 sm:$0xff] }
 0x366   : > { %v2861_v36 = vadd.f32 %v2860_v22, %v6936_v16  ;;  %v2867_v3 = vpop.permute.xlu1 %2866  ;;  %v2870_v5 = vpop.permute.xlu0 %2869  ;;  %v3504_v16 = vld [vmem:[%s7145_s3 + $0x39] ss:$0 sm:$0xff]  ;;  %v2999_v4 = vrot.slane %v2997_v59, 1  ;;  %v2987_v22 = vmul.f32 %v3508_v29, %v6968_v56  ;;  %v3511_v29 = vld [vmem:[%s7145_s3 + $0x40] ss:$0 sm:$0xff] }
 0x367   : > { %v2885_v30 = vsel %vm1269_vm1, %v2884_v33, %v2867_v3 }
 0x368   : > { %v2886_v7 = vsel %vm1271_vm2, %v2885_v30, %v2870_v5  ;;  %3164 = vrot.lane.b32.xlu1 %v6821_v43, %s3632_s28  ;;  %3196 = vrot.lane.b32.xlu0 %v6770_v31, %s3640_s11 }
 0x36a   : > { %v2873_v25 = vpop.permute.xlu1 %2872  ;;  %v2876_v39 = vpop.permute.xlu0 %2875 }
 0x36b   : > { %v2887_v19 = vsel %vm1273_vm3, %v2886_v7, %v2873_v25  ;;  %v2989_v7 = vrot.slane %v2987_v22, 1 }
 0x36c   : > { %v2888_v1 = vsel %vm1275_vm4, %v2887_v19, %v2876_v39  ;;  %3131 = vrot.lane.b32.xlu1 %v6770_v31, %s3635_s6  ;;  %3167 = vrot.lane.b32.xlu0 %v6821_v43, %s3635_s6 }
 0x36e   : > { %v2879_v38 = vpop.permute.xlu1 %2878  ;;  %v2882_v26 = vpop.permute.xlu0 %2881 }
 0x36f   : > { %v2889_v62 = vsel %vm1277_vm5, %v2888_v1, %v2879_v38 }
 0x370   : > { %v2890_v63 = vsel %vm1279_vm6, %v2889_v62, %v2882_v26  ;;  %3199 = vrot.lane.b32.xlu1 %v6770_v31, %s3637_s8  ;;  %3202 = vrot.lane.b32.xlu0 %v6770_v31, %s3641_s12  ;;  %s3350_s12 = sshll.u32 %s7809_s19, 2 }
 0x371   : > { %v2896_v12 = vmul.f32 %v3504_v16, %v2890_v63  ;;  %s249_s20 = scalar_lea.vmem %s7147_s5, %s3350_s12 }
 0x372   : > { %v2900_v42 = vpop.permute.xlu1 %2899  ;;  %v2903_v49 = vpop.permute.xlu0 %2902 }
 0x373   : > { %v2897_v53 = vadd.f32 %v2896_v12, %v2823_v54  ;;  %v2920_v9 = vsel %vm1267_vm0, %v7807_v15, %v2900_v42 }
 0x374   : > { %v2921_v47 = vsel %vm1269_vm1, %v2920_v9, %v2903_v49  ;;  %3205 = vrot.lane.b32.xlu1 %v6770_v31, %s3639_s10 }
 0x376   : > { %v2906_v6 = vpop.permute.xlu1 %2905  ;;  %v2909_v0 = vpop.permute.xlu0 %2908 }
 0x377   : > { %v2922_v52 = vsel %vm1271_vm2, %v2921_v47, %v2906_v6 }
 0x378   : > { %v2923_v21 = vsel %vm1273_vm3, %v2922_v52, %v2909_v0 }
 0x37a   : > { %v2912_v46 = vpop.permute.xlu1 %2911  ;;  %v2915_v50 = vpop.permute.xlu0 %2914 }
 0x37b   : > { %v2924_v18 = vsel %vm1275_vm4, %v2923_v21, %v2912_v46 }
 0x37c   : > { %v2925_v57 = vsel %vm1277_vm5, %v2924_v18, %v2915_v50 }
 0x37e   : > { %v2918_v2 = vpop.permute.xlu1 %2917  ;;  %v2935_v23 = vpop.permute.xlu0 %2934 }
 0x37f   : > { %v2926_v60 = vsel %vm1279_vm6, %v2925_v57, %v2918_v2 }
 0x380   : > { %v2932_v8 = vmul.f32 %v3505_v61, %v2926_v60 }
 0x382   : > { %v2933_v54 = vadd.f32 %v2932_v8, %v2861_v36  ;;  %v2938_v58 = vpop.permute.xlu1 %2937  ;;  %v2941_v44 = vpop.permute.xlu0 %2940 }
 0x383   : > { %v2958_v45 = vsel %vm1267_vm0, %v2935_v23, %v2938_v58 }
 0x384   : > { %v2981_v40 = vadd.f32 %v2979_v10, %v2933_v54  ;;  %v2959_v24 = vsel %vm1269_vm1, %v2958_v45, %v2941_v44 }
 0x386   : > { %v2944_v35 = vpop.permute.xlu1 %2943  ;;  %v2947_v37 = vpop.permute.xlu0 %2946  ;;  %v3001_v11 = vadd.f32 %v2999_v4, %v2981_v40 }
 0x387   : > { %v2960_v48 = vsel %vm1271_vm2, %v2959_v24, %v2944_v35 }
 0x388   : > { %v2961_v41 = vsel %vm1273_vm3, %v2960_v48, %v2947_v37 }
 0x38a   : > { %v2950_v14 = vpop.permute.xlu1 %2949  ;;  %v2953_v51 = vpop.permute.xlu0 %2952 }
 0x38b   : > { %v2962_v13 = vsel %vm1275_vm4, %v2961_v41, %v2950_v14 }
 0x38c   : > { %v2963_v32 = vsel %vm1277_vm5, %v2962_v13, %v2953_v51  ;;  %v3512_v13 = vld [vmem:[%s7145_s3 + $0x41] ss:$0 sm:$0xff] }
 0x38e   : > { %v2956_v33 = vpop.permute.xlu1 %2955  ;;  %v3004_v36 = vpop.permute.xlu0 %3003 }
 0x38f   : > { %v2964_v3 = vsel %vm1279_vm6, %v2963_v32, %v2956_v33  ;;  %v3024_v30 = vsel %vm1267_vm0, %v6571_v17, %v3004_v36 }
 0x390   : > { %v2970_v5 = vmul.f32 %v3506_v55, %v2964_v3 }
 0x392   : > { %v2971_v25 = vadd.f32 %v2970_v5, %v2897_v53  ;;  %v3007_v39 = vpop.permute.xlu1 %3006  ;;  %v3010_v19 = vpop.permute.xlu0 %3009 }
 0x393   : > { %v3025_v1 = vsel %vm1269_vm1, %v3024_v30, %v3007_v39 }
 0x394   : > { %v3026_v38 = vsel %vm1271_vm2, %v3025_v1, %v3010_v19  ;;  %v2991_v16 = vadd.f32 %v2989_v7, %v2971_v25 }
 0x396   : > { %v3013_v26 = vpop.permute.xlu1 %3012  ;;  %v3040_v62 = vpop.permute.xlu0 %3039 }
 0x397   : > { %v3027_v56 = vsel %vm1273_vm3, %v3026_v38, %v3013_v26  ;;  %v3060_v45 = vsel %vm1267_vm0, %v6605_v27, %v3040_v62 }
 0x39a   : > { %v3075_v63 = vpop.permute.xlu1 %3074  ;;  %v3078_v12 = vpop.permute.xlu0 %3077 }
 0x39b   : > { %v3098_v4 = vsel %vm1267_vm0, %v3075_v63, %v3078_v12 }
 0x39e   : > { %v3043_v42 = vpop.permute.xlu1 %3042  ;;  %v3081_v49 = vpop.permute.xlu0 %3080 }
 0x39f   : > { %v3061_v40 = vsel %vm1269_vm1, %v3060_v45, %v3043_v42  ;;  %v3099_v24 = vsel %vm1269_vm1, %v3098_v4, %v3081_v49  ;;  %v3516_v42 = vld [vmem:[%s7145_s3 + $0x45] ss:$0 sm:$0xff] }
 0x3a2   : > { %v3016_v15 = vpop.permute.xlu1 %3015  ;;  %v3046_v9 = vpop.permute.xlu0 %3045 }
 0x3a3   : > { %v3028_v50 = vsel %vm1275_vm4, %v3027_v56, %v3016_v15 }
 0x3a6   : > { %v3084_v17 = vpop.permute.xlu1 %3083  ;;  %v3114_v47 = vpop.permute.xlu0 %3113 }
 0x3a7   : > { %v3100_v48 = vsel %vm1271_vm2, %v3099_v24, %v3084_v17  ;;  %v3134_v12 = vsel %vm1267_vm0, %v6770_v31, %v3114_v47  ;;  %v3514_v31 = vld [vmem:[%s7145_s3 + $0x43] ss:$0 sm:$0xff] }
 0x3aa   : > { %v3150_v53 = vpop.permute.xlu1 %3149  ;;  %v3019_v6 = vpop.permute.xlu0 %3018 }
 0x3ab   : > { %v3029_v18 = vsel %vm1277_vm5, %v3028_v50, %v3019_v6  ;;  %v3170_v26 = vsel %vm1267_vm0, %v6821_v43, %v3150_v53  ;;  %v3518_v43 = vld [vmem:[%s7145_s3 + $0x47] ss:$0 sm:$0xff] }
 0x3ae   : > { %v3049_v0 = vpop.permute.xlu1 %3048  ;;  %v3087_v52 = vpop.permute.xlu0 %3086 }
 0x3af   : > { %v3101_v14 = vsel %vm1273_vm3, %v3100_v48, %v3087_v52 }
 0x3b2   : > { %v3117_v21 = vpop.permute.xlu1 %3116  ;;  %v3153_v46 = vpop.permute.xlu0 %3152 }
 0x3b3   : > { %v3171_v62 = vsel %vm1269_vm1, %v3170_v26, %v3153_v46  ;;  %v3135_v49 = vsel %vm1269_vm1, %v3134_v12, %v3117_v21 }
 0x3b6   : > { %v3022_v57 = vpop.permute.xlu1 %3021  ;;  %v3052_v20 = vpop.permute.xlu0 %3051 }
 0x3b7   : > { %v3030_v61 = vsel %vm1279_vm6, %v3029_v18, %v3022_v57 }
 0x3b8   : > { %v3036_v34 = vmul.f32 %v3510_v28, %v3030_v61  ;;  %v3227_v47 = vmul.f32 %v3516_v42, %v3030_v61 }
 0x3ba   : > { %v3037_v2 = vadd.f32 %v3036_v34, %v3001_v11  ;;  %v3090_v23 = vpop.permute.xlu1 %3089  ;;  %v3120_v60 = vpop.permute.xlu0 %3119  ;;  %v3062_v11 = vsel %vm1271_vm2, %v3061_v40, %v3046_v9  ;;  %v3513_v34 = vld [vmem:[%s7145_s3 + $0x42] ss:$0 sm:$0xff]  ;;  %v3515_v40 = vld [vmem:[%s7145_s3 + $0x44] ss:$0 sm:$0xff] }
 0x3bb   : > { %v3063_v41 = vsel %vm1273_vm3, %v3062_v11, %v3049_v0  ;;  %v3102_v27 = vsel %vm1275_vm4, %v3101_v14, %v3090_v23  ;;  %v3136_v9 = vsel %vm1271_vm2, %v3135_v49, %v3120_v60  ;;  %v3229_v23 = vrot.slane %v3227_v47, 1 }
 0x3bc   : > { %v3064_v51 = vsel %vm1275_vm4, %v3063_v41, %v3052_v20 }
 0x3be   : > { %v3156_v59 = vpop.permute.xlu1 %3155  ;;  %v3185_v8 = vpop.permute.xlu0 %3184 }
 0x3c2   : > { %v3188_v10 = vpop.permute.xlu1 %3187  ;;  %v3055_v54 = vpop.permute.xlu0 %3054 }
 0x3c3   : > { %v3065_v32 = vsel %vm1277_vm5, %v3064_v51, %v3055_v54  ;;  %v3208_v21 = vsel %vm1267_vm0, %v3185_v8, %v3188_v10  ;;  %v3517_v10 = vld [vmem:[%s7145_s3 + $0x46] ss:$0 sm:$0xff] }
 0x3c6   : > { %v3093_v58 = vpop.permute.xlu1 %3092  ;;  %v3123_v44 = vpop.permute.xlu0 %3122 }
 0x3c7   : > { %v3103_v55 = vsel %vm1277_vm5, %v3102_v27, %v3093_v58  ;;  %v3137_v53 = vsel %vm1273_vm3, %v3136_v9, %v3123_v44 }
 0x3ca   : > { %v3159_v35 = vpop.permute.xlu1 %3158  ;;  %v3191_v37 = vpop.permute.xlu0 %3190 }
 0x3cb   : > { %v3209_v28 = vsel %vm1269_vm1, %v3208_v21, %v3191_v37 }
 0x3ce   : > { %v3058_v22 = vpop.permute.xlu1 %3057  ;;  %v3096_v33 = vpop.permute.xlu0 %3095 }
 0x3cf   : > { %v3066_v36 = vsel %vm1279_vm6, %v3065_v32, %v3058_v22  ;;  %v3104_v3 = vsel %vm1279_vm6, %v3103_v55, %v3096_v33 }
 0x3d0   : > { %v3072_v5 = vmul.f32 %v3511_v29, %v3066_v36  ;;  %v3110_v30 = vmul.f32 %v3512_v13, %v3104_v3  ;;  %v3247_v18 = vmul.f32 %v3518_v43, %v3104_v3  ;;  %v3237_v24 = vmul.f32 %v3517_v10, %v3066_v36  ;;  %v3519_v13 = vld [vmem:[%s7146_s4] ss:$0 sm:$0xff] }
 0x3d2   : > { %v3073_v7 = vadd.f32 %v3072_v5, %v2991_v16  ;;  %v3111_v25 = vadd.f32 %v3110_v30, %v3037_v2  ;;  %v3126_v39 = vpop.permute.xlu1 %3125  ;;  %v3162_v19 = vpop.permute.xlu0 %3161  ;;  %v3172_v16 = vsel %vm1271_vm2, %v3171_v62, %v3156_v59  ;;  %v3249_v44 = vrot.slane %v3247_v18, 1 }
 0x3d3   : > { %v3173_v15 = vsel %vm1273_vm3, %v3172_v16, %v3159_v35  ;;  %v3138_v46 = vsel %vm1275_vm4, %v3137_v53, %v3126_v39  ;;  %v3239_v51 = vrot.slane %v3237_v24, 1 }
 0x3d4   : > { %v3174_v17 = vsel %vm1275_vm4, %v3173_v15, %v3162_v19 }
 0x3d6   : > { %v3194_v1 = vpop.permute.xlu1 %3193  ;;  %v3129_v38 = vpop.permute.xlu0 %3128 }
 0x3d7   : > { %v3139_v57 = vsel %vm1277_vm5, %v3138_v46, %v3129_v38  ;;  %v3210_v61 = vsel %vm1271_vm2, %v3209_v28, %v3194_v1 }
 0x3da   : > { %v3165_v56 = vpop.permute.xlu1 %3164  ;;  %v3197_v63 = vpop.permute.xlu0 %3196 }
 0x3db   : > { %v3175_v6 = vsel %vm1277_vm5, %v3174_v17, %v3165_v56  ;;  %v3211_v60 = vsel %vm1273_vm3, %v3210_v61, %v3197_v63 }
 0x3de   : > { %v3132_v0 = vpop.permute.xlu1 %3131  ;;  %v3168_v52 = vpop.permute.xlu0 %3167 }
 0x3df   : > { %v3176_v50 = vsel %vm1279_vm6, %v3175_v6, %v3168_v52  ;;  %v3140_v2 = vsel %vm1279_vm6, %v3139_v57, %v3132_v0 }
 0x3e0   : > { %v3182_v20 = vmul.f32 %v3514_v31, %v3176_v50  ;;  %v3146_v45 = vmul.f32 %v3513_v34, %v3140_v2 }
 0x3e2   : > { %v3183_v59 = vadd.f32 %v3182_v20, %v3111_v25  ;;  %v3200_v8 = vpop.permute.xlu1 %3199  ;;  %v3203_v58 = vpop.permute.xlu0 %3202  ;;  %v3147_v41 = vadd.f32 %v3146_v45, %v3073_v7 }
 0x3e3   : > { %v3212_v54 = vsel %vm1275_vm4, %v3211_v60, %v3200_v8 }
 0x3e4   : > { %v3231_v4 = vadd.f32 %v3229_v23, %v3183_v59  ;;  %v3213_v37 = vsel %vm1277_vm5, %v3212_v54, %v3203_v58 }
 0x3e6   : > { %v3251_v35 = vadd.f32 %v3249_v44, %v3231_v4  ;;  %v3206_v11 = vpop.permute.xlu1 %3205 }
 0x3e7   : > { %v3214_v48 = vsel %vm1279_vm6, %v3213_v37, %v3206_v11 }
 0x3e8   : > { %v3220_v14 = vmul.f32 %v3515_v40, %v3214_v48 }
 0x3ea   : > { %v3221_v27 = vadd.f32 %v3220_v14, %v3147_v41 }
 0x3ec   : > { %v3241_v29 = vadd.f32 %v3239_v51, %v3221_v27 }
 0x3ee   : > { %v3252_v32 = vadd.f32 %v3251_v35, %v3241_v29 }
 0x3f0   : > { %v3260_v55 = vadd.f32 %v3519_v13, %v3252_v32 }
 0x3f2   : > { %v3261_v22 = vmax.f32 %v3260_v55, 0.0 }
 0x3f4   : > { %3263 = vst.msk [vmem:[%s249_s20] sm:$0x7] %vm3262_vm7, %v3261_v22 }
 0x3f5 PF: > { %s17_s18 = sadd.s32 1, %s3623_s18  }
 0x3f6   : > { %p14_p5 = scmp.ge.s32.totalorder %s17_s18, 4  }
 0x3f8   :  { %16 = sbr.rel (!%p14_p5) target bundleno = 2 (0x2), region = 94 }
 0x3ff   :  { %3283 = vsyncpa [#allocation3], 1 }
 0x400   :  { %3285 = vsyncpa [#allocation3 + $0x1], 1 }
 0x401   :  { %3286 = vsyncpa [#allocation5], 1 }

</bundles_post_ra>
